<compile_context>
chip_gen: v5e
topology: v5e:2x2
jax: 0.10.0
libtpu: 0.0.40
codegen_flags: <defaults>
</compile_context>

<pallas_src>
import functools

import jax
import jax.numpy as jnp
from jax import lax
from jax.experimental import pallas as pl
from jax.experimental.pallas import tpu as pltpu


KSZ = 5  # all convs are 5x5, stride 1, valid padding


def _fused_kernel(p1_ref, w1_ref, b1_ref, w2_ref, b2_ref, w3_ref, b3_ref,
                  o_ref, h1_ref, h2_ref, col2_ref, col3_ref,
                  *, B, S1, S2, S3):
    # p1_ref:  (B, S1*S1, 25*Cin)      im2col patches of the input images
    # w1_ref:  (25*Cin, 256)           conv1 weights, im2col layout
    # w2_ref:  (25*256, 128)           conv2 weights, im2col layout, BN1 folded in
    # w3_ref:  (25*128, 64)            conv3 weights, im2col layout, BN2 folded in
    # b*_ref:  (1, Cout)               biases (BN shift folded in for b2/b3)
    # o_ref:   (B, S3*S3, 64)          conv3 output, lane-dense flat spatial layout
    # h1_ref:  (B, S1, S1, 256) VMEM   conv1 activation (spatial)
    # h2_ref:  (B, S2, S2, 128) VMEM   conv2 activation (spatial)
    # col2_ref:(B*S2*S2, 25*256) VMEM  conv2 im2col slab
    # col3_ref:(B*S3*S3, 25*128) VMEM  conv3 im2col slab
    C1 = w1_ref.shape[1]
    C2 = w2_ref.shape[1]
    C3 = w3_ref.shape[1]

    # ---- Layer 1: one im2col matmul per image (M = S1*S1 = 144) + bias + ReLU ----
    for b in range(B):
        a1 = jnp.dot(p1_ref[b], w1_ref[...], preferred_element_type=jnp.float32)
        a1 = jnp.maximum(a1 + b1_ref[...], 0.0)                   # (S1*S1, C1)
        for r in range(S1):                                       # static row stores
            h1_ref[b, r] = a1[r * S1:(r + 1) * S1, :]

    # ---- Layer 2: build full im2col once (25 tap copies), ONE long-K matmul -----
    for b in range(B):
        for kh in range(KSZ):                                     # static, unrolled
            for kw in range(KSZ):
                tap = kh * KSZ + kw
                patch = h1_ref[b, kh:kh + S2, kw:kw + S2, :]      # (S2, S2, C1)
                col2_ref[b * S2 * S2:(b + 1) * S2 * S2,
                         tap * C1:(tap + 1) * C1] = patch.reshape(S2 * S2, C1)
    a2 = jnp.dot(col2_ref[...], w2_ref[...], preferred_element_type=jnp.float32)
    a2 = jnp.maximum(a2 + b2_ref[...], 0.0)                       # (B*S2*S2, C2)
    for b in range(B):
        for r in range(S2):                                       # aligned (8,128) stores
            h2_ref[b, r] = a2[b * S2 * S2 + r * S2:b * S2 * S2 + (r + 1) * S2, :]

    # ---- Layer 3: build (B*S3*S3, 25*C2) im2col, ONE matmul, no ReLU -------------
    for b in range(B):
        for oh in range(S3):
            for kh in range(KSZ):
                row = h2_ref[b, oh + kh]                          # (S2, C2) aligned row
                for kw in range(KSZ):
                    tap = kh * KSZ + kw
                    col3_ref[b * S3 * S3 + oh * S3:b * S3 * S3 + (oh + 1) * S3,
                             tap * C2:(tap + 1) * C2] = row[kw:kw + S3, :]
    out3 = jnp.dot(col3_ref[...], w3_ref[...], preferred_element_type=jnp.float32)
    out3 = out3 + b3_ref[...]                                     # (B*S3*S3, C3)
    for b in range(B):                                            # one store per image
        o_ref[b] = out3[b * S3 * S3:(b + 1) * S3 * S3, :].astype(o_ref.dtype)


def _im2col(x, k):
    """x: (N,H,W,C) -> (N, Hout*Wout, k*k*C), last axis ordered (kh, kw, cin)."""
    N, H, W, C = x.shape
    Hout, Wout = H - k + 1, W - k + 1
    cols = [x[:, kh:kh + Hout, kw:kw + Wout, :] for kh in range(k) for kw in range(k)]
    p = jnp.stack(cols, axis=3)                                   # (N, Hout, Wout, k*k, C)
    return p.reshape(N, Hout * Wout, k * k * C)


def _fold_bn_into_conv(w_hwio, b, scale, shift):
    """Fold y = conv(x*scale + shift, w) + b into y = conv(x, w') + b'."""
    wf = w_hwio * scale[None, None, :, None]
    bf = b + jnp.einsum('hwic,i->c', w_hwio, shift)
    return wf.astype(jnp.float32), bf.astype(jnp.float32)


def _pick_batch_block(n):
    """Largest B in (4,2,1) dividing n that still leaves >=2 grid steps (keeps both
    v7x TensorCores busy); B>1 raises conv2's matmul M toward 128/256 on v5e/v6e."""
    for b in (4, 2, 1):
        if n % b == 0 and (n // b) >= 2:
            return b
    return 1


def lapgan_g1_forward(params, x_nchw, eps=1e-5, batch_block=None):
    """Fused Pallas implementation. Input/output in PyTorch NCHW convention."""
    x = jnp.transpose(x_nchw, (0, 2, 3, 1)).astype(jnp.float32)   # NCHW -> NHWC
    N, H, W, Cin = x.shape
    S1 = H - KSZ + 1          # conv1 output spatial
    S2 = S1 - KSZ + 1         # conv2 output spatial
    S3 = S2 - KSZ + 1         # conv3 output spatial

    B = batch_block if batch_block is not None else _pick_batch_block(N)
    assert N % B == 0, (N, B)

    def to_hwio(w_oihw):
        return jnp.transpose(w_oihw, (2, 3, 1, 0)).astype(jnp.float32)  # OIHW -> HWIO

    # Layer 1: no BN before it; im2col weights.
    w1 = to_hwio(params['w1'])                                    # (5,5,Cin,256)
    C1 = w1.shape[-1]
    w1r = w1.reshape(KSZ * KSZ * Cin, C1)
    b1 = params['b1'].reshape(1, C1).astype(jnp.float32)

    # Layer 2: bn1 folded into conv2; im2col weight layout (kh, kw, cin).
    s1 = params['g1'] / jnp.sqrt(params['rv1'] + eps)
    t1 = params['be1'] - params['rm1'] * s1
    w2f, b2f = _fold_bn_into_conv(to_hwio(params['w2']), params['b2'], s1, t1)
    C2 = w2f.shape[-1]
    w2r = w2f.reshape(KSZ * KSZ * C1, C2)                         # (6400, 128)
    b2r = b2f.reshape(1, C2)

    # Layer 3: bn2 folded into conv3; im2col weight layout.
    s2 = params['g2'] / jnp.sqrt(params['rv2'] + eps)
    t2 = params['be2'] - params['rm2'] * s2
    w3f, b3f = _fold_bn_into_conv(to_hwio(params['w3']), params['b3'], s2, t2)
    C3 = w3f.shape[-1]
    w3r = w3f.reshape(KSZ * KSZ * C2, C3)                         # (3200, 64)
    b3r = b3f.reshape(1, C3)

    patches1 = _im2col(x, KSZ)                                    # (N, S1*S1, 25*Cin)
    K1 = patches1.shape[-1]

    kernel = functools.partial(_fused_kernel, B=B, S1=S1, S2=S2, S3=S3)

    out_flat = pl.pallas_call(
        kernel,
        out_shape=jax.ShapeDtypeStruct((N, S3 * S3, C3), jnp.float32),
        grid_spec=pltpu.PrefetchScalarGridSpec(
            num_scalar_prefetch=0,
            grid=(N // B,),
            in_specs=[
                pl.BlockSpec((B, S1 * S1, K1), lambda n: (n, 0, 0)),
                pl.BlockSpec((K1, C1), lambda n: (0, 0)),
                pl.BlockSpec((1, C1), lambda n: (0, 0)),
                pl.BlockSpec((KSZ * KSZ * C1, C2), lambda n: (0, 0)),
                pl.BlockSpec((1, C2), lambda n: (0, 0)),
                pl.BlockSpec((KSZ * KSZ * C2, C3), lambda n: (0, 0)),
                pl.BlockSpec((1, C3), lambda n: (0, 0)),
            ],
            out_specs=pl.BlockSpec((B, S3 * S3, C3), lambda n: (n, 0, 0)),
            scratch_shapes=[
                pltpu.VMEM((B, S1, S1, C1), jnp.float32),               # h1
                pltpu.VMEM((B, S2, S2, C2), jnp.float32),               # h2
                pltpu.VMEM((B * S2 * S2, KSZ * KSZ * C1), jnp.float32),  # conv2 im2col
                pltpu.VMEM((B * S3 * S3, KSZ * KSZ * C2), jnp.float32),  # conv3 im2col
            ],
        ),
        compiler_params=pltpu.CompilerParams(
            dimension_semantics=("parallel",),
            vmem_limit_bytes=32 * 1024 * 1024,
        ),
    )(patches1, w1r, b1, w2r, b2r, w3r, b3r)

    out_nhwc = out_flat.reshape(N, S3, S3, C3)
    return jnp.transpose(out_nhwc, (0, 3, 1, 2))                  # NHWC -> NCHW


def init_params(key, channels):
    """Deterministic parameter init with the shapes implied by the PyTorch module."""
    ks = jax.random.split(key, 14)

    def conv_init(kw, kb, cin, cout, ksz=KSZ):
        fan_in = cin * ksz * ksz
        bound = 1.0 / (fan_in ** 0.5)
        w = jax.random.uniform(kw, (cout, cin, ksz, ksz), jnp.float32, -bound, bound)  # OIHW
        b = jax.random.uniform(kb, (cout,), jnp.float32, -bound, bound)
        return w, b

    def bn_init(kg, kb, km, kv, c):
        g = 1.0 + 0.1 * jax.random.normal(kg, (c,), jnp.float32)
        be = 0.1 * jax.random.normal(kb, (c,), jnp.float32)
        rm = 0.1 * jax.random.normal(km, (c,), jnp.float32)
        rv = jax.random.uniform(kv, (c,), jnp.float32, 0.5, 1.5)
        return g, be, rm, rv

    w1, b1 = conv_init(ks[0], ks[1], channels, 256)
    w2, b2 = conv_init(ks[2], ks[3], 256, 128)
    w3, b3 = conv_init(ks[4], ks[5], 128, 64)
    g1, be1, rm1, rv1 = bn_init(ks[6], ks[7], ks[8], ks[9], 256)
    g2, be2, rm2, rv2 = bn_init(ks[10], ks[11], ks[12], ks[13], 128)
    return dict(w1=w1, b1=b1, w2=w2, b2=b2, w3=w3, b3=b3,
                g1=g1, be1=be1, rm1=rm1, rv1=rv1,
                g2=g2, be2=be2, rm2=rm2, rv2=rv2)


def reference_forward(params, x_nchw, eps=1e-5):
    """Plain-JAX reference (lax.conv) for correctness checking."""
    def conv(x, w, b):
        y = lax.conv_general_dilated(x, w, (1, 1), 'VALID',
                                     dimension_numbers=('NCHW', 'OIHW', 'NCHW'))
        return y + b.reshape(1, -1, 1, 1)

    def bn(x, g, be, rm, rv):
        r = lambda v: v.reshape(1, -1, 1, 1)
        return (x - r(rm)) / jnp.sqrt(r(rv) + eps) * r(g) + r(be)

    h = jax.nn.relu(conv(x_nchw, params['w1'], params['b1']))
    h = jax.nn.relu(conv(bn(h, params['g1'], params['be1'], params['rm1'], params['rv1']),
                         params['w2'], params['b2']))
    h = conv(bn(h, params['g2'], params['be2'], params['rm2'], params['rv2']),
             params['w3'], params['b3'])
    return h


if __name__ == "__main__":
    key = jax.random.PRNGKey(0)
    kx, kp = jax.random.split(key)

    channels = 4
    x = jax.random.normal(kx, (2, channels, 16, 16), jnp.float32)   # NCHW, spatial 16
    params = init_params(kp, channels)

    out = lapgan_g1_forward(params, x)
    out = jax.block_until_ready(out)

    assert out.shape == (2, 64, 4, 4), out.shape                    # 16 -> 12 -> 8 -> 4

    ref = reference_forward(params, x)
    max_err = float(jnp.max(jnp.abs(out - ref)))
    assert max_err < 1e-3, f"max abs error {max_err}"

    print("KERNEL_OK")
</pallas_src>

<mosaic_0001>
module attributes {stable_mosaic.version = 11 : i64} {
  func.func @_fused_kernel(%arg0: i32, %arg1: memref<1x144x100xf32, #tpu.memory_space<vmem>>, %arg2: memref<100x256xf32, #tpu.memory_space<vmem>>, %arg3: memref<1x256xf32, #tpu.memory_space<vmem>>, %arg4: memref<6400x128xf32, #tpu.memory_space<vmem>>, %arg5: memref<1x128xf32, #tpu.memory_space<vmem>>, %arg6: memref<3200x64xf32, #tpu.memory_space<vmem>>, %arg7: memref<1x64xf32, #tpu.memory_space<vmem>>, %arg8: memref<1x16x64xf32, #tpu.memory_space<vmem>>, %arg9: memref<1x12x12x256xf32, #tpu.memory_space<vmem>>, %arg10: memref<1x8x8x128xf32, #tpu.memory_space<vmem>>, %arg11: memref<64x6400xf32, #tpu.memory_space<vmem>>, %arg12: memref<16x3200xf32, #tpu.memory_space<vmem>>) attributes {dimension_semantics = [#tpu.dimension_semantics<parallel>], iteration_bounds = array<i64: 2>, scalar_prefetch = 0 : i64, scratch_operands = 4 : i64, tpu.core_type = #tpu.core_type<tc>, window_params = [{transform_indices = @transform_0, window_bounds = array<i64: 1, 144, 100>}, {pipeline_mode = #tpu.pipeline_mode<synchronous>, transform_indices = @transform_1, window_bounds = array<i64: 100, 256>}, {pipeline_mode = #tpu.pipeline_mode<synchronous>, transform_indices = @transform_2, window_bounds = array<i64: 1, 256>}, {pipeline_mode = #tpu.pipeline_mode<synchronous>, transform_indices = @transform_3, window_bounds = array<i64: 6400, 128>}, {pipeline_mode = #tpu.pipeline_mode<synchronous>, transform_indices = @transform_4, window_bounds = array<i64: 1, 128>}, {pipeline_mode = #tpu.pipeline_mode<synchronous>, transform_indices = @transform_5, window_bounds = array<i64: 3200, 64>}, {pipeline_mode = #tpu.pipeline_mode<synchronous>, transform_indices = @transform_6, window_bounds = array<i64: 1, 64>}, {transform_indices = @transform_7, window_bounds = array<i64: 1, 16, 64>}]} {
    %c0 = arith.constant 0 : index
    %c0_0 = arith.constant 0 : index
    %c0_1 = arith.constant 0 : index
    %0 = vector.load %arg1[%c0, %c0_0, %c0_1] : memref<1x144x100xf32, #tpu.memory_space<vmem>>, vector<1x144x100xf32>
    %1 = vector.shape_cast %0 : vector<1x144x100xf32> to vector<144x100xf32>
    %c0_2 = arith.constant 0 : index
    %c0_3 = arith.constant 0 : index
    %2 = vector.load %arg2[%c0_2, %c0_3] : memref<100x256xf32, #tpu.memory_space<vmem>>, vector<100x256xf32>
    %cst = arith.constant dense<0.000000e+00> : vector<144x256xf32>
    %3 = tpu.matmul %1, %2, %cst {dimension_numbers = #tpu.dot_dimension_numbers<[1], [0], [0], [1], [0, 0, 1, 1], [], []>} : vector<144x100xf32>, vector<100x256xf32>, vector<144x256xf32> -> vector<144x256xf32>
    %c0_4 = arith.constant 0 : index
    %c0_5 = arith.constant 0 : index
    %4 = vector.load %arg3[%c0_4, %c0_5] : memref<1x256xf32, #tpu.memory_space<vmem>>, vector<1x256xf32>
    %5 = vector.broadcast %4 : vector<1x256xf32> to vector<144x256xf32>
    %6 = arith.addf %3, %5 : vector<144x256xf32>
    %cst_6 = arith.constant 0.000000e+00 : f32
    %7 = vector.broadcast %cst_6 : f32 to vector<144x256xf32>
    %8 = arith.maximumf %6, %7 : vector<144x256xf32>
    %9 = vector.extract_strided_slice %8 {offsets = [0, 0], sizes = [12, 256], strides = [1, 1]} : vector<144x256xf32> to vector<12x256xf32>
    %c0_7 = arith.constant 0 : index
    %c0_8 = arith.constant 0 : index
    %c0_9 = arith.constant 0 : index
    %c0_10 = arith.constant 0 : index
    %10 = vector.load %arg9[%c0_7, %c0_8, %c0_9, %c0_10] : memref<1x12x12x256xf32, #tpu.memory_space<vmem>>, vector<1x1x12x256xf32>
    %11 = vector.shape_cast %10 : vector<1x1x12x256xf32> to vector<12x256xf32>
    %12 = vector.shape_cast %9 : vector<12x256xf32> to vector<1x1x12x256xf32>
    tpu.vector_store %arg9[%c0_7, %c0_8, %c0_9, %c0_10], %12 {strides = array<i32>} : memref<1x12x12x256xf32, #tpu.memory_space<vmem>>, vector<1x1x12x256xf32>,
    %13 = vector.extract_strided_slice %8 {offsets = [12, 0], sizes = [12, 256], strides = [1, 1]} : vector<144x256xf32> to vector<12x256xf32>
    %c0_11 = arith.constant 0 : index
    %c1 = arith.constant 1 : index
    %c0_12 = arith.constant 0 : index
    %c0_13 = arith.constant 0 : index
    %14 = vector.load %arg9[%c0_11, %c1, %c0_12, %c0_13] : memref<1x12x12x256xf32, #tpu.memory_space<vmem>>, vector<1x1x12x256xf32>
    %15 = vector.shape_cast %14 : vector<1x1x12x256xf32> to vector<12x256xf32>
    %16 = vector.shape_cast %13 : vector<12x256xf32> to vector<1x1x12x256xf32>
    tpu.vector_store %arg9[%c0_11, %c1, %c0_12, %c0_13], %16 {strides = array<i32>} : memref<1x12x12x256xf32, #tpu.memory_space<vmem>>, vector<1x1x12x256xf32>,
    %17 = vector.extract_strided_slice %8 {offsets = [24, 0], sizes = [12, 256], strides = [1, 1]} : vector<144x256xf32> to vector<12x256xf32>
    %c0_14 = arith.constant 0 : index
    %c2 = arith.constant 2 : index
    %c0_15 = arith.constant 0 : index
    %c0_16 = arith.constant 0 : index
    %18 = vector.load %arg9[%c0_14, %c2, %c0_15, %c0_16] : memref<1x12x12x256xf32, #tpu.memory_space<vmem>>, vector<1x1x12x256xf32>
    %19 = vector.shape_cast %18 : vector<1x1x12x256xf32> to vector<12x256xf32>
    %20 = vector.shape_cast %17 : vector<12x256xf32> to vector<1x1x12x256xf32>
    tpu.vector_store %arg9[%c0_14, %c2, %c0_15, %c0_16], %20 {strides = array<i32>} : memref<1x12x12x256xf32, #tpu.memory_space<vmem>>, vector<1x1x12x256xf32>,
    %21 = vector.extract_strided_slice %8 {offsets = [36, 0], sizes = [12, 256], strides = [1, 1]} : vector<144x256xf32> to vector<12x256xf32>
    %c0_17 = arith.constant 0 : index
    %c3 = arith.constant 3 : index
    %c0_18 = arith.constant 0 : index
    %c0_19 = arith.constant 0 : index
    %22 = vector.load %arg9[%c0_17, %c3, %c0_18, %c0_19] : memref<1x12x12x256xf32, #tpu.memory_space<vmem>>, vector<1x1x12x256xf32>
    %23 = vector.shape_cast %22 : vector<1x1x12x256xf32> to vector<12x256xf32>
    %24 = vector.shape_cast %21 : vector<12x256xf32> to vector<1x1x12x256xf32>
    tpu.vector_store %arg9[%c0_17, %c3, %c0_18, %c0_19], %24 {strides = array<i32>} : memref<1x12x12x256xf32, #tpu.memory_space<vmem>>, vector<1x1x12x256xf32>,
    %25 = vector.extract_strided_slice %8 {offsets = [48, 0], sizes = [12, 256], strides = [1, 1]} : vector<144x256xf32> to vector<12x256xf32>
    %c0_20 = arith.constant 0 : index
    %c4 = arith.constant 4 : index
    %c0_21 = arith.constant 0 : index
    %c0_22 = arith.constant 0 : index
    %26 = vector.load %arg9[%c0_20, %c4, %c0_21, %c0_22] : memref<1x12x12x256xf32, #tpu.memory_space<vmem>>, vector<1x1x12x256xf32>
    %27 = vector.shape_cast %26 : vector<1x1x12x256xf32> to vector<12x256xf32>
    %28 = vector.shape_cast %25 : vector<12x256xf32> to vector<1x1x12x256xf32>
    tpu.vector_store %arg9[%c0_20, %c4, %c0_21, %c0_22], %28 {strides = array<i32>} : memref<1x12x12x256xf32, #tpu.memory_space<vmem>>, vector<1x1x12x256xf32>,
    %29 = vector.extract_strided_slice %8 {offsets = [60, 0], sizes = [12, 256], strides = [1, 1]} : vector<144x256xf32> to vector<12x256xf32>
    %c0_23 = arith.constant 0 : index
    %c5 = arith.constant 5 : index
    %c0_24 = arith.constant 0 : index
    %c0_25 = arith.constant 0 : index
    %30 = vector.load %arg9[%c0_23, %c5, %c0_24, %c0_25] : memref<1x12x12x256xf32, #tpu.memory_space<vmem>>, vector<1x1x12x256xf32>
    %31 = vector.shape_cast %30 : vector<1x1x12x256xf32> to vector<12x256xf32>
    %32 = vector.shape_cast %29 : vector<12x256xf32> to vector<1x1x12x256xf32>
    tpu.vector_store %arg9[%c0_23, %c5, %c0_24, %c0_25], %32 {strides = array<i32>} : memref<1x12x12x256xf32, #tpu.memory_space<vmem>>, vector<1x1x12x256xf32>,
    %33 = vector.extract_strided_slice %8 {offsets = [72, 0], sizes = [12, 256], strides = [1, 1]} : vector<144x256xf32> to vector<12x256xf32>
    %c0_26 = arith.constant 0 : index
    %c6 = arith.constant 6 : index
    %c0_27 = arith.constant 0 : index
    %c0_28 = arith.constant 0 : index
    %34 = vector.load %arg9[%c0_26, %c6, %c0_27, %c0_28] : memref<1x12x12x256xf32, #tpu.memory_space<vmem>>, vector<1x1x12x256xf32>
    %35 = vector.shape_cast %34 : vector<1x1x12x256xf32> to vector<12x256xf32>
    %36 = vector.shape_cast %33 : vector<12x256xf32> to vector<1x1x12x256xf32>
    tpu.vector_store %arg9[%c0_26, %c6, %c0_27, %c0_28], %36 {strides = array<i32>} : memref<1x12x12x256xf32, #tpu.memory_space<vmem>>, vector<1x1x12x256xf32>,
    %37 = vector.extract_strided_slice %8 {offsets = [84, 0], sizes = [12, 256], strides = [1, 1]} : vector<144x256xf32> to vector<12x256xf32>
    %c0_29 = arith.constant 0 : index
    %c7 = arith.constant 7 : index
    %c0_30 = arith.constant 0 : index
    %c0_31 = arith.constant 0 : index
    %38 = vector.load %arg9[%c0_29, %c7, %c0_30, %c0_31] : memref<1x12x12x256xf32, #tpu.memory_space<vmem>>, vector<1x1x12x256xf32>
    %39 = vector.shape_cast %38 : vector<1x1x12x256xf32> to vector<12x256xf32>
    %40 = vector.shape_cast %37 : vector<12x256xf32> to vector<1x1x12x256xf32>
    tpu.vector_store %arg9[%c0_29, %c7, %c0_30, %c0_31], %40 {strides = array<i32>} : memref<1x12x12x256xf32, #tpu.memory_space<vmem>>, vector<1x1x12x256xf32>,
    %41 = vector.extract_strided_slice %8 {offsets = [96, 0], sizes = [12, 256], strides = [1, 1]} : vector<144x256xf32> to vector<12x256xf32>
    %c0_32 = arith.constant 0 : index
    %c8 = arith.constant 8 : index
    %c0_33 = arith.constant 0 : index
    %c0_34 = arith.constant 0 : index
    %42 = vector.load %arg9[%c0_32, %c8, %c0_33, %c0_34] : memref<1x12x12x256xf32, #tpu.memory_space<vmem>>, vector<1x1x12x256xf32>
    %43 = vector.shape_cast %42 : vector<1x1x12x256xf32> to vector<12x256xf32>
    %44 = vector.shape_cast %41 : vector<12x256xf32> to vector<1x1x12x256xf32>
    tpu.vector_store %arg9[%c0_32, %c8, %c0_33, %c0_34], %44 {strides = array<i32>} : memref<1x12x12x256xf32, #tpu.memory_space<vmem>>, vector<1x1x12x256xf32>,
    %45 = vector.extract_strided_slice %8 {offsets = [108, 0], sizes = [12, 256], strides = [1, 1]} : vector<144x256xf32> to vector<12x256xf32>
    %c0_35 = arith.constant 0 : index
    %c9 = arith.constant 9 : index
    %c0_36 = arith.constant 0 : index
    %c0_37 = arith.constant 0 : index
    %46 = vector.load %arg9[%c0_35, %c9, %c0_36, %c0_37] : memref<1x12x12x256xf32, #tpu.memory_space<vmem>>, vector<1x1x12x256xf32>
    %47 = vector.shape_cast %46 : vector<1x1x12x256xf32> to vector<12x256xf32>
    %48 = vector.shape_cast %45 : vector<12x256xf32> to vector<1x1x12x256xf32>
    tpu.vector_store %arg9[%c0_35, %c9, %c0_36, %c0_37], %48 {strides = array<i32>} : memref<1x12x12x256xf32, #tpu.memory_space<vmem>>, vector<1x1x12x256xf32>,
    %49 = vector.extract_strided_slice %8 {offsets = [120, 0], sizes = [12, 256], strides = [1, 1]} : vector<144x256xf32> to vector<12x256xf32>
    %c0_38 = arith.constant 0 : index
    %c10 = arith.constant 10 : index
    %c0_39 = arith.constant 0 : index
    %c0_40 = arith.constant 0 : index
    %50 = vector.load %arg9[%c0_38, %c10, %c0_39, %c0_40] : memref<1x12x12x256xf32, #tpu.memory_space<vmem>>, vector<1x1x12x256xf32>
    %51 = vector.shape_cast %50 : vector<1x1x12x256xf32> to vector<12x256xf32>
    %52 = vector.shape_cast %49 : vector<12x256xf32> to vector<1x1x12x256xf32>
    tpu.vector_store %arg9[%c0_38, %c10, %c0_39, %c0_40], %52 {strides = array<i32>} : memref<1x12x12x256xf32, #tpu.memory_space<vmem>>, vector<1x1x12x256xf32>,
    %53 = vector.extract_strided_slice %8 {offsets = [132, 0], sizes = [12, 256], strides = [1, 1]} : vector<144x256xf32> to vector<12x256xf32>
    %c0_41 = arith.constant 0 : index
    %c11 = arith.constant 11 : index
    %c0_42 = arith.constant 0 : index
    %c0_43 = arith.constant 0 : index
    %54 = vector.load %arg9[%c0_41, %c11, %c0_42, %c0_43] : memref<1x12x12x256xf32, #tpu.memory_space<vmem>>, vector<1x1x12x256xf32>
    %55 = vector.shape_cast %54 : vector<1x1x12x256xf32> to vector<12x256xf32>
    %56 = vector.shape_cast %53 : vector<12x256xf32> to vector<1x1x12x256xf32>
    tpu.vector_store %arg9[%c0_41, %c11, %c0_42, %c0_43], %56 {strides = array<i32>} : memref<1x12x12x256xf32, #tpu.memory_space<vmem>>, vector<1x1x12x256xf32>,
    %c0_44 = arith.constant 0 : index
    %c0_45 = arith.constant 0 : index
    %c0_46 = arith.constant 0 : index
    %c0_47 = arith.constant 0 : index
    %57 = vector.load %arg9[%c0_44, %c0_45, %c0_46, %c0_47] : memref<1x12x12x256xf32, #tpu.memory_space<vmem>>, vector<1x8x8x256xf32>
    %58 = vector.shape_cast %57 : vector<1x8x8x256xf32> to vector<8x8x256xf32>
    %59 = vector.shape_cast %58 : vector<8x8x256xf32> to vector<64x256xf32>
    %c0_48 = arith.constant 0 : index
    %c0_49 = arith.constant 0 : index
    %60 = vector.load %arg11[%c0_48, %c0_49] : memref<64x6400xf32, #tpu.memory_space<vmem>>, vector<64x256xf32>
    tpu.vector_store %arg11[%c0_48, %c0_49], %59 {strides = array<i32>} : memref<64x6400xf32, #tpu.memory_space<vmem>>, vector<64x256xf32>,
    %c0_50 = arith.constant 0 : index
    %c0_51 = arith.constant 0 : index
    %c1_52 = arith.constant 1 : index
    %c0_53 = arith.constant 0 : index
    %61 = vector.load %arg9[%c0_50, %c0_51, %c1_52, %c0_53] : memref<1x12x12x256xf32, #tpu.memory_space<vmem>>, vector<1x8x8x256xf32>
    %62 = vector.shape_cast %61 : vector<1x8x8x256xf32> to vector<8x8x256xf32>
    %63 = vector.shape_cast %62 : vector<8x8x256xf32> to vector<64x256xf32>
    %c0_54 = arith.constant 0 : index
    %c256 = arith.constant 256 : index
    %64 = vector.load %arg11[%c0_54, %c256] : memref<64x6400xf32, #tpu.memory_space<vmem>>, vector<64x256xf32>
    tpu.vector_store %arg11[%c0_54, %c256], %63 {strides = array<i32>} : memref<64x6400xf32, #tpu.memory_space<vmem>>, vector<64x256xf32>,
    %c0_55 = arith.constant 0 : index
    %c0_56 = arith.constant 0 : index
    %c2_57 = arith.constant 2 : index
    %c0_58 = arith.constant 0 : index
    %65 = vector.load %arg9[%c0_55, %c0_56, %c2_57, %c0_58] : memref<1x12x12x256xf32, #tpu.memory_space<vmem>>, vector<1x8x8x256xf32>
    %66 = vector.shape_cast %65 : vector<1x8x8x256xf32> to vector<8x8x256xf32>
    %67 = vector.shape_cast %66 : vector<8x8x256xf32> to vector<64x256xf32>
    %c0_59 = arith.constant 0 : index
    %c512 = arith.constant 512 : index
    %68 = vector.load %arg11[%c0_59, %c512] : memref<64x6400xf32, #tpu.memory_space<vmem>>, vector<64x256xf32>
    tpu.vector_store %arg11[%c0_59, %c512], %67 {strides = array<i32>} : memref<64x6400xf32, #tpu.memory_space<vmem>>, vector<64x256xf32>,
    %c0_60 = arith.constant 0 : index
    %c0_61 = arith.constant 0 : index
    %c3_62 = arith.constant 3 : index
    %c0_63 = arith.constant 0 : index
    %69 = vector.load %arg9[%c0_60, %c0_61, %c3_62, %c0_63] : memref<1x12x12x256xf32, #tpu.memory_space<vmem>>, vector<1x8x8x256xf32>
    %70 = vector.shape_cast %69 : vector<1x8x8x256xf32> to vector<8x8x256xf32>
    %71 = vector.shape_cast %70 : vector<8x8x256xf32> to vector<64x256xf32>
    %c0_64 = arith.constant 0 : index
    %c768 = arith.constant 768 : index
    %72 = vector.load %arg11[%c0_64, %c768] : memref<64x6400xf32, #tpu.memory_space<vmem>>, vector<64x256xf32>
    tpu.vector_store %arg11[%c0_64, %c768], %71 {strides = array<i32>} : memref<64x6400xf32, #tpu.memory_space<vmem>>, vector<64x256xf32>,
    %c0_65 = arith.constant 0 : index
    %c0_66 = arith.constant 0 : index
    %c4_67 = arith.constant 4 : index
    %c0_68 = arith.constant 0 : index
    %73 = vector.load %arg9[%c0_65, %c0_66, %c4_67, %c0_68] : memref<1x12x12x256xf32, #tpu.memory_space<vmem>>, vector<1x8x8x256xf32>
    %74 = vector.shape_cast %73 : vector<1x8x8x256xf32> to vector<8x8x256xf32>
    %75 = vector.shape_cast %74 : vector<8x8x256xf32> to vector<64x256xf32>
    %c0_69 = arith.constant 0 : index
    %c1024 = arith.constant 1024 : index
    %76 = vector.load %arg11[%c0_69, %c1024] : memref<64x6400xf32, #tpu.memory_space<vmem>>, vector<64x256xf32>
    tpu.vector_store %arg11[%c0_69, %c1024], %75 {strides = array<i32>} : memref<64x6400xf32, #tpu.memory_space<vmem>>, vector<64x256xf32>,
    %c0_70 = arith.constant 0 : index
    %c1_71 = arith.constant 1 : index
    %c0_72 = arith.constant 0 : index
    %c0_73 = arith.constant 0 : index
    %77 = vector.load %arg9[%c0_70, %c1_71, %c0_72, %c0_73] : memref<1x12x12x256xf32, #tpu.memory_space<vmem>>, vector<1x8x8x256xf32>
    %78 = vector.shape_cast %77 : vector<1x8x8x256xf32> to vector<8x8x256xf32>
    %79 = vector.shape_cast %78 : vector<8x8x256xf32> to vector<64x256xf32>
    %c0_74 = arith.constant 0 : index
    %c1280 = arith.constant 1280 : index
    %80 = vector.load %arg11[%c0_74, %c1280] : memref<64x6400xf32, #tpu.memory_space<vmem>>, vector<64x256xf32>
    tpu.vector_store %arg11[%c0_74, %c1280], %79 {strides = array<i32>} : memref<64x6400xf32, #tpu.memory_space<vmem>>, vector<64x256xf32>,
    %c0_75 = arith.constant 0 : index
    %c1_76 = arith.constant 1 : index
    %c1_77 = arith.constant 1 : index
    %c0_78 = arith.constant 0 : index
    %81 = vector.load %arg9[%c0_75, %c1_76, %c1_77, %c0_78] : memref<1x12x12x256xf32, #tpu.memory_space<vmem>>, vector<1x8x8x256xf32>
    %82 = vector.shape_cast %81 : vector<1x8x8x256xf32> to vector<8x8x256xf32>
    %83 = vector.shape_cast %82 : vector<8x8x256xf32> to vector<64x256xf32>
    %c0_79 = arith.constant 0 : index
    %c1536 = arith.constant 1536 : index
    %84 = vector.load %arg11[%c0_79, %c1536] : memref<64x6400xf32, #tpu.memory_space<vmem>>, vector<64x256xf32>
    tpu.vector_store %arg11[%c0_79, %c1536], %83 {strides = array<i32>} : memref<64x6400xf32, #tpu.memory_space<vmem>>, vector<64x256xf32>,
    %c0_80 = arith.constant 0 : index
    %c1_81 = arith.constant 1 : index
    %c2_82 = arith.constant 2 : index
    %c0_83 = arith.constant 0 : index
    %85 = vector.load %arg9[%c0_80, %c1_81, %c2_82, %c0_83] : memref<1x12x12x256xf32, #tpu.memory_space<vmem>>, vector<1x8x8x256xf32>
    %86 = vector.shape_cast %85 : vector<1x8x8x256xf32> to vector<8x8x256xf32>
    %87 = vector.shape_cast %86 : vector<8x8x256xf32> to vector<64x256xf32>
    %c0_84 = arith.constant 0 : index
    %c1792 = arith.constant 1792 : index
    %88 = vector.load %arg11[%c0_84, %c1792] : memref<64x6400xf32, #tpu.memory_space<vmem>>, vector<64x256xf32>
    tpu.vector_store %arg11[%c0_84, %c1792], %87 {strides = array<i32>} : memref<64x6400xf32, #tpu.memory_space<vmem>>, vector<64x256xf32>,
    %c0_85 = arith.constant 0 : index
    %c1_86 = arith.constant 1 : index
    %c3_87 = arith.constant 3 : index
    %c0_88 = arith.constant 0 : index
    %89 = vector.load %arg9[%c0_85, %c1_86, %c3_87, %c0_88] : memref<1x12x12x256xf32, #tpu.memory_space<vmem>>, vector<1x8x8x256xf32>
    %90 = vector.shape_cast %89 : vector<1x8x8x256xf32> to vector<8x8x256xf32>
    %91 = vector.shape_cast %90 : vector<8x8x256xf32> to vector<64x256xf32>
    %c0_89 = arith.constant 0 : index
    %c2048 = arith.constant 2048 : index
    %92 = vector.load %arg11[%c0_89, %c2048] : memref<64x6400xf32, #tpu.memory_space<vmem>>, vector<64x256xf32>
    tpu.vector_store %arg11[%c0_89, %c2048], %91 {strides = array<i32>} : memref<64x6400xf32, #tpu.memory_space<vmem>>, vector<64x256xf32>,
    %c0_90 = arith.constant 0 : index
    %c1_91 = arith.constant 1 : index
    %c4_92 = arith.constant 4 : index
    %c0_93 = arith.constant 0 : index
    %93 = vector.load %arg9[%c0_90, %c1_91, %c4_92, %c0_93] : memref<1x12x12x256xf32, #tpu.memory_space<vmem>>, vector<1x8x8x256xf32>
    %94 = vector.shape_cast %93 : vector<1x8x8x256xf32> to vector<8x8x256xf32>
    %95 = vector.shape_cast %94 : vector<8x8x256xf32> to vector<64x256xf32>
    %c0_94 = arith.constant 0 : index
    %c2304 = arith.constant 2304 : index
    %96 = vector.load %arg11[%c0_94, %c2304] : memref<64x6400xf32, #tpu.memory_space<vmem>>, vector<64x256xf32>
    tpu.vector_store %arg11[%c0_94, %c2304], %95 {strides = array<i32>} : memref<64x6400xf32, #tpu.memory_space<vmem>>, vector<64x256xf32>,
    %c0_95 = arith.constant 0 : index
    %c2_96 = arith.constant 2 : index
    %c0_97 = arith.constant 0 : index
    %c0_98 = arith.constant 0 : index
    %97 = vector.load %arg9[%c0_95, %c2_96, %c0_97, %c0_98] : memref<1x12x12x256xf32, #tpu.memory_space<vmem>>, vector<1x8x8x256xf32>
    %98 = vector.shape_cast %97 : vector<1x8x8x256xf32> to vector<8x8x256xf32>
    %99 = vector.shape_cast %98 : vector<8x8x256xf32> to vector<64x256xf32>
    %c0_99 = arith.constant 0 : index
    %c2560 = arith.constant 2560 : index
    %100 = vector.load %arg11[%c0_99, %c2560] : memref<64x6400xf32, #tpu.memory_space<vmem>>, vector<64x256xf32>
    tpu.vector_store %arg11[%c0_99, %c2560], %99 {strides = array<i32>} : memref<64x6400xf32, #tpu.memory_space<vmem>>, vector<64x256xf32>,
    %c0_100 = arith.constant 0 : index
    %c2_101 = arith.constant 2 : index
    %c1_102 = arith.constant 1 : index
    %c0_103 = arith.constant 0 : index
    %101 = vector.load %arg9[%c0_100, %c2_101, %c1_102, %c0_103] : memref<1x12x12x256xf32, #tpu.memory_space<vmem>>, vector<1x8x8x256xf32>
    %102 = vector.shape_cast %101 : vector<1x8x8x256xf32> to vector<8x8x256xf32>
    %103 = vector.shape_cast %102 : vector<8x8x256xf32> to vector<64x256xf32>
    %c0_104 = arith.constant 0 : index
    %c2816 = arith.constant 2816 : index
    %104 = vector.load %arg11[%c0_104, %c2816] : memref<64x6400xf32, #tpu.memory_space<vmem>>, vector<64x256xf32>
    tpu.vector_store %arg11[%c0_104, %c2816], %103 {strides = array<i32>} : memref<64x6400xf32, #tpu.memory_space<vmem>>, vector<64x256xf32>,
    %c0_105 = arith.constant 0 : index
    %c2_106 = arith.constant 2 : index
    %c2_107 = arith.constant 2 : index
    %c0_108 = arith.constant 0 : index
    %105 = vector.load %arg9[%c0_105, %c2_106, %c2_107, %c0_108] : memref<1x12x12x256xf32, #tpu.memory_space<vmem>>, vector<1x8x8x256xf32>
    %106 = vector.shape_cast %105 : vector<1x8x8x256xf32> to vector<8x8x256xf32>
    %107 = vector.shape_cast %106 : vector<8x8x256xf32> to vector<64x256xf32>
    %c0_109 = arith.constant 0 : index
    %c3072 = arith.constant 3072 : index
    %108 = vector.load %arg11[%c0_109, %c3072] : memref<64x6400xf32, #tpu.memory_space<vmem>>, vector<64x256xf32>
    tpu.vector_store %arg11[%c0_109, %c3072], %107 {strides = array<i32>} : memref<64x6400xf32, #tpu.memory_space<vmem>>, vector<64x256xf32>,
    %c0_110 = arith.constant 0 : index
    %c2_111 = arith.constant 2 : index
    %c3_112 = arith.constant 3 : index
    %c0_113 = arith.constant 0 : index
    %109 = vector.load %arg9[%c0_110, %c2_111, %c3_112, %c0_113] : memref<1x12x12x256xf32, #tpu.memory_space<vmem>>, vector<1x8x8x256xf32>
    %110 = vector.shape_cast %109 : vector<1x8x8x256xf32> to vector<8x8x256xf32>
    %111 = vector.shape_cast %110 : vector<8x8x256xf32> to vector<64x256xf32>
    %c0_114 = arith.constant 0 : index
    %c3328 = arith.constant 3328 : index
    %112 = vector.load %arg11[%c0_114, %c3328] : memref<64x6400xf32, #tpu.memory_space<vmem>>, vector<64x256xf32>
    tpu.vector_store %arg11[%c0_114, %c3328], %111 {strides = array<i32>} : memref<64x6400xf32, #tpu.memory_space<vmem>>, vector<64x256xf32>,
    %c0_115 = arith.constant 0 : index
    %c2_116 = arith.constant 2 : index
    %c4_117 = arith.constant 4 : index
    %c0_118 = arith.constant 0 : index
    %113 = vector.load %arg9[%c0_115, %c2_116, %c4_117, %c0_118] : memref<1x12x12x256xf32, #tpu.memory_space<vmem>>, vector<1x8x8x256xf32>
    %114 = vector.shape_cast %113 : vector<1x8x8x256xf32> to vector<8x8x256xf32>
    %115 = vector.shape_cast %114 : vector<8x8x256xf32> to vector<64x256xf32>
    %c0_119 = arith.constant 0 : index
    %c3584 = arith.constant 3584 : index
    %116 = vector.load %arg11[%c0_119, %c3584] : memref<64x6400xf32, #tpu.memory_space<vmem>>, vector<64x256xf32>
    tpu.vector_store %arg11[%c0_119, %c3584], %115 {strides = array<i32>} : memref<64x6400xf32, #tpu.memory_space<vmem>>, vector<64x256xf32>,
    %c0_120 = arith.constant 0 : index
    %c3_121 = arith.constant 3 : index
    %c0_122 = arith.constant 0 : index
    %c0_123 = arith.constant 0 : index
    %117 = vector.load %arg9[%c0_120, %c3_121, %c0_122, %c0_123] : memref<1x12x12x256xf32, #tpu.memory_space<vmem>>, vector<1x8x8x256xf32>
    %118 = vector.shape_cast %117 : vector<1x8x8x256xf32> to vector<8x8x256xf32>
    %119 = vector.shape_cast %118 : vector<8x8x256xf32> to vector<64x256xf32>
    %c0_124 = arith.constant 0 : index
    %c3840 = arith.constant 3840 : index
    %120 = vector.load %arg11[%c0_124, %c3840] : memref<64x6400xf32, #tpu.memory_space<vmem>>, vector<64x256xf32>
    tpu.vector_store %arg11[%c0_124, %c3840], %119 {strides = array<i32>} : memref<64x6400xf32, #tpu.memory_space<vmem>>, vector<64x256xf32>,
    %c0_125 = arith.constant 0 : index
    %c3_126 = arith.constant 3 : index
    %c1_127 = arith.constant 1 : index
    %c0_128 = arith.constant 0 : index
    %121 = vector.load %arg9[%c0_125, %c3_126, %c1_127, %c0_128] : memref<1x12x12x256xf32, #tpu.memory_space<vmem>>, vector<1x8x8x256xf32>
    %122 = vector.shape_cast %121 : vector<1x8x8x256xf32> to vector<8x8x256xf32>
    %123 = vector.shape_cast %122 : vector<8x8x256xf32> to vector<64x256xf32>
    %c0_129 = arith.constant 0 : index
    %c4096 = arith.constant 4096 : index
    %124 = vector.load %arg11[%c0_129, %c4096] : memref<64x6400xf32, #tpu.memory_space<vmem>>, vector<64x256xf32>
    tpu.vector_store %arg11[%c0_129, %c4096], %123 {strides = array<i32>} : memref<64x6400xf32, #tpu.memory_space<vmem>>, vector<64x256xf32>,
    %c0_130 = arith.constant 0 : index
    %c3_131 = arith.constant 3 : index
    %c2_132 = arith.constant 2 : index
    %c0_133 = arith.constant 0 : index
    %125 = vector.load %arg9[%c0_130, %c3_131, %c2_132, %c0_133] : memref<1x12x12x256xf32, #tpu.memory_space<vmem>>, vector<1x8x8x256xf32>
    %126 = vector.shape_cast %125 : vector<1x8x8x256xf32> to vector<8x8x256xf32>
    %127 = vector.shape_cast %126 : vector<8x8x256xf32> to vector<64x256xf32>
    %c0_134 = arith.constant 0 : index
    %c4352 = arith.constant 4352 : index
    %128 = vector.load %arg11[%c0_134, %c4352] : memref<64x6400xf32, #tpu.memory_space<vmem>>, vector<64x256xf32>
    tpu.vector_store %arg11[%c0_134, %c4352], %127 {strides = array<i32>} : memref<64x6400xf32, #tpu.memory_space<vmem>>, vector<64x256xf32>,
    %c0_135 = arith.constant 0 : index
    %c3_136 = arith.constant 3 : index
    %c3_137 = arith.constant 3 : index
    %c0_138 = arith.constant 0 : index
    %129 = vector.load %arg9[%c0_135, %c3_136, %c3_137, %c0_138] : memref<1x12x12x256xf32, #tpu.memory_space<vmem>>, vector<1x8x8x256xf32>
    %130 = vector.shape_cast %129 : vector<1x8x8x256xf32> to vector<8x8x256xf32>
    %131 = vector.shape_cast %130 : vector<8x8x256xf32> to vector<64x256xf32>
    %c0_139 = arith.constant 0 : index
    %c4608 = arith.constant 4608 : index
    %132 = vector.load %arg11[%c0_139, %c4608] : memref<64x6400xf32, #tpu.memory_space<vmem>>, vector<64x256xf32>
    tpu.vector_store %arg11[%c0_139, %c4608], %131 {strides = array<i32>} : memref<64x6400xf32, #tpu.memory_space<vmem>>, vector<64x256xf32>,
    %c0_140 = arith.constant 0 : index
    %c3_141 = arith.constant 3 : index
    %c4_142 = arith.constant 4 : index
    %c0_143 = arith.constant 0 : index
    %133 = vector.load %arg9[%c0_140, %c3_141, %c4_142, %c0_143] : memref<1x12x12x256xf32, #tpu.memory_space<vmem>>, vector<1x8x8x256xf32>
    %134 = vector.shape_cast %133 : vector<1x8x8x256xf32> to vector<8x8x256xf32>
    %135 = vector.shape_cast %134 : vector<8x8x256xf32> to vector<64x256xf32>
    %c0_144 = arith.constant 0 : index
    %c4864 = arith.constant 4864 : index
    %136 = vector.load %arg11[%c0_144, %c4864] : memref<64x6400xf32, #tpu.memory_space<vmem>>, vector<64x256xf32>
    tpu.vector_store %arg11[%c0_144, %c4864], %135 {strides = array<i32>} : memref<64x6400xf32, #tpu.memory_space<vmem>>, vector<64x256xf32>,
    %c0_145 = arith.constant 0 : index
    %c4_146 = arith.constant 4 : index
    %c0_147 = arith.constant 0 : index
    %c0_148 = arith.constant 0 : index
    %137 = vector.load %arg9[%c0_145, %c4_146, %c0_147, %c0_148] : memref<1x12x12x256xf32, #tpu.memory_space<vmem>>, vector<1x8x8x256xf32>
    %138 = vector.shape_cast %137 : vector<1x8x8x256xf32> to vector<8x8x256xf32>
    %139 = vector.shape_cast %138 : vector<8x8x256xf32> to vector<64x256xf32>
    %c0_149 = arith.constant 0 : index
    %c5120 = arith.constant 5120 : index
    %140 = vector.load %arg11[%c0_149, %c5120] : memref<64x6400xf32, #tpu.memory_space<vmem>>, vector<64x256xf32>
    tpu.vector_store %arg11[%c0_149, %c5120], %139 {strides = array<i32>} : memref<64x6400xf32, #tpu.memory_space<vmem>>, vector<64x256xf32>,
    %c0_150 = arith.constant 0 : index
    %c4_151 = arith.constant 4 : index
    %c1_152 = arith.constant 1 : index
    %c0_153 = arith.constant 0 : index
    %141 = vector.load %arg9[%c0_150, %c4_151, %c1_152, %c0_153] : memref<1x12x12x256xf32, #tpu.memory_space<vmem>>, vector<1x8x8x256xf32>
    %142 = vector.shape_cast %141 : vector<1x8x8x256xf32> to vector<8x8x256xf32>
    %143 = vector.shape_cast %142 : vector<8x8x256xf32> to vector<64x256xf32>
    %c0_154 = arith.constant 0 : index
    %c5376 = arith.constant 5376 : index
    %144 = vector.load %arg11[%c0_154, %c5376] : memref<64x6400xf32, #tpu.memory_space<vmem>>, vector<64x256xf32>
    tpu.vector_store %arg11[%c0_154, %c5376], %143 {strides = array<i32>} : memref<64x6400xf32, #tpu.memory_space<vmem>>, vector<64x256xf32>,
    %c0_155 = arith.constant 0 : index
    %c4_156 = arith.constant 4 : index
    %c2_157 = arith.constant 2 : index
    %c0_158 = arith.constant 0 : index
    %145 = vector.load %arg9[%c0_155, %c4_156, %c2_157, %c0_158] : memref<1x12x12x256xf32, #tpu.memory_space<vmem>>, vector<1x8x8x256xf32>
    %146 = vector.shape_cast %145 : vector<1x8x8x256xf32> to vector<8x8x256xf32>
    %147 = vector.shape_cast %146 : vector<8x8x256xf32> to vector<64x256xf32>
    %c0_159 = arith.constant 0 : index
    %c5632 = arith.constant 5632 : index
    %148 = vector.load %arg11[%c0_159, %c5632] : memref<64x6400xf32, #tpu.memory_space<vmem>>, vector<64x256xf32>
    tpu.vector_store %arg11[%c0_159, %c5632], %147 {strides = array<i32>} : memref<64x6400xf32, #tpu.memory_space<vmem>>, vector<64x256xf32>,
    %c0_160 = arith.constant 0 : index
    %c4_161 = arith.constant 4 : index
    %c3_162 = arith.constant 3 : index
    %c0_163 = arith.constant 0 : index
    %149 = vector.load %arg9[%c0_160, %c4_161, %c3_162, %c0_163] : memref<1x12x12x256xf32, #tpu.memory_space<vmem>>, vector<1x8x8x256xf32>
    %150 = vector.shape_cast %149 : vector<1x8x8x256xf32> to vector<8x8x256xf32>
    %151 = vector.shape_cast %150 : vector<8x8x256xf32> to vector<64x256xf32>
    %c0_164 = arith.constant 0 : index
    %c5888 = arith.constant 5888 : index
    %152 = vector.load %arg11[%c0_164, %c5888] : memref<64x6400xf32, #tpu.memory_space<vmem>>, vector<64x256xf32>
    tpu.vector_store %arg11[%c0_164, %c5888], %151 {strides = array<i32>} : memref<64x6400xf32, #tpu.memory_space<vmem>>, vector<64x256xf32>,
    %c0_165 = arith.constant 0 : index
    %c4_166 = arith.constant 4 : index
    %c4_167 = arith.constant 4 : index
    %c0_168 = arith.constant 0 : index
    %153 = vector.load %arg9[%c0_165, %c4_166, %c4_167, %c0_168] : memref<1x12x12x256xf32, #tpu.memory_space<vmem>>, vector<1x8x8x256xf32>
    %154 = vector.shape_cast %153 : vector<1x8x8x256xf32> to vector<8x8x256xf32>
    %155 = vector.shape_cast %154 : vector<8x8x256xf32> to vector<64x256xf32>
    %c0_169 = arith.constant 0 : index
    %c6144 = arith.constant 6144 : index
    %156 = vector.load %arg11[%c0_169, %c6144] : memref<64x6400xf32, #tpu.memory_space<vmem>>, vector<64x256xf32>
    tpu.vector_store %arg11[%c0_169, %c6144], %155 {strides = array<i32>} : memref<64x6400xf32, #tpu.memory_space<vmem>>, vector<64x256xf32>,
    %c0_170 = arith.constant 0 : index
    %c0_171 = arith.constant 0 : index
    %157 = vector.load %arg11[%c0_170, %c0_171] : memref<64x6400xf32, #tpu.memory_space<vmem>>, vector<64x6400xf32>
    %c0_172 = arith.constant 0 : index
    %c0_173 = arith.constant 0 : index
    %158 = vector.load %arg4[%c0_172, %c0_173] : memref<6400x128xf32, #tpu.memory_space<vmem>>, vector<6400x128xf32>
    %cst_174 = arith.constant dense<0.000000e+00> : vector<64x128xf32>
    %159 = tpu.matmul %157, %158, %cst_174 {dimension_numbers = #tpu.dot_dimension_numbers<[1], [0], [0], [1], [0, 0, 1, 1], [], []>} : vector<64x6400xf32>, vector<6400x128xf32>, vector<64x128xf32> -> vector<64x128xf32>
    %c0_175 = arith.constant 0 : index
    %c0_176 = arith.constant 0 : index
    %160 = vector.load %arg5[%c0_175, %c0_176] : memref<1x128xf32, #tpu.memory_space<vmem>>, vector<1x128xf32>
    %161 = vector.broadcast %160 : vector<1x128xf32> to vector<64x128xf32>
    %162 = arith.addf %159, %161 : vector<64x128xf32>
    %cst_177 = arith.constant 0.000000e+00 : f32
    %163 = vector.broadcast %cst_177 : f32 to vector<64x128xf32>
    %164 = arith.maximumf %162, %163 : vector<64x128xf32>
    %165 = vector.extract_strided_slice %164 {offsets = [0, 0], sizes = [8, 128], strides = [1, 1]} : vector<64x128xf32> to vector<8x128xf32>
    %c0_178 = arith.constant 0 : index
    %c0_179 = arith.constant 0 : index
    %c0_180 = arith.constant 0 : index
    %c0_181 = arith.constant 0 : index
    %166 = vector.load %arg10[%c0_178, %c0_179, %c0_180, %c0_181] : memref<1x8x8x128xf32, #tpu.memory_space<vmem>>, vector<1x1x8x128xf32>
    %167 = vector.shape_cast %166 : vector<1x1x8x128xf32> to vector<8x128xf32>
    %168 = vector.shape_cast %165 : vector<8x128xf32> to vector<1x1x8x128xf32>
    tpu.vector_store %arg10[%c0_178, %c0_179, %c0_180, %c0_181], %168 {strides = array<i32>} : memref<1x8x8x128xf32, #tpu.memory_space<vmem>>, vector<1x1x8x128xf32>,
    %169 = vector.extract_strided_slice %164 {offsets = [8, 0], sizes = [8, 128], strides = [1, 1]} : vector<64x128xf32> to vector<8x128xf32>
    %c0_182 = arith.constant 0 : index
    %c1_183 = arith.constant 1 : index
    %c0_184 = arith.constant 0 : index
    %c0_185 = arith.constant 0 : index
    %170 = vector.load %arg10[%c0_182, %c1_183, %c0_184, %c0_185] : memref<1x8x8x128xf32, #tpu.memory_space<vmem>>, vector<1x1x8x128xf32>
    %171 = vector.shape_cast %170 : vector<1x1x8x128xf32> to vector<8x128xf32>
    %172 = vector.shape_cast %169 : vector<8x128xf32> to vector<1x1x8x128xf32>
    tpu.vector_store %arg10[%c0_182, %c1_183, %c0_184, %c0_185], %172 {strides = array<i32>} : memref<1x8x8x128xf32, #tpu.memory_space<vmem>>, vector<1x1x8x128xf32>,
    %173 = vector.extract_strided_slice %164 {offsets = [16, 0], sizes = [8, 128], strides = [1, 1]} : vector<64x128xf32> to vector<8x128xf32>
    %c0_186 = arith.constant 0 : index
    %c2_187 = arith.constant 2 : index
    %c0_188 = arith.constant 0 : index
    %c0_189 = arith.constant 0 : index
    %174 = vector.load %arg10[%c0_186, %c2_187, %c0_188, %c0_189] : memref<1x8x8x128xf32, #tpu.memory_space<vmem>>, vector<1x1x8x128xf32>
    %175 = vector.shape_cast %174 : vector<1x1x8x128xf32> to vector<8x128xf32>
    %176 = vector.shape_cast %173 : vector<8x128xf32> to vector<1x1x8x128xf32>
    tpu.vector_store %arg10[%c0_186, %c2_187, %c0_188, %c0_189], %176 {strides = array<i32>} : memref<1x8x8x128xf32, #tpu.memory_space<vmem>>, vector<1x1x8x128xf32>,
    %177 = vector.extract_strided_slice %164 {offsets = [24, 0], sizes = [8, 128], strides = [1, 1]} : vector<64x128xf32> to vector<8x128xf32>
    %c0_190 = arith.constant 0 : index
    %c3_191 = arith.constant 3 : index
    %c0_192 = arith.constant 0 : index
    %c0_193 = arith.constant 0 : index
    %178 = vector.load %arg10[%c0_190, %c3_191, %c0_192, %c0_193] : memref<1x8x8x128xf32, #tpu.memory_space<vmem>>, vector<1x1x8x128xf32>
    %179 = vector.shape_cast %178 : vector<1x1x8x128xf32> to vector<8x128xf32>
    %180 = vector.shape_cast %177 : vector<8x128xf32> to vector<1x1x8x128xf32>
    tpu.vector_store %arg10[%c0_190, %c3_191, %c0_192, %c0_193], %180 {strides = array<i32>} : memref<1x8x8x128xf32, #tpu.memory_space<vmem>>, vector<1x1x8x128xf32>,
    %181 = vector.extract_strided_slice %164 {offsets = [32, 0], sizes = [8, 128], strides = [1, 1]} : vector<64x128xf32> to vector<8x128xf32>
    %c0_194 = arith.constant 0 : index
    %c4_195 = arith.constant 4 : index
    %c0_196 = arith.constant 0 : index
    %c0_197 = arith.constant 0 : index
    %182 = vector.load %arg10[%c0_194, %c4_195, %c0_196, %c0_197] : memref<1x8x8x128xf32, #tpu.memory_space<vmem>>, vector<1x1x8x128xf32>
    %183 = vector.shape_cast %182 : vector<1x1x8x128xf32> to vector<8x128xf32>
    %184 = vector.shape_cast %181 : vector<8x128xf32> to vector<1x1x8x128xf32>
    tpu.vector_store %arg10[%c0_194, %c4_195, %c0_196, %c0_197], %184 {strides = array<i32>} : memref<1x8x8x128xf32, #tpu.memory_space<vmem>>, vector<1x1x8x128xf32>,
    %185 = vector.extract_strided_slice %164 {offsets = [40, 0], sizes = [8, 128], strides = [1, 1]} : vector<64x128xf32> to vector<8x128xf32>
    %c0_198 = arith.constant 0 : index
    %c5_199 = arith.constant 5 : index
    %c0_200 = arith.constant 0 : index
    %c0_201 = arith.constant 0 : index
    %186 = vector.load %arg10[%c0_198, %c5_199, %c0_200, %c0_201] : memref<1x8x8x128xf32, #tpu.memory_space<vmem>>, vector<1x1x8x128xf32>
    %187 = vector.shape_cast %186 : vector<1x1x8x128xf32> to vector<8x128xf32>
    %188 = vector.shape_cast %185 : vector<8x128xf32> to vector<1x1x8x128xf32>
    tpu.vector_store %arg10[%c0_198, %c5_199, %c0_200, %c0_201], %188 {strides = array<i32>} : memref<1x8x8x128xf32, #tpu.memory_space<vmem>>, vector<1x1x8x128xf32>,
    %189 = vector.extract_strided_slice %164 {offsets = [48, 0], sizes = [8, 128], strides = [1, 1]} : vector<64x128xf32> to vector<8x128xf32>
    %c0_202 = arith.constant 0 : index
    %c6_203 = arith.constant 6 : index
    %c0_204 = arith.constant 0 : index
    %c0_205 = arith.constant 0 : index
    %190 = vector.load %arg10[%c0_202, %c6_203, %c0_204, %c0_205] : memref<1x8x8x128xf32, #tpu.memory_space<vmem>>, vector<1x1x8x128xf32>
    %191 = vector.shape_cast %190 : vector<1x1x8x128xf32> to vector<8x128xf32>
    %192 = vector.shape_cast %189 : vector<8x128xf32> to vector<1x1x8x128xf32>
    tpu.vector_store %arg10[%c0_202, %c6_203, %c0_204, %c0_205], %192 {strides = array<i32>} : memref<1x8x8x128xf32, #tpu.memory_space<vmem>>, vector<1x1x8x128xf32>,
    %193 = vector.extract_strided_slice %164 {offsets = [56, 0], sizes = [8, 128], strides = [1, 1]} : vector<64x128xf32> to vector<8x128xf32>
    %c0_206 = arith.constant 0 : index
    %c7_207 = arith.constant 7 : index
    %c0_208 = arith.constant 0 : index
    %c0_209 = arith.constant 0 : index
    %194 = vector.load %arg10[%c0_206, %c7_207, %c0_208, %c0_209] : memref<1x8x8x128xf32, #tpu.memory_space<vmem>>, vector<1x1x8x128xf32>
    %195 = vector.shape_cast %194 : vector<1x1x8x128xf32> to vector<8x128xf32>
    %196 = vector.shape_cast %193 : vector<8x128xf32> to vector<1x1x8x128xf32>
    tpu.vector_store %arg10[%c0_206, %c7_207, %c0_208, %c0_209], %196 {strides = array<i32>} : memref<1x8x8x128xf32, #tpu.memory_space<vmem>>, vector<1x1x8x128xf32>,
    %c0_210 = arith.constant 0 : index
    %c0_211 = arith.constant 0 : index
    %c0_212 = arith.constant 0 : index
    %c0_213 = arith.constant 0 : index
    %197 = vector.load %arg10[%c0_210, %c0_211, %c0_212, %c0_213] : memref<1x8x8x128xf32, #tpu.memory_space<vmem>>, vector<1x1x8x128xf32>
    %198 = vector.shape_cast %197 : vector<1x1x8x128xf32> to vector<8x128xf32>
    %199 = vector.extract_strided_slice %198 {offsets = [0, 0], sizes = [4, 128], strides = [1, 1]} : vector<8x128xf32> to vector<4x128xf32>
    %c0_214 = arith.constant 0 : index
    %c0_215 = arith.constant 0 : index
    %200 = vector.load %arg12[%c0_214, %c0_215] : memref<16x3200xf32, #tpu.memory_space<vmem>>, vector<4x128xf32>
    tpu.vector_store %arg12[%c0_214, %c0_215], %199 {strides = array<i32>} : memref<16x3200xf32, #tpu.memory_space<vmem>>, vector<4x128xf32>,
    %201 = vector.extract_strided_slice %198 {offsets = [1, 0], sizes = [4, 128], strides = [1, 1]} : vector<8x128xf32> to vector<4x128xf32>
    %c0_216 = arith.constant 0 : index
    %c128 = arith.constant 128 : index
    %202 = vector.load %arg12[%c0_216, %c128] : memref<16x3200xf32, #tpu.memory_space<vmem>>, vector<4x128xf32>
    tpu.vector_store %arg12[%c0_216, %c128], %201 {strides = array<i32>} : memref<16x3200xf32, #tpu.memory_space<vmem>>, vector<4x128xf32>,
    %203 = vector.extract_strided_slice %198 {offsets = [2, 0], sizes = [4, 128], strides = [1, 1]} : vector<8x128xf32> to vector<4x128xf32>
    %c0_217 = arith.constant 0 : index
    %c256_218 = arith.constant 256 : index
    %204 = vector.load %arg12[%c0_217, %c256_218] : memref<16x3200xf32, #tpu.memory_space<vmem>>, vector<4x128xf32>
    tpu.vector_store %arg12[%c0_217, %c256_218], %203 {strides = array<i32>} : memref<16x3200xf32, #tpu.memory_space<vmem>>, vector<4x128xf32>,
    %205 = vector.extract_strided_slice %198 {offsets = [3, 0], sizes = [4, 128], strides = [1, 1]} : vector<8x128xf32> to vector<4x128xf32>
    %c0_219 = arith.constant 0 : index
    %c384 = arith.constant 384 : index
    %206 = vector.load %arg12[%c0_219, %c384] : memref<16x3200xf32, #tpu.memory_space<vmem>>, vector<4x128xf32>
    tpu.vector_store %arg12[%c0_219, %c384], %205 {strides = array<i32>} : memref<16x3200xf32, #tpu.memory_space<vmem>>, vector<4x128xf32>,
    %207 = vector.extract_strided_slice %198 {offsets = [4, 0], sizes = [4, 128], strides = [1, 1]} : vector<8x128xf32> to vector<4x128xf32>
    %c0_220 = arith.constant 0 : index
    %c512_221 = arith.constant 512 : index
    %208 = vector.load %arg12[%c0_220, %c512_221] : memref<16x3200xf32, #tpu.memory_space<vmem>>, vector<4x128xf32>
    tpu.vector_store %arg12[%c0_220, %c512_221], %207 {strides = array<i32>} : memref<16x3200xf32, #tpu.memory_space<vmem>>, vector<4x128xf32>,
    %c0_222 = arith.constant 0 : index
    %c1_223 = arith.constant 1 : index
    %c0_224 = arith.constant 0 : index
    %c0_225 = arith.constant 0 : index
    %209 = vector.load %arg10[%c0_222, %c1_223, %c0_224, %c0_225] : memref<1x8x8x128xf32, #tpu.memory_space<vmem>>, vector<1x1x8x128xf32>
    %210 = vector.shape_cast %209 : vector<1x1x8x128xf32> to vector<8x128xf32>
    %211 = vector.extract_strided_slice %210 {offsets = [0, 0], sizes = [4, 128], strides = [1, 1]} : vector<8x128xf32> to vector<4x128xf32>
    %c0_226 = arith.constant 0 : index
    %c640 = arith.constant 640 : index
    %212 = vector.load %arg12[%c0_226, %c640] : memref<16x3200xf32, #tpu.memory_space<vmem>>, vector<4x128xf32>
    tpu.vector_store %arg12[%c0_226, %c640], %211 {strides = array<i32>} : memref<16x3200xf32, #tpu.memory_space<vmem>>, vector<4x128xf32>,
    %213 = vector.extract_strided_slice %210 {offsets = [1, 0], sizes = [4, 128], strides = [1, 1]} : vector<8x128xf32> to vector<4x128xf32>
    %c0_227 = arith.constant 0 : index
    %c768_228 = arith.constant 768 : index
    %214 = vector.load %arg12[%c0_227, %c768_228] : memref<16x3200xf32, #tpu.memory_space<vmem>>, vector<4x128xf32>
    tpu.vector_store %arg12[%c0_227, %c768_228], %213 {strides = array<i32>} : memref<16x3200xf32, #tpu.memory_space<vmem>>, vector<4x128xf32>,
    %215 = vector.extract_strided_slice %210 {offsets = [2, 0], sizes = [4, 128], strides = [1, 1]} : vector<8x128xf32> to vector<4x128xf32>
    %c0_229 = arith.constant 0 : index
    %c896 = arith.constant 896 : index
    %216 = vector.load %arg12[%c0_229, %c896] : memref<16x3200xf32, #tpu.memory_space<vmem>>, vector<4x128xf32>
    tpu.vector_store %arg12[%c0_229, %c896], %215 {strides = array<i32>} : memref<16x3200xf32, #tpu.memory_space<vmem>>, vector<4x128xf32>,
    %217 = vector.extract_strided_slice %210 {offsets = [3, 0], sizes = [4, 128], strides = [1, 1]} : vector<8x128xf32> to vector<4x128xf32>
    %c0_230 = arith.constant 0 : index
    %c1024_231 = arith.constant 1024 : index
    %218 = vector.load %arg12[%c0_230, %c1024_231] : memref<16x3200xf32, #tpu.memory_space<vmem>>, vector<4x128xf32>
    tpu.vector_store %arg12[%c0_230, %c1024_231], %217 {strides = array<i32>} : memref<16x3200xf32, #tpu.memory_space<vmem>>, vector<4x128xf32>,
    %219 = vector.extract_strided_slice %210 {offsets = [4, 0], sizes = [4, 128], strides = [1, 1]} : vector<8x128xf32> to vector<4x128xf32>
    %c0_232 = arith.constant 0 : index
    %c1152 = arith.constant 1152 : index
    %220 = vector.load %arg12[%c0_232, %c1152] : memref<16x3200xf32, #tpu.memory_space<vmem>>, vector<4x128xf32>
    tpu.vector_store %arg12[%c0_232, %c1152], %219 {strides = array<i32>} : memref<16x3200xf32, #tpu.memory_space<vmem>>, vector<4x128xf32>,
    %c0_233 = arith.constant 0 : index
    %c2_234 = arith.constant 2 : index
    %c0_235 = arith.constant 0 : index
    %c0_236 = arith.constant 0 : index
    %221 = vector.load %arg10[%c0_233, %c2_234, %c0_235, %c0_236] : memref<1x8x8x128xf32, #tpu.memory_space<vmem>>, vector<1x1x8x128xf32>
    %222 = vector.shape_cast %221 : vector<1x1x8x128xf32> to vector<8x128xf32>
    %223 = vector.extract_strided_slice %222 {offsets = [0, 0], sizes = [4, 128], strides = [1, 1]} : vector<8x128xf32> to vector<4x128xf32>
    %c0_237 = arith.constant 0 : index
    %c1280_238 = arith.constant 1280 : index
    %224 = vector.load %arg12[%c0_237, %c1280_238] : memref<16x3200xf32, #tpu.memory_space<vmem>>, vector<4x128xf32>
    tpu.vector_store %arg12[%c0_237, %c1280_238], %223 {strides = array<i32>} : memref<16x3200xf32, #tpu.memory_space<vmem>>, vector<4x128xf32>,
    %225 = vector.extract_strided_slice %222 {offsets = [1, 0], sizes = [4, 128], strides = [1, 1]} : vector<8x128xf32> to vector<4x128xf32>
    %c0_239 = arith.constant 0 : index
    %c1408 = arith.constant 1408 : index
    %226 = vector.load %arg12[%c0_239, %c1408] : memref<16x3200xf32, #tpu.memory_space<vmem>>, vector<4x128xf32>
    tpu.vector_store %arg12[%c0_239, %c1408], %225 {strides = array<i32>} : memref<16x3200xf32, #tpu.memory_space<vmem>>, vector<4x128xf32>,
    %227 = vector.extract_strided_slice %222 {offsets = [2, 0], sizes = [4, 128], strides = [1, 1]} : vector<8x128xf32> to vector<4x128xf32>
    %c0_240 = arith.constant 0 : index
    %c1536_241 = arith.constant 1536 : index
    %228 = vector.load %arg12[%c0_240, %c1536_241] : memref<16x3200xf32, #tpu.memory_space<vmem>>, vector<4x128xf32>
    tpu.vector_store %arg12[%c0_240, %c1536_241], %227 {strides = array<i32>} : memref<16x3200xf32, #tpu.memory_space<vmem>>, vector<4x128xf32>,
    %229 = vector.extract_strided_slice %222 {offsets = [3, 0], sizes = [4, 128], strides = [1, 1]} : vector<8x128xf32> to vector<4x128xf32>
    %c0_242 = arith.constant 0 : index
    %c1664 = arith.constant 1664 : index
    %230 = vector.load %arg12[%c0_242, %c1664] : memref<16x3200xf32, #tpu.memory_space<vmem>>, vector<4x128xf32>
    tpu.vector_store %arg12[%c0_242, %c1664], %229 {strides = array<i32>} : memref<16x3200xf32, #tpu.memory_space<vmem>>, vector<4x128xf32>,
    %231 = vector.extract_strided_slice %222 {offsets = [4, 0], sizes = [4, 128], strides = [1, 1]} : vector<8x128xf32> to vector<4x128xf32>
    %c0_243 = arith.constant 0 : index
    %c1792_244 = arith.constant 1792 : index
    %232 = vector.load %arg12[%c0_243, %c1792_244] : memref<16x3200xf32, #tpu.memory_space<vmem>>, vector<4x128xf32>
    tpu.vector_store %arg12[%c0_243, %c1792_244], %231 {strides = array<i32>} : memref<16x3200xf32, #tpu.memory_space<vmem>>, vector<4x128xf32>,
    %c0_245 = arith.constant 0 : index
    %c3_246 = arith.constant 3 : index
    %c0_247 = arith.constant 0 : index
    %c0_248 = arith.constant 0 : index
    %233 = vector.load %arg10[%c0_245, %c3_246, %c0_247, %c0_248] : memref<1x8x8x128xf32, #tpu.memory_space<vmem>>, vector<1x1x8x128xf32>
    %234 = vector.shape_cast %233 : vector<1x1x8x128xf32> to vector<8x128xf32>
    %235 = vector.extract_strided_slice %234 {offsets = [0, 0], sizes = [4, 128], strides = [1, 1]} : vector<8x128xf32> to vector<4x128xf32>
    %c0_249 = arith.constant 0 : index
    %c1920 = arith.constant 1920 : index
    %236 = vector.load %arg12[%c0_249, %c1920] : memref<16x3200xf32, #tpu.memory_space<vmem>>, vector<4x128xf32>
    tpu.vector_store %arg12[%c0_249, %c1920], %235 {strides = array<i32>} : memref<16x3200xf32, #tpu.memory_space<vmem>>, vector<4x128xf32>,
    %237 = vector.extract_strided_slice %234 {offsets = [1, 0], sizes = [4, 128], strides = [1, 1]} : vector<8x128xf32> to vector<4x128xf32>
    %c0_250 = arith.constant 0 : index
    %c2048_251 = arith.constant 2048 : index
    %238 = vector.load %arg12[%c0_250, %c2048_251] : memref<16x3200xf32, #tpu.memory_space<vmem>>, vector<4x128xf32>
    tpu.vector_store %arg12[%c0_250, %c2048_251], %237 {strides = array<i32>} : memref<16x3200xf32, #tpu.memory_space<vmem>>, vector<4x128xf32>,
    %239 = vector.extract_strided_slice %234 {offsets = [2, 0], sizes = [4, 128], strides = [1, 1]} : vector<8x128xf32> to vector<4x128xf32>
    %c0_252 = arith.constant 0 : index
    %c2176 = arith.constant 2176 : index
    %240 = vector.load %arg12[%c0_252, %c2176] : memref<16x3200xf32, #tpu.memory_space<vmem>>, vector<4x128xf32>
    tpu.vector_store %arg12[%c0_252, %c2176], %239 {strides = array<i32>} : memref<16x3200xf32, #tpu.memory_space<vmem>>, vector<4x128xf32>,
    %241 = vector.extract_strided_slice %234 {offsets = [3, 0], sizes = [4, 128], strides = [1, 1]} : vector<8x128xf32> to vector<4x128xf32>
    %c0_253 = arith.constant 0 : index
    %c2304_254 = arith.constant 2304 : index
    %242 = vector.load %arg12[%c0_253, %c2304_254] : memref<16x3200xf32, #tpu.memory_space<vmem>>, vector<4x128xf32>
    tpu.vector_store %arg12[%c0_253, %c2304_254], %241 {strides = array<i32>} : memref<16x3200xf32, #tpu.memory_space<vmem>>, vector<4x128xf32>,
    %243 = vector.extract_strided_slice %234 {offsets = [4, 0], sizes = [4, 128], strides = [1, 1]} : vector<8x128xf32> to vector<4x128xf32>
    %c0_255 = arith.constant 0 : index
    %c2432 = arith.constant 2432 : index
    %244 = vector.load %arg12[%c0_255, %c2432] : memref<16x3200xf32, #tpu.memory_space<vmem>>, vector<4x128xf32>
    tpu.vector_store %arg12[%c0_255, %c2432], %243 {strides = array<i32>} : memref<16x3200xf32, #tpu.memory_space<vmem>>, vector<4x128xf32>,
    %c0_256 = arith.constant 0 : index
    %c4_257 = arith.constant 4 : index
    %c0_258 = arith.constant 0 : index
    %c0_259 = arith.constant 0 : index
    %245 = vector.load %arg10[%c0_256, %c4_257, %c0_258, %c0_259] : memref<1x8x8x128xf32, #tpu.memory_space<vmem>>, vector<1x1x8x128xf32>
    %246 = vector.shape_cast %245 : vector<1x1x8x128xf32> to vector<8x128xf32>
    %247 = vector.extract_strided_slice %246 {offsets = [0, 0], sizes = [4, 128], strides = [1, 1]} : vector<8x128xf32> to vector<4x128xf32>
    %c0_260 = arith.constant 0 : index
    %c2560_261 = arith.constant 2560 : index
    %248 = vector.load %arg12[%c0_260, %c2560_261] : memref<16x3200xf32, #tpu.memory_space<vmem>>, vector<4x128xf32>
    tpu.vector_store %arg12[%c0_260, %c2560_261], %247 {strides = array<i32>} : memref<16x3200xf32, #tpu.memory_space<vmem>>, vector<4x128xf32>,
    %249 = vector.extract_strided_slice %246 {offsets = [1, 0], sizes = [4, 128], strides = [1, 1]} : vector<8x128xf32> to vector<4x128xf32>
    %c0_262 = arith.constant 0 : index
    %c2688 = arith.constant 2688 : index
    %250 = vector.load %arg12[%c0_262, %c2688] : memref<16x3200xf32, #tpu.memory_space<vmem>>, vector<4x128xf32>
    tpu.vector_store %arg12[%c0_262, %c2688], %249 {strides = array<i32>} : memref<16x3200xf32, #tpu.memory_space<vmem>>, vector<4x128xf32>,
    %251 = vector.extract_strided_slice %246 {offsets = [2, 0], sizes = [4, 128], strides = [1, 1]} : vector<8x128xf32> to vector<4x128xf32>
    %c0_263 = arith.constant 0 : index
    %c2816_264 = arith.constant 2816 : index
    %252 = vector.load %arg12[%c0_263, %c2816_264] : memref<16x3200xf32, #tpu.memory_space<vmem>>, vector<4x128xf32>
    tpu.vector_store %arg12[%c0_263, %c2816_264], %251 {strides = array<i32>} : memref<16x3200xf32, #tpu.memory_space<vmem>>, vector<4x128xf32>,
    %253 = vector.extract_strided_slice %246 {offsets = [3, 0], sizes = [4, 128], strides = [1, 1]} : vector<8x128xf32> to vector<4x128xf32>
    %c0_265 = arith.constant 0 : index
    %c2944 = arith.constant 2944 : index
    %254 = vector.load %arg12[%c0_265, %c2944] : memref<16x3200xf32, #tpu.memory_space<vmem>>, vector<4x128xf32>
    tpu.vector_store %arg12[%c0_265, %c2944], %253 {strides = array<i32>} : memref<16x3200xf32, #tpu.memory_space<vmem>>, vector<4x128xf32>,
    %255 = vector.extract_strided_slice %246 {offsets = [4, 0], sizes = [4, 128], strides = [1, 1]} : vector<8x128xf32> to vector<4x128xf32>
    %c0_266 = arith.constant 0 : index
    %c3072_267 = arith.constant 3072 : index
    %256 = vector.load %arg12[%c0_266, %c3072_267] : memref<16x3200xf32, #tpu.memory_space<vmem>>, vector<4x128xf32>
    tpu.vector_store %arg12[%c0_266, %c3072_267], %255 {strides = array<i32>} : memref<16x3200xf32, #tpu.memory_space<vmem>>, vector<4x128xf32>,
    %c0_268 = arith.constant 0 : index
    %c1_269 = arith.constant 1 : index
    %c0_270 = arith.constant 0 : index
    %c0_271 = arith.constant 0 : index
    %257 = vector.load %arg10[%c0_268, %c1_269, %c0_270, %c0_271] : memref<1x8x8x128xf32, #tpu.memory_space<vmem>>, vector<1x1x8x128xf32>
    %258 = vector.shape_cast %257 : vector<1x1x8x128xf32> to vector<8x128xf32>
    %259 = vector.extract_strided_slice %258 {offsets = [0, 0], sizes = [4, 128], strides = [1, 1]} : vector<8x128xf32> to vector<4x128xf32>
    %c4_272 = arith.constant 4 : index
    %c0_273 = arith.constant 0 : index
    %260 = vector.load %arg12[%c4_272, %c0_273] : memref<16x3200xf32, #tpu.memory_space<vmem>>, vector<4x128xf32>
    tpu.vector_store %arg12[%c4_272, %c0_273], %259 {strides = array<i32>} : memref<16x3200xf32, #tpu.memory_space<vmem>>, vector<4x128xf32>,
    %261 = vector.extract_strided_slice %258 {offsets = [1, 0], sizes = [4, 128], strides = [1, 1]} : vector<8x128xf32> to vector<4x128xf32>
    %c4_274 = arith.constant 4 : index
    %c128_275 = arith.constant 128 : index
    %262 = vector.load %arg12[%c4_274, %c128_275] : memref<16x3200xf32, #tpu.memory_space<vmem>>, vector<4x128xf32>
    tpu.vector_store %arg12[%c4_274, %c128_275], %261 {strides = array<i32>} : memref<16x3200xf32, #tpu.memory_space<vmem>>, vector<4x128xf32>,
    %263 = vector.extract_strided_slice %258 {offsets = [2, 0], sizes = [4, 128], strides = [1, 1]} : vector<8x128xf32> to vector<4x128xf32>
    %c4_276 = arith.constant 4 : index
    %c256_277 = arith.constant 256 : index
    %264 = vector.load %arg12[%c4_276, %c256_277] : memref<16x3200xf32, #tpu.memory_space<vmem>>, vector<4x128xf32>
    tpu.vector_store %arg12[%c4_276, %c256_277], %263 {strides = array<i32>} : memref<16x3200xf32, #tpu.memory_space<vmem>>, vector<4x128xf32>,
    %265 = vector.extract_strided_slice %258 {offsets = [3, 0], sizes = [4, 128], strides = [1, 1]} : vector<8x128xf32> to vector<4x128xf32>
    %c4_278 = arith.constant 4 : index
    %c384_279 = arith.constant 384 : index
    %266 = vector.load %arg12[%c4_278, %c384_279] : memref<16x3200xf32, #tpu.memory_space<vmem>>, vector<4x128xf32>
    tpu.vector_store %arg12[%c4_278, %c384_279], %265 {strides = array<i32>} : memref<16x3200xf32, #tpu.memory_space<vmem>>, vector<4x128xf32>,
    %267 = vector.extract_strided_slice %258 {offsets = [4, 0], sizes = [4, 128], strides = [1, 1]} : vector<8x128xf32> to vector<4x128xf32>
    %c4_280 = arith.constant 4 : index
    %c512_281 = arith.constant 512 : index
    %268 = vector.load %arg12[%c4_280, %c512_281] : memref<16x3200xf32, #tpu.memory_space<vmem>>, vector<4x128xf32>
    tpu.vector_store %arg12[%c4_280, %c512_281], %267 {strides = array<i32>} : memref<16x3200xf32, #tpu.memory_space<vmem>>, vector<4x128xf32>,
    %c0_282 = arith.constant 0 : index
    %c2_283 = arith.constant 2 : index
    %c0_284 = arith.constant 0 : index
    %c0_285 = arith.constant 0 : index
    %269 = vector.load %arg10[%c0_282, %c2_283, %c0_284, %c0_285] : memref<1x8x8x128xf32, #tpu.memory_space<vmem>>, vector<1x1x8x128xf32>
    %270 = vector.shape_cast %269 : vector<1x1x8x128xf32> to vector<8x128xf32>
    %271 = vector.extract_strided_slice %270 {offsets = [0, 0], sizes = [4, 128], strides = [1, 1]} : vector<8x128xf32> to vector<4x128xf32>
    %c4_286 = arith.constant 4 : index
    %c640_287 = arith.constant 640 : index
    %272 = vector.load %arg12[%c4_286, %c640_287] : memref<16x3200xf32, #tpu.memory_space<vmem>>, vector<4x128xf32>
    tpu.vector_store %arg12[%c4_286, %c640_287], %271 {strides = array<i32>} : memref<16x3200xf32, #tpu.memory_space<vmem>>, vector<4x128xf32>,
    %273 = vector.extract_strided_slice %270 {offsets = [1, 0], sizes = [4, 128], strides = [1, 1]} : vector<8x128xf32> to vector<4x128xf32>
    %c4_288 = arith.constant 4 : index
    %c768_289 = arith.constant 768 : index
    %274 = vector.load %arg12[%c4_288, %c768_289] : memref<16x3200xf32, #tpu.memory_space<vmem>>, vector<4x128xf32>
    tpu.vector_store %arg12[%c4_288, %c768_289], %273 {strides = array<i32>} : memref<16x3200xf32, #tpu.memory_space<vmem>>, vector<4x128xf32>,
    %275 = vector.extract_strided_slice %270 {offsets = [2, 0], sizes = [4, 128], strides = [1, 1]} : vector<8x128xf32> to vector<4x128xf32>
    %c4_290 = arith.constant 4 : index
    %c896_291 = arith.constant 896 : index
    %276 = vector.load %arg12[%c4_290, %c896_291] : memref<16x3200xf32, #tpu.memory_space<vmem>>, vector<4x128xf32>
    tpu.vector_store %arg12[%c4_290, %c896_291], %275 {strides = array<i32>} : memref<16x3200xf32, #tpu.memory_space<vmem>>, vector<4x128xf32>,
    %277 = vector.extract_strided_slice %270 {offsets = [3, 0], sizes = [4, 128], strides = [1, 1]} : vector<8x128xf32> to vector<4x128xf32>
    %c4_292 = arith.constant 4 : index
    %c1024_293 = arith.constant 1024 : index
    %278 = vector.load %arg12[%c4_292, %c1024_293] : memref<16x3200xf32, #tpu.memory_space<vmem>>, vector<4x128xf32>
    tpu.vector_store %arg12[%c4_292, %c1024_293], %277 {strides = array<i32>} : memref<16x3200xf32, #tpu.memory_space<vmem>>, vector<4x128xf32>,
    %279 = vector.extract_strided_slice %270 {offsets = [4, 0], sizes = [4, 128], strides = [1, 1]} : vector<8x128xf32> to vector<4x128xf32>
    %c4_294 = arith.constant 4 : index
    %c1152_295 = arith.constant 1152 : index
    %280 = vector.load %arg12[%c4_294, %c1152_295] : memref<16x3200xf32, #tpu.memory_space<vmem>>, vector<4x128xf32>
    tpu.vector_store %arg12[%c4_294, %c1152_295], %279 {strides = array<i32>} : memref<16x3200xf32, #tpu.memory_space<vmem>>, vector<4x128xf32>,
    %c0_296 = arith.constant 0 : index
    %c3_297 = arith.constant 3 : index
    %c0_298 = arith.constant 0 : index
    %c0_299 = arith.constant 0 : index
    %281 = vector.load %arg10[%c0_296, %c3_297, %c0_298, %c0_299] : memref<1x8x8x128xf32, #tpu.memory_space<vmem>>, vector<1x1x8x128xf32>
    %282 = vector.shape_cast %281 : vector<1x1x8x128xf32> to vector<8x128xf32>
    %283 = vector.extract_strided_slice %282 {offsets = [0, 0], sizes = [4, 128], strides = [1, 1]} : vector<8x128xf32> to vector<4x128xf32>
    %c4_300 = arith.constant 4 : index
    %c1280_301 = arith.constant 1280 : index
    %284 = vector.load %arg12[%c4_300, %c1280_301] : memref<16x3200xf32, #tpu.memory_space<vmem>>, vector<4x128xf32>
    tpu.vector_store %arg12[%c4_300, %c1280_301], %283 {strides = array<i32>} : memref<16x3200xf32, #tpu.memory_space<vmem>>, vector<4x128xf32>,
    %285 = vector.extract_strided_slice %282 {offsets = [1, 0], sizes = [4, 128], strides = [1, 1]} : vector<8x128xf32> to vector<4x128xf32>
    %c4_302 = arith.constant 4 : index
    %c1408_303 = arith.constant 1408 : index
    %286 = vector.load %arg12[%c4_302, %c1408_303] : memref<16x3200xf32, #tpu.memory_space<vmem>>, vector<4x128xf32>
    tpu.vector_store %arg12[%c4_302, %c1408_303], %285 {strides = array<i32>} : memref<16x3200xf32, #tpu.memory_space<vmem>>, vector<4x128xf32>,
    %287 = vector.extract_strided_slice %282 {offsets = [2, 0], sizes = [4, 128], strides = [1, 1]} : vector<8x128xf32> to vector<4x128xf32>
    %c4_304 = arith.constant 4 : index
    %c1536_305 = arith.constant 1536 : index
    %288 = vector.load %arg12[%c4_304, %c1536_305] : memref<16x3200xf32, #tpu.memory_space<vmem>>, vector<4x128xf32>
    tpu.vector_store %arg12[%c4_304, %c1536_305], %287 {strides = array<i32>} : memref<16x3200xf32, #tpu.memory_space<vmem>>, vector<4x128xf32>,
    %289 = vector.extract_strided_slice %282 {offsets = [3, 0], sizes = [4, 128], strides = [1, 1]} : vector<8x128xf32> to vector<4x128xf32>
    %c4_306 = arith.constant 4 : index
    %c1664_307 = arith.constant 1664 : index
    %290 = vector.load %arg12[%c4_306, %c1664_307] : memref<16x3200xf32, #tpu.memory_space<vmem>>, vector<4x128xf32>
    tpu.vector_store %arg12[%c4_306, %c1664_307], %289 {strides = array<i32>} : memref<16x3200xf32, #tpu.memory_space<vmem>>, vector<4x128xf32>,
    %291 = vector.extract_strided_slice %282 {offsets = [4, 0], sizes = [4, 128], strides = [1, 1]} : vector<8x128xf32> to vector<4x128xf32>
    %c4_308 = arith.constant 4 : index
    %c1792_309 = arith.constant 1792 : index
    %292 = vector.load %arg12[%c4_308, %c1792_309] : memref<16x3200xf32, #tpu.memory_space<vmem>>, vector<4x128xf32>
    tpu.vector_store %arg12[%c4_308, %c1792_309], %291 {strides = array<i32>} : memref<16x3200xf32, #tpu.memory_space<vmem>>, vector<4x128xf32>,
    %c0_310 = arith.constant 0 : index
    %c4_311 = arith.constant 4 : index
    %c0_312 = arith.constant 0 : index
    %c0_313 = arith.constant 0 : index
    %293 = vector.load %arg10[%c0_310, %c4_311, %c0_312, %c0_313] : memref<1x8x8x128xf32, #tpu.memory_space<vmem>>, vector<1x1x8x128xf32>
    %294 = vector.shape_cast %293 : vector<1x1x8x128xf32> to vector<8x128xf32>
    %295 = vector.extract_strided_slice %294 {offsets = [0, 0], sizes = [4, 128], strides = [1, 1]} : vector<8x128xf32> to vector<4x128xf32>
    %c4_314 = arith.constant 4 : index
    %c1920_315 = arith.constant 1920 : index
    %296 = vector.load %arg12[%c4_314, %c1920_315] : memref<16x3200xf32, #tpu.memory_space<vmem>>, vector<4x128xf32>
    tpu.vector_store %arg12[%c4_314, %c1920_315], %295 {strides = array<i32>} : memref<16x3200xf32, #tpu.memory_space<vmem>>, vector<4x128xf32>,
    %297 = vector.extract_strided_slice %294 {offsets = [1, 0], sizes = [4, 128], strides = [1, 1]} : vector<8x128xf32> to vector<4x128xf32>
    %c4_316 = arith.constant 4 : index
    %c2048_317 = arith.constant 2048 : index
    %298 = vector.load %arg12[%c4_316, %c2048_317] : memref<16x3200xf32, #tpu.memory_space<vmem>>, vector<4x128xf32>
    tpu.vector_store %arg12[%c4_316, %c2048_317], %297 {strides = array<i32>} : memref<16x3200xf32, #tpu.memory_space<vmem>>, vector<4x128xf32>,
    %299 = vector.extract_strided_slice %294 {offsets = [2, 0], sizes = [4, 128], strides = [1, 1]} : vector<8x128xf32> to vector<4x128xf32>
    %c4_318 = arith.constant 4 : index
    %c2176_319 = arith.constant 2176 : index
    %300 = vector.load %arg12[%c4_318, %c2176_319] : memref<16x3200xf32, #tpu.memory_space<vmem>>, vector<4x128xf32>
    tpu.vector_store %arg12[%c4_318, %c2176_319], %299 {strides = array<i32>} : memref<16x3200xf32, #tpu.memory_space<vmem>>, vector<4x128xf32>,
    %301 = vector.extract_strided_slice %294 {offsets = [3, 0], sizes = [4, 128], strides = [1, 1]} : vector<8x128xf32> to vector<4x128xf32>
    %c4_320 = arith.constant 4 : index
    %c2304_321 = arith.constant 2304 : index
    %302 = vector.load %arg12[%c4_320, %c2304_321] : memref<16x3200xf32, #tpu.memory_space<vmem>>, vector<4x128xf32>
    tpu.vector_store %arg12[%c4_320, %c2304_321], %301 {strides = array<i32>} : memref<16x3200xf32, #tpu.memory_space<vmem>>, vector<4x128xf32>,
    %303 = vector.extract_strided_slice %294 {offsets = [4, 0], sizes = [4, 128], strides = [1, 1]} : vector<8x128xf32> to vector<4x128xf32>
    %c4_322 = arith.constant 4 : index
    %c2432_323 = arith.constant 2432 : index
    %304 = vector.load %arg12[%c4_322, %c2432_323] : memref<16x3200xf32, #tpu.memory_space<vmem>>, vector<4x128xf32>
    tpu.vector_store %arg12[%c4_322, %c2432_323], %303 {strides = array<i32>} : memref<16x3200xf32, #tpu.memory_space<vmem>>, vector<4x128xf32>,
    %c0_324 = arith.constant 0 : index
    %c5_325 = arith.constant 5 : index
    %c0_326 = arith.constant 0 : index
    %c0_327 = arith.constant 0 : index
    %305 = vector.load %arg10[%c0_324, %c5_325, %c0_326, %c0_327] : memref<1x8x8x128xf32, #tpu.memory_space<vmem>>, vector<1x1x8x128xf32>
    %306 = vector.shape_cast %305 : vector<1x1x8x128xf32> to vector<8x128xf32>
    %307 = vector.extract_strided_slice %306 {offsets = [0, 0], sizes = [4, 128], strides = [1, 1]} : vector<8x128xf32> to vector<4x128xf32>
    %c4_328 = arith.constant 4 : index
    %c2560_329 = arith.constant 2560 : index
    %308 = vector.load %arg12[%c4_328, %c2560_329] : memref<16x3200xf32, #tpu.memory_space<vmem>>, vector<4x128xf32>
    tpu.vector_store %arg12[%c4_328, %c2560_329], %307 {strides = array<i32>} : memref<16x3200xf32, #tpu.memory_space<vmem>>, vector<4x128xf32>,
    %309 = vector.extract_strided_slice %306 {offsets = [1, 0], sizes = [4, 128], strides = [1, 1]} : vector<8x128xf32> to vector<4x128xf32>
    %c4_330 = arith.constant 4 : index
    %c2688_331 = arith.constant 2688 : index
    %310 = vector.load %arg12[%c4_330, %c2688_331] : memref<16x3200xf32, #tpu.memory_space<vmem>>, vector<4x128xf32>
    tpu.vector_store %arg12[%c4_330, %c2688_331], %309 {strides = array<i32>} : memref<16x3200xf32, #tpu.memory_space<vmem>>, vector<4x128xf32>,
    %311 = vector.extract_strided_slice %306 {offsets = [2, 0], sizes = [4, 128], strides = [1, 1]} : vector<8x128xf32> to vector<4x128xf32>
    %c4_332 = arith.constant 4 : index
    %c2816_333 = arith.constant 2816 : index
    %312 = vector.load %arg12[%c4_332, %c2816_333] : memref<16x3200xf32, #tpu.memory_space<vmem>>, vector<4x128xf32>
    tpu.vector_store %arg12[%c4_332, %c2816_333], %311 {strides = array<i32>} : memref<16x3200xf32, #tpu.memory_space<vmem>>, vector<4x128xf32>,
    %313 = vector.extract_strided_slice %306 {offsets = [3, 0], sizes = [4, 128], strides = [1, 1]} : vector<8x128xf32> to vector<4x128xf32>
    %c4_334 = arith.constant 4 : index
    %c2944_335 = arith.constant 2944 : index
    %314 = vector.load %arg12[%c4_334, %c2944_335] : memref<16x3200xf32, #tpu.memory_space<vmem>>, vector<4x128xf32>
    tpu.vector_store %arg12[%c4_334, %c2944_335], %313 {strides = array<i32>} : memref<16x3200xf32, #tpu.memory_space<vmem>>, vector<4x128xf32>,
    %315 = vector.extract_strided_slice %306 {offsets = [4, 0], sizes = [4, 128], strides = [1, 1]} : vector<8x128xf32> to vector<4x128xf32>
    %c4_336 = arith.constant 4 : index
    %c3072_337 = arith.constant 3072 : index
    %316 = vector.load %arg12[%c4_336, %c3072_337] : memref<16x3200xf32, #tpu.memory_space<vmem>>, vector<4x128xf32>
    tpu.vector_store %arg12[%c4_336, %c3072_337], %315 {strides = array<i32>} : memref<16x3200xf32, #tpu.memory_space<vmem>>, vector<4x128xf32>,
    %c0_338 = arith.constant 0 : index
    %c2_339 = arith.constant 2 : index
    %c0_340 = arith.constant 0 : index
    %c0_341 = arith.constant 0 : index
    %317 = vector.load %arg10[%c0_338, %c2_339, %c0_340, %c0_341] : memref<1x8x8x128xf32, #tpu.memory_space<vmem>>, vector<1x1x8x128xf32>
    %318 = vector.shape_cast %317 : vector<1x1x8x128xf32> to vector<8x128xf32>
    %319 = vector.extract_strided_slice %318 {offsets = [0, 0], sizes = [4, 128], strides = [1, 1]} : vector<8x128xf32> to vector<4x128xf32>
    %c8_342 = arith.constant 8 : index
    %c0_343 = arith.constant 0 : index
    %320 = vector.load %arg12[%c8_342, %c0_343] : memref<16x3200xf32, #tpu.memory_space<vmem>>, vector<4x128xf32>
    tpu.vector_store %arg12[%c8_342, %c0_343], %319 {strides = array<i32>} : memref<16x3200xf32, #tpu.memory_space<vmem>>, vector<4x128xf32>,
    %321 = vector.extract_strided_slice %318 {offsets = [1, 0], sizes = [4, 128], strides = [1, 1]} : vector<8x128xf32> to vector<4x128xf32>
    %c8_344 = arith.constant 8 : index
    %c128_345 = arith.constant 128 : index
    %322 = vector.load %arg12[%c8_344, %c128_345] : memref<16x3200xf32, #tpu.memory_space<vmem>>, vector<4x128xf32>
    tpu.vector_store %arg12[%c8_344, %c128_345], %321 {strides = array<i32>} : memref<16x3200xf32, #tpu.memory_space<vmem>>, vector<4x128xf32>,
    %323 = vector.extract_strided_slice %318 {offsets = [2, 0], sizes = [4, 128], strides = [1, 1]} : vector<8x128xf32> to vector<4x128xf32>
    %c8_346 = arith.constant 8 : index
    %c256_347 = arith.constant 256 : index
    %324 = vector.load %arg12[%c8_346, %c256_347] : memref<16x3200xf32, #tpu.memory_space<vmem>>, vector<4x128xf32>
    tpu.vector_store %arg12[%c8_346, %c256_347], %323 {strides = array<i32>} : memref<16x3200xf32, #tpu.memory_space<vmem>>, vector<4x128xf32>,
    %325 = vector.extract_strided_slice %318 {offsets = [3, 0], sizes = [4, 128], strides = [1, 1]} : vector<8x128xf32> to vector<4x128xf32>
    %c8_348 = arith.constant 8 : index
    %c384_349 = arith.constant 384 : index
    %326 = vector.load %arg12[%c8_348, %c384_349] : memref<16x3200xf32, #tpu.memory_space<vmem>>, vector<4x128xf32>
    tpu.vector_store %arg12[%c8_348, %c384_349], %325 {strides = array<i32>} : memref<16x3200xf32, #tpu.memory_space<vmem>>, vector<4x128xf32>,
    %327 = vector.extract_strided_slice %318 {offsets = [4, 0], sizes = [4, 128], strides = [1, 1]} : vector<8x128xf32> to vector<4x128xf32>
    %c8_350 = arith.constant 8 : index
    %c512_351 = arith.constant 512 : index
    %328 = vector.load %arg12[%c8_350, %c512_351] : memref<16x3200xf32, #tpu.memory_space<vmem>>, vector<4x128xf32>
    tpu.vector_store %arg12[%c8_350, %c512_351], %327 {strides = array<i32>} : memref<16x3200xf32, #tpu.memory_space<vmem>>, vector<4x128xf32>,
    %c0_352 = arith.constant 0 : index
    %c3_353 = arith.constant 3 : index
    %c0_354 = arith.constant 0 : index
    %c0_355 = arith.constant 0 : index
    %329 = vector.load %arg10[%c0_352, %c3_353, %c0_354, %c0_355] : memref<1x8x8x128xf32, #tpu.memory_space<vmem>>, vector<1x1x8x128xf32>
    %330 = vector.shape_cast %329 : vector<1x1x8x128xf32> to vector<8x128xf32>
    %331 = vector.extract_strided_slice %330 {offsets = [0, 0], sizes = [4, 128], strides = [1, 1]} : vector<8x128xf32> to vector<4x128xf32>
    %c8_356 = arith.constant 8 : index
    %c640_357 = arith.constant 640 : index
    %332 = vector.load %arg12[%c8_356, %c640_357] : memref<16x3200xf32, #tpu.memory_space<vmem>>, vector<4x128xf32>
    tpu.vector_store %arg12[%c8_356, %c640_357], %331 {strides = array<i32>} : memref<16x3200xf32, #tpu.memory_space<vmem>>, vector<4x128xf32>,
    %333 = vector.extract_strided_slice %330 {offsets = [1, 0], sizes = [4, 128], strides = [1, 1]} : vector<8x128xf32> to vector<4x128xf32>
    %c8_358 = arith.constant 8 : index
    %c768_359 = arith.constant 768 : index
    %334 = vector.load %arg12[%c8_358, %c768_359] : memref<16x3200xf32, #tpu.memory_space<vmem>>, vector<4x128xf32>
    tpu.vector_store %arg12[%c8_358, %c768_359], %333 {strides = array<i32>} : memref<16x3200xf32, #tpu.memory_space<vmem>>, vector<4x128xf32>,
    %335 = vector.extract_strided_slice %330 {offsets = [2, 0], sizes = [4, 128], strides = [1, 1]} : vector<8x128xf32> to vector<4x128xf32>
    %c8_360 = arith.constant 8 : index
    %c896_361 = arith.constant 896 : index
    %336 = vector.load %arg12[%c8_360, %c896_361] : memref<16x3200xf32, #tpu.memory_space<vmem>>, vector<4x128xf32>
    tpu.vector_store %arg12[%c8_360, %c896_361], %335 {strides = array<i32>} : memref<16x3200xf32, #tpu.memory_space<vmem>>, vector<4x128xf32>,
    %337 = vector.extract_strided_slice %330 {offsets = [3, 0], sizes = [4, 128], strides = [1, 1]} : vector<8x128xf32> to vector<4x128xf32>
    %c8_362 = arith.constant 8 : index
    %c1024_363 = arith.constant 1024 : index
    %338 = vector.load %arg12[%c8_362, %c1024_363] : memref<16x3200xf32, #tpu.memory_space<vmem>>, vector<4x128xf32>
    tpu.vector_store %arg12[%c8_362, %c1024_363], %337 {strides = array<i32>} : memref<16x3200xf32, #tpu.memory_space<vmem>>, vector<4x128xf32>,
    %339 = vector.extract_strided_slice %330 {offsets = [4, 0], sizes = [4, 128], strides = [1, 1]} : vector<8x128xf32> to vector<4x128xf32>
    %c8_364 = arith.constant 8 : index
    %c1152_365 = arith.constant 1152 : index
    %340 = vector.load %arg12[%c8_364, %c1152_365] : memref<16x3200xf32, #tpu.memory_space<vmem>>, vector<4x128xf32>
    tpu.vector_store %arg12[%c8_364, %c1152_365], %339 {strides = array<i32>} : memref<16x3200xf32, #tpu.memory_space<vmem>>, vector<4x128xf32>,
    %c0_366 = arith.constant 0 : index
    %c4_367 = arith.constant 4 : index
    %c0_368 = arith.constant 0 : index
    %c0_369 = arith.constant 0 : index
    %341 = vector.load %arg10[%c0_366, %c4_367, %c0_368, %c0_369] : memref<1x8x8x128xf32, #tpu.memory_space<vmem>>, vector<1x1x8x128xf32>
    %342 = vector.shape_cast %341 : vector<1x1x8x128xf32> to vector<8x128xf32>
    %343 = vector.extract_strided_slice %342 {offsets = [0, 0], sizes = [4, 128], strides = [1, 1]} : vector<8x128xf32> to vector<4x128xf32>
    %c8_370 = arith.constant 8 : index
    %c1280_371 = arith.constant 1280 : index
    %344 = vector.load %arg12[%c8_370, %c1280_371] : memref<16x3200xf32, #tpu.memory_space<vmem>>, vector<4x128xf32>
    tpu.vector_store %arg12[%c8_370, %c1280_371], %343 {strides = array<i32>} : memref<16x3200xf32, #tpu.memory_space<vmem>>, vector<4x128xf32>,
    %345 = vector.extract_strided_slice %342 {offsets = [1, 0], sizes = [4, 128], strides = [1, 1]} : vector<8x128xf32> to vector<4x128xf32>
    %c8_372 = arith.constant 8 : index
    %c1408_373 = arith.constant 1408 : index
    %346 = vector.load %arg12[%c8_372, %c1408_373] : memref<16x3200xf32, #tpu.memory_space<vmem>>, vector<4x128xf32>
    tpu.vector_store %arg12[%c8_372, %c1408_373], %345 {strides = array<i32>} : memref<16x3200xf32, #tpu.memory_space<vmem>>, vector<4x128xf32>,
    %347 = vector.extract_strided_slice %342 {offsets = [2, 0], sizes = [4, 128], strides = [1, 1]} : vector<8x128xf32> to vector<4x128xf32>
    %c8_374 = arith.constant 8 : index
    %c1536_375 = arith.constant 1536 : index
    %348 = vector.load %arg12[%c8_374, %c1536_375] : memref<16x3200xf32, #tpu.memory_space<vmem>>, vector<4x128xf32>
    tpu.vector_store %arg12[%c8_374, %c1536_375], %347 {strides = array<i32>} : memref<16x3200xf32, #tpu.memory_space<vmem>>, vector<4x128xf32>,
    %349 = vector.extract_strided_slice %342 {offsets = [3, 0], sizes = [4, 128], strides = [1, 1]} : vector<8x128xf32> to vector<4x128xf32>
    %c8_376 = arith.constant 8 : index
    %c1664_377 = arith.constant 1664 : index
    %350 = vector.load %arg12[%c8_376, %c1664_377] : memref<16x3200xf32, #tpu.memory_space<vmem>>, vector<4x128xf32>
    tpu.vector_store %arg12[%c8_376, %c1664_377], %349 {strides = array<i32>} : memref<16x3200xf32, #tpu.memory_space<vmem>>, vector<4x128xf32>,
    %351 = vector.extract_strided_slice %342 {offsets = [4, 0], sizes = [4, 128], strides = [1, 1]} : vector<8x128xf32> to vector<4x128xf32>
    %c8_378 = arith.constant 8 : index
    %c1792_379 = arith.constant 1792 : index
    %352 = vector.load %arg12[%c8_378, %c1792_379] : memref<16x3200xf32, #tpu.memory_space<vmem>>, vector<4x128xf32>
    tpu.vector_store %arg12[%c8_378, %c1792_379], %351 {strides = array<i32>} : memref<16x3200xf32, #tpu.memory_space<vmem>>, vector<4x128xf32>,
    %c0_380 = arith.constant 0 : index
    %c5_381 = arith.constant 5 : index
    %c0_382 = arith.constant 0 : index
    %c0_383 = arith.constant 0 : index
    %353 = vector.load %arg10[%c0_380, %c5_381, %c0_382, %c0_383] : memref<1x8x8x128xf32, #tpu.memory_space<vmem>>, vector<1x1x8x128xf32>
    %354 = vector.shape_cast %353 : vector<1x1x8x128xf32> to vector<8x128xf32>
    %355 = vector.extract_strided_slice %354 {offsets = [0, 0], sizes = [4, 128], strides = [1, 1]} : vector<8x128xf32> to vector<4x128xf32>
    %c8_384 = arith.constant 8 : index
    %c1920_385 = arith.constant 1920 : index
    %356 = vector.load %arg12[%c8_384, %c1920_385] : memref<16x3200xf32, #tpu.memory_space<vmem>>, vector<4x128xf32>
    tpu.vector_store %arg12[%c8_384, %c1920_385], %355 {strides = array<i32>} : memref<16x3200xf32, #tpu.memory_space<vmem>>, vector<4x128xf32>,
    %357 = vector.extract_strided_slice %354 {offsets = [1, 0], sizes = [4, 128], strides = [1, 1]} : vector<8x128xf32> to vector<4x128xf32>
    %c8_386 = arith.constant 8 : index
    %c2048_387 = arith.constant 2048 : index
    %358 = vector.load %arg12[%c8_386, %c2048_387] : memref<16x3200xf32, #tpu.memory_space<vmem>>, vector<4x128xf32>
    tpu.vector_store %arg12[%c8_386, %c2048_387], %357 {strides = array<i32>} : memref<16x3200xf32, #tpu.memory_space<vmem>>, vector<4x128xf32>,
    %359 = vector.extract_strided_slice %354 {offsets = [2, 0], sizes = [4, 128], strides = [1, 1]} : vector<8x128xf32> to vector<4x128xf32>
    %c8_388 = arith.constant 8 : index
    %c2176_389 = arith.constant 2176 : index
    %360 = vector.load %arg12[%c8_388, %c2176_389] : memref<16x3200xf32, #tpu.memory_space<vmem>>, vector<4x128xf32>
    tpu.vector_store %arg12[%c8_388, %c2176_389], %359 {strides = array<i32>} : memref<16x3200xf32, #tpu.memory_space<vmem>>, vector<4x128xf32>,
    %361 = vector.extract_strided_slice %354 {offsets = [3, 0], sizes = [4, 128], strides = [1, 1]} : vector<8x128xf32> to vector<4x128xf32>
    %c8_390 = arith.constant 8 : index
    %c2304_391 = arith.constant 2304 : index
    %362 = vector.load %arg12[%c8_390, %c2304_391] : memref<16x3200xf32, #tpu.memory_space<vmem>>, vector<4x128xf32>
    tpu.vector_store %arg12[%c8_390, %c2304_391], %361 {strides = array<i32>} : memref<16x3200xf32, #tpu.memory_space<vmem>>, vector<4x128xf32>,
    %363 = vector.extract_strided_slice %354 {offsets = [4, 0], sizes = [4, 128], strides = [1, 1]} : vector<8x128xf32> to vector<4x128xf32>
    %c8_392 = arith.constant 8 : index
    %c2432_393 = arith.constant 2432 : index
    %364 = vector.load %arg12[%c8_392, %c2432_393] : memref<16x3200xf32, #tpu.memory_space<vmem>>, vector<4x128xf32>
    tpu.vector_store %arg12[%c8_392, %c2432_393], %363 {strides = array<i32>} : memref<16x3200xf32, #tpu.memory_space<vmem>>, vector<4x128xf32>,
    %c0_394 = arith.constant 0 : index
    %c6_395 = arith.constant 6 : index
    %c0_396 = arith.constant 0 : index
    %c0_397 = arith.constant 0 : index
    %365 = vector.load %arg10[%c0_394, %c6_395, %c0_396, %c0_397] : memref<1x8x8x128xf32, #tpu.memory_space<vmem>>, vector<1x1x8x128xf32>
    %366 = vector.shape_cast %365 : vector<1x1x8x128xf32> to vector<8x128xf32>
    %367 = vector.extract_strided_slice %366 {offsets = [0, 0], sizes = [4, 128], strides = [1, 1]} : vector<8x128xf32> to vector<4x128xf32>
    %c8_398 = arith.constant 8 : index
    %c2560_399 = arith.constant 2560 : index
    %368 = vector.load %arg12[%c8_398, %c2560_399] : memref<16x3200xf32, #tpu.memory_space<vmem>>, vector<4x128xf32>
    tpu.vector_store %arg12[%c8_398, %c2560_399], %367 {strides = array<i32>} : memref<16x3200xf32, #tpu.memory_space<vmem>>, vector<4x128xf32>,
    %369 = vector.extract_strided_slice %366 {offsets = [1, 0], sizes = [4, 128], strides = [1, 1]} : vector<8x128xf32> to vector<4x128xf32>
    %c8_400 = arith.constant 8 : index
    %c2688_401 = arith.constant 2688 : index
    %370 = vector.load %arg12[%c8_400, %c2688_401] : memref<16x3200xf32, #tpu.memory_space<vmem>>, vector<4x128xf32>
    tpu.vector_store %arg12[%c8_400, %c2688_401], %369 {strides = array<i32>} : memref<16x3200xf32, #tpu.memory_space<vmem>>, vector<4x128xf32>,
    %371 = vector.extract_strided_slice %366 {offsets = [2, 0], sizes = [4, 128], strides = [1, 1]} : vector<8x128xf32> to vector<4x128xf32>
    %c8_402 = arith.constant 8 : index
    %c2816_403 = arith.constant 2816 : index
    %372 = vector.load %arg12[%c8_402, %c2816_403] : memref<16x3200xf32, #tpu.memory_space<vmem>>, vector<4x128xf32>
    tpu.vector_store %arg12[%c8_402, %c2816_403], %371 {strides = array<i32>} : memref<16x3200xf32, #tpu.memory_space<vmem>>, vector<4x128xf32>,
    %373 = vector.extract_strided_slice %366 {offsets = [3, 0], sizes = [4, 128], strides = [1, 1]} : vector<8x128xf32> to vector<4x128xf32>
    %c8_404 = arith.constant 8 : index
    %c2944_405 = arith.constant 2944 : index
    %374 = vector.load %arg12[%c8_404, %c2944_405] : memref<16x3200xf32, #tpu.memory_space<vmem>>, vector<4x128xf32>
    tpu.vector_store %arg12[%c8_404, %c2944_405], %373 {strides = array<i32>} : memref<16x3200xf32, #tpu.memory_space<vmem>>, vector<4x128xf32>,
    %375 = vector.extract_strided_slice %366 {offsets = [4, 0], sizes = [4, 128], strides = [1, 1]} : vector<8x128xf32> to vector<4x128xf32>
    %c8_406 = arith.constant 8 : index
    %c3072_407 = arith.constant 3072 : index
    %376 = vector.load %arg12[%c8_406, %c3072_407] : memref<16x3200xf32, #tpu.memory_space<vmem>>, vector<4x128xf32>
    tpu.vector_store %arg12[%c8_406, %c3072_407], %375 {strides = array<i32>} : memref<16x3200xf32, #tpu.memory_space<vmem>>, vector<4x128xf32>,
    %c0_408 = arith.constant 0 : index
    %c3_409 = arith.constant 3 : index
    %c0_410 = arith.constant 0 : index
    %c0_411 = arith.constant 0 : index
    %377 = vector.load %arg10[%c0_408, %c3_409, %c0_410, %c0_411] : memref<1x8x8x128xf32, #tpu.memory_space<vmem>>, vector<1x1x8x128xf32>
    %378 = vector.shape_cast %377 : vector<1x1x8x128xf32> to vector<8x128xf32>
    %379 = vector.extract_strided_slice %378 {offsets = [0, 0], sizes = [4, 128], strides = [1, 1]} : vector<8x128xf32> to vector<4x128xf32>
    %c12 = arith.constant 12 : index
    %c0_412 = arith.constant 0 : index
    %380 = vector.load %arg12[%c12, %c0_412] : memref<16x3200xf32, #tpu.memory_space<vmem>>, vector<4x128xf32>
    tpu.vector_store %arg12[%c12, %c0_412], %379 {strides = array<i32>} : memref<16x3200xf32, #tpu.memory_space<vmem>>, vector<4x128xf32>,
    %381 = vector.extract_strided_slice %378 {offsets = [1, 0], sizes = [4, 128], strides = [1, 1]} : vector<8x128xf32> to vector<4x128xf32>
    %c12_413 = arith.constant 12 : index
    %c128_414 = arith.constant 128 : index
    %382 = vector.load %arg12[%c12_413, %c128_414] : memref<16x3200xf32, #tpu.memory_space<vmem>>, vector<4x128xf32>
    tpu.vector_store %arg12[%c12_413, %c128_414], %381 {strides = array<i32>} : memref<16x3200xf32, #tpu.memory_space<vmem>>, vector<4x128xf32>,
    %383 = vector.extract_strided_slice %378 {offsets = [2, 0], sizes = [4, 128], strides = [1, 1]} : vector<8x128xf32> to vector<4x128xf32>
    %c12_415 = arith.constant 12 : index
    %c256_416 = arith.constant 256 : index
    %384 = vector.load %arg12[%c12_415, %c256_416] : memref<16x3200xf32, #tpu.memory_space<vmem>>, vector<4x128xf32>
    tpu.vector_store %arg12[%c12_415, %c256_416], %383 {strides = array<i32>} : memref<16x3200xf32, #tpu.memory_space<vmem>>, vector<4x128xf32>,
    %385 = vector.extract_strided_slice %378 {offsets = [3, 0], sizes = [4, 128], strides = [1, 1]} : vector<8x128xf32> to vector<4x128xf32>
    %c12_417 = arith.constant 12 : index
    %c384_418 = arith.constant 384 : index
    %386 = vector.load %arg12[%c12_417, %c384_418] : memref<16x3200xf32, #tpu.memory_space<vmem>>, vector<4x128xf32>
    tpu.vector_store %arg12[%c12_417, %c384_418], %385 {strides = array<i32>} : memref<16x3200xf32, #tpu.memory_space<vmem>>, vector<4x128xf32>,
    %387 = vector.extract_strided_slice %378 {offsets = [4, 0], sizes = [4, 128], strides = [1, 1]} : vector<8x128xf32> to vector<4x128xf32>
    %c12_419 = arith.constant 12 : index
    %c512_420 = arith.constant 512 : index
    %388 = vector.load %arg12[%c12_419, %c512_420] : memref<16x3200xf32, #tpu.memory_space<vmem>>, vector<4x128xf32>
    tpu.vector_store %arg12[%c12_419, %c512_420], %387 {strides = array<i32>} : memref<16x3200xf32, #tpu.memory_space<vmem>>, vector<4x128xf32>,
    %c0_421 = arith.constant 0 : index
    %c4_422 = arith.constant 4 : index
    %c0_423 = arith.constant 0 : index
    %c0_424 = arith.constant 0 : index
    %389 = vector.load %arg10[%c0_421, %c4_422, %c0_423, %c0_424] : memref<1x8x8x128xf32, #tpu.memory_space<vmem>>, vector<1x1x8x128xf32>
    %390 = vector.shape_cast %389 : vector<1x1x8x128xf32> to vector<8x128xf32>
    %391 = vector.extract_strided_slice %390 {offsets = [0, 0], sizes = [4, 128], strides = [1, 1]} : vector<8x128xf32> to vector<4x128xf32>
    %c12_425 = arith.constant 12 : index
    %c640_426 = arith.constant 640 : index
    %392 = vector.load %arg12[%c12_425, %c640_426] : memref<16x3200xf32, #tpu.memory_space<vmem>>, vector<4x128xf32>
    tpu.vector_store %arg12[%c12_425, %c640_426], %391 {strides = array<i32>} : memref<16x3200xf32, #tpu.memory_space<vmem>>, vector<4x128xf32>,
    %393 = vector.extract_strided_slice %390 {offsets = [1, 0], sizes = [4, 128], strides = [1, 1]} : vector<8x128xf32> to vector<4x128xf32>
    %c12_427 = arith.constant 12 : index
    %c768_428 = arith.constant 768 : index
    %394 = vector.load %arg12[%c12_427, %c768_428] : memref<16x3200xf32, #tpu.memory_space<vmem>>, vector<4x128xf32>
    tpu.vector_store %arg12[%c12_427, %c768_428], %393 {strides = array<i32>} : memref<16x3200xf32, #tpu.memory_space<vmem>>, vector<4x128xf32>,
    %395 = vector.extract_strided_slice %390 {offsets = [2, 0], sizes = [4, 128], strides = [1, 1]} : vector<8x128xf32> to vector<4x128xf32>
    %c12_429 = arith.constant 12 : index
    %c896_430 = arith.constant 896 : index
    %396 = vector.load %arg12[%c12_429, %c896_430] : memref<16x3200xf32, #tpu.memory_space<vmem>>, vector<4x128xf32>
    tpu.vector_store %arg12[%c12_429, %c896_430], %395 {strides = array<i32>} : memref<16x3200xf32, #tpu.memory_space<vmem>>, vector<4x128xf32>,
    %397 = vector.extract_strided_slice %390 {offsets = [3, 0], sizes = [4, 128], strides = [1, 1]} : vector<8x128xf32> to vector<4x128xf32>
    %c12_431 = arith.constant 12 : index
    %c1024_432 = arith.constant 1024 : index
    %398 = vector.load %arg12[%c12_431, %c1024_432] : memref<16x3200xf32, #tpu.memory_space<vmem>>, vector<4x128xf32>
    tpu.vector_store %arg12[%c12_431, %c1024_432], %397 {strides = array<i32>} : memref<16x3200xf32, #tpu.memory_space<vmem>>, vector<4x128xf32>,
    %399 = vector.extract_strided_slice %390 {offsets = [4, 0], sizes = [4, 128], strides = [1, 1]} : vector<8x128xf32> to vector<4x128xf32>
    %c12_433 = arith.constant 12 : index
    %c1152_434 = arith.constant 1152 : index
    %400 = vector.load %arg12[%c12_433, %c1152_434] : memref<16x3200xf32, #tpu.memory_space<vmem>>, vector<4x128xf32>
    tpu.vector_store %arg12[%c12_433, %c1152_434], %399 {strides = array<i32>} : memref<16x3200xf32, #tpu.memory_space<vmem>>, vector<4x128xf32>,
    %c0_435 = arith.constant 0 : index
    %c5_436 = arith.constant 5 : index
    %c0_437 = arith.constant 0 : index
    %c0_438 = arith.constant 0 : index
    %401 = vector.load %arg10[%c0_435, %c5_436, %c0_437, %c0_438] : memref<1x8x8x128xf32, #tpu.memory_space<vmem>>, vector<1x1x8x128xf32>
    %402 = vector.shape_cast %401 : vector<1x1x8x128xf32> to vector<8x128xf32>
    %403 = vector.extract_strided_slice %402 {offsets = [0, 0], sizes = [4, 128], strides = [1, 1]} : vector<8x128xf32> to vector<4x128xf32>
    %c12_439 = arith.constant 12 : index
    %c1280_440 = arith.constant 1280 : index
    %404 = vector.load %arg12[%c12_439, %c1280_440] : memref<16x3200xf32, #tpu.memory_space<vmem>>, vector<4x128xf32>
    tpu.vector_store %arg12[%c12_439, %c1280_440], %403 {strides = array<i32>} : memref<16x3200xf32, #tpu.memory_space<vmem>>, vector<4x128xf32>,
    %405 = vector.extract_strided_slice %402 {offsets = [1, 0], sizes = [4, 128], strides = [1, 1]} : vector<8x128xf32> to vector<4x128xf32>
    %c12_441 = arith.constant 12 : index
    %c1408_442 = arith.constant 1408 : index
    %406 = vector.load %arg12[%c12_441, %c1408_442] : memref<16x3200xf32, #tpu.memory_space<vmem>>, vector<4x128xf32>
    tpu.vector_store %arg12[%c12_441, %c1408_442], %405 {strides = array<i32>} : memref<16x3200xf32, #tpu.memory_space<vmem>>, vector<4x128xf32>,
    %407 = vector.extract_strided_slice %402 {offsets = [2, 0], sizes = [4, 128], strides = [1, 1]} : vector<8x128xf32> to vector<4x128xf32>
    %c12_443 = arith.constant 12 : index
    %c1536_444 = arith.constant 1536 : index
    %408 = vector.load %arg12[%c12_443, %c1536_444] : memref<16x3200xf32, #tpu.memory_space<vmem>>, vector<4x128xf32>
    tpu.vector_store %arg12[%c12_443, %c1536_444], %407 {strides = array<i32>} : memref<16x3200xf32, #tpu.memory_space<vmem>>, vector<4x128xf32>,
    %409 = vector.extract_strided_slice %402 {offsets = [3, 0], sizes = [4, 128], strides = [1, 1]} : vector<8x128xf32> to vector<4x128xf32>
    %c12_445 = arith.constant 12 : index
    %c1664_446 = arith.constant 1664 : index
    %410 = vector.load %arg12[%c12_445, %c1664_446] : memref<16x3200xf32, #tpu.memory_space<vmem>>, vector<4x128xf32>
    tpu.vector_store %arg12[%c12_445, %c1664_446], %409 {strides = array<i32>} : memref<16x3200xf32, #tpu.memory_space<vmem>>, vector<4x128xf32>,
    %411 = vector.extract_strided_slice %402 {offsets = [4, 0], sizes = [4, 128], strides = [1, 1]} : vector<8x128xf32> to vector<4x128xf32>
    %c12_447 = arith.constant 12 : index
    %c1792_448 = arith.constant 1792 : index
    %412 = vector.load %arg12[%c12_447, %c1792_448] : memref<16x3200xf32, #tpu.memory_space<vmem>>, vector<4x128xf32>
    tpu.vector_store %arg12[%c12_447, %c1792_448], %411 {strides = array<i32>} : memref<16x3200xf32, #tpu.memory_space<vmem>>, vector<4x128xf32>,
    %c0_449 = arith.constant 0 : index
    %c6_450 = arith.constant 6 : index
    %c0_451 = arith.constant 0 : index
    %c0_452 = arith.constant 0 : index
    %413 = vector.load %arg10[%c0_449, %c6_450, %c0_451, %c0_452] : memref<1x8x8x128xf32, #tpu.memory_space<vmem>>, vector<1x1x8x128xf32>
    %414 = vector.shape_cast %413 : vector<1x1x8x128xf32> to vector<8x128xf32>
    %415 = vector.extract_strided_slice %414 {offsets = [0, 0], sizes = [4, 128], strides = [1, 1]} : vector<8x128xf32> to vector<4x128xf32>
    %c12_453 = arith.constant 12 : index
    %c1920_454 = arith.constant 1920 : index
    %416 = vector.load %arg12[%c12_453, %c1920_454] : memref<16x3200xf32, #tpu.memory_space<vmem>>, vector<4x128xf32>
    tpu.vector_store %arg12[%c12_453, %c1920_454], %415 {strides = array<i32>} : memref<16x3200xf32, #tpu.memory_space<vmem>>, vector<4x128xf32>,
    %417 = vector.extract_strided_slice %414 {offsets = [1, 0], sizes = [4, 128], strides = [1, 1]} : vector<8x128xf32> to vector<4x128xf32>
    %c12_455 = arith.constant 12 : index
    %c2048_456 = arith.constant 2048 : index
    %418 = vector.load %arg12[%c12_455, %c2048_456] : memref<16x3200xf32, #tpu.memory_space<vmem>>, vector<4x128xf32>
    tpu.vector_store %arg12[%c12_455, %c2048_456], %417 {strides = array<i32>} : memref<16x3200xf32, #tpu.memory_space<vmem>>, vector<4x128xf32>,
    %419 = vector.extract_strided_slice %414 {offsets = [2, 0], sizes = [4, 128], strides = [1, 1]} : vector<8x128xf32> to vector<4x128xf32>
    %c12_457 = arith.constant 12 : index
    %c2176_458 = arith.constant 2176 : index
    %420 = vector.load %arg12[%c12_457, %c2176_458] : memref<16x3200xf32, #tpu.memory_space<vmem>>, vector<4x128xf32>
    tpu.vector_store %arg12[%c12_457, %c2176_458], %419 {strides = array<i32>} : memref<16x3200xf32, #tpu.memory_space<vmem>>, vector<4x128xf32>,
    %421 = vector.extract_strided_slice %414 {offsets = [3, 0], sizes = [4, 128], strides = [1, 1]} : vector<8x128xf32> to vector<4x128xf32>
    %c12_459 = arith.constant 12 : index
    %c2304_460 = arith.constant 2304 : index
    %422 = vector.load %arg12[%c12_459, %c2304_460] : memref<16x3200xf32, #tpu.memory_space<vmem>>, vector<4x128xf32>
    tpu.vector_store %arg12[%c12_459, %c2304_460], %421 {strides = array<i32>} : memref<16x3200xf32, #tpu.memory_space<vmem>>, vector<4x128xf32>,
    %423 = vector.extract_strided_slice %414 {offsets = [4, 0], sizes = [4, 128], strides = [1, 1]} : vector<8x128xf32> to vector<4x128xf32>
    %c12_461 = arith.constant 12 : index
    %c2432_462 = arith.constant 2432 : index
    %424 = vector.load %arg12[%c12_461, %c2432_462] : memref<16x3200xf32, #tpu.memory_space<vmem>>, vector<4x128xf32>
    tpu.vector_store %arg12[%c12_461, %c2432_462], %423 {strides = array<i32>} : memref<16x3200xf32, #tpu.memory_space<vmem>>, vector<4x128xf32>,
    %c0_463 = arith.constant 0 : index
    %c7_464 = arith.constant 7 : index
    %c0_465 = arith.constant 0 : index
    %c0_466 = arith.constant 0 : index
    %425 = vector.load %arg10[%c0_463, %c7_464, %c0_465, %c0_466] : memref<1x8x8x128xf32, #tpu.memory_space<vmem>>, vector<1x1x8x128xf32>
    %426 = vector.shape_cast %425 : vector<1x1x8x128xf32> to vector<8x128xf32>
    %427 = vector.extract_strided_slice %426 {offsets = [0, 0], sizes = [4, 128], strides = [1, 1]} : vector<8x128xf32> to vector<4x128xf32>
    %c12_467 = arith.constant 12 : index
    %c2560_468 = arith.constant 2560 : index
    %428 = vector.load %arg12[%c12_467, %c2560_468] : memref<16x3200xf32, #tpu.memory_space<vmem>>, vector<4x128xf32>
    tpu.vector_store %arg12[%c12_467, %c2560_468], %427 {strides = array<i32>} : memref<16x3200xf32, #tpu.memory_space<vmem>>, vector<4x128xf32>,
    %429 = vector.extract_strided_slice %426 {offsets = [1, 0], sizes = [4, 128], strides = [1, 1]} : vector<8x128xf32> to vector<4x128xf32>
    %c12_469 = arith.constant 12 : index
    %c2688_470 = arith.constant 2688 : index
    %430 = vector.load %arg12[%c12_469, %c2688_470] : memref<16x3200xf32, #tpu.memory_space<vmem>>, vector<4x128xf32>
    tpu.vector_store %arg12[%c12_469, %c2688_470], %429 {strides = array<i32>} : memref<16x3200xf32, #tpu.memory_space<vmem>>, vector<4x128xf32>,
    %431 = vector.extract_strided_slice %426 {offsets = [2, 0], sizes = [4, 128], strides = [1, 1]} : vector<8x128xf32> to vector<4x128xf32>
    %c12_471 = arith.constant 12 : index
    %c2816_472 = arith.constant 2816 : index
    %432 = vector.load %arg12[%c12_471, %c2816_472] : memref<16x3200xf32, #tpu.memory_space<vmem>>, vector<4x128xf32>
    tpu.vector_store %arg12[%c12_471, %c2816_472], %431 {strides = array<i32>} : memref<16x3200xf32, #tpu.memory_space<vmem>>, vector<4x128xf32>,
    %433 = vector.extract_strided_slice %426 {offsets = [3, 0], sizes = [4, 128], strides = [1, 1]} : vector<8x128xf32> to vector<4x128xf32>
    %c12_473 = arith.constant 12 : index
    %c2944_474 = arith.constant 2944 : index
    %434 = vector.load %arg12[%c12_473, %c2944_474] : memref<16x3200xf32, #tpu.memory_space<vmem>>, vector<4x128xf32>
    tpu.vector_store %arg12[%c12_473, %c2944_474], %433 {strides = array<i32>} : memref<16x3200xf32, #tpu.memory_space<vmem>>, vector<4x128xf32>,
    %435 = vector.extract_strided_slice %426 {offsets = [4, 0], sizes = [4, 128], strides = [1, 1]} : vector<8x128xf32> to vector<4x128xf32>
    %c12_475 = arith.constant 12 : index
    %c3072_476 = arith.constant 3072 : index
    %436 = vector.load %arg12[%c12_475, %c3072_476] : memref<16x3200xf32, #tpu.memory_space<vmem>>, vector<4x128xf32>
    tpu.vector_store %arg12[%c12_475, %c3072_476], %435 {strides = array<i32>} : memref<16x3200xf32, #tpu.memory_space<vmem>>, vector<4x128xf32>,
    %c0_477 = arith.constant 0 : index
    %c0_478 = arith.constant 0 : index
    %437 = vector.load %arg12[%c0_477, %c0_478] : memref<16x3200xf32, #tpu.memory_space<vmem>>, vector<16x3200xf32>
    %c0_479 = arith.constant 0 : index
    %c0_480 = arith.constant 0 : index
    %438 = vector.load %arg6[%c0_479, %c0_480] : memref<3200x64xf32, #tpu.memory_space<vmem>>, vector<3200x64xf32>
    %cst_481 = arith.constant dense<0.000000e+00> : vector<16x64xf32>
    %439 = tpu.matmul %437, %438, %cst_481 {dimension_numbers = #tpu.dot_dimension_numbers<[1], [0], [0], [1], [0, 0, 1, 1], [], []>} : vector<16x3200xf32>, vector<3200x64xf32>, vector<16x64xf32> -> vector<16x64xf32>
    %c0_482 = arith.constant 0 : index
    %c0_483 = arith.constant 0 : index
    %440 = vector.load %arg7[%c0_482, %c0_483] : memref<1x64xf32, #tpu.memory_space<vmem>>, vector<1x64xf32>
    %441 = vector.broadcast %440 : vector<1x64xf32> to vector<16x64xf32>
    %442 = arith.addf %439, %441 : vector<16x64xf32>
    %c0_484 = arith.constant 0 : index
    %c0_485 = arith.constant 0 : index
    %c0_486 = arith.constant 0 : index
    %443 = vector.load %arg8[%c0_484, %c0_485, %c0_486] : memref<1x16x64xf32, #tpu.memory_space<vmem>>, vector<1x16x64xf32>
    %444 = vector.shape_cast %443 : vector<1x16x64xf32> to vector<16x64xf32>
    %445 = vector.shape_cast %442 : vector<16x64xf32> to vector<1x16x64xf32>
    tpu.vector_store %arg8[%c0_484, %c0_485, %c0_486], %445 {strides = array<i32>} : memref<1x16x64xf32, #tpu.memory_space<vmem>>, vector<1x16x64xf32>,
    return
  }
  func.func @transform_0(%arg0: i32) -> (i32, i32, i32) {
    %c0_i32 = arith.constant 0 : i32
    %c0_i32_0 = arith.constant 0 : i32
    %c0_i32_1 = arith.constant 0 : i32
    return %arg0, %c0_i32, %c0_i32_0 : i32, i32, i32
  }
  func.func @transform_1(%arg0: i32) -> (i32, i32) {
    %c0_i32 = arith.constant 0 : i32
    %c0_i32_0 = arith.constant 0 : i32
    %c0_i32_1 = arith.constant 0 : i32
    return %c0_i32, %c0_i32_0 : i32, i32
  }
  func.func @transform_2(%arg0: i32) -> (i32, i32) {
    %c0_i32 = arith.constant 0 : i32
    %c0_i32_0 = arith.constant 0 : i32
    %c0_i32_1 = arith.constant 0 : i32
    return %c0_i32, %c0_i32_0 : i32, i32
  }
  func.func @transform_3(%arg0: i32) -> (i32, i32) {
    %c0_i32 = arith.constant 0 : i32
    %c0_i32_0 = arith.constant 0 : i32
    %c0_i32_1 = arith.constant 0 : i32
    return %c0_i32, %c0_i32_0 : i32, i32
  }
  func.func @transform_4(%arg0: i32) -> (i32, i32) {
    %c0_i32 = arith.constant 0 : i32
    %c0_i32_0 = arith.constant 0 : i32
    %c0_i32_1 = arith.constant 0 : i32
    return %c0_i32, %c0_i32_0 : i32, i32
  }
  func.func @transform_5(%arg0: i32) -> (i32, i32) {
    %c0_i32 = arith.constant 0 : i32
    %c0_i32_0 = arith.constant 0 : i32
    %c0_i32_1 = arith.constant 0 : i32
    return %c0_i32, %c0_i32_0 : i32, i32
  }
  func.func @transform_6(%arg0: i32) -> (i32, i32) {
    %c0_i32 = arith.constant 0 : i32
    %c0_i32_0 = arith.constant 0 : i32
    %c0_i32_1 = arith.constant 0 : i32
    return %c0_i32, %c0_i32_0 : i32, i32
  }
  func.func @transform_7(%arg0: i32) -> (i32, i32, i32) {
    %c0_i32 = arith.constant 0 : i32
    %c0_i32_0 = arith.constant 0 : i32
    %c0_i32_1 = arith.constant 0 : i32
    return %arg0, %c0_i32, %c0_i32_0 : i32, i32, i32
  }
}

</mosaic_0001>

<bundles_post_ra>
// kernel: tpu_custom_call.1
= control target key start
LH: loop header
LB: loop body
LE: loop exit
PB: predicated region body
PF: predicated region fallthrough
CT: control target
= control target key end

     0   :  { %s11960_s0 = inlined_call_operand.hbm [shape: f32[2,144,100], index: 0, kind: input, shape index: {}]   ;;  %s11961_s1 = inlined_call_operand.hbm [shape: f32[100,256], index: 1, kind: input, shape index: {}]   ;;  %s11962_s2 = inlined_call_operand.hbm [shape: f32[1,256], index: 2, kind: input, shape index: {}]   ;;  %s11963_s3 = inlined_call_operand.hbm [shape: f32[6400,128], index: 3, kind: input, shape index: {}]   ;;  %s11964_s4 = inlined_call_operand.hbm [shape: f32[1,128], index: 4, kind: input, shape index: {}]   ;;  %s11965_s5 = inlined_call_operand.vmem [shape: f32[3200,64], index: 5, kind: input, shape index: {}]   ;;  %s11966_s6 = inlined_call_operand.hbm [shape: f32[1,64], index: 6, kind: input, shape index: {}]   ;;  %s11967_s7 = inlined_call_operand.hbm [shape: f32[2,16,64], index: 7, kind: output, shape index: {}]  }
   0x1   :  { %11970 = sst [smem:[#allocation41_spill]] %s11961_s1 }
   0x2   :  { %11971 = sst [smem:[#allocation42_spill]] %s11962_s2 }
   0x3   :  { %11972 = sst [smem:[#allocation43_spill]] %s11963_s3 }
   0x4   :  { %11973 = sst [smem:[#allocation44_spill]] %s11964_s4 }
   0x5   :  { %12 = vsyncpa [#allocation7], 0 }
   0x6   :  { %14 = vsyncpa [#allocation7 + $0x1], 0 }
   0x7   :  { %15 = vsyncpa [#allocation10], 0 }
   0x8   :  { %16 = vsyncpa [#allocation13], 0 }
   0x9   :  { %17 = vsyncpa [#allocation16], 0 }
   0xa   :  { %18 = vsyncpa [#allocation8], 0 }
   0xb   :  { %20 = vsyncpa [#allocation8 + $0x1], 0  ;;  %s9093_s24 = smov 0   ;;  %s9095_s25 = smov 0  }
   0xc   :  { %s9097_s26 = smov 0   ;;  %s9099_s27 = smov 0  }
   0xd LB: > { %s11974_s1 = sld [smem:[#allocation41_spill]]  ;;  %s9117_s8 = sadd.s32 4294967295, %s9040_s27   ;;  %s9040_s27 = sphi %s9099_s27, %s12072_s27   ;;  %s9036_s26 = sphi %s9097_s26, %s12071_s26   ;;  %s9032_s25 = sphi %s9095_s25, %s12070_s25   ;;  %s9028_s24 = sphi %s9093_s24, %s12069_s24  }
   0xe   : > { %p8599_p0 = scmp.ge.s32.totalorder %s9040_s27, 1  ;;  %p47_p1 = scmp.eq.s32.totalorder %s9117_s8, 0 }
   0xf   : > { %p209_p2 = scmp.lt.s32.totalorder %s9040_s27, 3  ;;  %s9042_s10 = smov [#allocation9]  }
  0x10   : > { %s222_s11 = sshll.u32 %s9042_s10, 4  ;;  %s11976_s3 = sld [smem:[#allocation43_spill]]  ;;  %s223_s11 = int_to_ptr.vmem [resolvable:$true] %s222_s11 }
  0x11   : > { %p9122_p3 = pnand %p8599_p0, %p209_p2  ;;  %s9043_s16 = smov [#allocation12]  }
  0x12   : > { %s248_s17 = sshll.u32 %s9043_s16, 4  ;;  %s9044_s18 = smov 256   ;;  %s249_s17 = int_to_ptr.vmem [resolvable:$true] %s248_s17 }
  0x13   : > { %s220_s30 = sshll.u32 %s11974_s1, 4  ;;  %p8701_p4 = pneg %p9122_p3  ;;  %s221_s30 = int_to_ptr.hbm [resolvable:$true] %s220_s30 }
  0x14   : > { %s9045_s19 = smov 16   ;;  %s11968_s20 = smov 128  }
  0x15   : > { %p9134_p6 = pnand %p8701_p4, %p47_p1  ;;  %s11969_s21 = smov 8  }
  0x16   : > { %s246_s14 = sshll.u32 %s11976_s3, 4  ;;  %s11978_s2 = sld [smem:[#allocation42_spill]]  ;;  %s247_s14 = int_to_ptr.hbm [resolvable:$true] %s246_s14 }
  0x17   : > { %8704 = dma.hbm_to_vmem [thread:$0]  (!%p9134_p6), %s221_s30, 3328, %s223_s11, [#allocation10], %s9044_s18, %s9044_s18, %s9045_s19  }
  0x18   : > { %8710 = dma.hbm_to_vmem [thread:$0]  (!%p9134_p6), %s247_s14, 102400, %s249_s17, [#allocation13], %s11968_s20, %s11968_s20, %s11969_s21  }
  0x19   : > { %s9048_s29 = smov [#allocation11]   ;;  %s11979_s4 = sld [smem:[#allocation44_spill]] }
  0x1a   : > { %s237_s10 = sshll.u32 %s9048_s29, 4  ;;  %s9049_s13 = smov [#allocation14]   ;;  %s238_s10 = int_to_ptr.vmem [resolvable:$true] %s237_s10 }
  0x1b   : > { %s263_s14 = sshll.u32 %s9049_s13, 4  ;;  %s276_s18 = sshll.u32 %s11966_s6, 4  ;;  %s264_s14 = int_to_ptr.vmem [resolvable:$true] %s263_s14  ;;  %s277_s18 = int_to_ptr.hbm [resolvable:$true] %s276_s18 }
  0x1c   : > { %s235_s28 = sshll.u32 %s11978_s2, 4  ;;  %s9050_s19 = smov [#allocation15]   ;;  %s236_s28 = int_to_ptr.hbm [resolvable:$true] %s235_s28 }
  0x1d   : > { %8707 = dma.hbm_to_vmem [thread:$0]  (!%p9134_p6), %s236_s28, 32, %s238_s10, [#allocation10]  }
  0x1e   : > { %s278_s22 = sshll.u32 %s9050_s19, 4  ;;  %s8598_s23 = sadd.s32 4294967294, %s9040_s27   ;;  %s279_s22 = int_to_ptr.vmem [resolvable:$true] %s278_s22 }
  0x1f   : > { %s261_s12 = sshll.u32 %s11979_s4, 4  ;;  %s9162_s28 = sadd.s32 1, %s9040_s27   ;;  %s262_s12 = int_to_ptr.hbm [resolvable:$true] %s261_s12 }
  0x20   : > { %8713 = dma.hbm_to_vmem [thread:$0]  (!%p9134_p6), %s262_s12, 16, %s264_s14, [#allocation13]  }
  0x21   : > { %8716 = dma.hbm_to_vmem [thread:$0]  (!%p9134_p6), %s277_s18, 16, %s279_s22, [#allocation16]  }
  0x22   : > { %s33_s29 = sadd.s32 1, %s9036_s26  ;;  %s30_s10 = ssub.s32 %s9040_s27, %s9162_s28 }
  0x23   : > { %p40_p7 = scmp.ne.s32.totalorder %s9036_s26, %s9032_s25  ;;  %p31_p8 = scmp.eq.s32.totalorder %s30_s10, 0 }
  0x24   : > { %p41_p9 = scmp.eq.s32.totalorder %s9040_s27, 0  ;;  %p46_p10 = scmp.ne.s32.totalorder %s9032_s25, %s9028_s24 }
  0x25   : > { %p196_p11 = scmp.eq.s32.totalorder %s9117_s8, 1  ;;  %p202_p2 = scmp.eq.s32.totalorder %s8598_s23, 1 }
  0x26   : > { %s9174_s30 = scalar_select %p31_p8, %s9036_s26, %s33_s29  }
  0x27   : > { %p42_p12 = por %p41_p9, %p40_p7  ;;  %p9178_p13 = por %p47_p1, %p46_p10 }
  0x28   : > { %p9182_p0 = por %p196_p11, %p40_p7  ;;  %p8730_p4 = scmp.lt.s32.totalorder %s9040_s27, 2 }
  0x29   : > { %s289_s12 = sand.u32 1, %s9036_s26   ;;  %p9188_p6 = por %p202_p2, %p46_p10 }
  0x2a   : > { %s8674_s14 = smul.u32 144, %s289_s12  ;;  %p9192_p8 = pnand %p8730_p4, %p42_p12 }
  0x2b   : > { %s8675_s17 = smul.u32 144, %s9040_s27  ;;  %s290_s20 = scalar_lea.sflag [#allocation7], %s289_s12 }
  0x2c   : > { %s293_s29 = scalar_lea.vmem [#allocation6], %s8674_s14  ;;  %p8936_p9 = pneg %p9192_p8 }
  0x2d   : > { %s298_s22 = scalar_lea.hbm %s11960_s0, %s8675_s17  ;;  %s301_s10 = sshll.u32 %s293_s29, 4  ;;  %s302_s10 = int_to_ptr.vmem [resolvable:$true] %s301_s10 }
  0x2e   : > { %s299_s23 = sshll.u32 %s298_s22, 4  ;;  %s8939_s4 = scalar_lea.hbm %s11960_s0, 288  ;;  %s300_s23 = int_to_ptr.hbm [resolvable:$true] %s299_s23 }
  0x2f   : > { %s8932_s21 = sshra.s32 %s300_s23, 4  ;;  %s8933_s21 = int_to_ptr.hbm [resolvable:$true] %s8932_s21 }
  0x30   : > { %s8934_s1 = scalar_lea.hbm %s8933_s21, 144  ;;  %p8940_p12 = scmp.lt.s32.totalorder %s8933_s21, %s11960_s0 }
  0x31   : > { %p8935_p7 = scmp.ne.s32.totalorder %s8933_s21, %s8934_s1  ;;  %p8941_p2 = scmp.lt.s32.totalorder %s8939_s4, %s8934_s1 }
  0x33   : > { %p8937_p10 = pnand %p8936_p9, %p8935_p7  ;;  %p8942_p4 = por %p8941_p2, %p8940_p12 }
  0x35   : > { %p8938_p11 = pneg %p8937_p10 }
  0x37   : > { %p8943_p5 = pnand %p8942_p4, %p8938_p11 }
  0x39   : > { %8946 = shalt.err (!%p8943_p5)
}
  0x3a   : > { %s11984_s12 = smov 8   ;;  %s11985_s14 = smov 128  }
  0x3b   : > { %8720 = dma.hbm_to_vmem [thread:$0]  (!%p9192_p8), %s300_s23, 2304, %s302_s10, %s290_s20, %s11985_s14, %s11985_s14, %s11984_s12  }
  0x3c   : > { %313 = sbr.rel (%p9122_p3) target bundleno = 1579 (0x62b), region = 48 }
  0x41   : > { %s9216_s2 = sand.u32 1, %s9032_s25  }
  0x42   : > { %s8676_s3 = smul.u32 144, %s9216_s2  ;;  %s316_s1 = scalar_lea.sflag [#allocation7], %s9216_s2 }
  0x44   : > { %s9220_s4 = scalar_lea.vmem [#allocation6], %s8676_s3 }
  0x45   : > { %9007 = dma.done.wait (%p9178_p13), %s316_s1, 2304  }
  0x46   : > { %9009 = vsyncadd (%p9178_p13), %s316_s1, 4294964992 }
  0x47   : > { %9011 = dma.done.wait (%p47_p1), [#allocation10], 3360  }
  0x48   : > { %9013 = vsyncadd (%p47_p1), [#allocation10], 4294963936 }
  0x49   : > { %9015 = dma.done.wait (%p47_p1), [#allocation13], 102416  }
  0x4a   : > { %9017 = vsyncadd (%p47_p1), [#allocation13], 4294864880 }
  0x4b   : > { %9019 = dma.done.wait (%p47_p1), [#allocation16], 16  }
  0x4c   : > { %9021 = vsyncadd (%p47_p1), [#allocation16], 4294967280  ;;  %vm481_vm0 = vcmask 1043456   ;;  %v418_v0 = vld [vmem:[#allocation9 + $0xc0] sm:$0xf]  ;;  %v416_v2 = vld [vmem:[#allocation9 + $0xb0] sm:$0xff] }
  0x4d   : > { %v419_v1 = vld [vmem:[#allocation9 + $0xc8] sm:$0xf]  ;;  %8614 = vmatpush.msk.msra.mxu0 %vm481_vm0, %v418_v0  ;;  %v417_v3 = vld [vmem:[#allocation9 + $0xb8] sm:$0xff]  ;;  %v414_v4 = vld [vmem:[#allocation9 + $0xa0] sm:$0xff]  ;;  %vm426_vm1 = vcmask 818176   ;;  %vm1195_vm2 = vcmask 1044480  }
  0x4e   : > { %8633 = vmatpush.msk.msra.mxu1 %vm481_vm0, %v419_v1  ;;  %v415_v5 = vld [vmem:[#allocation9 + $0xa8] sm:$0xff]  ;;  %v412_v6 = vld [vmem:[#allocation9 + $0x90] sm:$0xff]  ;;  %v413_v7 = vld [vmem:[#allocation9 + $0x98] sm:$0xff]  ;;  %vm905_vm3 = vcmask 1046528   ;;  %vm1050_vm4 = vcmask 1045504   ;;  %s8613_s20 = sshll.u32 %s9216_s2, 4 }
  0x4f   : > { %492 = vmatpush.msra.mxu0 %v416_v2  ;;  %v410_v8 = vld [vmem:[#allocation9 + $0x80] sm:$0xff]  ;;  %v411_v9 = vld [vmem:[#allocation9 + $0x88] sm:$0xff]  ;;  %v408_v10 = vld [vmem:[#allocation9 + $0x70] sm:$0xff]  ;;  %s8657_s21 = sshll.u32 %s9117_s8, 4  ;;  %vm8458_vm5 = vcmask 523264   ;;  %s375_s22 = scalar_lea.vmem [#allocation17], %s8613_s20 }
  0x50   : > { %563 = vmatpush.msra.mxu1 %v417_v3  ;;  %v409_v11 = vld [vmem:[#allocation9 + $0x78] sm:$0xff]  ;;  %v406_v12 = vld [vmem:[#allocation9 + $0x60] sm:$0xff]  ;;  %v407_v13 = vld [vmem:[#allocation9 + $0x68] sm:$0xff]  ;;  %s8473_s19 = scalar_lea.hbm %s11967_s7, %s8657_s21  ;;  %s8474_s29 = sshll.u32 %s375_s22, 4  ;;  %s8475_s29 = int_to_ptr.vmem [resolvable:$true] %s8474_s29 }
  0x51   : > { %493 = vmatpush.msra.mxu0 %v414_v4  ;;  %v404_v14 = vld [vmem:[#allocation9 + $0x50] sm:$0xff]  ;;  %v405_v15 = vld [vmem:[#allocation9 + $0x58] sm:$0xff]  ;;  %v402_v16 = vld [vmem:[#allocation9 + $0x40] sm:$0xff]  ;;  %s8476_s10 = sshll.u32 %s8473_s19, 4  ;;  %s8462_s8 = scalar_lea.sflag [#allocation8], %s9216_s2  ;;  %s8477_s10 = int_to_ptr.hbm [resolvable:$true] %s8476_s10 }
  0x52   : > { %564 = vmatpush.msra.mxu1 %v415_v5  ;;  %v403_v17 = vld [vmem:[#allocation9 + $0x48] sm:$0xff]  ;;  %v400_v18 = vld [vmem:[#allocation9 + $0x30] sm:$0xff]  ;;  %v401_v19 = vld [vmem:[#allocation9 + $0x38] sm:$0xff]  ;;  %s8976_s23 = sshra.s32 %s8477_s10, 4  ;;  %s8982_s14 = scalar_lea.hbm %s11967_s7, 32  ;;  %s8977_s23 = int_to_ptr.hbm [resolvable:$true] %s8976_s23 }
  0x53   : > { %494 = vmatpush.msra.mxu0 %v412_v6  ;;  %v398_v20 = vld [vmem:[#allocation9 + $0x20] sm:$0xff]  ;;  %v399_v21 = vld [vmem:[#allocation9 + $0x28] sm:$0xff]  ;;  %v396_v22 = vld [vmem:[#allocation9 + $0x10] sm:$0xff]  ;;  %s8978_s18 = scalar_lea.hbm %s8977_s23, 16  ;;  %p8983_p13 = scmp.lt.s32.totalorder %s8977_s23, %s11967_s7 }
  0x54   : > { %565 = vmatpush.msra.mxu1 %v413_v7  ;;  %v397_v23 = vld [vmem:[#allocation9 + $0x18] sm:$0xff]  ;;  %v394_v24 = vld [vmem:[#allocation9] sm:$0xff]  ;;  %v395_v25 = vld [vmem:[#allocation9 + $0x8] sm:$0xff]  ;;  %p8979_p1 = scmp.ne.s32.totalorder %s8977_s23, %s8978_s18  ;;  %p8984_p8 = scmp.lt.s32.totalorder %s8982_s14, %s8978_s18 }
  0x55   : > { %495 = vmatpush.msra.mxu0 %v410_v8  ;;  %v376_v26 = vld [vmem:[%s9220_s4] sm:$0xff]  ;;  %v377_v27 = vld [vmem:[%s9220_s4 + $0x8] sm:$0xff]  ;;  %v378_v28 = vld [vmem:[%s9220_s4 + $0x10] sm:$0xff] }
  0x56   : > { %566 = vmatpush.msra.mxu1 %v411_v9  ;;  %v379_v29 = vld [vmem:[%s9220_s4 + $0x18] sm:$0xff]  ;;  %v380_v30 = vld [vmem:[%s9220_s4 + $0x20] sm:$0xff]  ;;  %v381_v31 = vld [vmem:[%s9220_s4 + $0x28] sm:$0xff]  ;;  %p8980_p3 = pnand %p8979_p1, %p9182_p0  ;;  %p8985_p7 = por %p8984_p8, %p8983_p13 }
  0x57   : > { %496 = vmatpush.msra.mxu0 %v408_v10  ;;  %v382_v32 = vld [vmem:[%s9220_s4 + $0x30] sm:$0xff]  ;;  %v383_v33 = vld [vmem:[%s9220_s4 + $0x38] sm:$0xff]  ;;  %v384_v34 = vld [vmem:[%s9220_s4 + $0x40] sm:$0xff] }
  0x58   : > { %567 = vmatpush.msra.mxu1 %v409_v11  ;;  %v4267_v35 = vld [vmem:[#allocation12 + $0x78] sm:$0xff]  ;;  %v4266_v36 = vld [vmem:[#allocation12 + $0x70] sm:$0xff]  ;;  %v4265_v39 = vld [vmem:[#allocation12 + $0x68] sm:$0xff]  ;;  %p8981_p5 = pneg %p8980_p3 }
  0x59   : > { %497 = vmatpush.msra.mxu0 %v406_v12  ;;  %5056 = vmatpush.msra.mxu2 %v4267_v35  ;;  %v4283_v37 = vld [vmem:[#allocation12 + $0xf8] sm:$0xff]  ;;  %v4282_v40 = vld [vmem:[#allocation12 + $0xf0] sm:$0xff]  ;;  %v4264_v41 = vld [vmem:[#allocation12 + $0x60] sm:$0xff] }
  0x5a   : > { %568 = vmatpush.msra.mxu1 %v407_v13  ;;  %v385_v38 = vld [vmem:[%s9220_s4 + $0x48] sm:$0xff]  ;;  %5097 = vmatpush.msra.mxu3 %v4283_v37  ;;  %v386_v47 = vld [vmem:[%s9220_s4 + $0x50] sm:$0xff]  ;;  %v387_v0 = vld [vmem:[%s9220_s4 + $0x58] sm:$0xff]  ;;  %p8986_p9 = pnand %p8985_p7, %p8981_p5 }
  0x5b   : > { %498 = vmatpush.msra.mxu0 %v404_v14  ;;  %5057 = vmatpush.msra.mxu2 %v4266_v36  ;;  %v4281_v42 = vld [vmem:[#allocation12 + $0xe8] sm:$0xff]  ;;  %v4263_v43 = vld [vmem:[#allocation12 + $0x58] sm:$0xff]  ;;  %v4280_v44 = vld [vmem:[#allocation12 + $0xe0] sm:$0xff] }
  0x5c   : > { %569 = vmatpush.msra.mxu1 %v405_v15  ;;  %5098 = vmatpush.msra.mxu3 %v4282_v40  ;;  %v4262_v45 = vld [vmem:[#allocation12 + $0x50] sm:$0xff]  ;;  %v4279_v46 = vld [vmem:[#allocation12 + $0xd8] sm:$0xff]  ;;  %v4261_v48 = vld [vmem:[#allocation12 + $0x48] sm:$0xff] }
  0x5d   : > { %499 = vmatpush.msra.mxu0 %v402_v16  ;;  %5058 = vmatpush.msra.mxu2 %v4265_v39  ;;  %v4278_v49 = vld [vmem:[#allocation12 + $0xd0] sm:$0xff]  ;;  %v4363_v50 = vld [vmem:[#allocation12 + $0x378] sm:$0xff]  ;;  %v4260_v54 = vld [vmem:[#allocation12 + $0x40] sm:$0xff] }
  0x5e   : > { %570 = vmatpush.msra.mxu1 %v403_v17  ;;  %5099 = vmatpush.msra.mxu3 %v4281_v42  ;;  %v4379_v51 = vld [vmem:[#allocation12 + $0x3f8] sm:$0xff]  ;;  %v4362_v52 = vld [vmem:[#allocation12 + $0x370] sm:$0xff]  ;;  %v4277_v55 = vld [vmem:[#allocation12 + $0xc8] sm:$0xff] }
  0x5f   : > { %500 = vmatpush.msra.mxu0 %v400_v18  ;;  %5059 = vmatpush.msra.mxu2 %v4264_v41  ;;  %v4378_v53 = vld [vmem:[#allocation12 + $0x3f0] sm:$0xff]  ;;  %v4361_v56 = vld [vmem:[#allocation12 + $0x368] sm:$0xff]  ;;  %v4259_v58 = vld [vmem:[#allocation12 + $0x38] sm:$0xff] }
  0x60   : > { %571 = vmatpush.msra.mxu1 %v401_v19  ;;  %5100 = vmatpush.msra.mxu3 %v4280_v44  ;;  %v4377_v57 = vld [vmem:[#allocation12 + $0x3e8] sm:$0xff]  ;;  %v4276_v59 = vld [vmem:[#allocation12 + $0xc0] sm:$0xff]  ;;  %v4258_v62 = vld [vmem:[#allocation12 + $0x30] sm:$0xff] }
  0x61   : > { %501 = vmatpush.msra.mxu0 %v398_v20  ;;  %5060 = vmatpush.msra.mxu2 %v4263_v43  ;;  %v4360_v60 = vld [vmem:[#allocation12 + $0x360] sm:$0xff]  ;;  %v4275_v63 = vld [vmem:[#allocation12 + $0xb8] sm:$0xff]  ;;  %v4257_v1 = vld [vmem:[#allocation12 + $0x28] sm:$0xff] }
  0x62   : > { %572 = vmatpush.msra.mxu1 %v399_v21  ;;  %5101 = vmatpush.msra.mxu3 %v4279_v46  ;;  %v4376_v61 = vld [vmem:[#allocation12 + $0x3e0] sm:$0xff]  ;;  %v4274_v2 = vld [vmem:[#allocation12 + $0xb0] sm:$0xff]  ;;  %v4273_v4 = vld [vmem:[#allocation12 + $0xa8] sm:$0xff] }
  0x63   : > { %502 = vmatpush.msra.mxu0 %v396_v22  ;;  %5061 = vmatpush.msra.mxu2 %v4262_v45  ;;  %v4256_v3 = vld [vmem:[#allocation12 + $0x20] sm:$0xff]  ;;  %v4255_v5 = vld [vmem:[#allocation12 + $0x18] sm:$0xff]  ;;  %v4254_v10 = vld [vmem:[#allocation12 + $0x10] sm:$0xff] }
  0x64   : > { %573 = vmatpush.msra.mxu1 %v397_v23  ;;  %5102 = vmatpush.msra.mxu3 %v4278_v49  ;;  %v4272_v6 = vld [vmem:[#allocation12 + $0xa0] sm:$0xff]  ;;  %v4359_v8 = vld [vmem:[#allocation12 + $0x358] sm:$0xff]  ;;  %v4358_v12 = vld [vmem:[#allocation12 + $0x350] sm:$0xff] }
  0x65   : > { %503 = vmatpush.msra.mxu0 %v394_v24  ;;  %5062 = vmatpush.msra.mxu2 %v4261_v48  ;;  %v388_v7 = vld [vmem:[%s9220_s4 + $0x60] sm:$0xff]  ;;  %v389_v23 = vld [vmem:[%s9220_s4 + $0x68] sm:$0xff]  ;;  %v391_v39 = vld [vmem:[%s9220_s4 + $0x78] sm:$0xff] }
  0x66   : > { %574 = vmatpush.msra.mxu1 %v395_v25  ;;  %8615 = vmatmul.msk.f32.vlgmr.msra.gmra.mxu0 %vm426_vm1, %v376_v26  ;;  %v4375_v9 = vld [vmem:[#allocation12 + $0x3d8] sm:$0xff]  ;;  %v4374_v13 = vld [vmem:[#allocation12 + $0x3d0] sm:$0xff]  ;;  %v4253_v14 = vld [vmem:[#allocation12 + $0x8] sm:$0xff] }
  0x67   : > { %8634 = vmatmul.msk.f32.vlgmr.msra.gmra.mxu1 %vm426_vm1, %v376_v26  ;;  %5302 = vmatpush.msrb.mxu0 %v4363_v50  ;;  %v4271_v11 = vld [vmem:[#allocation12 + $0x98] sm:$0xff]  ;;  %v4270_v15 = vld [vmem:[#allocation12 + $0x90] sm:$0xff]  ;;  %v4357_v16 = vld [vmem:[#allocation12 + $0x348] sm:$0xff] }
  0x68   : > { %5343 = vmatpush.msrb.mxu1 %v4379_v51  ;;  %5063 = vmatpush.msra.mxu2 %v4260_v54  ;;  %v4373_v17 = vld [vmem:[#allocation12 + $0x3c8] sm:$0xff]  ;;  %v4252_v18 = vld [vmem:[#allocation12] sm:$0xff]  ;;  %v4355_v24 = vld [vmem:[#allocation12 + $0x338] sm:$0xff] }
  0x69   : > { %5103 = vmatpush.msra.mxu3 %v4277_v55  ;;  %5303 = vmatpush.msrb.mxu0 %v4362_v52  ;;  %v4269_v19 = vld [vmem:[#allocation12 + $0x88] sm:$0xff]  ;;  %v4356_v20 = vld [vmem:[#allocation12 + $0x340] sm:$0xff]  ;;  %v4371_v25 = vld [vmem:[#allocation12 + $0x3b8] sm:$0xff] }
  0x6a   : > { %5344 = vmatpush.msrb.mxu1 %v4378_v53  ;;  %5064 = vmatpush.msra.mxu2 %v4259_v58  ;;  %v4372_v21 = vld [vmem:[#allocation12 + $0x3c0] sm:$0xff]  ;;  %v4354_v26 = vld [vmem:[#allocation12 + $0x330] sm:$0xff]  ;;  %v4349_v37 = vld [vmem:[#allocation12 + $0x308] sm:$0xff] }
  0x6b   : > { %5104 = vmatpush.msra.mxu3 %v4276_v59  ;;  %5304 = vmatpush.msrb.mxu0 %v4361_v56  ;;  %v4268_v22 = vld [vmem:[#allocation12 + $0x80] sm:$0xff]  ;;  %v4350_v35 = vld [vmem:[#allocation12 + $0x310] sm:$0xff]  ;;  %v420_v42 = vld [vmem:[#allocation11] sm:$0x3] }
  0x6c   : > { %5345 = vmatpush.msrb.mxu1 %v4377_v57  ;;  %5065 = vmatpush.msra.mxu2 %v4258_v62  ;;  %v4366_v36 = vld [vmem:[#allocation12 + $0x390] sm:$0xff]  ;;  %v4348_v40 = vld [vmem:[#allocation12 + $0x300] sm:$0xff]  ;;  %v9288_v43 = vperm.slane %v420_v42, 0  ;;  %v9290_v44 = vperm.slane %v420_v42, 1 }
  0x6d   : > { %5105 = vmatpush.msra.mxu3 %v4275_v63  ;;  %5305 = vmatpush.msrb.mxu0 %v4360_v60  ;;  %v4364_v41 = vld [vmem:[#allocation12 + $0x380] sm:$0xff] }
  0x6e   : > { %8616 = vmatmul.msk.f32.gmra.mxu0 %vm426_vm1, %v377_v27  ;;  %5346 = vmatpush.msrb.mxu1 %v4376_v61  ;;  %v393_v54 = vld [vmem:[%s9220_s4 + $0x88] sm:$0xff] }
  0x6f   : > { %8635 = vmatmul.msk.f32.gmra.mxu1 %vm426_vm1, %v377_v27  ;;  %5066 = vmatpush.msra.mxu2 %v4257_v1  ;;  %v4370_v27 = vld [vmem:[#allocation12 + $0x3b0] sm:$0xff] }
  0x70   : > { %5106 = vmatpush.msra.mxu3 %v4274_v2  ;;  %5306 = vmatpush.msrb.mxu0 %v4359_v8 }
  0x71   : > { %5067 = vmatpush.msra.mxu2 %v4256_v3  ;;  %5347 = vmatpush.msrb.mxu1 %v4375_v9 }
  0x72   : > { %5107 = vmatpush.msra.mxu3 %v4273_v4  ;;  %5307 = vmatpush.msrb.mxu0 %v4358_v12 }
  0x73   : > { %5068 = vmatpush.msra.mxu2 %v4255_v5  ;;  %5348 = vmatpush.msrb.mxu1 %v4374_v13 }
  0x74   : > { %5108 = vmatpush.msra.mxu3 %v4272_v6  ;;  %5308 = vmatpush.msrb.mxu0 %v4357_v16 }
  0x75   : > { %5069 = vmatpush.msra.mxu2 %v4254_v10  ;;  %5349 = vmatpush.msrb.mxu1 %v4373_v17 }
  0x76   : > { %8617 = vmatmul.msk.f32.gmra.mxu0 %vm426_vm1, %v378_v28  ;;  %5109 = vmatpush.msra.mxu3 %v4271_v11 }
  0x77   : > { %8636 = vmatmul.msk.f32.gmra.mxu1 %vm426_vm1, %v378_v28  ;;  %5070 = vmatpush.msra.mxu2 %v4253_v14  ;;  %v4353_v28 = vld [vmem:[#allocation12 + $0x328] sm:$0xff] }
  0x78   : > { %5110 = vmatpush.msra.mxu3 %v4270_v15  ;;  %5309 = vmatpush.msrb.mxu0 %v4356_v20 }
  0x79   : > { %5071 = vmatpush.msra.mxu2 %v4252_v18  ;;  %5350 = vmatpush.msrb.mxu1 %v4372_v21 }
  0x7a   : > { %5111 = vmatpush.msra.mxu3 %v4269_v19  ;;  %5310 = vmatpush.msrb.mxu0 %v4355_v24 }
  0x7b   : > { %5351 = vmatpush.msrb.mxu1 %v4371_v25 }
  0x7c   : > { %5112 = vmatpush.msra.mxu3 %v4268_v22  ;;  %5311 = vmatpush.msrb.mxu0 %v4354_v26 }
  0x7d   : > { %5352 = vmatpush.msrb.mxu1 %v4370_v27 }
  0x7e   : > { %8618 = vmatmul.msk.f32.gmra.mxu0 %vm426_vm1, %v379_v29 }
  0x7f   : > { %8637 = vmatmul.msk.f32.gmra.mxu1 %vm426_vm1, %v379_v29  ;;  %v4369_v29 = vld [vmem:[#allocation12 + $0x3a8] sm:$0xff]  ;;  %5312 = vmatpush.msrb.mxu0 %v4353_v28 }
  0x80   : > { %5353 = vmatpush.msrb.mxu1 %v4369_v29 }
  0x86   : > { %8619 = vmatmul.msk.f32.gmra.mxu0 %vm426_vm1, %v380_v30 }
  0x87   : > { %8638 = vmatmul.msk.f32.gmra.mxu1 %vm426_vm1, %v380_v30  ;;  %v4352_v30 = vld [vmem:[#allocation12 + $0x320] sm:$0xff] }
  0x88   : > { %5313 = vmatpush.msrb.mxu0 %v4352_v30 }
  0x8e   : > { %8620 = vmatmul.msk.f32.gmra.mxu0 %vm426_vm1, %v381_v31 }
  0x8f   : > { %8639 = vmatmul.msk.f32.gmra.mxu1 %vm426_vm1, %v381_v31  ;;  %v4368_v31 = vld [vmem:[#allocation12 + $0x3a0] sm:$0xff] }
  0x90   : > { %5354 = vmatpush.msrb.mxu1 %v4368_v31 }
  0x96   : > { %8621 = vmatmul.msk.f32.gmra.mxu0 %vm426_vm1, %v382_v32 }
  0x97   : > { %8640 = vmatmul.msk.f32.gmra.mxu1 %vm426_vm1, %v382_v32  ;;  %v390_v32 = vld [vmem:[%s9220_s4 + $0x70] sm:$0xff] }
  0x9e   : > { %8622 = vmatmul.msk.f32.gmra.mxu0 %vm426_vm1, %v383_v33 }
  0x9f   : > { %8641 = vmatmul.msk.f32.gmra.mxu1 %vm426_vm1, %v383_v33  ;;  %v4351_v33 = vld [vmem:[#allocation12 + $0x318] sm:$0xff] }
  0xa0   : > { %5314 = vmatpush.msrb.mxu0 %v4351_v33 }
  0xa2   : > { %5315 = vmatpush.msrb.mxu0 %v4350_v35 }
  0xa4   : > { %5316 = vmatpush.msrb.mxu0 %v4349_v37 }
  0xa6   : > { %8623 = vmatmul.msk.f32.gmra.mxu0 %vm426_vm1, %v384_v34 }
  0xa7   : > { %8642 = vmatmul.msk.f32.gmra.mxu1 %vm426_vm1, %v384_v34  ;;  %v4367_v34 = vld [vmem:[#allocation12 + $0x398] sm:$0xff]  ;;  %5317 = vmatpush.msrb.mxu0 %v4348_v40 }
  0xa8   : > { %5355 = vmatpush.msrb.mxu1 %v4367_v34 }
  0xaa   : > { %5356 = vmatpush.msrb.mxu1 %v4366_v36 }
  0xae   : > { %8624 = vmatmul.msk.f32.gmra.mxu0 %vm426_vm1, %v385_v38 }
  0xaf   : > { %8643 = vmatmul.msk.f32.gmra.mxu1 %vm426_vm1, %v385_v38  ;;  %v4365_v38 = vld [vmem:[#allocation12 + $0x388] sm:$0xff] }
  0xb0   : > { %5357 = vmatpush.msrb.mxu1 %v4365_v38 }
  0xb2   : > { %5358 = vmatpush.msrb.mxu1 %v4364_v41 }
  0xb6   : > { %8625 = vmatmul.msk.f32.gmra.mxu0 %vm426_vm1, %v386_v47 }
  0xb7   : > { %8644 = vmatmul.msk.f32.gmra.mxu1 %vm426_vm1, %v386_v47  ;;  %v392_v47 = vld [vmem:[%s9220_s4 + $0x80] sm:$0xff] }
  0xbe   : > { %8626 = vmatmul.msk.f32.gmra.mxu0 %vm426_vm1, %v387_v0 }
  0xbf   : > { %8645 = vmatmul.msk.f32.gmra.mxu1 %vm426_vm1, %v387_v0 }
  0xc6   : > { %8627 = vmatmul.msk.f32.gmra.mxu0 %vm426_vm1, %v388_v7 }
  0xc7   : > { %8646 = vmatmul.msk.f32.gmra.mxu1 %vm426_vm1, %v388_v7 }
  0xce   : > { %8628 = vmatmul.msk.f32.gmra.mxu0 %vm426_vm1, %v389_v23 }
  0xcf   : > { %8647 = vmatmul.msk.f32.gmra.mxu1 %vm426_vm1, %v389_v23 }
  0xd6   : > { %8629 = vmatmul.msk.f32.gmra.mxu0 %vm426_vm1, %v390_v32 }
  0xd7   : > { %8648 = vmatmul.msk.f32.gmra.mxu1 %vm426_vm1, %v390_v32 }
  0xde   : > { %8630 = vmatmul.msk.f32.gmra.mxu0 %vm426_vm1, %v391_v39 }
  0xdf   : > { %8649 = vmatmul.msk.f32.gmra.mxu1 %vm426_vm1, %v391_v39 }
  0xe3   : > { %v505_v45 = vpop.f32.mrf.mxu0 }
  0xe4   : > { %v576_v46 = vpop.f32.mrf.mxu1  ;;  %v506_v48 = vadd.f32 %v505_v45, %v9288_v43 }
  0xe5   : > { %v577_v49 = vadd.f32 %v576_v46, %v9290_v44  ;;  %v4299_v46 = vld [vmem:[#allocation12 + $0x178] sm:$0xff] }
  0xe6   : > { %v630_v50 = vmax.f32 %v506_v48, 0.0  ;;  %8631 = vmatmul.msk.f32.gmra.mxu0 %vm426_vm1, %v392_v47  ;;  %5138 = vmatpush.msrb.mxu2 %v4299_v46 }
  0xe7   : > { %v631_v51 = vmax.f32 %v577_v49, 0.0  ;;  %8650 = vmatmul.msk.f32.gmra.mxu1 %vm426_vm1, %v392_v47  ;;  %v4315_v47 = vld [vmem:[#allocation12 + $0x1f8] sm:$0xff] }
  0xe8   : > { %666 = vst [vmem:[#allocation2 + $0xb0] sm:$0xff] %v630_v50  ;;  %5072 = vmatmul.f32.vlgmr.msra.gmra.mxu2 %v630_v50  ;;  %5179 = vmatpush.msrb.mxu3 %v4315_v47  ;;  %v4424_v47 = vld [vmem:[#allocation12 + $0x560] sm:$0xff] }
  0xe9   : > { %5113 = vmatmul.f32.vlgmr.msra.gmra.mxu3 %v631_v51  ;;  %667 = vst [vmem:[#allocation2 + $0xd0] sm:$0xff] %v631_v51 }
  0xeb   : > { %v508_v52 = vpop.f32.mrf.mxu0 }
  0xec   : > { %v579_v53 = vpop.f32.mrf.mxu1  ;;  %v509_v55 = vadd.f32 %v508_v52, %v9288_v43 }
  0xed   : > { %v580_v56 = vadd.f32 %v579_v53, %v9290_v44 }
  0xee   : > { %v632_v57 = vmax.f32 %v509_v55, 0.0  ;;  %8632 = vmatmul.msk.f32.gmra.mxu0 %vm426_vm1, %v393_v54  ;;  %v4314_v55 = vld [vmem:[#allocation12 + $0x1f0] sm:$0xff] }
  0xef   : > { %v633_v58 = vmax.f32 %v580_v56, 0.0  ;;  %8651 = vmatmul.msk.f32.gmra.mxu1 %vm426_vm1, %v393_v54  ;;  %v1131_v63 = vld [vmem:[#allocation2 + $0xb0] sm:$0xf8]  ;;  %5180 = vmatpush.msrb.mxu3 %v4314_v55 }
  0xf0   : > { %668 = vst [vmem:[#allocation2 + $0x10] sm:$0xf] %v632_v57  ;;  %v1132_v2 = vld [vmem:[#allocation2 + $0xd0] sm:$0xf8]  ;;  %v674_v3 = vrot.slane %v632_v57, 4  ;;  %v1196_v8 = vrot.slane %v1131_v63, 3 }
  0xf1   : > { %669 = vst [vmem:[#allocation2 + $0x48] sm:$0xf] %v633_v58  ;;  %v677_v4 = vrot.slane %v633_v58, 4  ;;  %v1199_v11 = vrot.slane %v1132_v2, 3  ;;  %v4298_v54 = vld [vmem:[#allocation12 + $0x170] sm:$0xff]  ;;  %v4297_v63 = vld [vmem:[#allocation12 + $0x168] sm:$0xff] }
  0xf2   : > { %5139 = vmatpush.msrb.mxu2 %v4298_v54  ;;  %v4307_v54 = vld [vmem:[#allocation12 + $0x1b8] sm:$0xff]  ;;  %v4290_v55 = vld [vmem:[#allocation12 + $0x130] sm:$0xff] }
  0xf3   : > { %v511_v59 = vpop.f32.mrf.mxu0 }
  0xf4   : > { %v582_v60 = vpop.f32.mrf.mxu1  ;;  %v512_v61 = vadd.f32 %v511_v59, %v9288_v43  ;;  %5140 = vmatpush.msrb.mxu2 %v4297_v63 }
  0xf5   : > { %v583_v62 = vadd.f32 %v582_v60, %v9290_v44 }
  0xf6   : > { %v634_v0 = vmax.f32 %v512_v61, 0.0 }
  0xf7   : > { %v635_v1 = vmax.f32 %v583_v62, 0.0  ;;  %v1133_v5 = vld [vmem:[#allocation2 + $0x10] sm:$0x7] }
  0xf8   : > { %v675_v6 = vrot.slane %v634_v0, 4  ;;  %v1197_v9 = vrot.slane %v1133_v5, 3  ;;  %v1134_v10 = vld [vmem:[#allocation2 + $0x48] sm:$0x7] }
  0xf9   : > { %v678_v7 = vrot.slane %v635_v1, 4  ;;  %v1200_v12 = vrot.slane %v1134_v10, 3  ;;  %v4313_v0 = vld [vmem:[#allocation12 + $0x1e8] sm:$0xff] }
  0xfa   : > { %v9305_v13 = vsel %vm481_vm0, %v674_v3, %v675_v6  ;;  %687 = vst [vmem:[#allocation2 + $0x40] sm:$0xf] %v675_v6  ;;  %v1198_v15 = vsel %vm1195_vm2, %v1196_v8, %v1197_v9  ;;  %5181 = vmatpush.msrb.mxu3 %v4313_v0  ;;  %v4312_v8 = vld [vmem:[#allocation12 + $0x1e0] sm:$0xff] }
  0xfb   : > { %v9308_v14 = vsel %vm481_vm0, %v677_v4, %v678_v7  ;;  %685 = vst [vmem:[#allocation2 + $0x160] sm:$0xff] %v9305_v13  ;;  %v514_v16 = vpop.f32.mrf.mxu0  ;;  %5318 = vmatmul.f32.vlgmr.msrb.gmra.mxu0 %v1198_v15  ;;  %v1201_v18 = vsel %vm1195_vm2, %v1199_v11, %v1200_v12  ;;  %5075 = vmatmul.f32.gmra.mxu2 %v9305_v13  ;;  %v4295_v11 = vld [vmem:[#allocation12 + $0x158] sm:$0xff] }
  0xfc   : > { %v585_v17 = vpop.f32.mrf.mxu1  ;;  %686 = vst [vmem:[#allocation2 + $0x128] sm:$0xff] %v9308_v14  ;;  %v515_v19 = vadd.f32 %v514_v16, %v9288_v43  ;;  %5359 = vmatmul.f32.vlgmr.msrb.gmra.mxu1 %v1201_v18  ;;  %5116 = vmatmul.f32.gmra.mxu3 %v9308_v14  ;;  %v4311_v12 = vld [vmem:[#allocation12 + $0x1d8] sm:$0xff]  ;;  %v4310_v18 = vld [vmem:[#allocation12 + $0x1d0] sm:$0xff] }
  0xfd   : > { %v586_v20 = vadd.f32 %v585_v17, %v9290_v44  ;;  %688 = vst [vmem:[#allocation2 + $0x178] sm:$0xf] %v678_v7  ;;  %v4296_v7 = vld [vmem:[#allocation12 + $0x160] sm:$0xff]  ;;  %5182 = vmatpush.msrb.mxu3 %v4312_v8  ;;  %v4294_v17 = vld [vmem:[#allocation12 + $0x150] sm:$0xff] }
  0xfe   : > { %v9318_v21 = vmax.f32 %v515_v19, 0.0  ;;  %5141 = vmatpush.msrb.mxu2 %v4296_v7  ;;  %v4427_v19 = vld [vmem:[#allocation12 + $0x578] sm:$0xff]  ;;  %v4288_v7 = vld [vmem:[#allocation12 + $0x120] sm:$0xff] }
  0xff   : > { %v9320_v22 = vmax.f32 %v586_v20, 0.0  ;;  %5183 = vmatpush.msrb.mxu3 %v4311_v12  ;;  %v4443_v20 = vld [vmem:[#allocation12 + $0x5f8] sm:$0xff]  ;;  %5466 = vmatpush.msra.mxu0 %v4427_v19 }
 0x100   : > { %690 = vst [vmem:[#allocation2 + $0x108] sm:$0xff] %v9318_v21  ;;  %5142 = vmatpush.msrb.mxu2 %v4295_v11  ;;  %5507 = vmatpush.msra.mxu1 %v4443_v20  ;;  %v4436_v11 = vld [vmem:[#allocation12 + $0x5c0] sm:$0xff]  ;;  %v4419_v12 = vld [vmem:[#allocation12 + $0x538] sm:$0xff] }
 0x101   : > { %691 = vst [vmem:[#allocation2 + $0x110] sm:$0xff] %v9320_v22  ;;  %v1137_v23 = vld [vmem:[#allocation2 + $0x40] sm:$0x7]  ;;  %5184 = vmatpush.msrb.mxu3 %v4310_v18 }
 0x102   : > { %v1135_v24 = vld [vmem:[#allocation2 + $0x160] sm:$0xf8]  ;;  %v1203_v25 = vrot.slane %v1137_v23, 3  ;;  %5143 = vmatpush.msrb.mxu2 %v4294_v17 }
 0x103   : > { %v517_v26 = vpop.f32.mrf.mxu0  ;;  %v1202_v28 = vrot.slane %v1135_v24, 3  ;;  %v1136_v29 = vld [vmem:[#allocation2 + $0x128] sm:$0xf8]  ;;  %5078 = vmatmul.f32.gmra.mxu2 %v9318_v21  ;;  %v4426_v24 = vld [vmem:[#allocation12 + $0x570] sm:$0xff]  ;;  %v4304_v20 = vld [vmem:[#allocation12 + $0x1a0] sm:$0xff] }
 0x104   : > { %v588_v27 = vpop.f32.mrf.mxu1  ;;  %v518_v30 = vadd.f32 %v517_v26, %v9288_v43  ;;  %v1138_v32 = vld [vmem:[#allocation2 + $0x178] sm:$0x7]  ;;  %v1205_v33 = vrot.slane %v1136_v29, 3  ;;  %5119 = vmatmul.f32.gmra.mxu3 %v9320_v22  ;;  %5467 = vmatpush.msra.mxu0 %v4426_v24 }
 0x105   : > { %v589_v31 = vadd.f32 %v588_v27, %v9290_v44  ;;  %v1204_v34 = vsel %vm1195_vm2, %v1202_v28, %v1203_v25  ;;  %v1206_v35 = vrot.slane %v1138_v32, 3  ;;  %v4442_v25 = vld [vmem:[#allocation12 + $0x5f0] sm:$0xff]  ;;  %v4293_v28 = vld [vmem:[#allocation12 + $0x148] sm:$0xff] }
 0x106   : > { %v638_v36 = vmax.f32 %v518_v30, 0.0  ;;  %5321 = vmatmul.f32.gmra.mxu0 %v1204_v34  ;;  %5508 = vmatpush.msra.mxu1 %v4442_v25 }
 0x107   : > { %v639_v37 = vmax.f32 %v589_v31, 0.0  ;;  %v1207_v38 = vsel %vm1195_vm2, %v1205_v33, %v1206_v35  ;;  %v1139_v45 = vld [vmem:[#allocation2 + $0x108] sm:$0xf8]  ;;  %5144 = vmatpush.msrb.mxu2 %v4293_v28 }
 0x108   : > { %692 = vst [vmem:[#allocation2 + $0x90] sm:$0xf] %v638_v36  ;;  %5362 = vmatmul.f32.gmra.mxu1 %v1207_v38  ;;  %v1140_v50 = vld [vmem:[#allocation2 + $0x110] sm:$0xf8]  ;;  %v698_v51 = vrot.slane %v638_v36, 4  ;;  %v1208_v58 = vrot.slane %v1139_v45, 3 }
 0x109   : > { %693 = vst [vmem:[#allocation2 + $0x118] sm:$0xf] %v639_v37  ;;  %v701_v52 = vrot.slane %v639_v37, 4  ;;  %v1211_v61 = vrot.slane %v1140_v50, 3  ;;  %v4309_v33 = vld [vmem:[#allocation12 + $0x1c8] sm:$0xff]  ;;  %v4308_v50 = vld [vmem:[#allocation12 + $0x1c0] sm:$0xff] }
 0x10a   : > { %v4425_v38 = vld [vmem:[#allocation12 + $0x568] sm:$0xff]  ;;  %5185 = vmatpush.msrb.mxu3 %v4309_v33 }
 0x10b   : > { %v520_v39 = vpop.f32.mrf.mxu0  ;;  %5468 = vmatpush.msra.mxu0 %v4425_v38 }
 0x10c   : > { %v591_v40 = vpop.f32.mrf.mxu1  ;;  %v521_v41 = vadd.f32 %v520_v39, %v9288_v43  ;;  %v4441_v39 = vld [vmem:[#allocation12 + $0x5e8] sm:$0xff]  ;;  %5186 = vmatpush.msrb.mxu3 %v4308_v50 }
 0x10d   : > { %v592_v42 = vadd.f32 %v591_v40, %v9290_v44  ;;  %5509 = vmatpush.msra.mxu1 %v4441_v39  ;;  %5469 = vmatpush.msra.mxu0 %v4424_v47  ;;  %v4303_v39 = vld [vmem:[#allocation12 + $0x198] sm:$0xff]  ;;  %v4302_v47 = vld [vmem:[#allocation12 + $0x190] sm:$0xff] }
 0x10e   : > { %v640_v48 = vmax.f32 %v521_v41, 0.0  ;;  %5187 = vmatpush.msrb.mxu3 %v4307_v54  ;;  %v4284_v54 = vld [vmem:[#allocation12 + $0x100] sm:$0xff] }
 0x10f   : > { %v641_v49 = vmax.f32 %v592_v42, 0.0  ;;  %v1141_v53 = vld [vmem:[#allocation2 + $0x90] sm:$0x7]  ;;  %v4292_v42 = vld [vmem:[#allocation12 + $0x140] sm:$0xff] }
 0x110   : > { %v699_v56 = vrot.slane %v640_v48, 4  ;;  %v1209_v59 = vrot.slane %v1141_v53, 3  ;;  %v1142_v60 = vld [vmem:[#allocation2 + $0x118] sm:$0x7]  ;;  %v4440_v48 = vld [vmem:[#allocation12 + $0x5e0] sm:$0xff]  ;;  %5145 = vmatpush.msrb.mxu2 %v4292_v42 }
 0x111   : > { %v702_v57 = vrot.slane %v641_v49, 4  ;;  %v1212_v62 = vrot.slane %v1142_v60, 3  ;;  %5510 = vmatpush.msra.mxu1 %v4440_v48  ;;  %v4439_v53 = vld [vmem:[#allocation12 + $0x5d8] sm:$0xff]  ;;  %v4306_v60 = vld [vmem:[#allocation12 + $0x1b0] sm:$0xff]  ;;  %v4285_v48 = vld [vmem:[#allocation12 + $0x108] sm:$0xff] }
 0x112   : > { %v9333_v1 = vsel %vm481_vm0, %v698_v51, %v699_v56  ;;  %711 = vst [vmem:[#allocation2 + $0x58] sm:$0xf] %v699_v56  ;;  %v1210_v3 = vsel %vm1195_vm2, %v1208_v58, %v1209_v59  ;;  %v4291_v51 = vld [vmem:[#allocation12 + $0x138] sm:$0xff]  ;;  %v4422_v56 = vld [vmem:[#allocation12 + $0x550] sm:$0xff]  ;;  %5188 = vmatpush.msrb.mxu3 %v4306_v60 }
 0x113   : > { %v9336_v2 = vsel %vm481_vm0, %v701_v52, %v702_v57  ;;  %709 = vst [vmem:[#allocation2 + $0x148] sm:$0xff] %v9333_v1  ;;  %v523_v4 = vpop.f32.mrf.mxu0  ;;  %5324 = vmatmul.f32.gmra.mxu0 %v1210_v3  ;;  %v1213_v6 = vsel %vm1195_vm2, %v1211_v61, %v1212_v62  ;;  %5081 = vmatmul.f32.gmra.mxu2 %v9333_v1  ;;  %v4423_v52 = vld [vmem:[#allocation12 + $0x558] sm:$0xff]  ;;  %v4289_v61 = vld [vmem:[#allocation12 + $0x128] sm:$0xff] }
 0x114   : > { %v594_v5 = vpop.f32.mrf.mxu1  ;;  %710 = vst [vmem:[#allocation2 + $0x100] sm:$0xff] %v9336_v2  ;;  %v524_v9 = vadd.f32 %v523_v4, %v9288_v43  ;;  %5365 = vmatmul.f32.gmra.mxu1 %v1213_v6  ;;  %5122 = vmatmul.f32.gmra.mxu3 %v9336_v2  ;;  %v4421_v3 = vld [vmem:[#allocation12 + $0x548] sm:$0xff]  ;;  %v4431_v60 = vld [vmem:[#allocation12 + $0x598] sm:$0xff] }
 0x115   : > { %v595_v10 = vadd.f32 %v594_v5, %v9290_v44  ;;  %712 = vst [vmem:[#allocation2 + $0xd8] sm:$0xf] %v702_v57  ;;  %5470 = vmatpush.msra.mxu0 %v4423_v52  ;;  %v4438_v57 = vld [vmem:[#allocation12 + $0x5d0] sm:$0xff]  ;;  %5146 = vmatpush.msrb.mxu2 %v4291_v51  ;;  %v4437_v4 = vld [vmem:[#allocation12 + $0x5c8] sm:$0xff]  ;;  %v4420_v5 = vld [vmem:[#allocation12 + $0x540] sm:$0xff] }
 0x116   : > { %v9346_v15 = vmax.f32 %v524_v9, 0.0  ;;  %5511 = vmatpush.msra.mxu1 %v4439_v53  ;;  %v4305_v6 = vld [vmem:[#allocation12 + $0x1a8] sm:$0xff]  ;;  %v4416_v52 = vld [vmem:[#allocation12 + $0x520] sm:$0xff] }
 0x117   : > { %v9348_v16 = vmax.f32 %v595_v10, 0.0  ;;  %5471 = vmatpush.msra.mxu0 %v4422_v56  ;;  %5147 = vmatpush.msrb.mxu2 %v4290_v55  ;;  %v4433_v51 = vld [vmem:[#allocation12 + $0x5a8] sm:$0xff]  ;;  %v4432_v55 = vld [vmem:[#allocation12 + $0x5a0] sm:$0xff] }
 0x118   : > { %714 = vst [vmem:[#allocation2 + $0x80] sm:$0xff] %v9346_v15  ;;  %5512 = vmatpush.msra.mxu1 %v4438_v57  ;;  %5189 = vmatpush.msrb.mxu3 %v4305_v6  ;;  %v4301_v53 = vld [vmem:[#allocation12 + $0x188] sm:$0xff]  ;;  %v4415_v57 = vld [vmem:[#allocation12 + $0x518] sm:$0xff] }
 0x119   : > { %715 = vst [vmem:[#allocation2 + $0x130] sm:$0xff] %v9348_v16  ;;  %v1145_v23 = vld [vmem:[#allocation2 + $0x58] sm:$0x7]  ;;  %5472 = vmatpush.msra.mxu0 %v4421_v3  ;;  %5148 = vmatpush.msrb.mxu2 %v4289_v61  ;;  %v4300_v61 = vld [vmem:[#allocation12 + $0x180] sm:$0xff] }
 0x11a   : > { %v1143_v26 = vld [vmem:[#allocation2 + $0x148] sm:$0xf8]  ;;  %v1215_v27 = vrot.slane %v1145_v23, 3  ;;  %5513 = vmatpush.msra.mxu1 %v4437_v4  ;;  %v4287_v23 = vld [vmem:[#allocation12 + $0x118] sm:$0xff]  ;;  %5190 = vmatpush.msrb.mxu3 %v4304_v20 }
 0x11b   : > { %v526_v29 = vpop.f32.mrf.mxu0  ;;  %v1214_v31 = vrot.slane %v1143_v26, 3  ;;  %v1144_v32 = vld [vmem:[#allocation2 + $0x100] sm:$0xf8]  ;;  %5084 = vmatmul.f32.gmra.mxu2 %v9346_v15  ;;  %5473 = vmatpush.msra.mxu0 %v4420_v5 }
 0x11c   : > { %v597_v30 = vpop.f32.mrf.mxu1  ;;  %v9354_v34 = vadd.f32 %v526_v29, %v9288_v43  ;;  %v1146_v36 = vld [vmem:[#allocation2 + $0xd8] sm:$0x7]  ;;  %v1217_v37 = vrot.slane %v1144_v32, 3  ;;  %5125 = vmatmul.f32.gmra.mxu3 %v9348_v16  ;;  %5149 = vmatpush.msrb.mxu2 %v4288_v7 }
 0x11d   : > { %v9357_v35 = vadd.f32 %v597_v30, %v9290_v44  ;;  %v1216_v40 = vsel %vm1195_vm2, %v1214_v31, %v1215_v27  ;;  %v1218_v41 = vrot.slane %v1146_v36, 3  ;;  %5514 = vmatpush.msra.mxu1 %v4436_v11  ;;  %5474 = vmatpush.msra.mxu0 %v4419_v12 }
 0x11e   : > { %v644_v45 = vmax.f32 %v9354_v34, 0.0  ;;  %5327 = vmatmul.f32.gmra.mxu0 %v1216_v40  ;;  %v4435_v34 = vld [vmem:[#allocation12 + $0x5b8] sm:$0xff]  ;;  %5150 = vmatpush.msrb.mxu2 %v4287_v23  ;;  %v4286_v40 = vld [vmem:[#allocation12 + $0x110] sm:$0xff]  ;;  %v4412_v23 = vld [vmem:[#allocation12 + $0x500] sm:$0xff] }
 0x11f   : > { %v645_v46 = vmax.f32 %v9357_v35, 0.0  ;;  %v1219_v49 = vsel %vm1195_vm2, %v1217_v37, %v1218_v41  ;;  %v1147_v0 = vld [vmem:[#allocation2 + $0x80] sm:$0xf8]  ;;  %v4418_v35 = vld [vmem:[#allocation12 + $0x530] sm:$0xff]  ;;  %5515 = vmatpush.msra.mxu1 %v4435_v34  ;;  %5191 = vmatpush.msrb.mxu3 %v4303_v39 }
 0x120   : > { %716 = vst [vmem:[#allocation2 + $0x138] sm:$0xf] %v644_v45  ;;  %5368 = vmatmul.f32.gmra.mxu1 %v1219_v49  ;;  %v1148_v10 = vld [vmem:[#allocation2 + $0x130] sm:$0xf8]  ;;  %v722_v17 = vrot.slane %v644_v45, 4  ;;  %v1220_v26 = vrot.slane %v1147_v0, 3  ;;  %5475 = vmatpush.msra.mxu0 %v4418_v35 }
 0x121   : > { %717 = vst [vmem:[#allocation2 + $0x120] sm:$0xf] %v645_v46  ;;  %v725_v18 = vrot.slane %v645_v46, 4  ;;  %v1223_v29 = vrot.slane %v1148_v10, 3  ;;  %v4434_v45 = vld [vmem:[#allocation12 + $0x5b0] sm:$0xff]  ;;  %v4417_v46 = vld [vmem:[#allocation12 + $0x528] sm:$0xff]  ;;  %5151 = vmatpush.msrb.mxu2 %v4286_v40  ;;  %5192 = vmatpush.msrb.mxu3 %v4302_v47 }
 0x122   : > { %5516 = vmatpush.msra.mxu1 %v4434_v45  ;;  %5476 = vmatpush.msra.mxu0 %v4417_v46 }
 0x123   : > { %v529_v58 = vpop.f32.mrf.mxu0  ;;  %5152 = vmatpush.msrb.mxu2 %v4285_v48  ;;  %5193 = vmatpush.msrb.mxu3 %v4301_v53 }
 0x124   : > { %v600_v59 = vpop.f32.mrf.mxu1  ;;  %v530_v62 = vadd.f32 %v529_v58, %v9288_v43  ;;  %5517 = vmatpush.msra.mxu1 %v4433_v51  ;;  %5477 = vmatpush.msra.mxu0 %v4416_v52 }
 0x125   : > { %v601_v63 = vadd.f32 %v600_v59, %v9290_v44  ;;  %5153 = vmatpush.msrb.mxu2 %v4284_v54  ;;  %5194 = vmatpush.msrb.mxu3 %v4300_v61 }
 0x126   : > { %v646_v8 = vmax.f32 %v530_v62, 0.0  ;;  %5518 = vmatpush.msra.mxu1 %v4432_v55  ;;  %5478 = vmatpush.msra.mxu0 %v4415_v57  ;;  %v843_v55 = vld [vmem:[#allocation2 + $0x10] sm:$0x1] }
 0x127   : > { %v647_v9 = vmax.f32 %v601_v63, 0.0  ;;  %v1149_v19 = vld [vmem:[#allocation2 + $0x138] sm:$0x7]  ;;  %v907_v61 = vrot.slane %v843_v55, 1 }
 0x128   : > { %v723_v24 = vrot.slane %v646_v8, 4  ;;  %v1221_v27 = vrot.slane %v1149_v19, 3  ;;  %v1150_v28 = vld [vmem:[#allocation2 + $0x120] sm:$0x7]  ;;  %v4414_v8 = vld [vmem:[#allocation12 + $0x510] sm:$0xff]  ;;  %5519 = vmatpush.msra.mxu1 %v4431_v60  ;;  %v4429_v19 = vld [vmem:[#allocation12 + $0x588] sm:$0xff] }
 0x129   : > { %v726_v25 = vrot.slane %v647_v9, 4  ;;  %v1224_v30 = vrot.slane %v1150_v28, 3  ;;  %v4430_v9 = vld [vmem:[#allocation12 + $0x590] sm:$0xff]  ;;  %5479 = vmatpush.msra.mxu0 %v4414_v8 }
 0x12a   : > { %v9367_v31 = vsel %vm481_vm0, %v722_v17, %v723_v24  ;;  %735 = vst [vmem:[#allocation2 + $0xb8] sm:$0xf] %v723_v24  ;;  %v1222_v33 = vsel %vm1195_vm2, %v1220_v26, %v1221_v27  ;;  %5520 = vmatpush.msra.mxu1 %v4430_v9  ;;  %v4428_v24 = vld [vmem:[#allocation12 + $0x580] sm:$0xff] }
 0x12b   : > { %v9370_v32 = vsel %vm481_vm0, %v725_v18, %v726_v25  ;;  %733 = vst [vmem:[#allocation2 + $0xe0] sm:$0xff] %v9367_v31  ;;  %v532_v36 = vpop.f32.mrf.mxu0  ;;  %5330 = vmatmul.f32.gmra.mxu0 %v1222_v33  ;;  %v1225_v38 = vsel %vm1195_vm2, %v1223_v29, %v1224_v30  ;;  %5087 = vmatmul.f32.gmra.mxu2 %v9367_v31  ;;  %v4413_v18 = vld [vmem:[#allocation12 + $0x508] sm:$0xff] }
 0x12c   : > { %v603_v37 = vpop.f32.mrf.mxu1  ;;  %734 = vst [vmem:[#allocation2 + $0xa8] sm:$0xff] %v9370_v32  ;;  %v533_v41 = vadd.f32 %v532_v36, %v9288_v43  ;;  %5371 = vmatmul.f32.gmra.mxu1 %v1225_v38  ;;  %5128 = vmatmul.f32.gmra.mxu3 %v9370_v32 }
 0x12d   : > { %v604_v42 = vadd.f32 %v603_v37, %v9290_v44  ;;  %736 = vst [vmem:[#allocation2 + $0x168] sm:$0xf] %v726_v25  ;;  %5480 = vmatpush.msra.mxu0 %v4413_v18  ;;  %5521 = vmatpush.msra.mxu1 %v4429_v19 }
 0x12e   : > { %v9380_v49 = vmax.f32 %v533_v41, 0.0 }
 0x12f   : > { %v9382_v50 = vmax.f32 %v604_v42, 0.0  ;;  %5481 = vmatpush.msra.mxu0 %v4412_v23  ;;  %5522 = vmatpush.msra.mxu1 %v4428_v24 }
 0x130   : > { %738 = vst [vmem:[#allocation2 + $0xe8] sm:$0xff] %v9380_v49 }
 0x131   : > { %739 = vst [vmem:[#allocation2 + $0xf8] sm:$0xff] %v9382_v50  ;;  %v1153_v56 = vld [vmem:[#allocation2 + $0xb8] sm:$0x7] }
 0x132   : > { %v1151_v58 = vld [vmem:[#allocation2 + $0xe0] sm:$0xf8]  ;;  %v1227_v59 = vrot.slane %v1153_v56, 3 }
 0x133   : > { %v535_v62 = vpop.f32.mrf.mxu0  ;;  %v1226_v0 = vrot.slane %v1151_v58, 3  ;;  %v1152_v3 = vld [vmem:[#allocation2 + $0xa8] sm:$0xf8]  ;;  %5090 = vmatmul.f32.gmra.mxu2 %v9380_v49  ;;  %v844_v58 = vld [vmem:[#allocation2 + $0x48] sm:$0x1] }
 0x134   : > { %v606_v63 = vpop.f32.mrf.mxu1  ;;  %v536_v4 = vadd.f32 %v535_v62, %v9288_v43  ;;  %v1154_v6 = vld [vmem:[#allocation2 + $0x168] sm:$0x7]  ;;  %v1229_v7 = vrot.slane %v1152_v3, 3  ;;  %5131 = vmatmul.f32.gmra.mxu3 %v9382_v50  ;;  %v842_v62 = vld [vmem:[#allocation2 + $0xd0] sm:$0xfe] }
 0x135   : > { %v607_v5 = vadd.f32 %v606_v63, %v9290_v44  ;;  %v1228_v10 = vsel %vm1195_vm2, %v1226_v0, %v1227_v59  ;;  %v1230_v11 = vrot.slane %v1154_v6, 3  ;;  %v841_v59 = vld [vmem:[#allocation2 + $0xb0] sm:$0xfe]  ;;  %v910_v0 = vrot.slane %v844_v58, 1  ;;  %v847_v6 = vld [vmem:[#allocation2 + $0x40] sm:$0x1] }
 0x136   : > { %v650_v12 = vmax.f32 %v536_v4, 0.0  ;;  %5333 = vmatmul.f32.gmra.mxu0 %v1228_v10  ;;  %v906_v3 = vrot.slane %v841_v59, 1  ;;  %v845_v10 = vld [vmem:[#allocation2 + $0x160] sm:$0xfe] }
 0x137   : > { %v651_v17 = vmax.f32 %v607_v5, 0.0  ;;  %v1231_v20 = vsel %vm1195_vm2, %v1229_v7, %v1230_v11  ;;  %v1155_v29 = vld [vmem:[#allocation2 + $0xe8] sm:$0xf8]  ;;  %v909_v5 = vrot.slane %v842_v62, 1  ;;  %v4331_v58 = vld [vmem:[#allocation12 + $0x278] sm:$0xff] }
 0x138   : > { %740 = vst [vmem:[#allocation2 + $0x20] sm:$0xf] %v650_v12  ;;  %5374 = vmatmul.f32.gmra.mxu1 %v1231_v20  ;;  %v1156_v34 = vld [vmem:[#allocation2 + $0xf8] sm:$0xf8]  ;;  %v746_v35 = vrot.slane %v650_v12, 4  ;;  %v1232_v40 = vrot.slane %v1155_v29, 3  ;;  %v908_v9 = vsel %vm905_vm3, %v906_v3, %v907_v61  ;;  %5220 = vmatpush.msra.mxu2 %v4331_v58 }
 0x139   : > { %741 = vst [vmem:[#allocation2 + $0x88] sm:$0xf] %v651_v17  ;;  %v749_v36 = vrot.slane %v651_v17, 4  ;;  %v1235_v45 = vrot.slane %v1156_v34, 3  ;;  %v911_v19 = vsel %vm905_vm3, %v909_v5, %v910_v0  ;;  %v846_v20 = vld [vmem:[#allocation2 + $0x128] sm:$0xfe] }
 0x13a   : > { %v912_v34 = vrot.slane %v845_v10, 1  ;;  %v4347_v59 = vld [vmem:[#allocation12 + $0x2f8] sm:$0xff]  ;;  %v4330_v61 = vld [vmem:[#allocation12 + $0x270] sm:$0xff] }
 0x13b   : > { %v538_v25 = vpop.f32.mrf.mxu0  ;;  %v4346_v5 = vld [vmem:[#allocation12 + $0x2f0] sm:$0xff]  ;;  %5261 = vmatpush.msra.mxu3 %v4347_v59  ;;  %5221 = vmatpush.msra.mxu2 %v4330_v61  ;;  %v4491_v10 = vld [vmem:[#allocation12 + $0x778] sm:$0xff] }
 0x13c   : > { %v609_v26 = vpop.f32.mrf.mxu1  ;;  %v539_v27 = vadd.f32 %v538_v25, %v9288_v43  ;;  %5630 = vmatpush.msrb.mxu0 %v4491_v10  ;;  %v4342_v58 = vld [vmem:[#allocation12 + $0x2d0] sm:$0xff] }
 0x13d   : > { %v610_v28 = vadd.f32 %v609_v26, %v9290_v44  ;;  %5262 = vmatpush.msra.mxu3 %v4346_v5  ;;  %v859_v61 = vld [vmem:[#allocation2 + $0x138] sm:$0x1] }
 0x13e   : > { %v652_v30 = vmax.f32 %v539_v27, 0.0  ;;  %v848_v27 = vld [vmem:[#allocation2 + $0x178] sm:$0x1] }
 0x13f   : > { %v653_v33 = vmax.f32 %v610_v28, 0.0  ;;  %v1157_v37 = vld [vmem:[#allocation2 + $0x20] sm:$0x7]  ;;  %v4502_v10 = vld [vmem:[#allocation12 + $0x7d0] sm:$0xff] }
 0x140   : > { %v747_v38 = vrot.slane %v652_v30, 4  ;;  %v1233_v41 = vrot.slane %v1157_v37, 3  ;;  %v1158_v42 = vld [vmem:[#allocation2 + $0x88] sm:$0x7]  ;;  %v915_v37 = vrot.slane %v846_v20, 1 }
 0x141   : > { %v750_v39 = vrot.slane %v653_v33, 4  ;;  %v1236_v46 = vrot.slane %v1158_v42, 3 }
 0x142   : > { %v9395_v47 = vsel %vm481_vm0, %v746_v35, %v747_v38  ;;  %759 = vst [vmem:[#allocation2 + $0xf0] sm:$0xf] %v747_v38  ;;  %v1234_v51 = vsel %vm1195_vm2, %v1232_v40, %v1233_v41  ;;  %v913_v35 = vrot.slane %v847_v6, 1  ;;  %v916_v38 = vrot.slane %v848_v27, 1  ;;  %v851_v40 = vld [vmem:[#allocation2 + $0x90] sm:$0x1] }
 0x143   : > { %v9398_v48 = vsel %vm481_vm0, %v749_v36, %v750_v39  ;;  %757 = vst [vmem:[#allocation2 + $0xa0] sm:$0xff] %v9395_v47  ;;  %5336 = vmatmul.f32.gmra.mxu0 %v1234_v51  ;;  %v1237_v52 = vsel %vm1195_vm2, %v1235_v45, %v1236_v46  ;;  %v541_v53 = vpop.f32.mrf.mxu0  ;;  %5093 = vmatmul.f32.gmra.mxu2 %v9395_v47  ;;  %v919_v55 = vrot.slane %v851_v40, 1 }
 0x144   : > { %v612_v54 = vpop.f32.mrf.mxu1  ;;  %758 = vst [vmem:[#allocation2 + $0x170] sm:$0xff] %v9398_v48  ;;  %5377 = vmatmul.f32.gmra.mxu1 %v1237_v52  ;;  %v9406_v56 = vadd.f32 %v541_v53, %v9288_v43  ;;  %5134 = vmatmul.f32.gmra.mxu3 %v9398_v48  ;;  %v917_v45 = vsel %vm905_vm3, %v915_v37, %v916_v38  ;;  %v849_v52 = vld [vmem:[#allocation2 + $0x108] sm:$0xfe]  ;;  %v850_v53 = vld [vmem:[#allocation2 + $0x110] sm:$0xfe] }
 0x145   : > { %v9409_v57 = vadd.f32 %v612_v54, %v9290_v44  ;;  %760 = vst [vmem:[#allocation2 + $0x140] sm:$0xf] %v750_v39  ;;  %v914_v39 = vsel %vm905_vm3, %v912_v34, %v913_v35  ;;  %v852_v54 = vld [vmem:[#allocation2 + $0x118] sm:$0x1]  ;;  %v4489_v37 = vld [vmem:[#allocation12 + $0x768] sm:$0xff] }
 0x146   : > { %v654_v60 = vmax.f32 %v9406_v56, 0.0  ;;  %v922_v6 = vrot.slane %v852_v54, 1  ;;  %v4505_v38 = vld [vmem:[#allocation12 + $0x7e8] sm:$0xff]  ;;  %v4504_v54 = vld [vmem:[#allocation12 + $0x7e0] sm:$0xff] }
 0x147   : > { %v655_v63 = vmax.f32 %v9409_v57, 0.0  ;;  %v997_v57 = vld [vmem:[#allocation2 + $0x118] sm:$0x3] }
 0x148   : > { %762 = vst [vmem:[#allocation2 + $0x60] sm:$0xff] %v654_v60 }
 0x149   : > { %763 = vst [vmem:[#allocation2 + $0xc8] sm:$0xff] %v655_v63  ;;  %v1161_v4 = vld [vmem:[#allocation2 + $0xf0] sm:$0x7] }
 0x14a   : > { %v1159_v7 = vld [vmem:[#allocation2 + $0xa0] sm:$0xf8]  ;;  %v1239_v8 = vrot.slane %v1161_v4, 3 }
 0x14b   : > { %v1238_v11 = vrot.slane %v1159_v7, 3  ;;  %v1160_v12 = vld [vmem:[#allocation2 + $0x170] sm:$0xf8]  ;;  %v544_v17 = vpop.f32.mrf.mxu0  ;;  %5154 = vmatmul.f32.vlgmr.msrb.gmra.mxu2 %v908_v9  ;;  %v918_v9 = vrot.slane %v849_v52, 1 }
 0x14c   : > { %v615_v18 = vpop.f32.mrf.mxu1  ;;  %v1162_v23 = vld [vmem:[#allocation2 + $0x140] sm:$0x7]  ;;  %v1241_v24 = vrot.slane %v1160_v12, 3  ;;  %v545_v25 = vadd.f32 %v544_v17, %v9288_v43  ;;  %5195 = vmatmul.f32.vlgmr.msrb.gmra.mxu3 %v911_v19  ;;  %v4329_v12 = vld [vmem:[#allocation12 + $0x268] sm:$0xff]  ;;  %v921_v17 = vrot.slane %v850_v53, 1 }
 0x14d   : > { %v616_v26 = vadd.f32 %v615_v18, %v9290_v44  ;;  %v1240_v28 = vsel %vm1195_vm2, %v1238_v11, %v1239_v8  ;;  %v1242_v29 = vrot.slane %v1162_v23, 3  ;;  %v4507_v11 = vld [vmem:[#allocation12 + $0x7f8] sm:$0xff]  ;;  %v4345_v18 = vld [vmem:[#allocation12 + $0x2e8] sm:$0xff]  ;;  %v920_v23 = vsel %vm905_vm3, %v918_v9, %v919_v55  ;;  %5222 = vmatpush.msra.mxu2 %v4329_v12  ;;  %v4326_v55 = vld [vmem:[#allocation12 + $0x250] sm:$0xff] }
 0x14e   : > { %5339 = vmatmul.f32.gmra.mxu0 %v1240_v28  ;;  %v656_v30 = vmax.f32 %v545_v25, 0.0  ;;  %5671 = vmatpush.msrb.mxu1 %v4507_v11  ;;  %v4328_v25 = vld [vmem:[#allocation12 + $0x260] sm:$0xff]  ;;  %v923_v28 = vsel %vm905_vm3, %v921_v17, %v922_v6  ;;  %v4486_v9 = vld [vmem:[#allocation12 + $0x750] sm:$0xff]  ;;  %v931_v12 = vrot.slane %v859_v61, 1 }
 0x14f   : > { %v657_v33 = vmax.f32 %v616_v26, 0.0  ;;  %v1243_v36 = vsel %vm1195_vm2, %v1241_v24, %v1242_v29  ;;  %v4506_v24 = vld [vmem:[#allocation12 + $0x7f0] sm:$0xff]  ;;  %5263 = vmatpush.msra.mxu3 %v4345_v18  ;;  %5223 = vmatpush.msra.mxu2 %v4328_v25  ;;  %v857_v11 = vld [vmem:[#allocation2 + $0x80] sm:$0xfe] }
 0x150   : > { %5380 = vmatmul.f32.gmra.mxu1 %v1243_v36  ;;  %764 = vst [vmem:[#allocation2 + $0x28] sm:$0xf] %v656_v30  ;;  %v770_v62 = vrot.slane %v656_v30, 4  ;;  %v855_v29 = vld [vmem:[#allocation2 + $0x58] sm:$0x1]  ;;  %v4324_v17 = vld [vmem:[#allocation12 + $0x240] sm:$0xff] }
 0x151   : > { %765 = vst [vmem:[#allocation2 + $0x38] sm:$0xf] %v657_v33  ;;  %v773_v0 = vrot.slane %v657_v33, 4  ;;  %v854_v30 = vld [vmem:[#allocation2 + $0x100] sm:$0xfe]  ;;  %5672 = vmatpush.msrb.mxu1 %v4506_v24  ;;  %v4501_v24 = vld [vmem:[#allocation12 + $0x7c8] sm:$0xff] }
 0x152   : > { %v4344_v33 = vld [vmem:[#allocation12 + $0x2e0] sm:$0xff]  ;;  %v856_v36 = vld [vmem:[#allocation2 + $0xd8] sm:$0x1]  ;;  %v927_v52 = vrot.slane %v854_v30, 1  ;;  %v4323_v25 = vld [vmem:[#allocation12 + $0x238] sm:$0xff] }
 0x153   : > { %v547_v41 = vpop.f32.mrf.mxu0  ;;  %5157 = vmatmul.f32.gmra.mxu2 %v914_v39  ;;  %v4327_v39 = vld [vmem:[#allocation12 + $0x258] sm:$0xff]  ;;  %5264 = vmatpush.msra.mxu3 %v4344_v33  ;;  %v928_v53 = vrot.slane %v856_v36, 1  ;;  %v863_v33 = vld [vmem:[#allocation2 + $0xb8] sm:$0x1] }
 0x154   : > { %v618_v42 = vpop.f32.mrf.mxu1  ;;  %v548_v46 = vadd.f32 %v547_v41, %v9288_v43  ;;  %5198 = vmatmul.f32.gmra.mxu3 %v917_v45  ;;  %v925_v45 = vrot.slane %v855_v29, 1  ;;  %5673 = vmatpush.msrb.mxu1 %v4505_v38  ;;  %v4484_v29 = vld [vmem:[#allocation12 + $0x740] sm:$0xff] }
 0x155   : > { %v619_v51 = vadd.f32 %v618_v42, %v9290_v44  ;;  %5224 = vmatpush.msra.mxu2 %v4327_v39  ;;  %v929_v5 = vsel %vm905_vm3, %v927_v52, %v928_v53  ;;  %v862_v38 = vld [vmem:[#allocation2 + $0xa8] sm:$0xfe]  ;;  %v4338_v39 = vld [vmem:[#allocation12 + $0x2b0] sm:$0xff]  ;;  %v937_v52 = vrot.slane %v863_v33, 1  ;;  %v871_v33 = vld [vmem:[#allocation2 + $0xf0] sm:$0x1] }
 0x156   : > { %5482 = vmatmul.f32.vlgmr.msra.gmra.mxu0 %v9305_v13  ;;  %v658_v3 = vmax.f32 %v548_v46, 0.0  ;;  %v4490_v13 = vld [vmem:[#allocation12 + $0x770] sm:$0xff]  ;;  %v4343_v46 = vld [vmem:[#allocation12 + $0x2d8] sm:$0xff]  ;;  %5674 = vmatpush.msrb.mxu1 %v4504_v54  ;;  %v4321_v53 = vld [vmem:[#allocation12 + $0x228] sm:$0xff] }
 0x157   : > { %v659_v4 = vmax.f32 %v619_v51, 0.0  ;;  %5631 = vmatpush.msrb.mxu0 %v4490_v13  ;;  %v4488_v51 = vld [vmem:[#allocation12 + $0x760] sm:$0xff]  ;;  %5265 = vmatpush.msra.mxu3 %v4343_v46  ;;  %v4499_v46 = vld [vmem:[#allocation12 + $0x7b8] sm:$0xff] }
 0x158   : > { %5523 = vmatmul.f32.vlgmr.msra.gmra.mxu1 %v9308_v14  ;;  %v771_v7 = vrot.slane %v658_v3, 4  ;;  %v853_v14 = vld [vmem:[#allocation2 + $0x148] sm:$0xfe]  ;;  %5225 = vmatpush.msra.mxu2 %v4326_v55 }
 0x159   : > { %v774_v8 = vrot.slane %v659_v4, 4  ;;  %v924_v42 = vrot.slane %v853_v14, 1  ;;  %5632 = vmatpush.msrb.mxu0 %v4489_v37  ;;  %5266 = vmatpush.msra.mxu3 %v4342_v58 }
 0x15a   : > { %v772_v19 = vsel %vm481_vm0, %v770_v62, %v771_v7  ;;  %783 = vst [vmem:[#allocation2 + $0x98] sm:$0xf] %v771_v7  ;;  %v4503_v62 = vld [vmem:[#allocation12 + $0x7d8] sm:$0xff] }
 0x15b   : > { %v775_v20 = vsel %vm481_vm0, %v773_v0, %v774_v8  ;;  %781 = vst [vmem:[#allocation2 + $0xc0] sm:$0xff] %v772_v19  ;;  %v550_v26 = vpop.f32.mrf.mxu0  ;;  %5160 = vmatmul.f32.gmra.mxu2 %v920_v23  ;;  %5633 = vmatpush.msrb.mxu0 %v4488_v51  ;;  %v926_v59 = vsel %vm905_vm3, %v924_v42, %v925_v45  ;;  %v4325_v0 = vld [vmem:[#allocation12 + $0x248] sm:$0xff]  ;;  %v864_v42 = vld [vmem:[#allocation2 + $0x168] sm:$0x1]  ;;  %v4483_v45 = vld [vmem:[#allocation12 + $0x738] sm:$0xff] }
 0x15c   : > { %v621_v27 = vpop.f32.mrf.mxu1  ;;  %782 = vst [vmem:[#allocation2 + $0x18] sm:$0xff] %v775_v20  ;;  %v551_v34 = vadd.f32 %v550_v26, %v9288_v43  ;;  %5201 = vmatmul.f32.gmra.mxu3 %v923_v28  ;;  %5675 = vmatpush.msrb.mxu1 %v4503_v62  ;;  %v858_v19 = vld [vmem:[#allocation2 + $0x130] sm:$0xfe]  ;;  %v4340_v20 = vld [vmem:[#allocation12 + $0x2c0] sm:$0xff]  ;;  %v930_v26 = vrot.slane %v857_v11, 1  ;;  %v940_v61 = vrot.slane %v864_v42, 1 }
 0x15d   : > { %v622_v35 = vadd.f32 %v621_v27, %v9290_v44  ;;  %784 = vst [vmem:[#allocation2 + $0x8] sm:$0xf] %v774_v8  ;;  %v860_v8 = vld [vmem:[#allocation2 + $0x120] sm:$0x1]  ;;  %5226 = vmatpush.msra.mxu2 %v4325_v0  ;;  %v4485_v23 = vld [vmem:[#allocation12 + $0x748] sm:$0xff]  ;;  %v933_v28 = vrot.slane %v858_v19, 1 }
 0x15e   : > { %5485 = vmatmul.f32.gmra.mxu0 %v9318_v21  ;;  %v660_v40 = vmax.f32 %v551_v34, 0.0  ;;  %v4487_v21 = vld [vmem:[#allocation12 + $0x758] sm:$0xff]  ;;  %v934_v14 = vrot.slane %v860_v8, 1  ;;  %5676 = vmatpush.msrb.mxu1 %v4502_v10  ;;  %v932_v30 = vsel %vm905_vm3, %v930_v26, %v931_v12  ;;  %v4500_v34 = vld [vmem:[#allocation12 + $0x7c0] sm:$0xff]  ;;  %v4498_v62 = vld [vmem:[#allocation12 + $0x7b0] sm:$0xff]  ;;  %v949_v42 = vrot.slane %v871_v33, 1 }
 0x15f   : > { %v661_v41 = vmax.f32 %v622_v35, 0.0  ;;  %5634 = vmatpush.msrb.mxu0 %v4487_v21  ;;  %5227 = vmatpush.msra.mxu2 %v4324_v17  ;;  %v4339_v27 = vld [vmem:[#allocation12 + $0x2b8] sm:$0xff]  ;;  %v4322_v35 = vld [vmem:[#allocation12 + $0x230] sm:$0xff]  ;;  %v4320_v0 = vld [vmem:[#allocation12 + $0x220] sm:$0xff] }
 0x160   : > { %5526 = vmatmul.f32.gmra.mxu1 %v9320_v22  ;;  %786 = vst [vmem:[#allocation2] sm:$0xff] %v660_v40  ;;  %v4341_v22 = vld [vmem:[#allocation12 + $0x2c8] sm:$0xff]  ;;  %v867_v10 = vld [vmem:[#allocation2 + $0x20] sm:$0x1]  ;;  %v868_v12 = vld [vmem:[#allocation2 + $0x88] sm:$0x1] }
 0x161   : > { %787 = vst [vmem:[#allocation2 + $0x78] sm:$0xff] %v661_v41  ;;  %5267 = vmatpush.msra.mxu3 %v4341_v22  ;;  %5635 = vmatpush.msrb.mxu0 %v4486_v9  ;;  %v4497_v8 = vld [vmem:[#allocation12 + $0x7a8] sm:$0xff]  ;;  %v4319_v9 = vld [vmem:[#allocation12 + $0x218] sm:$0xff]  ;;  %v4480_v17 = vld [vmem:[#allocation12 + $0x720] sm:$0xff] }
 0x162   : > { %5677 = vmatpush.msrb.mxu1 %v4501_v24  ;;  %5228 = vmatpush.msra.mxu2 %v4323_v25  ;;  %v4335_v11 = vld [vmem:[#allocation12 + $0x298] sm:$0xff]  ;;  %v4318_v19 = vld [vmem:[#allocation12 + $0x210] sm:$0xff]  ;;  %v946_v25 = vrot.slane %v868_v12, 1  ;;  %v1600_v33 = vld [vmem:[#allocation2 + $0x108] sm:$0xfc] }
 0x163   : > { %v553_v3 = vpop.f32.mrf.mxu0  ;;  %5163 = vmatmul.f32.gmra.mxu2 %v926_v59  ;;  %5268 = vmatpush.msra.mxu3 %v4340_v20  ;;  %v4482_v59 = vld [vmem:[#allocation12 + $0x730] sm:$0xff]  ;;  %v943_v20 = vrot.slane %v867_v10, 1  ;;  %v4479_v24 = vld [vmem:[#allocation12 + $0x718] sm:$0xff]  ;;  %v1597_v10 = vld [vmem:[#allocation2 + $0x128] sm:$0xfc] }
 0x164   : > { %v624_v4 = vpop.f32.mrf.mxu1  ;;  %v554_v6 = vadd.f32 %v553_v3, %v9288_v43  ;;  %5204 = vmatmul.f32.gmra.mxu3 %v929_v5  ;;  %5636 = vmatpush.msrb.mxu0 %v4485_v23  ;;  %v4336_v5 = vld [vmem:[#allocation12 + $0x2a0] sm:$0xff]  ;;  %v866_v23 = vld [vmem:[#allocation2 + $0xf8] sm:$0xfe] }
 0x165   : > { %v625_v7 = vadd.f32 %v624_v4, %v9290_v44  ;;  %5269 = vmatpush.msra.mxu3 %v4339_v27  ;;  %5678 = vmatpush.msrb.mxu1 %v4500_v34  ;;  %v4495_v26 = vld [vmem:[#allocation12 + $0x798] sm:$0xff]  ;;  %v4317_v27 = vld [vmem:[#allocation12 + $0x208] sm:$0xff]  ;;  %v4494_v34 = vld [vmem:[#allocation12 + $0x790] sm:$0xff] }
 0x166   : > { %5488 = vmatmul.f32.gmra.mxu0 %v9333_v1  ;;  %v662_v18 = vmax.f32 %v554_v6, 0.0  ;;  %v861_v1 = vld [vmem:[#allocation2 + $0xe0] sm:$0xfe]  ;;  %5229 = vmatpush.msra.mxu2 %v4322_v35 }
 0x167   : > { %v663_v13 = vmax.f32 %v625_v7, 0.0  ;;  %5637 = vmatpush.msrb.mxu0 %v4484_v29  ;;  %v936_v51 = vrot.slane %v861_v1, 1  ;;  %5270 = vmatpush.msra.mxu3 %v4338_v39  ;;  %v4333_v1 = vld [vmem:[#allocation12 + $0x288] sm:$0xff]  ;;  %v945_v29 = vrot.slane %v866_v23, 1  ;;  %v4316_v35 = vld [vmem:[#allocation12 + $0x200] sm:$0xff] }
 0x168   : > { %5529 = vmatmul.f32.gmra.mxu1 %v9336_v2  ;;  %788 = vst [vmem:[#allocation2 + $0x50] sm:$0xf] %v662_v18  ;;  %v935_v2 = vsel %vm905_vm3, %v933_v28, %v934_v14  ;;  %v794_v54 = vrot.slane %v662_v18, 4  ;;  %5230 = vmatpush.msra.mxu2 %v4321_v53  ;;  %v4496_v18 = vld [vmem:[#allocation12 + $0x7a0] sm:$0xff]  ;;  %v4334_v14 = vld [vmem:[#allocation12 + $0x290] sm:$0xff]  ;;  %v4477_v39 = vld [vmem:[#allocation12 + $0x708] sm:$0xff] }
 0x169   : > { %789 = vst [vmem:[#allocation2 + $0x68] sm:$0xf] %v663_v13  ;;  %v797_v55 = vrot.slane %v663_v13, 4  ;;  %5638 = vmatpush.msrb.mxu0 %v4483_v45  ;;  %5679 = vmatpush.msrb.mxu1 %v4499_v46  ;;  %v938_v7 = vsel %vm905_vm3, %v936_v51, %v937_v52  ;;  %v865_v13 = vld [vmem:[#allocation2 + $0xe8] sm:$0xfe] }
 0x16a   : > { %5231 = vmatpush.msra.mxu2 %v4320_v0  ;;  %v942_v28 = vrot.slane %v865_v13, 1  ;;  %v4476_v45 = vld [vmem:[#allocation12 + $0x700] sm:$0xff]  ;;  %v1663_v13 = vrot.slane %v1597_v10, 2  ;;  %v996_v23 = vld [vmem:[#allocation2 + $0x90] sm:$0x3] }
 0x16b   : > { %v556_v36 = vpop.f32.mrf.mxu0  ;;  %5166 = vmatmul.f32.gmra.mxu2 %v932_v30  ;;  %5639 = vmatpush.msrb.mxu0 %v4482_v59  ;;  %v4478_v30 = vld [vmem:[#allocation12 + $0x710] sm:$0xff]  ;;  %v4492_v46 = vld [vmem:[#allocation12 + $0x780] sm:$0xff] }
 0x16c   : > { %v627_v37 = vpop.f32.mrf.mxu1  ;;  %v557_v40 = vadd.f32 %v556_v36, %v9288_v43  ;;  %5207 = vmatmul.f32.gmra.mxu3 %v935_v2  ;;  %v4337_v43 = vld [vmem:[#allocation12 + $0x2a8] sm:$0xff]  ;;  %5680 = vmatpush.msrb.mxu1 %v4498_v62  ;;  %v947_v36 = vsel %vm905_vm3, %v945_v29, %v946_v25  ;;  %v4395_v25 = vld [vmem:[#allocation12 + $0x478] sm:$0xff]  ;;  %v995_v29 = vld [vmem:[#allocation2 + $0x110] sm:$0xfc] }
 0x16d   : > { %v628_v41 = vadd.f32 %v627_v37, %v9290_v44  ;;  %v939_v44 = vrot.slane %v862_v38, 1  ;;  %5271 = vmatpush.msra.mxu3 %v4337_v43  ;;  %5232 = vmatpush.msra.mxu2 %v4319_v9  ;;  %v869_v37 = vld [vmem:[#allocation2 + $0xa0] sm:$0xfe]  ;;  %v870_v2 = vld [vmem:[#allocation2 + $0x170] sm:$0xfe] }
 0x16e   : > { %5491 = vmatmul.f32.gmra.mxu0 %v9346_v15  ;;  %v664_v58 = vmax.f32 %v557_v40, 0.0  ;;  %v4481_v15 = vld [vmem:[#allocation12 + $0x728] sm:$0xff]  ;;  %5681 = vmatpush.msrb.mxu1 %v4497_v8  ;;  %v872_v38 = vld [vmem:[#allocation2 + $0x140] sm:$0x1]  ;;  %v951_v51 = vrot.slane %v870_v2, 1 }
 0x16f   : > { %v665_v21 = vmax.f32 %v628_v41, 0.0  ;;  %5272 = vmatpush.msra.mxu3 %v4336_v5  ;;  %5640 = vmatpush.msrb.mxu0 %v4481_v15  ;;  %v4493_v40 = vld [vmem:[#allocation12 + $0x788] sm:$0xff]  ;;  %v948_v41 = vrot.slane %v869_v37, 1  ;;  %v952_v52 = vrot.slane %v872_v38, 1  ;;  %v987_v43 = vld [vmem:[#allocation2 + $0xd0] sm:$0xfc] }
 0x170   : > { %5532 = vmatmul.f32.gmra.mxu1 %v9348_v16  ;;  %v795_v3 = vrot.slane %v664_v58, 4  ;;  %v941_v16 = vsel %vm905_vm3, %v939_v44, %v940_v61  ;;  %5233 = vmatpush.msra.mxu2 %v4318_v19  ;;  %v986_v58 = vld [vmem:[#allocation2 + $0xb0] sm:$0xfc]  ;;  %v9463_v44 = vpop.f32.mrf.mxu2  ;;  %v9466_v61 = vpop.f32.mrf.mxu3  ;;  %v1054_v62 = vrot.slane %v987_v43, 2  ;;  %v992_v5 = vld [vmem:[#allocation2 + $0x40] sm:$0x3] }
 0x171   : > { %v798_v4 = vrot.slane %v665_v21, 4  ;;  %5273 = vmatpush.msra.mxu3 %v4335_v11  ;;  %5641 = vmatpush.msrb.mxu0 %v4480_v17  ;;  %v950_v53 = vsel %vm905_vm3, %v948_v41, %v949_v42  ;;  %v993_v15 = vld [vmem:[#allocation2 + $0x178] sm:$0x3]  ;;  %v4555_v37 = vld [vmem:[#allocation12 + $0x978] sm:$0xff]  ;;  %v4409_v41 = vld [vmem:[#allocation12 + $0x4e8] sm:$0xff] }
 0x172   : > { %v796_v22 = vsel %vm481_vm0, %v794_v54, %v795_v3  ;;  %807 = vst [vmem:[#allocation2 + $0x158] sm:$0xf] %v795_v3  ;;  %5682 = vmatpush.msrb.mxu1 %v4496_v18  ;;  %5234 = vmatpush.msra.mxu2 %v4317_v27  ;;  %v953_v54 = vsel %vm905_vm3, %v951_v51, %v952_v52  ;;  %v1061_v9 = vrot.slane %v993_v15, 2  ;;  %v1599_v11 = vld [vmem:[#allocation2 + $0x178] sm:$0x3]  ;;  %v4571_v2 = vld [vmem:[#allocation12 + $0x9f8] sm:$0xff] }
 0x173   : > { %v799_v6 = vsel %vm481_vm0, %v797_v55, %v798_v4  ;;  %805 = vst [vmem:[#allocation2 + $0x70] sm:$0xff] %v796_v22  ;;  %5169 = vmatmul.f32.gmra.mxu2 %v938_v7  ;;  %5274 = vmatpush.msra.mxu3 %v4334_v14  ;;  %v988_v55 = vld [vmem:[#allocation2 + $0x10] sm:$0x3]  ;;  %v1596_v22 = vld [vmem:[#allocation2 + $0x160] sm:$0xfc]  ;;  %v1058_v7 = vrot.slane %v992_v5, 2 }
 0x174   : > { %806 = vst [vmem:[#allocation2 + $0x30] sm:$0xff] %v799_v6  ;;  %5210 = vmatmul.f32.gmra.mxu3 %v941_v16  ;;  %5642 = vmatpush.msrb.mxu0 %v4479_v24  ;;  %v1052_v21 = vrot.slane %v988_v55, 2  ;;  %v1598_v6 = vld [vmem:[#allocation2 + $0x40] sm:$0x3]  ;;  %v1660_v17 = vrot.slane %v1596_v22, 2  ;;  %v1664_v19 = vrot.slane %v1599_v11, 2 }
 0x175   : > { %808 = vst [vmem:[#allocation2 + $0x150] sm:$0xf] %v798_v4  ;;  %5683 = vmatpush.msrb.mxu1 %v4495_v26  ;;  %5275 = vmatpush.msra.mxu3 %v4333_v1  ;;  %v990_v4 = vld [vmem:[#allocation2 + $0x160] sm:$0xfc]  ;;  %v1661_v18 = vrot.slane %v1598_v6, 2  ;;  %v4411_v26 = vld [vmem:[#allocation12 + $0x4f8] sm:$0xff] }
 0x176   : > { %5494 = vmatmul.f32.gmra.mxu0 %v9367_v31  ;;  %v944_v31 = vsel %vm905_vm3, %v942_v28, %v943_v20  ;;  %5235 = vmatpush.msra.mxu2 %v4316_v35  ;;  %v994_v14 = vld [vmem:[#allocation2 + $0x108] sm:$0xfc]  ;;  %v4394_v27 = vld [vmem:[#allocation12 + $0x470] sm:$0xff]  ;;  %v1602_v28 = vld [vmem:[#allocation2 + $0x90] sm:$0x3]  ;;  %v1064_v1 = vrot.slane %v996_v23, 2 }
 0x177   : > { %5643 = vmatpush.msrb.mxu0 %v4478_v30  ;;  %5684 = vmatpush.msrb.mxu1 %v4494_v34  ;;  %v1662_v24 = vsel %vm1050_vm4, %v1660_v17, %v1661_v18  ;;  %v4410_v30 = vld [vmem:[#allocation12 + $0x4f0] sm:$0xff]  ;;  %v1067_v35 = vrot.slane %v997_v57, 2  ;;  %v1667_v38 = vrot.slane %v1602_v28, 2  ;;  %v998_v52 = vld [vmem:[#allocation2 + $0x148] sm:$0xfc]  ;;  %v4391_v22 = vld [vmem:[#allocation12 + $0x458] sm:$0xff] }
 0x178   : > { %5535 = vmatmul.f32.gmra.mxu1 %v9370_v32  ;;  %v4332_v32 = vld [vmem:[#allocation12 + $0x280] sm:$0xff]  ;;  %5384 = vmatpush.msrb.mxu2 %v4395_v25  ;;  %v1603_v34 = vld [vmem:[#allocation2 + $0x118] sm:$0x3]  ;;  %v1604_v15 = vld [vmem:[#allocation2 + $0x148] sm:$0xfc] }
 0x179   : > { %5276 = vmatpush.msra.mxu3 %v4332_v32  ;;  %5644 = vmatpush.msrb.mxu0 %v4477_v39  ;;  %v4393_v32 = vld [vmem:[#allocation12 + $0x468] sm:$0xff]  ;;  %v1601_v39 = vld [vmem:[#allocation2 + $0x110] sm:$0xfc]  ;;  %v1000_v43 = vld [vmem:[#allocation2 + $0x58] sm:$0x3]  ;;  %v1672_v23 = vrot.slane %v1604_v15, 2 }
 0x17a   : > { %5685 = vmatpush.msrb.mxu1 %v4493_v40  ;;  %5385 = vmatpush.msrb.mxu2 %v4394_v27  ;;  %v1066_v40 = vrot.slane %v995_v29, 2  ;;  %v4554_v42 = vld [vmem:[#allocation12 + $0x970] sm:$0xff]  ;;  %v4568_v18 = vld [vmem:[#allocation12 + $0x9e0] sm:$0xff]  ;;  %v4551_v57 = vld [vmem:[#allocation12 + $0x958] sm:$0xff] }
 0x17b   : > { %5172 = vmatmul.f32.gmra.mxu2 %v944_v31  ;;  %5645 = vmatpush.msrb.mxu0 %v4476_v45  ;;  %v1665_v31 = vsel %vm1050_vm4, %v1663_v13, %v1664_v19  ;;  %v1606_v6 = vld [vmem:[#allocation2 + $0x58] sm:$0x3]  ;;  %v1605_v13 = vld [vmem:[#allocation2 + $0x100] sm:$0xfc]  ;;  %v4389_v27 = vld [vmem:[#allocation12 + $0x448] sm:$0xff] }
 0x17c   : > { %5213 = vmatmul.f32.gmra.mxu3 %v947_v36  ;;  %5686 = vmatpush.msrb.mxu1 %v4492_v46  ;;  %v1063_v36 = vrot.slane %v994_v14, 2  ;;  %v1666_v46 = vrot.slane %v1600_v33, 2  ;;  %v1607_v19 = vld [vmem:[#allocation2 + $0xd8] sm:$0x3]  ;;  %v1673_v14 = vrot.slane %v1606_v6, 2  ;;  %v1675_v29 = vrot.slane %v1605_v13, 2 }
 0x17d   : > { %5425 = vmatpush.msrb.mxu3 %v4411_v26  ;;  %5794 = vmatpush.msra.mxu0 %v4555_v37  ;;  %v4567_v26 = vld [vmem:[#allocation12 + $0x9d8] sm:$0xff]  ;;  %v1004_v33 = vld [vmem:[#allocation2 + $0x138] sm:$0x3]  ;;  %v4564_v6 = vld [vmem:[#allocation12 + $0x9c0] sm:$0xff] }
 0x17e   : > { %5497 = vmatmul.f32.gmra.mxu0 %v9380_v49  ;;  %v989_v49 = vld [vmem:[#allocation2 + $0x48] sm:$0x3]  ;;  %v9472_v16 = vpop.f32.mrf.mxu2  ;;  %v1065_v51 = vsel %vm1050_vm4, %v1063_v36, %v1064_v1  ;;  %5835 = vmatpush.msra.mxu1 %v4571_v2  ;;  %v1668_v5 = vsel %vm1050_vm4, %v1666_v46, %v1667_v38  ;;  %v4550_v36 = vld [vmem:[#allocation12 + $0x950] sm:$0xff]  ;;  %v4547_v13 = vld [vmem:[#allocation12 + $0x938] sm:$0xff] }
 0x17f   : > { %v1055_v59 = vrot.slane %v989_v49, 2  ;;  %v9476_v12 = vpop.f32.mrf.mxu3  ;;  %5426 = vmatpush.msrb.mxu3 %v4410_v30  ;;  %5386 = vmatpush.msrb.mxu2 %v4393_v32  ;;  %v1676_v30 = vrot.slane %v1607_v19, 2  ;;  %v4566_v37 = vld [vmem:[#allocation12 + $0x9d0] sm:$0xff]  ;;  %v1674_v32 = vsel %vm1050_vm4, %v1672_v23, %v1673_v14  ;;  %v4404_v46 = vld [vmem:[#allocation12 + $0x4c0] sm:$0xff]  ;;  %v4563_v19 = vld [vmem:[#allocation12 + $0x9b8] sm:$0xff] }
 0x180   : > { %5538 = vmatmul.f32.gmra.mxu1 %v9382_v50  ;;  %v1051_v50 = vrot.slane %v986_v58, 2  ;;  %v1670_v58 = vrot.slane %v1603_v34, 2  ;;  %5795 = vmatpush.msra.mxu0 %v4554_v42  ;;  %v4405_v34 = vld [vmem:[#allocation12 + $0x4c8] sm:$0xff]  ;;  %v1610_v38 = vld [vmem:[#allocation2 + $0x138] sm:$0x3] }
 0x181   : > { %v1056_v3 = vsel %vm1050_vm4, %v1054_v62, %v1055_v59  ;;  %v999_v59 = vld [vmem:[#allocation2 + $0x100] sm:$0xfc]  ;;  %5427 = vmatpush.msrb.mxu3 %v4409_v41  ;;  %v1001_v62 = vld [vmem:[#allocation2 + $0xd8] sm:$0x3]  ;;  %v1076_v41 = vrot.slane %v1004_v33, 2 }
 0x182   : > { %v1053_v0 = vsel %vm1050_vm4, %v1051_v50, %v1052_v21  ;;  %v1068_v21 = vsel %vm1050_vm4, %v1066_v40, %v1067_v35  ;;  %v4408_v50 = vld [vmem:[#allocation12 + $0x4e0] sm:$0xff]  ;;  %v1072_v11 = vrot.slane %v999_v59, 2  ;;  %v1073_v17 = vrot.slane %v1001_v62, 2  ;;  %v1005_v35 = vld [vmem:[#allocation2 + $0x120] sm:$0x3]  ;;  %v4546_v33 = vld [vmem:[#allocation12 + $0x930] sm:$0xff] }
 0x183   : > { %5175 = vmatmul.f32.gmra.mxu2 %v950_v53  ;;  %v4570_v53 = vld [vmem:[#allocation12 + $0x9f0] sm:$0xff]  ;;  %5428 = vmatpush.msrb.mxu3 %v4408_v50  ;;  %v4388_v40 = vld [vmem:[#allocation12 + $0x440] sm:$0xff]  ;;  %v4403_v50 = vld [vmem:[#allocation12 + $0x4b8] sm:$0xff]  ;;  %v1679_v62 = vrot.slane %v1610_v38, 2 }
 0x184   : > { %5216 = vmatmul.f32.gmra.mxu3 %v953_v54  ;;  %v4392_v54 = vld [vmem:[#allocation12 + $0x460] sm:$0xff]  ;;  %5836 = vmatpush.msra.mxu1 %v4570_v53  ;;  %v1003_v42 = vld [vmem:[#allocation2 + $0x130] sm:$0xfc]  ;;  %v1613_v38 = vld [vmem:[#allocation2 + $0xa8] sm:$0xfc] }
 0x185   : > { %5387 = vmatpush.msrb.mxu2 %v4392_v54  ;;  %v1608_v53 = vld [vmem:[#allocation2 + $0x80] sm:$0xfc]  ;;  %v1079_v54 = vrot.slane %v1005_v35, 2 }
 0x186   : > { %5500 = vmatmul.f32.gmra.mxu0 %v9395_v47  ;;  %v991_v47 = vld [vmem:[#allocation2 + $0x128] sm:$0xfc]  ;;  %v9486_v45 = vpop.f32.mrf.mxu2 }
 0x187   : > { %v1060_v8 = vrot.slane %v991_v47, 2  ;;  %v9491_v49 = vpop.f32.mrf.mxu3  ;;  %v1669_v47 = vrot.slane %v1601_v39, 2  ;;  %5388 = vmatpush.msrb.mxu2 %v4391_v22  ;;  %v1002_v39 = vld [vmem:[#allocation2 + $0x80] sm:$0xfc] }
 0x188   : > { %5541 = vmatmul.f32.gmra.mxu1 %v9398_v48  ;;  %v1057_v48 = vrot.slane %v990_v4, 2  ;;  %v1075_v59 = vrot.slane %v1002_v39, 2  ;;  %v1006_v22 = vld [vmem:[#allocation2 + $0xe0] sm:$0xfc]  ;;  %v1615_v39 = vld [vmem:[#allocation2 + $0x168] sm:$0x3] }
 0x189   : > { %v1062_v20 = vsel %vm1050_vm4, %v1060_v8, %v1061_v9  ;;  %v4407_v8 = vld [vmem:[#allocation12 + $0x4d8] sm:$0xff]  ;;  %v4552_v9 = vld [vmem:[#allocation12 + $0x960] sm:$0xff]  ;;  %v1671_v10 = vsel %vm1050_vm4, %v1669_v47, %v1670_v58  ;;  %v4565_v58 = vld [vmem:[#allocation12 + $0x9c8] sm:$0xff]  ;;  %v1678_v47 = vrot.slane %v1608_v53, 2 }
 0x18a   : > { %v1059_v56 = vsel %vm1050_vm4, %v1057_v48, %v1058_v7  ;;  %v1069_v48 = vrot.slane %v998_v52, 2  ;;  %v1070_v7 = vrot.slane %v1000_v43, 2  ;;  %5429 = vmatpush.msrb.mxu3 %v4407_v8  ;;  %v1677_v52 = vsel %vm1050_vm4, %v1675_v29, %v1676_v30  ;;  %v1611_v43 = vld [vmem:[#allocation2 + $0x120] sm:$0x3] }
 0x18b   : > { %5236 = vmatmul.f32.vlgmr.msra.gmra.mxu2 %v1053_v0  ;;  %v4553_v0 = vld [vmem:[#allocation12 + $0x968] sm:$0xff]  ;;  %v1077_v15 = vsel %vm1050_vm4, %v1075_v59, %v1076_v41  ;;  %v1682_v8 = vrot.slane %v1611_v43, 2  ;;  %v1680_v14 = vsel %vm1050_vm4, %v1678_v47, %v1679_v62  ;;  %v1081_v29 = vrot.slane %v1006_v22, 2  ;;  %v4383_v53 = vld [vmem:[#allocation12 + $0x418] sm:$0xff] }
 0x18c   : > { %5277 = vmatmul.f32.vlgmr.msra.gmra.mxu3 %v1056_v3  ;;  %v4569_v3 = vld [vmem:[#allocation12 + $0x9e8] sm:$0xff]  ;;  %5796 = vmatpush.msra.mxu0 %v4553_v0  ;;  %v1071_v25 = vsel %vm1050_vm4, %v1069_v48, %v1070_v7  ;;  %v1609_v0 = vld [vmem:[#allocation2 + $0x130] sm:$0xfc]  ;;  %v1012_v59 = vld [vmem:[#allocation2 + $0x20] sm:$0x3] }
 0x18d   : > { %5837 = vmatpush.msra.mxu1 %v4569_v3  ;;  %v1078_v3 = vrot.slane %v1003_v42, 2  ;;  %v4386_v48 = vld [vmem:[#allocation12 + $0x430] sm:$0xff] }
 0x18e   : > { %5503 = vmatmul.f32.gmra.mxu0 %v654_v60  ;;  %v9479_v60 = vpop.f32.mrf.mxu0 }
 0x18f   : > { %5797 = vmatpush.msra.mxu0 %v4552_v9  ;;  %5838 = vmatpush.msra.mxu1 %v4568_v18  ;;  %v1080_v9 = vsel %vm1050_vm4, %v1078_v3, %v1079_v54  ;;  %v4544_v3 = vld [vmem:[#allocation12 + $0x920] sm:$0xff] }
 0x190   : > { %5544 = vmatmul.f32.gmra.mxu1 %v655_v63  ;;  %v9482_v63 = vpop.f32.mrf.mxu1 }
 0x191   : > { %5798 = vmatpush.msra.mxu0 %v4551_v57  ;;  %5839 = vmatpush.msra.mxu1 %v4567_v26  ;;  %v1681_v57 = vrot.slane %v1609_v0, 2  ;;  %v4385_v26 = vld [vmem:[#allocation12 + $0x428] sm:$0xff]  ;;  %v1013_v0 = vld [vmem:[#allocation2 + $0x88] sm:$0x3] }
 0x193   : > { %5239 = vmatmul.f32.gmra.mxu2 %v1059_v56  ;;  %v4390_v56 = vld [vmem:[#allocation12 + $0x450] sm:$0xff]  ;;  %5799 = vmatpush.msra.mxu0 %v4550_v36 }
 0x194   : > { %5280 = vmatmul.f32.gmra.mxu3 %v1062_v20  ;;  %v4406_v20 = vld [vmem:[#allocation12 + $0x4d0] sm:$0xff]  ;;  %5389 = vmatpush.msrb.mxu2 %v4390_v56  ;;  %v1009_v56 = vld [vmem:[#allocation2 + $0x168] sm:$0x3] }
 0x195   : > { %5430 = vmatpush.msrb.mxu3 %v4406_v20  ;;  %5840 = vmatpush.msra.mxu1 %v4566_v37  ;;  %v1085_v36 = vrot.slane %v1009_v56, 2  ;;  %v4562_v37 = vld [vmem:[#allocation12 + $0x9b0] sm:$0xff] }
 0x196   : > { %5646 = vmatmul.f32.vlgmr.msrb.gmra.mxu0 %v1662_v24  ;;  %v9489_v55 = vpop.f32.mrf.mxu0  ;;  %v9498_v24 = vpop.f32.mrf.mxu2  ;;  %5390 = vmatpush.msrb.mxu2 %v4389_v27  ;;  %v1614_v27 = vld [vmem:[#allocation2 + $0xb8] sm:$0x3] }
 0x197   : > { %v9503_v1 = vpop.f32.mrf.mxu3  ;;  %5431 = vmatpush.msrb.mxu3 %v4405_v34  ;;  %5841 = vmatpush.msra.mxu1 %v4565_v58  ;;  %v1683_v34 = vsel %vm1050_vm4, %v1681_v57, %v1682_v8  ;;  %v1685_v42 = vrot.slane %v1614_v27, 2  ;;  %v1687_v58 = vrot.slane %v1613_v38, 2  ;;  %v4382_v8 = vld [vmem:[#allocation12 + $0x410] sm:$0xff]  ;;  %v4381_v57 = vld [vmem:[#allocation12 + $0x408] sm:$0xff] }
 0x198   : > { %5687 = vmatmul.f32.vlgmr.msrb.gmra.mxu1 %v1665_v31  ;;  %v9494_v4 = vpop.f32.mrf.mxu1  ;;  %v1074_v31 = vsel %vm1050_vm4, %v1072_v11, %v1073_v17  ;;  %5391 = vmatpush.msrb.mxu2 %v4388_v40  ;;  %v1007_v11 = vld [vmem:[#allocation2 + $0xa8] sm:$0xfc]  ;;  %v4402_v17 = vld [vmem:[#allocation12 + $0x4b0] sm:$0xff]  ;;  %v4400_v40 = vld [vmem:[#allocation12 + $0x4a0] sm:$0xff] }
 0x199   : > { %5432 = vmatpush.msrb.mxu3 %v4404_v46  ;;  %5842 = vmatpush.msra.mxu1 %v4564_v6  ;;  %v1084_v35 = vrot.slane %v1007_v11, 2  ;;  %v4545_v46 = vld [vmem:[#allocation12 + $0x928] sm:$0xff]  ;;  %v1618_v6 = vld [vmem:[#allocation2 + $0x20] sm:$0x3]  ;;  %v4398_v11 = vld [vmem:[#allocation12 + $0x490] sm:$0xff] }
 0x19a   : > { %v4397_v27 = vld [vmem:[#allocation12 + $0x488] sm:$0xff] }
 0x19b   : > { %5242 = vmatmul.f32.gmra.mxu2 %v1065_v51  ;;  %v4549_v51 = vld [vmem:[#allocation12 + $0x948] sm:$0xff]  ;;  %5433 = vmatpush.msrb.mxu3 %v4403_v50  ;;  %v1086_v43 = vsel %vm1050_vm4, %v1084_v35, %v1085_v36  ;;  %v4399_v50 = vld [vmem:[#allocation12 + $0x498] sm:$0xff]  ;;  %v1014_v36 = vld [vmem:[#allocation2 + $0xa0] sm:$0xfc] }
 0x19c   : > { %5283 = vmatmul.f32.gmra.mxu3 %v1068_v21  ;;  %v4387_v21 = vld [vmem:[#allocation12 + $0x438] sm:$0xff]  ;;  %5800 = vmatpush.msra.mxu0 %v4549_v51 }
 0x19d   : > { %5392 = vmatpush.msrb.mxu2 %v4387_v21  ;;  %5434 = vmatpush.msrb.mxu3 %v4402_v17  ;;  %v1688_v21 = vrot.slane %v1615_v39, 2  ;;  %v4543_v17 = vld [vmem:[#allocation12 + $0x918] sm:$0xff] }
 0x19e   : > { %5649 = vmatmul.f32.gmra.mxu0 %v1668_v5  ;;  %v9501_v28 = vpop.f32.mrf.mxu0  ;;  %v4548_v5 = vld [vmem:[#allocation12 + $0x940] sm:$0xff]  ;;  %v9514_v18 = vpop.f32.mrf.mxu2  ;;  %5843 = vmatpush.msra.mxu1 %v4563_v19  ;;  %v1091_v19 = vrot.slane %v1013_v0, 2  ;;  %v1622_v0 = vld [vmem:[#allocation2 + $0xf0] sm:$0x3] }
 0x19f   : > { %5801 = vmatpush.msra.mxu0 %v4548_v5  ;;  %v9518_v23 = vpop.f32.mrf.mxu3  ;;  %5393 = vmatpush.msrb.mxu2 %v4386_v48  ;;  %v4560_v5 = vld [vmem:[#allocation12 + $0x9a0] sm:$0xff]  ;;  %v1010_v48 = vld [vmem:[#allocation2 + $0xe8] sm:$0xfc]  ;;  %v1689_v56 = vsel %vm1050_vm4, %v1687_v58, %v1688_v21 }
 0x1a0   : > { %5690 = vmatmul.f32.gmra.mxu1 %v1671_v10  ;;  %v9506_v2 = vpop.f32.mrf.mxu1  ;;  %v1008_v10 = vld [vmem:[#allocation2 + $0xb8] sm:$0x3] }
 0x1a1   : > { %v1082_v30 = vrot.slane %v1008_v10, 2  ;;  %5802 = vmatpush.msra.mxu0 %v4547_v13  ;;  %5394 = vmatpush.msrb.mxu2 %v4385_v26  ;;  %v1011_v10 = vld [vmem:[#allocation2 + $0xf8] sm:$0xfc]  ;;  %v1616_v13 = vld [vmem:[#allocation2 + $0xe8] sm:$0xfc]  ;;  %v1087_v26 = vrot.slane %v1010_v48, 2 }
 0x1a2   : > { %5844 = vmatpush.msra.mxu1 %v4562_v37  ;;  %v4558_v37 = vld [vmem:[#allocation12 + $0x990] sm:$0xff] }
 0x1a3   : > { %5245 = vmatmul.f32.gmra.mxu2 %v1071_v25  ;;  %v1612_v25 = vld [vmem:[#allocation2 + $0xe0] sm:$0xfc]  ;;  %5803 = vmatpush.msra.mxu0 %v4546_v33  ;;  %v1083_v51 = vsel %vm1050_vm4, %v1081_v29, %v1082_v30  ;;  %v1691_v29 = vrot.slane %v1618_v6, 2  ;;  %v1617_v30 = vld [vmem:[#allocation2 + $0xf8] sm:$0xfc]  ;;  %v4542_v33 = vld [vmem:[#allocation12 + $0x910] sm:$0xff] }
 0x1a4   : > { %5286 = vmatmul.f32.gmra.mxu3 %v1074_v31  ;;  %v4401_v31 = vld [vmem:[#allocation12 + $0x4a8] sm:$0xff]  ;;  %v1684_v41 = vrot.slane %v1612_v25, 2  ;;  %v1619_v25 = vld [vmem:[#allocation2 + $0x88] sm:$0x3] }
 0x1a5   : > { %5435 = vmatpush.msrb.mxu3 %v4401_v31  ;;  %5804 = vmatpush.msra.mxu0 %v4545_v46  ;;  %v1090_v31 = vrot.slane %v1011_v10, 2  ;;  %v1694_v39 = vrot.slane %v1619_v25, 2  ;;  %v4396_v46 = vld [vmem:[#allocation12 + $0x480] sm:$0xff] }
 0x1a6   : > { %5652 = vmatmul.f32.gmra.mxu0 %v1674_v32  ;;  %v9511_v7 = vpop.f32.mrf.mxu0  ;;  %v4384_v32 = vld [vmem:[#allocation12 + $0x420] sm:$0xff]  ;;  %v1686_v22 = vsel %vm1050_vm4, %v1684_v41, %v1685_v42  ;;  %v1016_v41 = vld [vmem:[#allocation2 + $0xf0] sm:$0x3]  ;;  %v1015_v42 = vld [vmem:[#allocation2 + $0x170] sm:$0xfc] }
 0x1a7   : > { %5395 = vmatpush.msrb.mxu2 %v4384_v32  ;;  %5436 = vmatpush.msrb.mxu3 %v4400_v40  ;;  %v4380_v32 = vld [vmem:[#allocation12 + $0x400] sm:$0xff]  ;;  %v1092_v40 = vsel %vm1050_vm4, %v1090_v31, %v1091_v19 }
 0x1a8   : > { %5693 = vmatmul.f32.gmra.mxu1 %v1677_v52  ;;  %v9516_v20 = vpop.f32.mrf.mxu1  ;;  %v4561_v52 = vld [vmem:[#allocation12 + $0x9a8] sm:$0xff]  ;;  %5805 = vmatpush.msra.mxu0 %v4544_v3  ;;  %v1093_v3 = vrot.slane %v1014_v36, 2  ;;  %v4556_v6 = vld [vmem:[#allocation12 + $0x980] sm:$0xff]  ;;  %v1276_v36 = vld [vmem:[#allocation2 + $0xb0] sm:$0xf0] }
 0x1a9   : > { %5845 = vmatpush.msra.mxu1 %v4561_v52  ;;  %5396 = vmatpush.msrb.mxu2 %v4383_v53  ;;  %v4541_v52 = vld [vmem:[#allocation12 + $0x908] sm:$0xff]  ;;  %v1626_v31 = vld [vmem:[#allocation2 + $0x28] sm:$0x3] }
 0x1aa   : > { %5437 = vmatpush.msrb.mxu3 %v4399_v50  ;;  %5806 = vmatpush.msra.mxu0 %v4543_v17  ;;  %v4557_v53 = vld [vmem:[#allocation12 + $0x988] sm:$0xff]  ;;  %v1623_v17 = vld [vmem:[#allocation2 + $0x140] sm:$0x3] }
 0x1ab   : > { %5248 = vmatmul.f32.gmra.mxu2 %v1077_v15  ;;  %5846 = vmatpush.msra.mxu1 %v4560_v5  ;;  %v1094_v5 = vrot.slane %v1016_v41, 2  ;;  %v1700_v25 = vrot.slane %v1623_v17, 2  ;;  %v1282_v17 = vld [vmem:[#allocation2 + $0x40] sm:$0xf] }
 0x1ac   : > { %5289 = vmatmul.f32.gmra.mxu3 %v1080_v9  ;;  %v1088_v9 = vrot.slane %v1012_v59, 2  ;;  %5397 = vmatpush.msrb.mxu2 %v4382_v8  ;;  %v1620_v59 = vld [vmem:[#allocation2 + $0xa0] sm:$0xfc] }
 0x1ad   : > { %5438 = vmatpush.msrb.mxu3 %v4398_v11  ;;  %5807 = vmatpush.msra.mxu0 %v4542_v33  ;;  %v1621_v11 = vld [vmem:[#allocation2 + $0x170] sm:$0xfc]  ;;  %v1095_v19 = vsel %vm1050_vm4, %v1093_v3, %v1094_v5  ;;  %v9550_v33 = vld [vmem:[#allocation14] ss:$0 sm:$0xff] }
 0x1ae   : > { %5655 = vmatmul.f32.gmra.mxu0 %v1680_v14  ;;  %v9523_v54 = vpop.f32.mrf.mxu0  ;;  %v9526_v62 = vpop.f32.mrf.mxu2  ;;  %v4559_v14 = vld [vmem:[#allocation12 + $0x998] sm:$0xff]  ;;  %v1089_v35 = vsel %vm1050_vm4, %v1087_v26, %v1088_v9  ;;  %5398 = vmatpush.msrb.mxu2 %v4381_v57  ;;  %v1096_v9 = vrot.slane %v1015_v42, 2  ;;  %v1699_v57 = vrot.slane %v1621_v11, 2  ;;  %v1280_v11 = vld [vmem:[#allocation2 + $0x160] sm:$0xf0] }
 0x1af   : > { %v9530_v15 = vpop.f32.mrf.mxu3  ;;  %5847 = vmatpush.msra.mxu1 %v4559_v14  ;;  %5439 = vmatpush.msrb.mxu3 %v4397_v27  ;;  %v1278_v27 = vld [vmem:[#allocation2 + $0x10] sm:$0xf] }
 0x1b0   : > { %5696 = vmatmul.f32.gmra.mxu1 %v1683_v34  ;;  %v9528_v47 = vpop.f32.mrf.mxu1  ;;  %v1690_v34 = vrot.slane %v1616_v13, 2  ;;  %5399 = vmatpush.msrb.mxu2 %v4380_v32  ;;  %v1697_v13 = vrot.slane %v1622_v0, 2  ;;  %v1341_v41 = vrot.slane %v1278_v27, 4  ;;  %v5074_v0 = vadd.f32 %v9550_v33, %v9463_v44  ;;  %v1886_v27 = vld [vmem:[#allocation2 + $0x40] sm:$0xf] }
 0x1b1   : > { %5848 = vmatpush.msra.mxu1 %v4558_v37  ;;  %5440 = vmatpush.msrb.mxu3 %v4396_v46  ;;  %v1277_v37 = vld [vmem:[#allocation2 + $0xd0] sm:$0xf0]  ;;  %v1701_v46 = vsel %vm1050_vm4, %v1699_v57, %v1700_v25 }
 0x1b2   : > { %v1692_v21 = vsel %vm1050_vm4, %v1690_v34, %v1691_v29  ;;  %5808 = vmatpush.msra.mxu0 %v4541_v52  ;;  %v1279_v29 = vld [vmem:[#allocation2 + $0x48] sm:$0xf]  ;;  %v5115_v44 = vadd.f32 %v9466_v61, %v5074_v0  ;;  %v5077_v61 = vadd.f32 %v9550_v33, %v9472_v16  ;;  %v1287_v0 = vld [vmem:[#allocation2 + $0x118] sm:$0xf] }
 0x1b3   : > { %5251 = vmatmul.f32.gmra.mxu2 %v1083_v51  ;;  %v1017_v51 = vld [vmem:[#allocation2 + $0x140] sm:$0x3]  ;;  %5849 = vmatpush.msra.mxu1 %v4557_v53  ;;  %v1344_v42 = vrot.slane %v1279_v29, 4  ;;  %v1346_v29 = vrot.slane %v1280_v11, 4 }
 0x1b4   : > { %5292 = vmatmul.f32.gmra.mxu3 %v1086_v43  ;;  %v1693_v43 = vrot.slane %v1617_v30, 2  ;;  %v1097_v10 = vrot.slane %v1017_v51, 2  ;;  %v1624_v30 = vld [vmem:[#allocation2 + $0x60] sm:$0xfc] }
 0x1b5   : > { %5850 = vmatpush.msra.mxu1 %v4556_v6  ;;  %v1702_v53 = vrot.slane %v1624_v30, 2  ;;  %v1347_v30 = vrot.slane %v1282_v17, 4  ;;  %v1890_v17 = vld [vmem:[#allocation2 + $0x90] sm:$0xf] }
 0x1b6   : > { %5658 = vmatmul.f32.gmra.mxu0 %v1686_v22  ;;  %v9535_v38 = vpop.f32.mrf.mxu0  ;;  %v9541_v50 = vpop.f32.mrf.mxu2  ;;  %v4540_v22 = vld [vmem:[#allocation12 + $0x900] sm:$0xff]  ;;  %v1695_v8 = vsel %vm1050_vm4, %v1693_v43, %v1694_v39  ;;  %v1098_v26 = vsel %vm1050_vm4, %v1096_v9, %v1097_v10  ;;  %v1625_v39 = vld [vmem:[#allocation2 + $0xc8] sm:$0xfc]  ;;  %v1340_v43 = vrot.slane %v1276_v36, 4 }
 0x1b7   : > { %v9543_v48 = vpop.f32.mrf.mxu3  ;;  %5809 = vmatpush.msra.mxu0 %v4540_v22  ;;  %v1705_v5 = vrot.slane %v1625_v39, 2  ;;  %v1887_v39 = vld [vmem:[#allocation2 + $0x178] sm:$0xf] }
 0x1b8   : > { %5699 = vmatmul.f32.gmra.mxu1 %v1689_v56  ;;  %v9538_v58 = vpop.f32.mrf.mxu1  ;;  %v1696_v56 = vrot.slane %v1620_v59, 2  ;;  %v1343_v59 = vrot.slane %v1277_v37, 4  ;;  %v1342_v6 = vsel %vm481_vm0, %v1340_v43, %v1341_v41  ;;  %v1286_v43 = vld [vmem:[#allocation2 + $0x90] sm:$0xf] }
 0x1ba   : > { %v1345_v10 = vsel %vm481_vm0, %v1343_v59, %v1344_v42  ;;  %v1949_v42 = vrot.slane %v1886_v27, 4  ;;  %v1284_v59 = vld [vmem:[#allocation2 + $0x108] sm:$0xf0] }
 0x1bb   : > { %5254 = vmatmul.f32.gmra.mxu2 %v1089_v35  ;;  %v1698_v35 = vsel %vm1050_vm4, %v1696_v56, %v1697_v13  ;;  %v1281_v56 = vld [vmem:[#allocation2 + $0x128] sm:$0xf0]  ;;  %v1283_v13 = vld [vmem:[#allocation2 + $0x178] sm:$0xf] }
 0x1bc   : > { %5295 = vmatmul.f32.gmra.mxu3 %v1092_v40  ;;  %v1627_v40 = vld [vmem:[#allocation2 + $0x38] sm:$0x3]  ;;  %v1349_v36 = vrot.slane %v1281_v56, 4  ;;  %v1350_v37 = vrot.slane %v1283_v13, 4  ;;  %v1353_v56 = vrot.slane %v1286_v43, 4  ;;  %v4456_v43 = vld [vmem:[#allocation12 + $0x660] sm:$0xff] }
 0x1bd   : > { %v1706_v22 = vrot.slane %v1627_v40, 2  ;;  %v1285_v13 = vld [vmem:[#allocation2 + $0x110] sm:$0xf0]  ;;  %v1888_v27 = vld [vmem:[#allocation2 + $0x108] sm:$0xf0] }
 0x1be   : > { %5661 = vmatmul.f32.gmra.mxu0 %v1692_v21  ;;  %v1703_v21 = vrot.slane %v1626_v31, 2 }
 0x1bf   : > { %v1707_v57 = vsel %vm1050_vm4, %v1705_v5, %v1706_v22  ;;  %v5118_v5 = vadd.f32 %v9476_v12, %v5077_v61  ;;  %v1891_v12 = vld [vmem:[#allocation2 + $0x118] sm:$0xf]  ;;  %v1355_v61 = vrot.slane %v1285_v13, 4 }
 0x1c0   : > { %5702 = vmatmul.f32.gmra.mxu1 %v1695_v8  ;;  %v9547_v14 = vpop.f32.mrf.mxu0  ;;  %v1704_v9 = vsel %vm1050_vm4, %v1702_v53, %v1703_v21  ;;  %v1952_v53 = vrot.slane %v1887_v39, 4  ;;  %v1351_v21 = vsel %vm481_vm0, %v1349_v36, %v1350_v37  ;;  %v4457_v36 = vld [vmem:[#allocation12 + $0x668] sm:$0xff]  ;;  %v5080_v37 = vadd.f32 %v9550_v33, %v9486_v45 }
 0x1c1   : > { %v9552_v34 = vpop.f32.mrf.mxu1  ;;  %v1955_v39 = vrot.slane %v1890_v17, 4 }
 0x1c2   : > { %v5121_v17 = vadd.f32 %v9491_v49, %v5080_v37 }
 0x1c3   : > { %5257 = vmatmul.f32.gmra.mxu2 %v1095_v19 }
 0x1c4   : > { %5298 = vmatmul.f32.gmra.mxu3 %v1098_v26  ;;  %v1884_v26 = vld [vmem:[#allocation2 + $0x160] sm:$0xf0] }
 0x1c5   : > { %v1948_v41 = vrot.slane %v1884_v26, 4 }
 0x1c6   : > { %5664 = vmatmul.f32.gmra.mxu0 %v1698_v35  ;;  %v5094_v32 = vpop.f32.mrf.mxu2 }
 0x1c7   : > { %v5095_v51 = vadd.f32 %v9550_v33, %v5094_v32  ;;  %v5135_v52 = vpop.f32.mrf.mxu3  ;;  %v1885_v32 = vld [vmem:[#allocation2 + $0x128] sm:$0xf0]  ;;  %v1950_v22 = vsel %vm481_vm0, %v1948_v41, %v1949_v42  ;;  %v4618_v42 = vld [vmem:[#allocation12 + $0xb70] sm:$0xff] }
 0x1c8   : > { %5705 = vmatmul.f32.gmra.mxu1 %v1701_v46  ;;  %v1348_v46 = vsel %vm481_vm0, %v1346_v29, %v1347_v30  ;;  %v1356_v29 = vrot.slane %v1287_v0, 4  ;;  %v1352_v30 = vrot.slane %v1284_v59, 4  ;;  %v4473_v41 = vld [vmem:[#allocation12 + $0x6e8] sm:$0xff]  ;;  %v1958_v0 = vrot.slane %v1891_v12, 4  ;;  %v1894_v12 = vld [vmem:[#allocation2 + $0x58] sm:$0xf] }
 0x1c9   : > { %v9559_v3 = vadd.f32 %v5135_v52, %v5095_v51  ;;  %v1951_v52 = vrot.slane %v1885_v32, 4 }
 0x1ca   : > { %v1357_v45 = vsel %vm481_vm0, %v1355_v61, %v1356_v29 }
 0x1cb   : > { %v9562_v8 = vpop.f32.mrf.mxu0  ;;  %5400 = vmatmul.f32.vlgmr.msrb.gmra.mxu2 %v1342_v6  ;;  %v4459_v6 = vld [vmem:[#allocation12 + $0x678] sm:$0xff] }
 0x1cc   : > { %5441 = vmatmul.f32.vlgmr.msrb.gmra.mxu3 %v1345_v10  ;;  %v4458_v10 = vld [vmem:[#allocation12 + $0x670] sm:$0xff]  ;;  %5548 = vmatpush.msra.mxu2 %v4459_v6  ;;  %v4472_v6 = vld [vmem:[#allocation12 + $0x6e0] sm:$0xff] }
 0x1cd   : > { %v9567_v19 = vpop.f32.mrf.mxu1 }
 0x1ce   : > { %5667 = vmatmul.f32.gmra.mxu0 %v1704_v9  ;;  %v5155_v25 = vpop.f32.mrf.mxu2  ;;  %v4475_v9 = vld [vmem:[#allocation12 + $0x6f8] sm:$0xff]  ;;  %5549 = vmatpush.msra.mxu2 %v4458_v10  ;;  %v1289_v10 = vld [vmem:[#allocation2 + $0x100] sm:$0xf0] }
 0x1cf   : > { %v5156_v31 = vadd.f32 %v5155_v25, %v5115_v44  ;;  %v5196_v35 = vpop.f32.mrf.mxu3  ;;  %v4474_v44 = vld [vmem:[#allocation12 + $0x6f0] sm:$0xff]  ;;  %5589 = vmatpush.msra.mxu3 %v4475_v9  ;;  %v9591_v9 = vld [vmem:[#allocation2 + $0x148] sm:$0xf0]  ;;  %v1361_v61 = vrot.slane %v1289_v10, 4 }
 0x1d0   : > { %5708 = vmatmul.f32.gmra.mxu1 %v1707_v57  ;;  %v1953_v57 = vsel %vm481_vm0, %v1951_v52, %v1952_v53  ;;  %v1889_v52 = vld [vmem:[#allocation2 + $0x110] sm:$0xf0]  ;;  %v1354_v53 = vsel %vm481_vm0, %v1352_v30, %v1353_v56  ;;  %5550 = vmatpush.msra.mxu2 %v4457_v36  ;;  %v4453_v10 = vld [vmem:[#allocation12 + $0x648] sm:$0xff] }
 0x1d1   : > { %v9572_v40 = vadd.f32 %v5196_v35, %v5156_v31  ;;  %v4619_v31 = vld [vmem:[#allocation12 + $0xb78] sm:$0xff]  ;;  %5590 = vmatpush.msra.mxu3 %v4474_v44  ;;  %v1957_v44 = vrot.slane %v1889_v52, 4 }
 0x1d2   : > { %v4635_v35 = vld [vmem:[#allocation12 + $0xbf8] sm:$0xff]  ;;  %5958 = vmatpush.msrb.mxu0 %v4619_v31  ;;  %5551 = vmatpush.msra.mxu2 %v4456_v43 }
 0x1d3   : > { %v9575_v51 = vpop.f32.mrf.mxu0  ;;  %5403 = vmatmul.f32.gmra.mxu2 %v1348_v46  ;;  %v1954_v46 = vrot.slane %v1888_v27, 4  ;;  %5999 = vmatpush.msrb.mxu1 %v4635_v35  ;;  %v4471_v31 = vld [vmem:[#allocation12 + $0x6d8] sm:$0xff]  ;;  %v4616_v35 = vld [vmem:[#allocation12 + $0xb60] sm:$0xff]  ;;  %v1959_v49 = vsel %vm481_vm0, %v1957_v44, %v1958_v0  ;;  %v1960_v0 = vrot.slane %v9591_v9, 4  ;;  %v4469_v9 = vld [vmem:[#allocation12 + $0x6c8] sm:$0xff] }
 0x1d4   : > { %5444 = vmatmul.f32.gmra.mxu3 %v1351_v21  ;;  %v4634_v21 = vld [vmem:[#allocation12 + $0xbf0] sm:$0xff]  ;;  %5959 = vmatpush.msrb.mxu0 %v4618_v42 }
 0x1d5   : > { %v9579_v16 = vpop.f32.mrf.mxu1  ;;  %5591 = vmatpush.msra.mxu3 %v4473_v41  ;;  %v1956_v13 = vsel %vm481_vm0, %v1954_v46, %v1955_v39  ;;  %6000 = vmatpush.msrb.mxu1 %v4634_v21  ;;  %v4632_v41 = vld [vmem:[#allocation12 + $0xbe0] sm:$0xff]  ;;  %v4454_v42 = vld [vmem:[#allocation12 + $0x650] sm:$0xff]  ;;  %v5083_v21 = vadd.f32 %v9550_v33, %v9498_v24 }
 0x1d6   : > { %5810 = vmatmul.f32.vlgmr.msra.gmra.mxu0 %v1950_v22  ;;  %v5158_v11 = vpop.f32.mrf.mxu2  ;;  %v1290_v22 = vld [vmem:[#allocation2 + $0x58] sm:$0xf]  ;;  %v1893_v46 = vld [vmem:[#allocation2 + $0x100] sm:$0xf0] }
 0x1d7   : > { %v5159_v25 = vadd.f32 %v5158_v11, %v5118_v5  ;;  %v5199_v26 = vpop.f32.mrf.mxu3  ;;  %v1288_v5 = vld [vmem:[#allocation2 + $0x148] sm:$0xf0]  ;;  %v1291_v11 = vld [vmem:[#allocation2 + $0xd8] sm:$0xf]  ;;  %v1359_v30 = vrot.slane %v1290_v22, 4  ;;  %5592 = vmatpush.msra.mxu3 %v4472_v6 }
 0x1d8   : > { %5851 = vmatmul.f32.vlgmr.msra.gmra.mxu1 %v1953_v57  ;;  %v4617_v57 = vld [vmem:[#allocation12 + $0xb68] sm:$0xff]  ;;  %v1358_v29 = vrot.slane %v1288_v5, 4  ;;  %v1362_v39 = vrot.slane %v1291_v11, 4  ;;  %v1895_v52 = vld [vmem:[#allocation2 + $0xd8] sm:$0xf] }
 0x1d9   : > { %v9585_v32 = vadd.f32 %v5199_v26, %v5159_v25  ;;  %v4633_v25 = vld [vmem:[#allocation12 + $0xbe8] sm:$0xff]  ;;  %v4455_v26 = vld [vmem:[#allocation12 + $0x658] sm:$0xff]  ;;  %5960 = vmatpush.msrb.mxu0 %v4617_v57  ;;  %5593 = vmatpush.msra.mxu3 %v4471_v31  ;;  %v1292_v31 = vld [vmem:[#allocation2 + $0x80] sm:$0xf0] }
 0x1da   : > { %6001 = vmatpush.msrb.mxu1 %v4633_v25  ;;  %5552 = vmatpush.msra.mxu2 %v4455_v26  ;;  %v4615_v5 = vld [vmem:[#allocation12 + $0xb58] sm:$0xff]  ;;  %v1360_v22 = vsel %vm481_vm0, %v1358_v29, %v1359_v30  ;;  %v1363_v24 = vsel %vm481_vm0, %v1361_v61, %v1362_v39  ;;  %v4614_v25 = vld [vmem:[#allocation12 + $0xb50] sm:$0xff]  ;;  %v4468_v61 = vld [vmem:[#allocation12 + $0x6c0] sm:$0xff] }
 0x1db   : > { %v9588_v59 = vpop.f32.mrf.mxu0  ;;  %5406 = vmatmul.f32.gmra.mxu2 %v1354_v53  ;;  %v4470_v53 = vld [vmem:[#allocation12 + $0x6d0] sm:$0xff]  ;;  %5961 = vmatpush.msrb.mxu0 %v4616_v35  ;;  %v4631_v6 = vld [vmem:[#allocation12 + $0xbd8] sm:$0xff]  ;;  %v4452_v35 = vld [vmem:[#allocation12 + $0x640] sm:$0xff] }
 0x1dc   : > { %5447 = vmatmul.f32.gmra.mxu3 %v1357_v45  ;;  %v1961_v45 = vrot.slane %v1894_v12, 4  ;;  %6002 = vmatpush.msrb.mxu1 %v4632_v41  ;;  %v1294_v44 = vld [vmem:[#allocation2 + $0x138] sm:$0xf]  ;;  %v1295_v57 = vld [vmem:[#allocation2 + $0x120] sm:$0xf]  ;;  %v4613_v39 = vld [vmem:[#allocation12 + $0xb48] sm:$0xff] }
 0x1dd   : > { %v9594_v56 = vpop.f32.mrf.mxu1  ;;  %5553 = vmatpush.msra.mxu2 %v4454_v42  ;;  %5594 = vmatpush.msra.mxu3 %v4470_v53  ;;  %v4630_v26 = vld [vmem:[#allocation12 + $0xbd0] sm:$0xff]  ;;  %v4629_v53 = vld [vmem:[#allocation12 + $0xbc8] sm:$0xff] }
 0x1de   : > { %5813 = vmatmul.f32.gmra.mxu0 %v1956_v13  ;;  %v5161_v27 = vpop.f32.mrf.mxu2  ;;  %v1964_v13 = vrot.slane %v1895_v52, 4  ;;  %v1962_v29 = vsel %vm481_vm0, %v1960_v0, %v1961_v45  ;;  %v1898_v30 = vld [vmem:[#allocation2 + $0x138] sm:$0xf]  ;;  %6003 = vmatpush.msrb.mxu1 %v4631_v6  ;;  %v1368_v52 = vrot.slane %v1295_v57, 4  ;;  %v1899_v0 = vld [vmem:[#allocation2 + $0x120] sm:$0xf] }
 0x1df   : > { %v5162_v36 = vadd.f32 %v5161_v27, %v5121_v17  ;;  %v5202_v37 = vpop.f32.mrf.mxu3  ;;  %v1963_v17 = vrot.slane %v1893_v46, 4  ;;  %5962 = vmatpush.msrb.mxu0 %v4615_v5  ;;  %v5124_v27 = vadd.f32 %v9503_v1, %v5083_v21  ;;  %5554 = vmatpush.msra.mxu2 %v4453_v10  ;;  %v1896_v46 = vld [vmem:[#allocation2 + $0x80] sm:$0xf0]  ;;  %v4451_v21 = vld [vmem:[#allocation12 + $0x638] sm:$0xff]  ;;  %v1364_v45 = vrot.slane %v1292_v31, 4 }
 0x1e0   : > { %5854 = vmatmul.f32.gmra.mxu1 %v1959_v49  ;;  %5595 = vmatpush.msra.mxu3 %v4469_v9  ;;  %v4467_v5 = vld [vmem:[#allocation12 + $0x6b8] sm:$0xff]  ;;  %v1967_v10 = vrot.slane %v1898_v30, 4  ;;  %v1296_v57 = vld [vmem:[#allocation2 + $0xe0] sm:$0xf0]  ;;  %v1297_v31 = vld [vmem:[#allocation2 + $0xa8] sm:$0xf0] }
 0x1e1   : > { %v9600_v43 = vadd.f32 %v5202_v37, %v5162_v36  ;;  %v1365_v36 = vrot.slane %v1294_v44, 4  ;;  %v1293_v37 = vld [vmem:[#allocation2 + $0x130] sm:$0xf0]  ;;  %v1965_v41 = vsel %vm481_vm0, %v1963_v17, %v1964_v13  ;;  %5963 = vmatpush.msrb.mxu0 %v4614_v25  ;;  %6004 = vmatpush.msrb.mxu1 %v4630_v26  ;;  %v1966_v44 = vrot.slane %v1896_v46, 4  ;;  %v4628_v25 = vld [vmem:[#allocation12 + $0xbc0] sm:$0xff]  ;;  %v4449_v46 = vld [vmem:[#allocation12 + $0x628] sm:$0xff] }
 0x1e2   : > { %5555 = vmatpush.msra.mxu2 %v4452_v35  ;;  %v1897_v17 = vld [vmem:[#allocation2 + $0x130] sm:$0xf0]  ;;  %v1367_v13 = vrot.slane %v1293_v37, 4  ;;  %5596 = vmatpush.msra.mxu3 %v4468_v61  ;;  %v1298_v30 = vld [vmem:[#allocation2 + $0xb8] sm:$0xf] }
 0x1e3   : > { %v9604_v11 = vpop.f32.mrf.mxu0  ;;  %5409 = vmatmul.f32.gmra.mxu2 %v1360_v22  ;;  %v5086_v22 = vadd.f32 %v9550_v33, %v9514_v18  ;;  %5964 = vmatpush.msrb.mxu0 %v4613_v39  ;;  %v1366_v9 = vsel %vm481_vm0, %v1364_v45, %v1365_v36  ;;  %v4450_v26 = vld [vmem:[#allocation12 + $0x630] sm:$0xff]  ;;  %v4611_v37 = vld [vmem:[#allocation12 + $0xb38] sm:$0xff]  ;;  %v4465_v45 = vld [vmem:[#allocation12 + $0x6a8] sm:$0xff] }
 0x1e4   : > { %5450 = vmatmul.f32.gmra.mxu3 %v1363_v24  ;;  %v4612_v24 = vld [vmem:[#allocation12 + $0xb40] sm:$0xff]  ;;  %6005 = vmatpush.msrb.mxu1 %v4629_v53  ;;  %v1369_v18 = vsel %vm481_vm0, %v1367_v13, %v1368_v52  ;;  %v4466_v35 = vld [vmem:[#allocation12 + $0x6b0] sm:$0xff]  ;;  %v4627_v36 = vld [vmem:[#allocation12 + $0xbb8] sm:$0xff] }
 0x1e5   : > { %v9608_v12 = vpop.f32.mrf.mxu1  ;;  %5556 = vmatpush.msra.mxu2 %v4451_v21  ;;  %5597 = vmatpush.msra.mxu3 %v4467_v5  ;;  %v5127_v61 = vadd.f32 %v9518_v23, %v5086_v22  ;;  %v1900_v53 = vld [vmem:[#allocation2 + $0xe0] sm:$0xf0]  ;;  %v1370_v21 = vrot.slane %v1296_v57, 4  ;;  %v4610_v5 = vld [vmem:[#allocation12 + $0xb30] sm:$0xff]  ;;  %v5089_v57 = vadd.f32 %v9550_v33, %v9526_v62 }
 0x1e6   : > { %5816 = vmatmul.f32.gmra.mxu0 %v1962_v29  ;;  %v5164_v49 = vpop.f32.mrf.mxu2  ;;  %v1970_v29 = vrot.slane %v1899_v0, 4  ;;  %6006 = vmatpush.msrb.mxu1 %v4628_v25  ;;  %v1371_v0 = vrot.slane %v1298_v30, 4  ;;  %v1903_v25 = vld [vmem:[#allocation2 + $0x168] sm:$0xf]  ;;  %v1972_v30 = vrot.slane %v1900_v53, 4 }
 0x1e7   : > { %v5165_v42 = vadd.f32 %v5164_v49, %v5124_v27  ;;  %v5205_v1 = vpop.f32.mrf.mxu3  ;;  %v1299_v49 = vld [vmem:[#allocation2 + $0x168] sm:$0xf]  ;;  %5965 = vmatpush.msrb.mxu0 %v4612_v24  ;;  %5557 = vmatpush.msra.mxu2 %v4450_v26  ;;  %v1373_v24 = vrot.slane %v1297_v31, 4 }
 0x1e8   : > { %5857 = vmatmul.f32.gmra.mxu1 %v1965_v41  ;;  %v1968_v41 = vsel %vm481_vm0, %v1966_v44, %v1967_v10  ;;  %5598 = vmatpush.msra.mxu3 %v4466_v35  ;;  %v4626_v10 = vld [vmem:[#allocation12 + $0xbb0] sm:$0xff]  ;;  %v1901_v44 = vld [vmem:[#allocation2 + $0xa8] sm:$0xf0]  ;;  %v4464_v26 = vld [vmem:[#allocation12 + $0x6a0] sm:$0xff]  ;;  %v1372_v35 = vsel %vm481_vm0, %v1370_v21, %v1371_v0  ;;  %v5130_v21 = vadd.f32 %v9530_v15, %v5089_v57 }
 0x1e9   : > { %v9614_v6 = vadd.f32 %v5205_v1, %v5165_v42  ;;  %v1969_v42 = vrot.slane %v1897_v17, 4  ;;  %v1902_v1 = vld [vmem:[#allocation2 + $0xb8] sm:$0xf]  ;;  %5966 = vmatpush.msrb.mxu0 %v4611_v37  ;;  %6007 = vmatpush.msrb.mxu1 %v4627_v36  ;;  %v4448_v17 = vld [vmem:[#allocation12 + $0x620] sm:$0xff]  ;;  %v4609_v31 = vld [vmem:[#allocation12 + $0xb28] sm:$0xff] }
 0x1ea   : > { %5558 = vmatpush.msra.mxu2 %v4449_v46  ;;  %5599 = vmatpush.msra.mxu3 %v4465_v45  ;;  %v4447_v37 = vld [vmem:[#allocation12 + $0x618] sm:$0xff]  ;;  %v4624_v53 = vld [vmem:[#allocation12 + $0xba0] sm:$0xff] }
 0x1eb   : > { %v9617_v27 = vpop.f32.mrf.mxu0  ;;  %5412 = vmatmul.f32.gmra.mxu2 %v1366_v9  ;;  %v1971_v13 = vsel %vm481_vm0, %v1969_v42, %v1970_v29  ;;  %v1374_v9 = vrot.slane %v1299_v49, 4  ;;  %v1973_v29 = vrot.slane %v1902_v1, 4  ;;  %5967 = vmatpush.msrb.mxu0 %v4610_v5  ;;  %v4625_v49 = vld [vmem:[#allocation12 + $0xba8] sm:$0xff]  ;;  %v1302_v42 = vld [vmem:[#allocation2 + $0x20] sm:$0xf] }
 0x1ec   : > { %5453 = vmatmul.f32.gmra.mxu3 %v1369_v18  ;;  %6008 = vmatpush.msrb.mxu1 %v4626_v10  ;;  %v4463_v46 = vld [vmem:[#allocation12 + $0x698] sm:$0xff]  ;;  %v1303_v1 = vld [vmem:[#allocation2 + $0x88] sm:$0xf]  ;;  %v1300_v5 = vld [vmem:[#allocation2 + $0xe8] sm:$0xf0] }
 0x1ed   : > { %v9621_v39 = vpop.f32.mrf.mxu1  ;;  %5559 = vmatpush.msra.mxu2 %v4448_v17  ;;  %v1375_v62 = vsel %vm481_vm0, %v1373_v24, %v1374_v9  ;;  %5600 = vmatpush.msra.mxu3 %v4464_v26  ;;  %v1974_v45 = vsel %vm481_vm0, %v1972_v30, %v1973_v29  ;;  %v1906_v24 = vld [vmem:[#allocation2 + $0x20] sm:$0xf]  ;;  %v1377_v9 = vrot.slane %v1302_v42, 4  ;;  %v4462_v10 = vld [vmem:[#allocation12 + $0x690] sm:$0xff]  ;;  %v1904_v26 = vld [vmem:[#allocation2 + $0xe8] sm:$0xf0] }
 0x1ee   : > { %5819 = vmatmul.f32.gmra.mxu0 %v1968_v41  ;;  %v5167_v52 = vpop.f32.mrf.mxu2  ;;  %v1976_v41 = vrot.slane %v1903_v25, 4  ;;  %6009 = vmatpush.msrb.mxu1 %v4625_v49  ;;  %v4607_v17 = vld [vmem:[#allocation12 + $0xb18] sm:$0xff]  ;;  %v1380_v57 = vrot.slane %v1303_v1, 4  ;;  %v4445_v29 = vld [vmem:[#allocation12 + $0x608] sm:$0xff]  ;;  %v1979_v42 = vrot.slane %v1906_v24, 4  ;;  %v1978_v1 = vrot.slane %v1904_v26, 4 }
 0x1ef   : > { %v5168_v23 = vadd.f32 %v5167_v52, %v5127_v61  ;;  %v5208_v22 = vpop.f32.mrf.mxu3  ;;  %v1975_v61 = vrot.slane %v1901_v44, 4  ;;  %5968 = vmatpush.msrb.mxu0 %v4609_v31  ;;  %v4608_v52 = vld [vmem:[#allocation12 + $0xb20] sm:$0xff]  ;;  %5560 = vmatpush.msra.mxu2 %v4447_v37  ;;  %v4623_v30 = vld [vmem:[#allocation12 + $0xb98] sm:$0xff]  ;;  %v4461_v49 = vld [vmem:[#allocation12 + $0x688] sm:$0xff]  ;;  %v5092_v37 = vadd.f32 %v9550_v33, %v9541_v50 }
 0x1f0   : > { %5860 = vmatmul.f32.gmra.mxu1 %v1971_v13  ;;  %v1301_v13 = vld [vmem:[#allocation2 + $0xf8] sm:$0xf0]  ;;  %5601 = vmatpush.msra.mxu3 %v4463_v46  ;;  %v1907_v31 = vld [vmem:[#allocation2 + $0x88] sm:$0xf]  ;;  %v4606_v46 = vld [vmem:[#allocation12 + $0xb10] sm:$0xff] }
 0x1f1   : > { %v9627_v18 = vadd.f32 %v5208_v22, %v5168_v23  ;;  %v4446_v23 = vld [vmem:[#allocation12 + $0x610] sm:$0xff]  ;;  %v1977_v44 = vsel %vm481_vm0, %v1975_v61, %v1976_v41  ;;  %5969 = vmatpush.msrb.mxu0 %v4608_v52  ;;  %6010 = vmatpush.msrb.mxu1 %v4624_v53  ;;  %v1905_v61 = vld [vmem:[#allocation2 + $0xf8] sm:$0xf0]  ;;  %v1379_v41 = vrot.slane %v1301_v13, 4  ;;  %v1304_v33 = vld [vmem:[#allocation2 + $0xa0] sm:$0xf0] }
 0x1f2   : > { %5561 = vmatpush.msra.mxu2 %v4446_v23  ;;  %5602 = vmatpush.msra.mxu3 %v4462_v10  ;;  %v1306_v53 = vld [vmem:[#allocation2 + $0xf0] sm:$0xf]  ;;  %v1982_v23 = vrot.slane %v1907_v31, 4  ;;  %v4460_v13 = vld [vmem:[#allocation12 + $0x680] sm:$0xff] }
 0x1f3   : > { %v9630_v36 = vpop.f32.mrf.mxu0  ;;  %5415 = vmatmul.f32.gmra.mxu2 %v1372_v35  ;;  %v1376_v35 = vrot.slane %v1300_v5, 4  ;;  %5970 = vmatpush.msrb.mxu0 %v4607_v17  ;;  %v1381_v50 = vsel %vm481_vm0, %v1379_v41, %v1380_v57  ;;  %v1307_v24 = vld [vmem:[#allocation2 + $0x140] sm:$0xf]  ;;  %v4605_v10 = vld [vmem:[#allocation12 + $0xb08] sm:$0xff]  ;;  %v5133_v17 = vadd.f32 %v9543_v48, %v5092_v37  ;;  %v1383_v31 = vrot.slane %v1306_v53, 4 }
 0x1f4   : > { %5456 = vmatmul.f32.gmra.mxu3 %v1375_v62  ;;  %6011 = vmatpush.msrb.mxu1 %v4623_v30  ;;  %v1910_v26 = vld [vmem:[#allocation2 + $0xf0] sm:$0xf]  ;;  %v1908_v30 = vld [vmem:[#allocation2 + $0xa0] sm:$0xf0] }
 0x1f5   : > { %v9634_v0 = vpop.f32.mrf.mxu1  ;;  %v1378_v52 = vsel %vm481_vm0, %v1376_v35, %v1377_v9  ;;  %5562 = vmatpush.msra.mxu2 %v4445_v29  ;;  %5603 = vmatpush.msra.mxu3 %v4461_v49  ;;  %v4621_v9 = vld [vmem:[#allocation12 + $0xb88] sm:$0xff]  ;;  %v1382_v29 = vrot.slane %v1304_v33, 4  ;;  %v4604_v35 = vld [vmem:[#allocation12 + $0xb00] sm:$0xff]  ;;  %v1454_v33 = vld [vmem:[#allocation2 + $0x40] sm:$0x1] }
 0x1f6   : > { %5822 = vmatmul.f32.gmra.mxu0 %v1974_v45  ;;  %v5170_v22 = vpop.f32.mrf.mxu2  ;;  %v4444_v45 = vld [vmem:[#allocation12 + $0x600] sm:$0xff] }
 0x1f7   : > { %v5171_v25 = vadd.f32 %v5170_v22, %v5130_v21  ;;  %v5211_v15 = vpop.f32.mrf.mxu3  ;;  %v4622_v21 = vld [vmem:[#allocation12 + $0xb90] sm:$0xff]  ;;  %5971 = vmatpush.msrb.mxu0 %v4606_v46  ;;  %5563 = vmatpush.msra.mxu2 %v4444_v45  ;;  %v4620_v49 = vld [vmem:[#allocation12 + $0xb80] sm:$0xff]  ;;  %v1985_v45 = vrot.slane %v1910_v26, 4  ;;  %v1384_v53 = vsel %vm481_vm0, %v1382_v29, %v1383_v31  ;;  %v1913_v31 = vld [vmem:[#allocation2 + $0xc8] sm:$0xf0] }
 0x1f8   : > { %5863 = vmatmul.f32.gmra.mxu1 %v1977_v44  ;;  %v1305_v22 = vld [vmem:[#allocation2 + $0x170] sm:$0xf0]  ;;  %5604 = vmatpush.msra.mxu3 %v4460_v13 }
 0x1f9   : > { %v9640_v62 = vadd.f32 %v5211_v15, %v5171_v25  ;;  %v1980_v25 = vsel %vm481_vm0, %v1978_v1, %v1979_v42  ;;  %v1981_v15 = vrot.slane %v1905_v61, 4  ;;  %6012 = vmatpush.msrb.mxu1 %v4622_v21  ;;  %v1385_v37 = vrot.slane %v1305_v22, 4  ;;  %5972 = vmatpush.msrb.mxu0 %v4605_v10  ;;  %v1909_v42 = vld [vmem:[#allocation2 + $0x170] sm:$0xf0]  ;;  %v1911_v61 = vld [vmem:[#allocation2 + $0x140] sm:$0xf] }
 0x1fa   : > { %v1984_v21 = vrot.slane %v1908_v30, 4  ;;  %v1987_v13 = vrot.slane %v1909_v42, 4  ;;  %v1988_v22 = vrot.slane %v1911_v61, 4  ;;  %v1453_v10 = vld [vmem:[#allocation2 + $0x128] sm:$0xfe]  ;;  %v1517_v30 = vrot.slane %v1454_v33, 1 }
 0x1fb   : > { %v9643_v5 = vpop.f32.mrf.mxu0  ;;  %5418 = vmatmul.f32.gmra.mxu2 %v1378_v52  ;;  %v1983_v41 = vsel %vm481_vm0, %v1981_v15, %v1982_v23  ;;  %v1386_v52 = vrot.slane %v1307_v24, 4  ;;  %6013 = vmatpush.msrb.mxu1 %v4621_v9  ;;  %v1455_v9 = vld [vmem:[#allocation2 + $0x178] sm:$0x1] }
 0x1fc   : > { %5459 = vmatmul.f32.gmra.mxu3 %v1381_v50  ;;  %5973 = vmatpush.msrb.mxu0 %v4604_v35  ;;  %v1452_v50 = vld [vmem:[#allocation2 + $0x160] sm:$0xfe]  ;;  %v1986_v26 = vsel %vm481_vm0, %v1984_v21, %v1985_v45  ;;  %v1915_v35 = vld [vmem:[#allocation2 + $0x38] sm:$0xf] }
 0x1fd   : > { %v9647_v44 = vpop.f32.mrf.mxu1  ;;  %6014 = vmatpush.msrb.mxu1 %v4620_v49  ;;  %v1387_v24 = vsel %vm481_vm0, %v1385_v37, %v1386_v52  ;;  %v1519_v49 = vrot.slane %v1453_v10, 1  ;;  %v1994_v21 = vrot.slane %v1915_v35, 4  ;;  %v2060_v35 = vld [vmem:[#allocation2 + $0x108] sm:$0xfe] }
 0x1fe   : > { %5825 = vmatmul.f32.gmra.mxu0 %v1980_v25  ;;  %v5173_v57 = vpop.f32.mrf.mxu2  ;;  %v1914_v25 = vld [vmem:[#allocation2 + $0x28] sm:$0xf] }
 0x1ff   : > { %v5174_v46 = vadd.f32 %v5173_v57, %v5133_v17  ;;  %v5214_v48 = vpop.f32.mrf.mxu3  ;;  %v1912_v17 = vld [vmem:[#allocation2 + $0x60] sm:$0xf0]  ;;  %v1516_v57 = vrot.slane %v1452_v50, 1  ;;  %v1991_v42 = vrot.slane %v1914_v25, 4  ;;  %v2062_v25 = vld [vmem:[#allocation2 + $0x90] sm:$0x1] }
 0x200   : > { %5866 = vmatmul.f32.gmra.mxu1 %v1983_v41  ;;  %v1520_v41 = vrot.slane %v1455_v9, 1  ;;  %v1990_v52 = vrot.slane %v1912_v17, 4  ;;  %v1456_v9 = vld [vmem:[#allocation2 + $0x108] sm:$0xfe] }
 0x201   : > { %v9651_v1 = vadd.f32 %v5214_v48, %v5174_v46  ;;  %v1989_v46 = vsel %vm481_vm0, %v1987_v13, %v1988_v22  ;;  %v1518_v45 = vsel %vm905_vm3, %v1516_v57, %v1517_v30  ;;  %v1458_v13 = vld [vmem:[#allocation2 + $0x90] sm:$0x1]  ;;  %v1457_v57 = vld [vmem:[#allocation2 + $0x110] sm:$0xfe] }
 0x202   : > { %v1992_v33 = vsel %vm481_vm0, %v1990_v52, %v1991_v42  ;;  %v2061_v52 = vld [vmem:[#allocation2 + $0x110] sm:$0xfe] }
 0x203   : > { %v9654_v23 = vpop.f32.mrf.mxu0  ;;  %5421 = vmatmul.f32.gmra.mxu2 %v1384_v53  ;;  %v1993_v53 = vrot.slane %v1913_v31, 4 }
 0x204   : > { %5462 = vmatmul.f32.gmra.mxu3 %v1387_v24  ;;  %v1521_v24 = vsel %vm905_vm3, %v1519_v49, %v1520_v41  ;;  %v2063_v49 = vld [vmem:[#allocation2 + $0x118] sm:$0x1]  ;;  %v1522_v41 = vrot.slane %v1456_v9, 1 }
 0x205   : > { %v9657_v15 = vpop.f32.mrf.mxu1  ;;  %v1995_v10 = vsel %vm481_vm0, %v1993_v53, %v1994_v21  ;;  %v2124_v21 = vrot.slane %v2060_v35, 1  ;;  %v2066_v35 = vld [vmem:[#allocation2 + $0x58] sm:$0x1] }
 0x206   : > { %11986 = vst [vmem:[#allocation23_spill] sm:$0xff] %v9657_v15  ;;  %5828 = vmatmul.f32.gmra.mxu0 %v1986_v26  ;;  %v5176_v29 = vpop.f32.mrf.mxu2  ;;  %v1523_v26 = vrot.slane %v1458_v13, 1  ;;  %v2064_v13 = vld [vmem:[#allocation2 + $0x148] sm:$0xfe] }
 0x207   : > { %v5177_v48 = vadd.f32 %v5176_v29, %v9559_v3  ;;  %v5217_v37 = vpop.f32.mrf.mxu3  ;;  %v1459_v3 = vld [vmem:[#allocation2 + $0x118] sm:$0x1] }
 0x208   : > { %5869 = vmatmul.f32.gmra.mxu1 %v1989_v46  ;;  %v1526_v31 = vrot.slane %v1459_v3, 1  ;;  %v1524_v42 = vsel %vm905_vm3, %v1522_v41, %v1523_v26  ;;  %v1461_v3 = vld [vmem:[#allocation2 + $0x100] sm:$0xfe] }
 0x209   : > { %v9662_v61 = vadd.f32 %v5217_v37, %v5177_v48  ;;  %v2125_v48 = vrot.slane %v2062_v25, 1  ;;  %v1525_v37 = vrot.slane %v1457_v57, 1  ;;  %v2127_v25 = vrot.slane %v2061_v52, 1  ;;  %v4523_v57 = vld [vmem:[#allocation12 + $0x878] sm:$0xff] }
 0x20a   : > { %v4539_v26 = vld [vmem:[#allocation12 + $0x8f8] sm:$0xff]  ;;  %5712 = vmatpush.msrb.mxu2 %v4523_v57 }
 0x20b   : > { %v9665_v50 = vpop.f32.mrf.mxu0  ;;  %5564 = vmatmul.f32.vlgmr.msra.gmra.mxu2 %v1518_v45  ;;  %v2128_v45 = vrot.slane %v2063_v49, 1  ;;  %5753 = vmatpush.msrb.mxu3 %v4539_v26  ;;  %v4683_v52 = vld [vmem:[#allocation12 + $0xd78] sm:$0xff] }
 0x20c   : > { %11987 = vst [vmem:[#allocation24_spill] sm:$0xff] %v9665_v50  ;;  %5605 = vmatmul.f32.vlgmr.msra.gmra.mxu3 %v1521_v24  ;;  %v1462_v24 = vld [vmem:[#allocation2 + $0x58] sm:$0x1]  ;;  %6122 = vmatpush.msra.mxu0 %v4683_v52 }
 0x20d   : > { %v9669_v22 = vpop.f32.mrf.mxu1  ;;  %v1529_v41 = vrot.slane %v1462_v24, 1  ;;  %v2131_v24 = vrot.slane %v2066_v35, 1  ;;  %v2070_v35 = vld [vmem:[#allocation2 + $0x138] sm:$0x1] }
 0x20e   : > { %11988 = vst [vmem:[#allocation25_spill] sm:$0xff] %v9669_v22  ;;  %5831 = vmatmul.f32.gmra.mxu0 %v1992_v33  ;;  %v5237_v17 = vpop.f32.mrf.mxu2  ;;  %v1460_v33 = vld [vmem:[#allocation2 + $0x148] sm:$0xfe]  ;;  %v1531_v22 = vrot.slane %v1461_v3, 1  ;;  %v4698_v3 = vld [vmem:[#allocation12 + $0xdf0] sm:$0xff] }
 0x20f   : > { %v5238_v30 = vadd.f32 %v5237_v17, %v9572_v40  ;;  %v5278_v29 = vpop.f32.mrf.mxu3  ;;  %v1527_v40 = vsel %vm905_vm3, %v1525_v37, %v1526_v31  ;;  %v2126_v17 = vsel %vm905_vm3, %v2124_v21, %v2125_v48  ;;  %v1528_v49 = vrot.slane %v1460_v33, 1  ;;  %v4538_v31 = vld [vmem:[#allocation12 + $0x8f0] sm:$0xff]  ;;  %v4699_v21 = vld [vmem:[#allocation12 + $0xdf8] sm:$0xff] }
 0x210   : > { %5872 = vmatmul.f32.gmra.mxu1 %v1995_v10  ;;  %v1463_v10 = vld [vmem:[#allocation2 + $0xd8] sm:$0x1]  ;;  %v2129_v37 = vsel %vm905_vm3, %v2127_v25, %v2128_v45  ;;  %v2130_v33 = vrot.slane %v2064_v13, 1  ;;  %5754 = vmatpush.msrb.mxu3 %v4538_v31  ;;  %v4537_v45 = vld [vmem:[#allocation12 + $0x8e8] sm:$0xff]  ;;  %v4536_v13 = vld [vmem:[#allocation12 + $0x8e0] sm:$0xff] }
 0x211   : > { %v9673_v46 = vadd.f32 %v5278_v29, %v5238_v30  ;;  %v4522_v30 = vld [vmem:[#allocation12 + $0x870] sm:$0xff]  ;;  %v1532_v48 = vrot.slane %v1463_v10, 1  ;;  %6163 = vmatpush.msra.mxu1 %v4699_v21  ;;  %v4520_v10 = vld [vmem:[#allocation12 + $0x860] sm:$0xff]  ;;  %v4535_v21 = vld [vmem:[#allocation12 + $0x8d8] sm:$0xff] }
 0x212   : > { %5713 = vmatpush.msrb.mxu2 %v4522_v30  ;;  %v4682_v25 = vld [vmem:[#allocation12 + $0xd70] sm:$0xff]  ;;  %5755 = vmatpush.msrb.mxu3 %v4537_v45  ;;  %v1464_v31 = vld [vmem:[#allocation2 + $0x80] sm:$0xfe] }
 0x213   : > { %v9676_v53 = vpop.f32.mrf.mxu0  ;;  %5567 = vmatmul.f32.gmra.mxu2 %v1524_v42  ;;  %6123 = vmatpush.msra.mxu0 %v4682_v25 }
 0x214   : > { %11989 = vst [vmem:[#allocation26_spill] sm:$0xff] %v9676_v53  ;;  %5608 = vmatmul.f32.gmra.mxu3 %v1527_v40  ;;  %v2065_v53 = vld [vmem:[#allocation2 + $0x100] sm:$0xfe]  ;;  %6164 = vmatpush.msra.mxu1 %v4698_v3  ;;  %v2071_v3 = vld [vmem:[#allocation2 + $0x120] sm:$0x1] }
 0x215   : > { %v9679_v9 = vpop.f32.mrf.mxu1  ;;  %v2133_v26 = vrot.slane %v2065_v53, 1  ;;  %v4697_v53 = vld [vmem:[#allocation12 + $0xde8] sm:$0xff]  ;;  %5756 = vmatpush.msrb.mxu3 %v4536_v13  ;;  %v2137_v13 = vrot.slane %v2070_v35, 1  ;;  %v1470_v35 = vld [vmem:[#allocation2 + $0xb8] sm:$0x1] }
 0x216   : > { %11990 = vst [vmem:[#allocation27_spill] sm:$0xff] %v9679_v9  ;;  %5974 = vmatmul.f32.vlgmr.msrb.gmra.mxu0 %v2126_v17  ;;  %v5240_v29 = vpop.f32.mrf.mxu2  ;;  %v2067_v9 = vld [vmem:[#allocation2 + $0xd8] sm:$0x1]  ;;  %v4521_v17 = vld [vmem:[#allocation12 + $0x868] sm:$0xff]  ;;  %6165 = vmatpush.msra.mxu1 %v4697_v53 }
 0x217   : > { %v5241_v42 = vadd.f32 %v5240_v29, %v9585_v32  ;;  %v5281_v40 = vpop.f32.mrf.mxu3  ;;  %v1530_v32 = vsel %vm905_vm3, %v1528_v49, %v1529_v41  ;;  %5714 = vmatpush.msrb.mxu2 %v4521_v17  ;;  %v2134_v30 = vrot.slane %v2067_v9, 1  ;;  %v1533_v29 = vsel %vm905_vm3, %v1531_v22, %v1532_v48  ;;  %v4519_v9 = vld [vmem:[#allocation12 + $0x858] sm:$0xff]  ;;  %v1465_v48 = vld [vmem:[#allocation2 + $0x130] sm:$0xfe]  ;;  %v4680_v17 = vld [vmem:[#allocation12 + $0xd60] sm:$0xff]  ;;  %5757 = vmatpush.msrb.mxu3 %v4535_v21 }
 0x218   : > { %6015 = vmatmul.f32.vlgmr.msrb.gmra.mxu1 %v2129_v37  ;;  %v1466_v37 = vld [vmem:[#allocation2 + $0x138] sm:$0x1]  ;;  %v2132_v41 = vsel %vm905_vm3, %v2130_v33, %v2131_v24  ;;  %v4696_v33 = vld [vmem:[#allocation12 + $0xde0] sm:$0xff]  ;;  %v1537_v15 = vrot.slane %v1465_v48, 1  ;;  %v4517_v53 = vld [vmem:[#allocation12 + $0x848] sm:$0xff] }
 0x219   : > { %v9684_v50 = vadd.f32 %v5281_v40, %v5241_v42  ;;  %v1467_v42 = vld [vmem:[#allocation2 + $0x120] sm:$0x1]  ;;  %5715 = vmatpush.msrb.mxu2 %v4520_v10  ;;  %v4681_v40 = vld [vmem:[#allocation12 + $0xd68] sm:$0xff]  ;;  %v1535_v22 = vrot.slane %v1466_v37, 1  ;;  %v2135_v45 = vsel %vm905_vm3, %v2133_v26, %v2134_v30  ;;  %v4518_v24 = vld [vmem:[#allocation12 + $0x850] sm:$0xff]  ;;  %v1534_v10 = vrot.slane %v1464_v31, 1  ;;  %6166 = vmatpush.msra.mxu1 %v4696_v33 }
 0x21a   : > { %6124 = vmatpush.msra.mxu0 %v4681_v40  ;;  %v4534_v37 = vld [vmem:[#allocation12 + $0x8d0] sm:$0xff]  ;;  %v4695_v40 = vld [vmem:[#allocation12 + $0xdd8] sm:$0xff]  ;;  %v2140_v31 = vrot.slane %v2071_v3, 1  ;;  %v4533_v48 = vld [vmem:[#allocation12 + $0x8c8] sm:$0xff] }
 0x21b   : > { %v9687_v57 = vpop.f32.mrf.mxu0  ;;  %5570 = vmatmul.f32.gmra.mxu2 %v1530_v32  ;;  %v1536_v30 = vsel %vm905_vm3, %v1534_v10, %v1535_v22  ;;  %5758 = vmatpush.msrb.mxu3 %v4534_v37  ;;  %v1471_v21 = vld [vmem:[#allocation2 + $0x168] sm:$0x1]  ;;  %v4694_v22 = vld [vmem:[#allocation12 + $0xdd0] sm:$0xff]  ;;  %v2072_v33 = vld [vmem:[#allocation2 + $0xe0] sm:$0xfe]  ;;  %v1541_v10 = vrot.slane %v1470_v35, 1 }
 0x21c   : > { %11991 = vst [vmem:[#allocation28_spill] sm:$0xff] %v9687_v57  ;;  %5611 = vmatmul.f32.gmra.mxu3 %v1533_v29  ;;  %v2068_v29 = vld [vmem:[#allocation2 + $0x80] sm:$0xfe]  ;;  %5716 = vmatpush.msrb.mxu2 %v4519_v9  ;;  %v2069_v57 = vld [vmem:[#allocation2 + $0x130] sm:$0xfe] }
 0x21d   : > { %v9690_v49 = vpop.f32.mrf.mxu1  ;;  %6125 = vmatpush.msra.mxu0 %v4680_v17  ;;  %v2136_v26 = vrot.slane %v2068_v29, 1  ;;  %v4678_v17 = vld [vmem:[#allocation12 + $0xd50] sm:$0xff]  ;;  %v2139_v29 = vrot.slane %v2069_v57, 1  ;;  %6167 = vmatpush.msra.mxu1 %v4695_v40  ;;  %v4532_v37 = vld [vmem:[#allocation12 + $0x8c0] sm:$0xff]  ;;  %v4693_v57 = vld [vmem:[#allocation12 + $0xdc8] sm:$0xff] }
 0x21e   : > { %11992 = vst [vmem:[#allocation29_spill] sm:$0xff] %v9690_v49  ;;  %5977 = vmatmul.f32.gmra.mxu0 %v2132_v41  ;;  %v5243_v52 = vpop.f32.mrf.mxu2  ;;  %v1538_v49 = vrot.slane %v1467_v42, 1  ;;  %v1468_v42 = vld [vmem:[#allocation2 + $0xe0] sm:$0xfe]  ;;  %5717 = vmatpush.msrb.mxu2 %v4518_v24  ;;  %v2073_v40 = vld [vmem:[#allocation2 + $0xa8] sm:$0xfe] }
 0x21f   : > { %v5244_v25 = vadd.f32 %v5243_v52, %v9600_v43  ;;  %v5284_v32 = vpop.f32.mrf.mxu3  ;;  %v4679_v43 = vld [vmem:[#allocation12 + $0xd58] sm:$0xff]  ;;  %v4516_v24 = vld [vmem:[#allocation12 + $0x840] sm:$0xff]  ;;  %v1540_v3 = vrot.slane %v1468_v42, 1  ;;  %5759 = vmatpush.msrb.mxu3 %v4533_v48  ;;  %6168 = vmatpush.msra.mxu1 %v4694_v22  ;;  %v2142_v48 = vrot.slane %v2072_v33, 1  ;;  %v2145_v22 = vrot.slane %v2073_v40, 1  ;;  %v4530_v33 = vld [vmem:[#allocation12 + $0x8b0] sm:$0xff] }
 0x220   : > { %6018 = vmatmul.f32.gmra.mxu1 %v2135_v45  ;;  %v1539_v9 = vsel %vm905_vm3, %v1537_v15, %v1538_v49  ;;  %v1469_v45 = vld [vmem:[#allocation2 + $0xa8] sm:$0xfe]  ;;  %6126 = vmatpush.msra.mxu0 %v4679_v43  ;;  %v2074_v49 = vld [vmem:[#allocation2 + $0xb8] sm:$0x1]  ;;  %v2141_v43 = vsel %vm905_vm3, %v2139_v29, %v2140_v31  ;;  %v4531_v42 = vld [vmem:[#allocation12 + $0x8b8] sm:$0xff] }
 0x221   : > { %v9695_v41 = vadd.f32 %v5284_v32, %v5244_v25  ;;  %v2138_v32 = vsel %vm905_vm3, %v2136_v26, %v2137_v13  ;;  %5718 = vmatpush.msrb.mxu2 %v4517_v53  ;;  %v1544_v13 = vrot.slane %v1471_v21, 1  ;;  %v4515_v26 = vld [vmem:[#allocation12 + $0x838] sm:$0xff]  ;;  %v2075_v53 = vld [vmem:[#allocation2 + $0x168] sm:$0x1]  ;;  %5760 = vmatpush.msrb.mxu3 %v4532_v37  ;;  %v4514_v21 = vld [vmem:[#allocation12 + $0x830] sm:$0xff] }
 0x222   : > { %6127 = vmatpush.msra.mxu0 %v4678_v17  ;;  %v4676_v31 = vld [vmem:[#allocation12 + $0xd40] sm:$0xff]  ;;  %6169 = vmatpush.msra.mxu1 %v4693_v57  ;;  %v2146_v29 = vrot.slane %v2075_v53, 1  ;;  %v4691_v37 = vld [vmem:[#allocation12 + $0xdb8] sm:$0xff]  ;;  %v4674_v40 = vld [vmem:[#allocation12 + $0xd30] sm:$0xff] }
 0x223   : > { %v9698_v52 = vpop.f32.mrf.mxu0  ;;  %5573 = vmatmul.f32.gmra.mxu2 %v1536_v30  ;;  %v4677_v30 = vld [vmem:[#allocation12 + $0xd48] sm:$0xff]  ;;  %5761 = vmatpush.msrb.mxu3 %v4531_v42 }
 0x224   : > { %11993 = vst [vmem:[#allocation30_spill] sm:$0xff] %v9698_v52  ;;  %5614 = vmatmul.f32.gmra.mxu3 %v1539_v9  ;;  %v1543_v52 = vrot.slane %v1469_v45, 1  ;;  %5719 = vmatpush.msrb.mxu2 %v4516_v24  ;;  %v4692_v45 = vld [vmem:[#allocation12 + $0xdc0] sm:$0xff]  ;;  %v2147_v53 = vsel %vm905_vm3, %v2145_v22, %v2146_v29 }
 0x225   : > { %v9701_v25 = vpop.f32.mrf.mxu1  ;;  %6128 = vmatpush.msra.mxu0 %v4677_v30  ;;  %v2078_v30 = vld [vmem:[#allocation2 + $0x20] sm:$0x1]  ;;  %6170 = vmatpush.msra.mxu1 %v4692_v45  ;;  %v2079_v45 = vld [vmem:[#allocation2 + $0x88] sm:$0x1] }
 0x226   : > { %11994 = vst [vmem:[#allocation31_spill] sm:$0xff] %v9701_v25  ;;  %5980 = vmatmul.f32.gmra.mxu0 %v2138_v32  ;;  %v5246_v15 = vpop.f32.mrf.mxu2  ;;  %v2143_v32 = vrot.slane %v2074_v49, 1  ;;  %5720 = vmatpush.msrb.mxu2 %v4515_v26  ;;  %v1545_v24 = vsel %vm905_vm3, %v1543_v52, %v1544_v13  ;;  %v4675_v49 = vld [vmem:[#allocation12 + $0xd38] sm:$0xff]  ;;  %v4529_v26 = vld [vmem:[#allocation12 + $0x8a8] sm:$0xff] }
 0x227   : > { %v5247_v9 = vadd.f32 %v5246_v15, %v9614_v6  ;;  %v5287_v25 = vpop.f32.mrf.mxu3  ;;  %v1542_v6 = vsel %vm905_vm3, %v1540_v3, %v1541_v10  ;;  %v1475_v15 = vld [vmem:[#allocation2 + $0x88] sm:$0x1]  ;;  %6129 = vmatpush.msra.mxu0 %v4676_v31  ;;  %v1473_v13 = vld [vmem:[#allocation2 + $0xf8] sm:$0xfe]  ;;  %5762 = vmatpush.msrb.mxu3 %v4530_v33  ;;  %v2149_v33 = vrot.slane %v2078_v30, 1 }
 0x228   : > { %6021 = vmatmul.f32.gmra.mxu1 %v2141_v43  ;;  %v2144_v10 = vsel %vm905_vm3, %v2142_v48, %v2143_v32  ;;  %v1472_v43 = vld [vmem:[#allocation2 + $0xe8] sm:$0xfe]  ;;  %5721 = vmatpush.msrb.mxu2 %v4514_v21  ;;  %v4690_v48 = vld [vmem:[#allocation12 + $0xdb0] sm:$0xff]  ;;  %v1478_v30 = vld [vmem:[#allocation2 + $0xf0] sm:$0x1] }
 0x229   : > { %v9706_v35 = vadd.f32 %v5287_v25, %v5247_v9  ;;  %v1474_v25 = vld [vmem:[#allocation2 + $0x20] sm:$0x1]  ;;  %v4513_v9 = vld [vmem:[#allocation12 + $0x828] sm:$0xff]  ;;  %6130 = vmatpush.msra.mxu0 %v4675_v49  ;;  %6171 = vmatpush.msra.mxu1 %v4691_v37  ;;  %v4512_v32 = vld [vmem:[#allocation12 + $0x820] sm:$0xff]  ;;  %v1546_v21 = vrot.slane %v1472_v43, 1  ;;  %v2152_v43 = vrot.slane %v2079_v45, 1 }
 0x22a   : > { %v1547_v52 = vrot.slane %v1474_v25, 1  ;;  %5722 = vmatpush.msrb.mxu2 %v4513_v9  ;;  %v4528_v25 = vld [vmem:[#allocation12 + $0x8a0] sm:$0xff]  ;;  %5763 = vmatpush.msrb.mxu3 %v4529_v26  ;;  %v4689_v49 = vld [vmem:[#allocation12 + $0xda8] sm:$0xff]  ;;  %v4511_v37 = vld [vmem:[#allocation12 + $0x818] sm:$0xff] }
 0x22b   : > { %v9709_v17 = vpop.f32.mrf.mxu0  ;;  %5576 = vmatmul.f32.gmra.mxu2 %v1542_v6  ;;  %v2076_v6 = vld [vmem:[#allocation2 + $0xe8] sm:$0xfe]  ;;  %6131 = vmatpush.msra.mxu0 %v4674_v40  ;;  %v1479_v26 = vld [vmem:[#allocation2 + $0x140] sm:$0x1] }
 0x22c   : > { %11995 = vst [vmem:[#allocation32_spill] sm:$0xff] %v9709_v17  ;;  %5617 = vmatmul.f32.gmra.mxu3 %v1545_v24  ;;  %v1550_v24 = vrot.slane %v1475_v15, 1  ;;  %v1549_v17 = vrot.slane %v1473_v13, 1  ;;  %v2148_v22 = vrot.slane %v2076_v6, 1  ;;  %v1548_v29 = vsel %vm905_vm3, %v1546_v21, %v1547_v52  ;;  %v1476_v15 = vld [vmem:[#allocation2 + $0xa0] sm:$0xfe]  ;;  %6172 = vmatpush.msra.mxu1 %v4690_v48 }
 0x22d   : > { %v9712_v3 = vpop.f32.mrf.mxu1  ;;  %5723 = vmatpush.msrb.mxu2 %v4512_v32  ;;  %5764 = vmatpush.msrb.mxu3 %v4528_v25  ;;  %v4527_v13 = vld [vmem:[#allocation12 + $0x898] sm:$0xff]  ;;  %v4672_v40 = vld [vmem:[#allocation12 + $0xd20] sm:$0xff]  ;;  %v4510_v32 = vld [vmem:[#allocation12 + $0x810] sm:$0xff]  ;;  %v1552_v45 = vrot.slane %v1476_v15, 1  ;;  %v1553_v21 = vrot.slane %v1478_v30, 1 }
 0x22e   : > { %11996 = vst [vmem:[#allocation33_spill] sm:$0xff] %v9712_v3  ;;  %5983 = vmatmul.f32.gmra.mxu0 %v2144_v10  ;;  %v5249_v57 = vpop.f32.mrf.mxu2  ;;  %v2077_v3 = vld [vmem:[#allocation2 + $0xf8] sm:$0xfe]  ;;  %v1551_v9 = vsel %vm905_vm3, %v1549_v17, %v1550_v24  ;;  %v4688_v52 = vld [vmem:[#allocation12 + $0xda0] sm:$0xff]  ;;  %6173 = vmatpush.msra.mxu1 %v4689_v49  ;;  %v2082_v24 = vld [vmem:[#allocation2 + $0xf0] sm:$0x1] }
 0x22f   : > { %v5250_v42 = vadd.f32 %v5249_v57, %v9627_v18  ;;  %v5290_v31 = vpop.f32.mrf.mxu3  ;;  %v4673_v18 = vld [vmem:[#allocation12 + $0xd28] sm:$0xff]  ;;  %v2151_v6 = vrot.slane %v2077_v3, 1  ;;  %v2080_v48 = vld [vmem:[#allocation2 + $0xa0] sm:$0xfe]  ;;  %5724 = vmatpush.msrb.mxu2 %v4511_v37  ;;  %5765 = vmatpush.msrb.mxu3 %v4527_v13  ;;  %v4526_v25 = vld [vmem:[#allocation12 + $0x890] sm:$0xff]  ;;  %v1556_v3 = vrot.slane %v1479_v26, 1 }
 0x230   : > { %6024 = vmatmul.f32.gmra.mxu1 %v2147_v53  ;;  %v1477_v53 = vld [vmem:[#allocation2 + $0x170] sm:$0xfe]  ;;  %6132 = vmatpush.msra.mxu0 %v4673_v18  ;;  %v2083_v37 = vld [vmem:[#allocation2 + $0x140] sm:$0x1]  ;;  %v2154_v13 = vrot.slane %v2080_v48, 1 }
 0x231   : > { %v9717_v10 = vadd.f32 %v5290_v31, %v5250_v42  ;;  %v2150_v31 = vsel %vm905_vm3, %v2148_v22, %v2149_v33  ;;  %v2153_v18 = vsel %vm905_vm3, %v2151_v6, %v2152_v43  ;;  %v1555_v33 = vrot.slane %v1477_v53, 1  ;;  %6174 = vmatpush.msra.mxu1 %v4688_v52  ;;  %v4687_v22 = vld [vmem:[#allocation12 + $0xd98] sm:$0xff]  ;;  %v4509_v49 = vld [vmem:[#allocation12 + $0x808] sm:$0xff]  ;;  %5725 = vmatpush.msrb.mxu2 %v4510_v32  ;;  %v4670_v43 = vld [vmem:[#allocation12 + $0xd10] sm:$0xff] }
 0x232   : > { %6133 = vmatpush.msra.mxu0 %v4672_v40  ;;  %v4525_v15 = vld [vmem:[#allocation12 + $0x888] sm:$0xff]  ;;  %5766 = vmatpush.msrb.mxu3 %v4526_v25  ;;  %v1554_v6 = vsel %vm905_vm3, %v1552_v45, %v1553_v21  ;;  %v1480_v53 = vld [vmem:[#allocation2 + $0x60] sm:$0xfe]  ;;  %v4686_v26 = vld [vmem:[#allocation12 + $0xd90] sm:$0xff] }
 0x233   : > { %v9720_v57 = vpop.f32.mrf.mxu0  ;;  %5579 = vmatmul.f32.gmra.mxu2 %v1548_v29  ;;  %v4671_v29 = vld [vmem:[#allocation12 + $0xd18] sm:$0xff]  ;;  %6175 = vmatpush.msra.mxu1 %v4687_v22  ;;  %v4508_v40 = vld [vmem:[#allocation12 + $0x800] sm:$0xff]  ;;  %v1483_v25 = vld [vmem:[#allocation2 + $0x38] sm:$0x1] }
 0x234   : > { %11997 = vst [vmem:[#allocation34_spill] sm:$0xff] %v9720_v57  ;;  %5620 = vmatmul.f32.gmra.mxu3 %v1551_v9  ;;  %v2081_v57 = vld [vmem:[#allocation2 + $0x170] sm:$0xfe]  ;;  %6134 = vmatpush.msra.mxu0 %v4671_v29  ;;  %v1482_v32 = vld [vmem:[#allocation2 + $0x28] sm:$0x1] }
 0x235   : > { %v9723_v42 = vpop.f32.mrf.mxu1  ;;  %5726 = vmatpush.msrb.mxu2 %v4509_v49  ;;  %v1481_v48 = vld [vmem:[#allocation2 + $0xc8] sm:$0xfe]  ;;  %5767 = vmatpush.msrb.mxu3 %v4525_v15  ;;  %v2086_v22 = vld [vmem:[#allocation2 + $0x28] sm:$0x1] }
 0x236   : > { %11998 = vst [vmem:[#allocation35_spill] sm:$0xff] %v9723_v42  ;;  %5986 = vmatmul.f32.gmra.mxu0 %v2150_v31  ;;  %v5252_v17 = vpop.f32.mrf.mxu2  ;;  %v2155_v31 = vrot.slane %v2082_v24, 1  ;;  %v4524_v24 = vld [vmem:[#allocation12 + $0x880] sm:$0xff]  ;;  %v4685_v45 = vld [vmem:[#allocation12 + $0xd88] sm:$0xff]  ;;  %6176 = vmatpush.msra.mxu1 %v4686_v26 }
 0x237   : > { %v5253_v9 = vadd.f32 %v5252_v17, %v9640_v62  ;;  %v5293_v42 = vpop.f32.mrf.mxu3  ;;  %v2157_v62 = vrot.slane %v2081_v57, 1  ;;  %v2158_v17 = vrot.slane %v2083_v37, 1  ;;  %6135 = vmatpush.msra.mxu0 %v4670_v43  ;;  %v4669_v57 = vld [vmem:[#allocation12 + $0xd08] sm:$0xff]  ;;  %5727 = vmatpush.msrb.mxu2 %v4508_v40  ;;  %v4668_v49 = vld [vmem:[#allocation12 + $0xd00] sm:$0xff] }
 0x238   : > { %6027 = vmatmul.f32.gmra.mxu1 %v2153_v18  ;;  %v2156_v29 = vsel %vm905_vm3, %v2154_v13, %v2155_v31  ;;  %v2084_v18 = vld [vmem:[#allocation2 + $0x60] sm:$0xfe]  ;;  %5768 = vmatpush.msrb.mxu3 %v4524_v24  ;;  %v2085_v13 = vld [vmem:[#allocation2 + $0xc8] sm:$0xfe]  ;;  %v2087_v31 = vld [vmem:[#allocation2 + $0x38] sm:$0x1] }
 0x239   : > { %v9728_v30 = vadd.f32 %v5293_v42, %v5253_v9  ;;  %v1557_v42 = vsel %vm905_vm3, %v1555_v33, %v1556_v3  ;;  %v1558_v33 = vrot.slane %v1480_v53, 1  ;;  %v1559_v3 = vrot.slane %v1482_v32, 1  ;;  %v4684_v37 = vld [vmem:[#allocation12 + $0xd80] sm:$0xff]  ;;  %6136 = vmatpush.msra.mxu0 %v4669_v57  ;;  %6177 = vmatpush.msra.mxu1 %v4685_v45  ;;  %v1741_v57 = vld [vmem:[#allocation2 + $0x128] sm:$0xf8] }
 0x23a   : > { %v2159_v15 = vsel %vm905_vm3, %v2157_v62, %v2158_v17  ;;  %v2160_v40 = vrot.slane %v2084_v18, 1  ;;  %v2161_v53 = vrot.slane %v2086_v22, 1  ;;  %v2163_v62 = vrot.slane %v2085_v13, 1  ;;  %v1743_v45 = vld [vmem:[#allocation2 + $0x178] sm:$0x7] }
 0x23b   : > { %v9731_v52 = vpop.f32.mrf.mxu0  ;;  %5582 = vmatmul.f32.gmra.mxu2 %v1554_v6  ;;  %6137 = vmatpush.msra.mxu0 %v4668_v49  ;;  %v1560_v32 = vsel %vm905_vm3, %v1558_v33, %v1559_v3  ;;  %v2088_v22 = vld [vmem:[#allocation2 + $0xc0] sm:$0xfe]  ;;  %v2090_v33 = vld [vmem:[#allocation2 + $0x98] sm:$0x1]  ;;  %v2091_v13 = vld [vmem:[#allocation2 + $0x8] sm:$0x1] }
 0x23c   : > { %5623 = vmatmul.f32.gmra.mxu3 %v1557_v42  ;;  %v1561_v42 = vrot.slane %v1481_v48, 1  ;;  %6178 = vmatpush.msra.mxu1 %v4684_v37  ;;  %v1740_v48 = vld [vmem:[#allocation2 + $0x160] sm:$0xf8]  ;;  %v2162_v18 = vsel %vm905_vm3, %v2160_v40, %v2161_v53  ;;  %v2166_v53 = vrot.slane %v2088_v22, 1  ;;  %v2350_v22 = vld [vmem:[#allocation2 + $0x90] sm:$0x7] }
 0x23d   : > { %v9734_v21 = vpop.f32.mrf.mxu1  ;;  %v1804_v3 = vrot.slane %v1740_v48, 3 }
 0x23e   : > { %11999 = vst [vmem:[#allocation36_spill] sm:$0xff] %v9734_v21  ;;  %5989 = vmatmul.f32.gmra.mxu0 %v2156_v29  ;;  %v5255_v9 = vpop.f32.mrf.mxu2  ;;  %v1562_v21 = vrot.slane %v1483_v25, 1  ;;  %v1742_v25 = vld [vmem:[#allocation2 + $0x40] sm:$0x7] }
 0x23f   : > { %v5256_v43 = vadd.f32 %v5255_v9, %v9651_v1  ;;  %v5296_v6 = vpop.f32.mrf.mxu3  ;;  %v2164_v1 = vrot.slane %v2087_v31, 1  ;;  %v1805_v49 = vrot.slane %v1742_v25, 3  ;;  %v5320_v31 = vadd.f32 %v9479_v60, %v9673_v46  ;;  %v1746_v25 = vld [vmem:[#allocation2 + $0x90] sm:$0x7] }
 0x240   : > { %6030 = vmatmul.f32.gmra.mxu1 %v2159_v15  ;;  %v1563_v17 = vsel %vm905_vm3, %v1561_v42, %v1562_v21  ;;  %v2089_v42 = vld [vmem:[#allocation2 + $0x18] sm:$0xfe] }
 0x241   : > { %v9739_v26 = vadd.f32 %v5296_v6, %v5256_v43  ;;  %v2165_v37 = vsel %vm905_vm3, %v2163_v62, %v2164_v1  ;;  %v1807_v43 = vrot.slane %v1741_v57, 3  ;;  %v1808_v6 = vrot.slane %v1743_v45, 3  ;;  %v1747_v57 = vld [vmem:[#allocation2 + $0x118] sm:$0x7] }
 0x242   : > { %v2169_v62 = vrot.slane %v2089_v42, 1  ;;  %v2170_v1 = vrot.slane %v2091_v13, 1  ;;  %v5361_v46 = vadd.f32 %v9482_v63, %v5320_v31  ;;  %v5323_v13 = vadd.f32 %v9489_v55, %v9684_v50  ;;  %v1751_v55 = vld [vmem:[#allocation2 + $0xd8] sm:$0x7] }
 0x243   : > { %v9742_v24 = vpop.f32.mrf.mxu0  ;;  %5585 = vmatmul.f32.gmra.mxu2 %v1560_v32  ;;  %v2167_v32 = vrot.slane %v2090_v33, 1  ;;  %v1811_v33 = vrot.slane %v1746_v25, 3  ;;  %v2413_v63 = vrot.slane %v2350_v22, 3 }
 0x244   : > { %5626 = vmatmul.f32.gmra.mxu3 %v1563_v17  ;;  %v1806_v17 = vsel %vm1195_vm2, %v1804_v3, %v1805_v49  ;;  %v1745_v3 = vld [vmem:[#allocation2 + $0x110] sm:$0xf8]  ;;  %v2171_v49 = vsel %vm905_vm3, %v2169_v62, %v2170_v1 }
 0x245   : > { %v9745_v29 = vpop.f32.mrf.mxu1  ;;  %v2168_v60 = vsel %vm905_vm3, %v2166_v53, %v2167_v32  ;;  %v1813_v31 = vrot.slane %v1745_v3, 3  ;;  %v2349_v32 = vld [vmem:[#allocation2 + $0x110] sm:$0xf8]  ;;  %v4587_v3 = vld [vmem:[#allocation12 + $0xa78] sm:$0xff] }
 0x246   : > { %5992 = vmatmul.f32.gmra.mxu0 %v2162_v18  ;;  %v5258_v9 = vpop.f32.mrf.mxu2  ;;  %v1744_v18 = vld [vmem:[#allocation2 + $0x108] sm:$0xf8]  ;;  %v2415_v22 = vrot.slane %v2349_v32, 3  ;;  %5876 = vmatpush.msra.mxu2 %v4587_v3  ;;  %v1820_v32 = vrot.slane %v1751_v55, 3  ;;  %v4762_v55 = vld [vmem:[#allocation12 + $0xff0] sm:$0xff] }
 0x247   : > { %v5259_v15 = vadd.f32 %v5258_v9, %v9662_v61  ;;  %v5299_v21 = vpop.f32.mrf.mxu3  ;;  %v1809_v61 = vsel %vm1195_vm2, %v1807_v43, %v1808_v6  ;;  %v2348_v43 = vld [vmem:[#allocation2 + $0x108] sm:$0xf8]  ;;  %v2351_v6 = vld [vmem:[#allocation2 + $0x118] sm:$0x7]  ;;  %v1810_v42 = vrot.slane %v1744_v18, 3 }
 0x248   : > { %6033 = vmatmul.f32.gmra.mxu1 %v2165_v37  ;;  %v2412_v62 = vrot.slane %v2348_v43, 3  ;;  %v2416_v1 = vrot.slane %v2351_v6, 3  ;;  %v1749_v18 = vld [vmem:[#allocation2 + $0x100] sm:$0xf8]  ;;  %v2354_v43 = vld [vmem:[#allocation2 + $0x58] sm:$0x7] }
 0x249   : > { %v9752_v40 = vadd.f32 %v5299_v21, %v5259_v15  ;;  %v1814_v21 = vrot.slane %v1747_v57, 3  ;;  %v1748_v57 = vld [vmem:[#allocation2 + $0x148] sm:$0xf8]  ;;  %v2419_v3 = vrot.slane %v2354_v43, 3  ;;  %v9784_v43 = vld [vmem:[#allocation2 + $0x138] sm:$0x7] }
 0x24b   : > { %v9755_v48 = vpop.f32.mrf.mxu0  ;;  %5728 = vmatmul.f32.vlgmr.msrb.gmra.mxu2 %v1806_v17  ;;  %v1812_v17 = vsel %vm1195_vm2, %v1810_v42, %v1811_v33  ;;  %v1815_v25 = vsel %vm1195_vm2, %v1813_v31, %v1814_v21  ;;  %v5364_v33 = vadd.f32 %v9494_v4, %v5323_v13  ;;  %v1816_v21 = vrot.slane %v1748_v57, 3  ;;  %v4602_v42 = vld [vmem:[#allocation12 + $0xaf0] sm:$0xff]  ;;  %v4747_v4 = vld [vmem:[#allocation12 + $0xf78] sm:$0xff] }
 0x24c   : > { %5769 = vmatmul.f32.vlgmr.msrb.gmra.mxu3 %v1809_v61  ;;  %v2417_v31 = vsel %vm1195_vm2, %v2415_v22, %v2416_v1  ;;  %v4763_v13 = vld [vmem:[#allocation12 + $0xff8] sm:$0xff]  ;;  %v5326_v57 = vadd.f32 %v9501_v28, %v9695_v41  ;;  %6286 = vmatpush.msrb.mxu0 %v4747_v4  ;;  %v4601_v1 = vld [vmem:[#allocation12 + $0xae8] sm:$0xff]  ;;  %v4746_v22 = vld [vmem:[#allocation12 + $0xf70] sm:$0xff] }
 0x24d   : > { %v9758_v45 = vpop.f32.mrf.mxu1  ;;  %6327 = vmatpush.msrb.mxu1 %v4763_v13  ;;  %v1754_v41 = vld [vmem:[#allocation2 + $0x138] sm:$0x7]  ;;  %v1753_v4 = vld [vmem:[#allocation2 + $0x130] sm:$0xf8] }
 0x24e   : > { %5995 = vmatmul.f32.gmra.mxu0 %v2168_v60  ;;  %v5401_v9 = vpop.f32.mrf.mxu2  ;;  %v1750_v60 = vld [vmem:[#allocation2 + $0x58] sm:$0x7] }
 0x24f   : > { %v5402_v37 = vadd.f32 %v5401_v9, %v5361_v46  ;;  %v5442_v15 = vpop.f32.mrf.mxu3  ;;  %v2352_v46 = vld [vmem:[#allocation2 + $0x148] sm:$0xf8]  ;;  %v2414_v9 = vsel %vm1195_vm2, %v2412_v62, %v2413_v63  ;;  %v1817_v6 = vrot.slane %v1750_v60, 3  ;;  %v1819_v63 = vrot.slane %v1749_v18, 3  ;;  %6287 = vmatpush.msrb.mxu0 %v4746_v22  ;;  %6328 = vmatpush.msrb.mxu1 %v4762_v55  ;;  %v4599_v13 = vld [vmem:[#allocation12 + $0xad8] sm:$0xff] }
 0x250   : > { %6036 = vmatmul.f32.gmra.mxu1 %v2171_v49  ;;  %v4603_v49 = vld [vmem:[#allocation12 + $0xaf8] sm:$0xff]  ;;  %v4585_v62 = vld [vmem:[#allocation12 + $0xa68] sm:$0xff] }
 0x251   : > { %v9765_v53 = vadd.f32 %v5442_v15, %v5402_v37  ;;  %v4586_v37 = vld [vmem:[#allocation12 + $0xa70] sm:$0xff]  ;;  %5917 = vmatpush.msra.mxu3 %v4603_v49  ;;  %v1818_v18 = vsel %vm1195_vm2, %v1816_v21, %v1817_v6  ;;  %v1821_v28 = vsel %vm1195_vm2, %v1819_v63, %v1820_v32  ;;  %v1823_v32 = vrot.slane %v1754_v41, 3 }
 0x252   : > { %5877 = vmatpush.msra.mxu2 %v4586_v37  ;;  %v5329_v41 = vadd.f32 %v9511_v7, %v9706_v35 }
 0x253   : > { %v9768_v61 = vpop.f32.mrf.mxu0  ;;  %5731 = vmatmul.f32.gmra.mxu2 %v1812_v17  ;;  %5918 = vmatpush.msra.mxu3 %v4602_v42  ;;  %v1752_v42 = vld [vmem:[#allocation2 + $0x80] sm:$0xf8] }
 0x254   : > { %12000 = vst [vmem:[#allocation37_spill] sm:$0xff] %v9768_v61  ;;  %5772 = vmatmul.f32.gmra.mxu3 %v1815_v25  ;;  %v2355_v61 = vld [vmem:[#allocation2 + $0xd8] sm:$0x7]  ;;  %5878 = vmatpush.msra.mxu2 %v4585_v62  ;;  %v4744_v62 = vld [vmem:[#allocation12 + $0xf60] sm:$0xff]  ;;  %v1822_v55 = vrot.slane %v1752_v42, 3 }
 0x255   : > { %v9771_v50 = vpop.f32.mrf.mxu1  ;;  %5919 = vmatpush.msra.mxu3 %v4601_v1  ;;  %v4759_v42 = vld [vmem:[#allocation12 + $0xfd8] sm:$0xff] }
 0x256   : > { %12001 = vst [vmem:[#allocation38_spill] sm:$0xff] %v9771_v50  ;;  %6138 = vmatmul.f32.vlgmr.msra.gmra.mxu0 %v2414_v9  ;;  %v5404_v15 = vpop.f32.mrf.mxu2  ;;  %v2353_v50 = vld [vmem:[#allocation2 + $0x100] sm:$0xf8]  ;;  %v2418_v9 = vrot.slane %v2352_v46, 3 }
 0x257   : > { %v5405_v17 = vadd.f32 %v5404_v15, %v5364_v33  ;;  %v5445_v25 = vpop.f32.mrf.mxu3  ;;  %v4584_v33 = vld [vmem:[#allocation12 + $0xa60] sm:$0xff]  ;;  %v2421_v37 = vrot.slane %v2353_v50, 3  ;;  %v2422_v15 = vrot.slane %v2355_v61, 3  ;;  %v4745_v61 = vld [vmem:[#allocation12 + $0xf68] sm:$0xff] }
 0x258   : > { %6179 = vmatmul.f32.vlgmr.msra.gmra.mxu1 %v2417_v31  ;;  %v4600_v46 = vld [vmem:[#allocation12 + $0xae0] sm:$0xff]  ;;  %v2420_v6 = vsel %vm1195_vm2, %v2418_v9, %v2419_v3  ;;  %5879 = vmatpush.msra.mxu2 %v4584_v33  ;;  %v4761_v50 = vld [vmem:[#allocation12 + $0xfe8] sm:$0xff]  ;;  %v4598_v33 = vld [vmem:[#allocation12 + $0xad0] sm:$0xff] }
 0x259   : > { %v9778_v60 = vadd.f32 %v5445_v25, %v5405_v17  ;;  %v1755_v31 = vld [vmem:[#allocation2 + $0x120] sm:$0x7]  ;;  %v5367_v17 = vadd.f32 %v9506_v2, %v5326_v57  ;;  %5920 = vmatpush.msra.mxu3 %v4600_v46  ;;  %v2423_v1 = vsel %vm1195_vm2, %v2421_v37, %v2422_v15  ;;  %6288 = vmatpush.msrb.mxu0 %v4745_v61  ;;  %v4582_v57 = vld [vmem:[#allocation12 + $0xa50] sm:$0xff]  ;;  %v2425_v37 = vrot.slane %v9784_v43, 3  ;;  %v1756_v43 = vld [vmem:[#allocation2 + $0xe0] sm:$0xf8] }
 0x25a   : > { %v4583_v25 = vld [vmem:[#allocation12 + $0xa58] sm:$0xff]  ;;  %v1826_v9 = vrot.slane %v1755_v31, 3  ;;  %6329 = vmatpush.msrb.mxu1 %v4761_v50  ;;  %v4760_v2 = vld [vmem:[#allocation12 + $0xfe0] sm:$0xff]  ;;  %v2357_v15 = vld [vmem:[#allocation2 + $0x130] sm:$0xf8]  ;;  %v1824_v61 = vsel %vm1195_vm2, %v1822_v55, %v1823_v32 }
 0x25b   : > { %v9781_v49 = vpop.f32.mrf.mxu0  ;;  %5734 = vmatmul.f32.gmra.mxu2 %v1818_v18  ;;  %v2359_v3 = vld [vmem:[#allocation2 + $0x120] sm:$0x7]  ;;  %5921 = vmatpush.msra.mxu3 %v4599_v13  ;;  %v1758_v50 = vld [vmem:[#allocation2 + $0xb8] sm:$0x7]  ;;  %v1759_v13 = vld [vmem:[#allocation2 + $0x168] sm:$0x7] }
 0x25c   : > { %5775 = vmatmul.f32.gmra.mxu3 %v1821_v28  ;;  %v2356_v28 = vld [vmem:[#allocation2 + $0x80] sm:$0xf8]  ;;  %5880 = vmatpush.msra.mxu2 %v4583_v25  ;;  %v4743_v31 = vld [vmem:[#allocation12 + $0xf58] sm:$0xff]  ;;  %v4581_v25 = vld [vmem:[#allocation12 + $0xa48] sm:$0xff]  ;;  %v2428_v7 = vrot.slane %v2359_v3, 3 }
 0x25d   : > { %v9786_v21 = vpop.f32.mrf.mxu1  ;;  %6289 = vmatpush.msrb.mxu0 %v4744_v62  ;;  %6330 = vmatpush.msrb.mxu1 %v4760_v2  ;;  %v4742_v62 = vld [vmem:[#allocation12 + $0xf50] sm:$0xff]  ;;  %v5370_v2 = vadd.f32 %v9516_v20, %v5329_v41  ;;  %v2360_v55 = vld [vmem:[#allocation2 + $0xe0] sm:$0xf8]  ;;  %v4757_v20 = vld [vmem:[#allocation12 + $0xfc8] sm:$0xff] }
 0x25e   : > { %6141 = vmatmul.f32.gmra.mxu0 %v2420_v6  ;;  %v5407_v63 = vpop.f32.mrf.mxu2  ;;  %v1825_v6 = vrot.slane %v1753_v4, 3  ;;  %5881 = vmatpush.msra.mxu2 %v4582_v57  ;;  %v4597_v4 = vld [vmem:[#allocation12 + $0xac8] sm:$0xff]  ;;  %v4758_v32 = vld [vmem:[#allocation12 + $0xfd0] sm:$0xff]  ;;  %v4579_v41 = vld [vmem:[#allocation12 + $0xa38] sm:$0xff] }
 0x25f   : > { %v5408_v22 = vadd.f32 %v5407_v63, %v5367_v17  ;;  %v5448_v18 = vpop.f32.mrf.mxu3  ;;  %v2424_v17 = vrot.slane %v2356_v28, 3  ;;  %5922 = vmatpush.msra.mxu3 %v4598_v33  ;;  %6290 = vmatpush.msrb.mxu0 %v4743_v31  ;;  %v2427_v28 = vrot.slane %v2357_v15, 3  ;;  %v2362_v57 = vld [vmem:[#allocation2 + $0xb8] sm:$0x7]  ;;  %v1828_v33 = vrot.slane %v1756_v43, 3  ;;  %v4596_v31 = vld [vmem:[#allocation12 + $0xac0] sm:$0xff] }
 0x260   : > { %6182 = vmatmul.f32.gmra.mxu1 %v2423_v1  ;;  %v1827_v35 = vsel %vm1195_vm2, %v1825_v6, %v1826_v9  ;;  %v1757_v1 = vld [vmem:[#allocation2 + $0xa8] sm:$0xf8]  ;;  %5882 = vmatpush.msra.mxu2 %v4581_v25  ;;  %v4580_v9 = vld [vmem:[#allocation12 + $0xa40] sm:$0xff]  ;;  %v1829_v6 = vrot.slane %v1758_v50, 3  ;;  %v1832_v15 = vrot.slane %v1759_v13, 3  ;;  %v4595_v25 = vld [vmem:[#allocation12 + $0xab8] sm:$0xff]  ;;  %v5332_v50 = vadd.f32 %v9523_v54, %v9717_v10 }
 0x261   : > { %v9793_v46 = vadd.f32 %v5448_v18, %v5408_v22  ;;  %v2426_v18 = vsel %vm1195_vm2, %v2424_v17, %v2425_v37  ;;  %6331 = vmatpush.msrb.mxu1 %v4759_v42  ;;  %5923 = vmatpush.msra.mxu3 %v4597_v4  ;;  %v1831_v37 = vrot.slane %v1757_v1, 3  ;;  %v2361_v17 = vld [vmem:[#allocation2 + $0xa8] sm:$0xf8]  ;;  %v2363_v42 = vld [vmem:[#allocation2 + $0x168] sm:$0x7]  ;;  %v2430_v4 = vrot.slane %v2360_v55, 3 }
 0x262   : > { %6291 = vmatpush.msrb.mxu0 %v4742_v62  ;;  %5883 = vmatpush.msra.mxu2 %v4580_v9  ;;  %v4740_v1 = vld [vmem:[#allocation12 + $0xf40] sm:$0xff]  ;;  %v1830_v13 = vsel %vm1195_vm2, %v1828_v33, %v1829_v6  ;;  %v4755_v9 = vld [vmem:[#allocation12 + $0xfb8] sm:$0xff]  ;;  %v5373_v33 = vadd.f32 %v9528_v47, %v5332_v50  ;;  %v1760_v6 = vld [vmem:[#allocation2 + $0xe8] sm:$0xf8] }
 0x263   : > { %v9797_v63 = vpop.f32.mrf.mxu0  ;;  %5737 = vmatmul.f32.gmra.mxu2 %v1824_v61  ;;  %v4741_v61 = vld [vmem:[#allocation12 + $0xf48] sm:$0xff]  ;;  %6332 = vmatpush.msrb.mxu1 %v4758_v32  ;;  %v4756_v62 = vld [vmem:[#allocation12 + $0xfc0] sm:$0xff]  ;;  %v4578_v32 = vld [vmem:[#allocation12 + $0xa30] sm:$0xff]  ;;  %v1833_v54 = vsel %vm1195_vm2, %v1831_v37, %v1832_v15 }
 0x264   : > { %12002 = vst [vmem:[#allocation39_spill] sm:$0xff] %v9797_v63  ;;  %5778 = vmatmul.f32.gmra.mxu3 %v1827_v35  ;;  %v2429_v35 = vsel %vm1195_vm2, %v2427_v28, %v2428_v7  ;;  %v2431_v7 = vrot.slane %v2362_v57, 3  ;;  %6292 = vmatpush.msrb.mxu0 %v4741_v61  ;;  %v2433_v28 = vrot.slane %v2361_v17, 3  ;;  %v1762_v10 = vld [vmem:[#allocation2 + $0x20] sm:$0x7]  ;;  %v4577_v61 = vld [vmem:[#allocation12 + $0xa28] sm:$0xff] }
 0x265   : > { %v9800_v22 = vpop.f32.mrf.mxu1  ;;  %5924 = vmatpush.msra.mxu3 %v4596_v31  ;;  %6333 = vmatpush.msrb.mxu1 %v4757_v20  ;;  %v4739_v57 = vld [vmem:[#allocation12 + $0xf38] sm:$0xff]  ;;  %v1835_v15 = vrot.slane %v1762_v10, 3  ;;  %v4593_v20 = vld [vmem:[#allocation12 + $0xaa8] sm:$0xff]  ;;  %v4754_v47 = vld [vmem:[#allocation12 + $0xfb0] sm:$0xff] }
 0x266   : > { %12003 = vst [vmem:[#allocation40_spill] sm:$0xff] %v9800_v22  ;;  %6144 = vmatmul.f32.gmra.mxu0 %v2426_v18  ;;  %v5410_v3 = vpop.f32.mrf.mxu2  ;;  %5884 = vmatpush.msra.mxu2 %v4579_v41  ;;  %v2432_v55 = vsel %vm1195_vm2, %v2430_v4, %v2431_v7  ;;  %v1761_v31 = vld [vmem:[#allocation2 + $0xf8] sm:$0xf8]  ;;  %v2366_v37 = vld [vmem:[#allocation2 + $0x20] sm:$0x7]  ;;  %v4738_v41 = vld [vmem:[#allocation12 + $0xf30] sm:$0xff] }
 0x267   : > { %v5411_v22 = vadd.f32 %v5410_v3, %v5370_v2  ;;  %v5451_v63 = vpop.f32.mrf.mxu3  ;;  %v2434_v2 = vrot.slane %v2363_v42, 3  ;;  %5925 = vmatpush.msra.mxu3 %v4595_v25  ;;  %6293 = vmatpush.msrb.mxu0 %v4740_v1  ;;  %v2364_v1 = vld [vmem:[#allocation2 + $0xe8] sm:$0xf8]  ;;  %v4576_v50 = vld [vmem:[#allocation12 + $0xa20] sm:$0xff]  ;;  %v2437_v10 = vrot.slane %v2366_v37, 3 }
 0x268   : > { %6185 = vmatmul.f32.gmra.mxu1 %v2429_v35  ;;  %5885 = vmatpush.msra.mxu2 %v4578_v32  ;;  %v2367_v7 = vld [vmem:[#allocation2 + $0x88] sm:$0x7]  ;;  %v5335_v32 = vadd.f32 %v9535_v38, %v9728_v30  ;;  %v1764_v30 = vld [vmem:[#allocation2 + $0xa0] sm:$0xf8]  ;;  %v1767_v37 = vld [vmem:[#allocation2 + $0x140] sm:$0x7] }
 0x269   : > { %v9807_v43 = vadd.f32 %v5451_v63, %v5411_v22  ;;  %v4594_v63 = vld [vmem:[#allocation12 + $0xab0] sm:$0xff]  ;;  %v1763_v22 = vld [vmem:[#allocation2 + $0x88] sm:$0x7]  ;;  %6334 = vmatpush.msrb.mxu1 %v4756_v62  ;;  %v2435_v17 = vsel %vm1195_vm2, %v2433_v28, %v2434_v2  ;;  %6294 = vmatpush.msrb.mxu0 %v4739_v57  ;;  %v2365_v28 = vld [vmem:[#allocation2 + $0xf8] sm:$0xf8]  ;;  %v1837_v2 = vrot.slane %v1761_v31, 3 }
 0x26a   : > { %5926 = vmatpush.msra.mxu3 %v4594_v63  ;;  %v1838_v4 = vrot.slane %v1763_v22, 3  ;;  %5886 = vmatpush.msra.mxu2 %v4577_v61  ;;  %v4592_v62 = vld [vmem:[#allocation12 + $0xaa0] sm:$0xff]  ;;  %v4737_v63 = vld [vmem:[#allocation12 + $0xf28] sm:$0xff]  ;;  %v2436_v22 = vrot.slane %v2364_v1, 3  ;;  %v2440_v61 = vrot.slane %v2367_v7, 3  ;;  %v4591_v31 = vld [vmem:[#allocation12 + $0xa98] sm:$0xff] }
 0x26b   : > { %v9810_v18 = vpop.f32.mrf.mxu0  ;;  %5740 = vmatmul.f32.gmra.mxu2 %v1830_v13  ;;  %6335 = vmatpush.msrb.mxu1 %v4755_v9  ;;  %v1834_v13 = vrot.slane %v1760_v6, 3  ;;  %v1766_v9 = vld [vmem:[#allocation2 + $0xf0] sm:$0x7]  ;;  %v1840_v7 = vrot.slane %v1764_v30, 3 }
 0x26c   : > { %5781 = vmatmul.f32.gmra.mxu3 %v1833_v54  ;;  %6295 = vmatpush.msrb.mxu0 %v4738_v41  ;;  %v1839_v38 = vsel %vm1195_vm2, %v1837_v2, %v1838_v4  ;;  %v2370_v1 = vld [vmem:[#allocation2 + $0xf0] sm:$0x7]  ;;  %v4735_v2 = vld [vmem:[#allocation12 + $0xf18] sm:$0xff] }
 0x26d   : > { %v9813_v3 = vpop.f32.mrf.mxu1  ;;  %5927 = vmatpush.msra.mxu3 %v4593_v20  ;;  %v1836_v57 = vsel %vm1195_vm2, %v1834_v13, %v1835_v15  ;;  %6336 = vmatpush.msrb.mxu1 %v4754_v47  ;;  %v4736_v20 = vld [vmem:[#allocation12 + $0xf20] sm:$0xff]  ;;  %v4574_v4 = vld [vmem:[#allocation12 + $0xa10] sm:$0xff]  ;;  %v1841_v13 = vrot.slane %v1766_v9, 3  ;;  %v5338_v9 = vadd.f32 %v9547_v14, %v9739_v26 }
 0x26e   : > { %6147 = vmatmul.f32.gmra.mxu0 %v2432_v55  ;;  %v5413_v35 = vpop.f32.mrf.mxu2  ;;  %5887 = vmatpush.msra.mxu2 %v4576_v50  ;;  %v4753_v55 = vld [vmem:[#allocation12 + $0xfa8] sm:$0xff]  ;;  %v4752_v15 = vld [vmem:[#allocation12 + $0xfa0] sm:$0xff] }
 0x26f   : > { %v5414_v42 = vadd.f32 %v5413_v35, %v5373_v33  ;;  %v5454_v25 = vpop.f32.mrf.mxu3  ;;  %v4575_v33 = vld [vmem:[#allocation12 + $0xa18] sm:$0xff]  ;;  %v1765_v35 = vld [vmem:[#allocation2 + $0x170] sm:$0xf8]  ;;  %5928 = vmatpush.msra.mxu3 %v4592_v62  ;;  %6296 = vmatpush.msrb.mxu0 %v4737_v63  ;;  %v2368_v50 = vld [vmem:[#allocation2 + $0xa0] sm:$0xf8] }
 0x270   : > { %6188 = vmatmul.f32.gmra.mxu1 %v2435_v17  ;;  %v2438_v17 = vsel %vm1195_vm2, %v2436_v22, %v2437_v10  ;;  %5888 = vmatpush.msra.mxu2 %v4575_v33  ;;  %v4590_v62 = vld [vmem:[#allocation12 + $0xa90] sm:$0xff]  ;;  %v1844_v22 = vrot.slane %v1767_v37, 3  ;;  %v4589_v33 = vld [vmem:[#allocation12 + $0xa88] sm:$0xff]  ;;  %v1842_v37 = vsel %vm1195_vm2, %v1840_v7, %v1841_v13 }
 0x271   : > { %v9820_v54 = vadd.f32 %v5454_v25, %v5414_v42  ;;  %v2439_v42 = vrot.slane %v2365_v28, 3  ;;  %v5376_v25 = vadd.f32 %v9538_v58, %v5335_v32  ;;  %6337 = vmatpush.msrb.mxu1 %v4753_v55  ;;  %5929 = vmatpush.msra.mxu3 %v4591_v31  ;;  %v2369_v10 = vld [vmem:[#allocation2 + $0x170] sm:$0xf8]  ;;  %v1843_v28 = vrot.slane %v1765_v35, 3  ;;  %v4751_v58 = vld [vmem:[#allocation12 + $0xf98] sm:$0xff]  ;;  %v4573_v32 = vld [vmem:[#allocation12 + $0xa08] sm:$0xff] }
 0x272   : > { %6297 = vmatpush.msrb.mxu0 %v4736_v20  ;;  %v2371_v55 = vld [vmem:[#allocation2 + $0x140] sm:$0x7]  ;;  %5889 = vmatpush.msra.mxu2 %v4574_v4  ;;  %v2442_v31 = vrot.slane %v2368_v50, 3  ;;  %v2445_v35 = vrot.slane %v2369_v10, 3  ;;  %v1768_v20 = vld [vmem:[#allocation2 + $0x60] sm:$0xf8] }
 0x273   : > { %v9823_v6 = vpop.f32.mrf.mxu0  ;;  %5743 = vmatmul.f32.gmra.mxu2 %v1836_v57  ;;  %v2441_v63 = vsel %vm1195_vm2, %v2439_v42, %v2440_v61  ;;  %6338 = vmatpush.msrb.mxu1 %v4752_v15  ;;  %v2443_v61 = vrot.slane %v2370_v1, 3  ;;  %v4750_v15 = vld [vmem:[#allocation12 + $0xf90] sm:$0xff]  ;;  %v4572_v42 = vld [vmem:[#allocation12 + $0xa00] sm:$0xff]  ;;  %v2446_v4 = vrot.slane %v2371_v55, 3  ;;  %v1845_v14 = vsel %vm1195_vm2, %v1843_v28, %v1844_v22  ;;  %v4749_v7 = vld [vmem:[#allocation12 + $0xf88] sm:$0xff] }
 0x274   : > { %5784 = vmatmul.f32.gmra.mxu3 %v1839_v38  ;;  %6298 = vmatpush.msrb.mxu0 %v4735_v2  ;;  %v1770_v26 = vld [vmem:[#allocation2 + $0x28] sm:$0x7]  ;;  %v1771_v50 = vld [vmem:[#allocation2 + $0x38] sm:$0x7]  ;;  %v1846_v28 = vrot.slane %v1768_v20, 3 }
 0x275   : > { %v9826_v41 = vpop.f32.mrf.mxu1  ;;  %5930 = vmatpush.msra.mxu3 %v4590_v62  ;;  %6339 = vmatpush.msrb.mxu1 %v4751_v58  ;;  %v4588_v1 = vld [vmem:[#allocation12 + $0xa80] sm:$0xff]  ;;  %v4733_v62 = vld [vmem:[#allocation12 + $0xf08] sm:$0xff]  ;;  %v2444_v2 = vsel %vm1195_vm2, %v2442_v31, %v2443_v61  ;;  %v1847_v22 = vrot.slane %v1770_v26, 3  ;;  %v2447_v55 = vsel %vm1195_vm2, %v2445_v35, %v2446_v4  ;;  %v5341_v31 = vadd.f32 %v9562_v8, %v9752_v40 }
 0x276   : > { %6150 = vmatmul.f32.gmra.mxu0 %v2438_v17  ;;  %v5416_v47 = vpop.f32.mrf.mxu2  ;;  %v4734_v17 = vld [vmem:[#allocation12 + $0xf10] sm:$0xff]  ;;  %5890 = vmatpush.msra.mxu2 %v4573_v32  ;;  %v2374_v10 = vld [vmem:[#allocation2 + $0x28] sm:$0x7] }
 0x277   : > { %v5417_v57 = vadd.f32 %v5416_v47, %v5376_v25  ;;  %v5457_v38 = vpop.f32.mrf.mxu3  ;;  %v1769_v47 = vld [vmem:[#allocation2 + $0xc8] sm:$0xf8]  ;;  %5931 = vmatpush.msra.mxu3 %v4589_v33  ;;  %6299 = vmatpush.msrb.mxu0 %v4734_v17  ;;  %v4732_v58 = vld [vmem:[#allocation12 + $0xf00] sm:$0xff]  ;;  %v1848_v35 = vsel %vm1195_vm2, %v1846_v28, %v1847_v22  ;;  %v5382_v8 = vadd.f32 %v9567_v19, %v5341_v31 }
 0x278   : > { %6191 = vmatmul.f32.gmra.mxu1 %v2441_v63  ;;  %v5379_v63 = vadd.f32 %v9552_v34, %v5338_v9  ;;  %5891 = vmatpush.msra.mxu2 %v4572_v42  ;;  %v4748_v32 = vld [vmem:[#allocation12 + $0xf80] sm:$0xff]  ;;  %v2373_v34 = vld [vmem:[#allocation2 + $0xc8] sm:$0xf8]  ;;  %v2375_v9 = vld [vmem:[#allocation2 + $0x38] sm:$0x7]  ;;  %v5484_v28 = vadd.f32 %v9575_v51, %v9765_v53 }
 0x279   : > { %v9833_v30 = vadd.f32 %v5457_v38, %v5417_v57  ;;  %v2372_v57 = vld [vmem:[#allocation2 + $0x60] sm:$0xf8]  ;;  %6340 = vmatpush.msrb.mxu1 %v4750_v15  ;;  %5932 = vmatpush.msra.mxu3 %v4588_v1  ;;  %v2449_v15 = vrot.slane %v2374_v10, 3  ;;  %v2451_v42 = vrot.slane %v2373_v34, 3  ;;  %v2452_v4 = vrot.slane %v2375_v9, 3 }
 0x27a   : > { %6300 = vmatpush.msrb.mxu0 %v4733_v62  ;;  %v2448_v20 = vrot.slane %v2372_v57, 3  ;;  %v2376_v62 = vld [vmem:[#allocation2 + $0xc0] sm:$0xf8]  ;;  %v2379_v10 = vld [vmem:[#allocation2 + $0x8] sm:$0x7] }
 0x27b   : > { %v9836_v25 = vpop.f32.mrf.mxu0  ;;  %5746 = vmatmul.f32.gmra.mxu2 %v1842_v37  ;;  %v1849_v37 = vrot.slane %v1769_v47, 3  ;;  %6341 = vmatpush.msrb.mxu1 %v4749_v7  ;;  %v2378_v7 = vld [vmem:[#allocation2 + $0x98] sm:$0x7] }
 0x27c   : > { %5787 = vmatmul.f32.gmra.mxu3 %v1845_v14  ;;  %v1850_v14 = vrot.slane %v1771_v50, 3  ;;  %6301 = vmatpush.msrb.mxu0 %v4732_v58  ;;  %v2450_v1 = vsel %vm1195_vm2, %v2448_v20, %v2449_v15  ;;  %v2454_v58 = vrot.slane %v2376_v62, 3  ;;  %v2455_v19 = vrot.slane %v2378_v7, 3  ;;  %v4666_v62 = vld [vmem:[#allocation12 + $0xcf0] sm:$0xff] }
 0x27d   : > { %v9839_v13 = vpop.f32.mrf.mxu1  ;;  %6342 = vmatpush.msrb.mxu1 %v4748_v32  ;;  %v2028_v32 = vld [vmem:[#allocation2 + $0x108] sm:$0xff]  ;;  %v5487_v15 = vadd.f32 %v9588_v59, %v9778_v60  ;;  %v4811_v59 = vld [vmem:[#allocation12 + $0x1178] sm:$0xff] }
 0x27e   : > { %6153 = vmatmul.f32.gmra.mxu0 %v2444_v2  ;;  %v5419_v38 = vpop.f32.mrf.mxu2  ;;  %v1851_v26 = vsel %vm1195_vm2, %v1849_v37, %v1850_v14  ;;  %v2453_v2 = vsel %vm1195_vm2, %v2451_v42, %v2452_v4  ;;  %v2456_v37 = vsel %vm1195_vm2, %v2454_v58, %v2455_v19  ;;  %v5525_v14 = vadd.f32 %v9579_v16, %v5484_v28  ;;  %v2636_v42 = vld [vmem:[#allocation2 + $0x148] sm:$0xff]  ;;  %v2637_v4 = vld [vmem:[#allocation2 + $0x100] sm:$0xff]  ;;  %v4810_v28 = vld [vmem:[#allocation12 + $0x1170] sm:$0xff] }
 0x27f   : > { %v5420_v33 = vadd.f32 %v5419_v38, %v5379_v63  ;;  %v5460_v17 = vpop.f32.mrf.mxu3  ;;  %v2377_v38 = vld [vmem:[#allocation2 + $0x18] sm:$0xf8]  ;;  %v5528_v16 = vadd.f32 %v9594_v56, %v5487_v15  ;;  %v5490_v56 = vadd.f32 %v9604_v11, %v9793_v46  ;;  %6450 = vmatpush.msra.mxu0 %v4811_v59  ;;  %v2638_v19 = vld [vmem:[#allocation2 + $0x80] sm:$0xff]  ;;  %v4809_v46 = vld [vmem:[#allocation12 + $0x1168] sm:$0xff] }
 0x280   : > { %6194 = vmatmul.f32.gmra.mxu1 %v2447_v55  ;;  %v2457_v55 = vrot.slane %v2377_v38, 3  ;;  %v4827_v60 = vld [vmem:[#allocation12 + $0x11f8] sm:$0xff]  ;;  %v4661_v59 = vld [vmem:[#allocation12 + $0xcc8] sm:$0xff] }
 0x281   : > { %v9846_v61 = vadd.f32 %v5460_v17, %v5420_v33  ;;  %v2458_v33 = vrot.slane %v2379_v10, 3  ;;  %v2029_v17 = vld [vmem:[#allocation2 + $0x110] sm:$0xff]  ;;  %6491 = vmatpush.msra.mxu1 %v4827_v60  ;;  %6451 = vmatpush.msra.mxu0 %v4810_v28  ;;  %v5531_v11 = vadd.f32 %v9608_v12, %v5490_v56  ;;  %v5493_v12 = vadd.f32 %v9617_v27, %v9807_v43  ;;  %v4644_v56 = vld [vmem:[#allocation12 + $0xc40] sm:$0xff] }
 0x282   : > { %v4665_v10 = vld [vmem:[#allocation12 + $0xce8] sm:$0xff]  ;;  %v4806_v27 = vld [vmem:[#allocation12 + $0x1150] sm:$0xff]  ;;  %v4660_v28 = vld [vmem:[#allocation12 + $0xcc0] sm:$0xff] }
 0x283   : > { %5749 = vmatmul.f32.gmra.mxu2 %v1848_v35  ;;  %v9850_v47 = vpop.f32.mrf.mxu0  ;;  %v2459_v51 = vsel %vm1195_vm2, %v2457_v55, %v2458_v33  ;;  %v4648_v55 = vld [vmem:[#allocation12 + $0xc60] sm:$0xff]  ;;  %v2639_v33 = vld [vmem:[#allocation2 + $0x130] sm:$0xff]  ;;  %6452 = vmatpush.msra.mxu0 %v4809_v46 }
 0x284   : > { %5790 = vmatmul.f32.gmra.mxu3 %v1851_v26  ;;  %v4651_v26 = vld [vmem:[#allocation12 + $0xc78] sm:$0xff]  ;;  %v4822_v43 = vld [vmem:[#allocation12 + $0x11d0] sm:$0xff] }
 0x285   : > { %v9854_v40 = vpop.f32.mrf.mxu1  ;;  %6040 = vmatpush.msrb.mxu2 %v4651_v26 }
 0x286   : > { %6156 = vmatmul.f32.gmra.mxu0 %v2450_v1  ;;  %v5422_v50 = vpop.f32.mrf.mxu2  ;;  %v4667_v1 = vld [vmem:[#allocation12 + $0xcf8] sm:$0xff] }
 0x287   : > { %v5423_v63 = vadd.f32 %v5422_v50, %v5382_v8  ;;  %v5463_v57 = vpop.f32.mrf.mxu3  ;;  %v4650_v8 = vld [vmem:[#allocation12 + $0xc70] sm:$0xff]  ;;  %6081 = vmatpush.msrb.mxu3 %v4667_v1  ;;  %v4807_v1 = vld [vmem:[#allocation12 + $0x1158] sm:$0xff] }
 0x288   : > { %6197 = vmatmul.f32.gmra.mxu1 %v2453_v2  ;;  %6041 = vmatpush.msrb.mxu2 %v4650_v8 }
 0x289   : > { %v9859_v22 = vadd.f32 %v5463_v57, %v5423_v63  ;;  %v4649_v57 = vld [vmem:[#allocation12 + $0xc68] sm:$0xff]  ;;  %6082 = vmatpush.msrb.mxu3 %v4666_v62  ;;  %v4823_v62 = vld [vmem:[#allocation12 + $0x11d8] sm:$0xff] }
 0x28a   : > { %6042 = vmatpush.msrb.mxu2 %v4649_v57  ;;  %v5534_v57 = vadd.f32 %v9621_v39, %v5493_v12  ;;  %v5496_v39 = vadd.f32 %v9630_v36, %v9820_v54  ;;  %v4819_v36 = vld [vmem:[#allocation12 + $0x11b8] sm:$0xff] }
 0x28b   : > { %5892 = vmatmul.f32.vlgmr.msra.gmra.mxu2 %v2028_v32  ;;  %v9863_v34 = vpop.f32.mrf.mxu0  ;;  %v4826_v32 = vld [vmem:[#allocation12 + $0x11f0] sm:$0xff]  ;;  %6083 = vmatpush.msrb.mxu3 %v4665_v10 }
 0x28c   : > { %5933 = vmatmul.f32.vlgmr.msra.gmra.mxu3 %v2029_v17  ;;  %v4664_v17 = vld [vmem:[#allocation12 + $0xce0] sm:$0xff]  ;;  %6492 = vmatpush.msra.mxu1 %v4826_v32  ;;  %v5537_v54 = vadd.f32 %v9634_v0, %v5496_v39  ;;  %v5499_v0 = vadd.f32 %v9643_v5, %v9833_v30  ;;  %v4638_v30 = vld [vmem:[#allocation12 + $0xc10] sm:$0xff] }
 0x28d   : > { %v9866_v20 = vpop.f32.mrf.mxu1  ;;  %6043 = vmatpush.msrb.mxu2 %v4648_v55  ;;  %6084 = vmatpush.msrb.mxu3 %v4664_v17  ;;  %v4643_v17 = vld [vmem:[#allocation12 + $0xc38] sm:$0xff]  ;;  %v4654_v39 = vld [vmem:[#allocation12 + $0xc90] sm:$0xff] }
 0x28e   : > { %6159 = vmatmul.f32.gmra.mxu0 %v2456_v37  ;;  %v5565_v9 = vpop.f32.mrf.mxu2  ;;  %v4825_v37 = vld [vmem:[#allocation12 + $0x11e8] sm:$0xff]  ;;  %v5540_v5 = vadd.f32 %v9647_v44, %v5499_v0  ;;  %v4812_v0 = vld [vmem:[#allocation12 + $0x1180] sm:$0xff] }
 0x28f   : > { %v5566_v53 = vadd.f32 %v5565_v9, %v5525_v14  ;;  %v5606_v31 = vpop.f32.mrf.mxu3  ;;  %v4647_v14 = vld [vmem:[#allocation12 + $0xc58] sm:$0xff]  ;;  %6493 = vmatpush.msra.mxu1 %v4825_v37  ;;  %v4804_v37 = vld [vmem:[#allocation12 + $0x1140] sm:$0xff]  ;;  %v4653_v44 = vld [vmem:[#allocation12 + $0xc88] sm:$0xff] }
 0x290   : > { %6200 = vmatmul.f32.gmra.mxu1 %v2459_v51  ;;  %v4663_v51 = vld [vmem:[#allocation12 + $0xcd8] sm:$0xff]  ;;  %6044 = vmatpush.msrb.mxu2 %v4647_v14  ;;  %v2642_v14 = vld [vmem:[#allocation2 + $0xe8] sm:$0xff] }
 0x291   : > { %v9870_v35 = vadd.f32 %v5606_v31, %v5566_v53  ;;  %v4808_v53 = vld [vmem:[#allocation12 + $0x1160] sm:$0xff]  ;;  %6085 = vmatpush.msrb.mxu3 %v4663_v51  ;;  %v4642_v51 = vld [vmem:[#allocation12 + $0xc30] sm:$0xff] }
 0x292   : > { %6453 = vmatpush.msra.mxu0 %v4808_v53  ;;  %v2643_v53 = vld [vmem:[#allocation2 + $0xf8] sm:$0xff] }
 0x293   : > { %5895 = vmatmul.f32.gmra.mxu2 %v2636_v42  ;;  %v9873_v63 = vpop.f32.mrf.mxu0 }
 0x294   : > { %5936 = vmatmul.f32.gmra.mxu3 %v2637_v4  ;;  %6454 = vmatpush.msra.mxu0 %v4807_v1  ;;  %v4657_v1 = vld [vmem:[#allocation12 + $0xca8] sm:$0xff] }
 0x295   : > { %v9879_v58 = vpop.f32.mrf.mxu1 }
 0x296   : > { %6302 = vmatmul.f32.vlgmr.msrb.gmra.mxu0 %v2636_v42  ;;  %v5568_v50 = vpop.f32.mrf.mxu2  ;;  %v4824_v42 = vld [vmem:[#allocation12 + $0x11e0] sm:$0xff] }
 0x297   : > { %v5569_v7 = vadd.f32 %v5568_v50, %v5528_v16  ;;  %v5609_v2 = vpop.f32.mrf.mxu3  ;;  %v4662_v16 = vld [vmem:[#allocation12 + $0xcd0] sm:$0xff]  ;;  %v2640_v50 = vld [vmem:[#allocation2 + $0xe0] sm:$0xff]  ;;  %6494 = vmatpush.msra.mxu1 %v4824_v42  ;;  %6455 = vmatpush.msra.mxu0 %v4806_v27 }
 0x298   : > { %6343 = vmatmul.f32.vlgmr.msrb.gmra.mxu1 %v2637_v4  ;;  %v4646_v4 = vld [vmem:[#allocation12 + $0xc50] sm:$0xff]  ;;  %6086 = vmatpush.msrb.mxu3 %v4662_v16  ;;  %v4803_v42 = vld [vmem:[#allocation12 + $0x1138] sm:$0xff]  ;;  %v4656_v27 = vld [vmem:[#allocation12 + $0xca0] sm:$0xff] }
 0x299   : > { %v9877_v38 = vadd.f32 %v5609_v2, %v5569_v7  ;;  %6045 = vmatpush.msrb.mxu2 %v4646_v4  ;;  %v4645_v7 = vld [vmem:[#allocation12 + $0xc48] sm:$0xff]  ;;  %6495 = vmatpush.msra.mxu1 %v4823_v62 }
 0x29a   : > { %v2641_v2 = vld [vmem:[#allocation2 + $0xa8] sm:$0xff]  ;;  %6087 = vmatpush.msrb.mxu3 %v4661_v59 }
 0x29b   : > { %5898 = vmatmul.f32.gmra.mxu2 %v2638_v19  ;;  %v9886_v8 = vpop.f32.mrf.mxu0  ;;  %6496 = vmatpush.msra.mxu1 %v4822_v43  ;;  %v4641_v4 = vld [vmem:[#allocation12 + $0xc28] sm:$0xff]  ;;  %v4640_v59 = vld [vmem:[#allocation12 + $0xc20] sm:$0xff] }
 0x29c   : > { %5939 = vmatmul.f32.gmra.mxu3 %v2639_v33  ;;  %6046 = vmatpush.msrb.mxu2 %v4645_v7 }
 0x29d   : > { %v9888_v60 = vpop.f32.mrf.mxu1  ;;  %6088 = vmatpush.msrb.mxu3 %v4660_v28  ;;  %v4639_v28 = vld [vmem:[#allocation12 + $0xc18] sm:$0xff] }
 0x29e   : > { %6305 = vmatmul.f32.gmra.mxu0 %v2638_v19  ;;  %v5571_v9 = vpop.f32.mrf.mxu2  ;;  %v4805_v19 = vld [vmem:[#allocation12 + $0x1148] sm:$0xff]  ;;  %6047 = vmatpush.msrb.mxu2 %v4644_v56  ;;  %v2644_v56 = vld [vmem:[#allocation2 + $0xa0] sm:$0xff] }
 0x29f   : > { %v5572_v31 = vadd.f32 %v5571_v9, %v5531_v11  ;;  %v5612_v15 = vpop.f32.mrf.mxu3  ;;  %v4659_v11 = vld [vmem:[#allocation12 + $0xcb8] sm:$0xff]  ;;  %6456 = vmatpush.msra.mxu0 %v4805_v19  ;;  %v4820_v9 = vld [vmem:[#allocation12 + $0x11c0] sm:$0xff]  ;;  %v2645_v19 = vld [vmem:[#allocation2 + $0x170] sm:$0xff] }
 0x2a0   : > { %6346 = vmatmul.f32.gmra.mxu1 %v2639_v33  ;;  %v4821_v33 = vld [vmem:[#allocation12 + $0x11c8] sm:$0xff]  ;;  %6048 = vmatpush.msrb.mxu2 %v4643_v17 }
 0x2a1   : > { %v9884_v26 = vadd.f32 %v5612_v15, %v5572_v31  ;;  %6497 = vmatpush.msra.mxu1 %v4821_v33  ;;  %6089 = vmatpush.msrb.mxu3 %v4659_v11  ;;  %v4658_v31 = vld [vmem:[#allocation12 + $0xcb0] sm:$0xff]  ;;  %v4816_v33 = vld [vmem:[#allocation12 + $0x11a0] sm:$0xff] }
 0x2a2   : > { %6457 = vmatpush.msra.mxu0 %v4804_v37  ;;  %6049 = vmatpush.msrb.mxu2 %v4642_v51  ;;  %v4799_v37 = vld [vmem:[#allocation12 + $0x1118] sm:$0xff] }
 0x2a3   : > { %5901 = vmatmul.f32.gmra.mxu2 %v2640_v50  ;;  %v9895_v15 = vpop.f32.mrf.mxu0  ;;  %6498 = vmatpush.msra.mxu1 %v4820_v9  ;;  %v4815_v51 = vld [vmem:[#allocation12 + $0x1198] sm:$0xff] }
 0x2a4   : > { %5942 = vmatmul.f32.gmra.mxu3 %v2641_v2  ;;  %6458 = vmatpush.msra.mxu0 %v4803_v42  ;;  %v5502_v42 = vadd.f32 %v9654_v23, %v9846_v61 }
 0x2a5   : > { %v9898_v16 = vpop.f32.mrf.mxu1  ;;  %6090 = vmatpush.msrb.mxu3 %v4658_v31  ;;  %6499 = vmatpush.msra.mxu1 %v4819_v36 }
 0x2a6   : > { %6308 = vmatmul.f32.gmra.mxu0 %v2640_v50  ;;  %v5574_v10 = vpop.f32.mrf.mxu2  ;;  %v4802_v50 = vld [vmem:[#allocation12 + $0x1130] sm:$0xff]  ;;  %6050 = vmatpush.msrb.mxu2 %v4641_v4  ;;  %v2646_v4 = vld [vmem:[#allocation2 + $0x60] sm:$0xff] }
 0x2a7   : > { %v5575_v32 = vadd.f32 %v5574_v10, %v5534_v57  ;;  %v5615_v55 = vpop.f32.mrf.mxu3  ;;  %6091 = vmatpush.msrb.mxu3 %v4657_v1  ;;  %6459 = vmatpush.msra.mxu0 %v4802_v50  ;;  %v4801_v57 = vld [vmem:[#allocation12 + $0x1128] sm:$0xff]  ;;  %v4636_v1 = vld [vmem:[#allocation12 + $0xc00] sm:$0xff] }
 0x2a8   : > { %6349 = vmatmul.f32.gmra.mxu1 %v2641_v2  ;;  %v4818_v2 = vld [vmem:[#allocation12 + $0x11b0] sm:$0xff]  ;;  %6051 = vmatpush.msrb.mxu2 %v4640_v59  ;;  %v4817_v10 = vld [vmem:[#allocation12 + $0x11a8] sm:$0xff] }
 0x2a9   : > { %v9893_v46 = vadd.f32 %v5615_v55, %v5575_v32  ;;  %6500 = vmatpush.msra.mxu1 %v4818_v2  ;;  %6092 = vmatpush.msrb.mxu3 %v4656_v27  ;;  %v4655_v32 = vld [vmem:[#allocation12 + $0xc98] sm:$0xff]  ;;  %v4800_v55 = vld [vmem:[#allocation12 + $0x1120] sm:$0xff]  ;;  %v4813_v2 = vld [vmem:[#allocation12 + $0x1188] sm:$0xff] }
 0x2aa   : > { %6460 = vmatpush.msra.mxu0 %v4801_v57  ;;  %6052 = vmatpush.msrb.mxu2 %v4639_v28  ;;  %v2647_v50 = vld [vmem:[#allocation2 + $0xc8] sm:$0xff] }
 0x2ab   : > { %5904 = vmatmul.f32.gmra.mxu2 %v2642_v14  ;;  %6501 = vmatpush.msra.mxu1 %v4817_v10  ;;  %v9905_v17 = vpop.f32.mrf.mxu0  ;;  %v12004_v59 = vld [vmem:[#allocation23_spill] sm:$0xff]  ;;  %v12005_v28 = vld [vmem:[#allocation24_spill] sm:$0xff] }
 0x2ac   : > { %5945 = vmatmul.f32.gmra.mxu3 %v2643_v53  ;;  %6461 = vmatpush.msra.mxu0 %v4800_v55  ;;  %v5543_v23 = vadd.f32 %v12004_v59, %v5502_v42  ;;  %v4796_v27 = vld [vmem:[#allocation12 + $0x1100] sm:$0xff]  ;;  %v2208_v59 = vld [vmem:[#allocation2 + $0x148] sm:$0xfc] }
 0x2ad   : > { %6093 = vmatpush.msrb.mxu3 %v4655_v32  ;;  %6502 = vmatpush.msra.mxu1 %v4816_v33  ;;  %v9907_v31 = vpop.f32.mrf.mxu1  ;;  %v2648_v33 = vld [vmem:[#allocation2 + $0xc0] sm:$0xff] }
 0x2ae   : > { %6311 = vmatmul.f32.gmra.mxu0 %v2642_v14  ;;  %v5577_v12 = vpop.f32.mrf.mxu2  ;;  %6053 = vmatpush.msrb.mxu2 %v4638_v30  ;;  %v2206_v30 = vld [vmem:[#allocation2 + $0x90] sm:$0x3] }
 0x2af   : > { %v5578_v62 = vadd.f32 %v5577_v12, %v5537_v54  ;;  %v5618_v7 = vpop.f32.mrf.mxu3  ;;  %6094 = vmatpush.msrb.mxu3 %v4654_v39  ;;  %6462 = vmatpush.msra.mxu0 %v4799_v37  ;;  %v4798_v54 = vld [vmem:[#allocation12 + $0x1110] sm:$0xff] }
 0x2b0   : > { %6352 = vmatmul.f32.gmra.mxu1 %v2643_v53  ;;  %v4637_v53 = vld [vmem:[#allocation12 + $0xc08] sm:$0xff]  ;;  %v4814_v12 = vld [vmem:[#allocation12 + $0x1190] sm:$0xff] }
 0x2b1   : > { %v9902_v43 = vadd.f32 %v5618_v7, %v5578_v62  ;;  %6503 = vmatpush.msra.mxu1 %v4815_v51  ;;  %6054 = vmatpush.msrb.mxu2 %v4637_v53  ;;  %v4652_v62 = vld [vmem:[#allocation12 + $0xc80] sm:$0xff]  ;;  %v4797_v7 = vld [vmem:[#allocation12 + $0x1108] sm:$0xff]  ;;  %v12006_v39 = vld [vmem:[#allocation25_spill] sm:$0xff]  ;;  %v2269_v51 = vrot.slane %v2206_v30, 2 }
 0x2b2   : > { %6095 = vmatpush.msrb.mxu3 %v4653_v44  ;;  %6463 = vmatpush.msra.mxu0 %v4798_v54  ;;  %v2205_v53 = vld [vmem:[#allocation2 + $0x110] sm:$0xfc] }
 0x2b3   : > { %5907 = vmatmul.f32.gmra.mxu2 %v2644_v56  ;;  %6504 = vmatpush.msra.mxu1 %v4814_v12  ;;  %v9914_v10 = vpop.f32.mrf.mxu0 }
 0x2b4   : > { %5948 = vmatmul.f32.gmra.mxu3 %v2645_v19  ;;  %6055 = vmatpush.msrb.mxu2 %v4636_v1 }
 0x2b5   : > { %6096 = vmatpush.msrb.mxu3 %v4652_v62  ;;  %6464 = vmatpush.msra.mxu0 %v4797_v7  ;;  %v9920_v55 = vpop.f32.mrf.mxu1 }
 0x2b6   : > { %6314 = vmatmul.f32.gmra.mxu0 %v2644_v56  ;;  %v5580_v11 = vpop.f32.mrf.mxu2  ;;  %6505 = vmatpush.msra.mxu1 %v4813_v2 }
 0x2b7   : > { %v5581_v14 = vadd.f32 %v5580_v11, %v5540_v5  ;;  %v5621_v9 = vpop.f32.mrf.mxu3  ;;  %6465 = vmatpush.msra.mxu0 %v4796_v27  ;;  %v2649_v5 = vld [vmem:[#allocation2 + $0x18] sm:$0xff]  ;;  %v2209_v27 = vld [vmem:[#allocation2 + $0x100] sm:$0xfc] }
 0x2b8   : > { %6355 = vmatmul.f32.gmra.mxu1 %v2645_v19  ;;  %v5505_v19 = vadd.f32 %v12005_v28, %v9859_v22  ;;  %v2207_v11 = vld [vmem:[#allocation2 + $0x118] sm:$0x3] }
 0x2b9   : > { %v9911_v36 = vadd.f32 %v5621_v9, %v5581_v14  ;;  %6506 = vmatpush.msra.mxu1 %v4812_v0  ;;  %v2204_v14 = vld [vmem:[#allocation2 + $0x108] sm:$0xfc]  ;;  %v2272_v42 = vrot.slane %v2207_v11, 2  ;;  %v2211_v0 = vld [vmem:[#allocation2 + $0xd8] sm:$0x3] }
 0x2ba   : > { %v5546_v37 = vadd.f32 %v12006_v39, %v5505_v19  ;;  %v2268_v54 = vrot.slane %v2204_v14, 2  ;;  %v2812_v19 = vld [vmem:[#allocation2 + $0x148] sm:$0xfc]  ;;  %v2651_v11 = vld [vmem:[#allocation2 + $0x78] sm:$0xff]  ;;  %v2277_v14 = vrot.slane %v2209_v27, 2 }
 0x2bb   : > { %5910 = vmatmul.f32.gmra.mxu2 %v2646_v4  ;;  %v9927_v62 = vpop.f32.mrf.mxu0  ;;  %v2212_v27 = vld [vmem:[#allocation2 + $0x80] sm:$0xfc] }
 0x2bc   : > { %5951 = vmatmul.f32.gmra.mxu3 %v2647_v50  ;;  %v2270_v7 = vsel %vm1050_vm4, %v2268_v54, %v2269_v51  ;;  %v2813_v51 = vld [vmem:[#allocation2 + $0x100] sm:$0xfc]  ;;  %v2876_v54 = vrot.slane %v2812_v19, 2  ;;  %v4714_v19 = vld [vmem:[#allocation12 + $0xe70] sm:$0xff] }
 0x2be   : > { %6317 = vmatmul.f32.gmra.mxu0 %v2646_v4  ;;  %v5583_v61 = vpop.f32.mrf.mxu2  ;;  %v12007_v4 = vld [vmem:[#allocation26_spill] sm:$0xff] }
 0x2bf   : > { %v5584_v57 = vadd.f32 %v5583_v61, %v5543_v23  ;;  %v5624_v56 = vpop.f32.mrf.mxu3  ;;  %v5648_v12 = vadd.f32 %v12007_v4, %v9870_v35  ;;  %v2210_v23 = vld [vmem:[#allocation2 + $0x58] sm:$0x3]  ;;  %v9931_v61 = vpop.f32.mrf.mxu1 }
 0x2c0   : > { %6358 = vmatmul.f32.gmra.mxu1 %v2647_v50  ;;  %v2271_v50 = vrot.slane %v2205_v53, 2  ;;  %12008 = vst [vmem:[#allocation23_spill] sm:$0xff] %v9931_v61  ;;  %v2275_v30 = vrot.slane %v2210_v23, 2  ;;  %v2815_v53 = vld [vmem:[#allocation2 + $0xd8] sm:$0x3] }
 0x2c1   : > { %v9918_v32 = vadd.f32 %v5624_v56, %v5584_v57  ;;  %v2650_v57 = vld [vmem:[#allocation2] sm:$0xff] }
 0x2c2   : > { %v2273_v2 = vsel %vm1050_vm4, %v2271_v50, %v2272_v42  ;;  %v12009_v56 = vld [vmem:[#allocation27_spill] sm:$0xff]  ;;  %v2879_v50 = vrot.slane %v2813_v51, 2 }
 0x2c3   : > { %5913 = vmatmul.f32.gmra.mxu2 %v2648_v33  ;;  %v5689_v35 = vadd.f32 %v12009_v56, %v5648_v12  ;;  %v9940_v23 = vpop.f32.mrf.mxu0 }
 0x2c4   : > { %5954 = vmatmul.f32.gmra.mxu3 %v2649_v5  ;;  %12011 = vst [vmem:[#allocation24_spill] sm:$0xff] %v9940_v23 }
 0x2c6   : > { %6320 = vmatmul.f32.gmra.mxu0 %v2648_v33  ;;  %v5586_v9 = vpop.f32.mrf.mxu2  ;;  %v2814_v33 = vld [vmem:[#allocation2 + $0x58] sm:$0x3] }
 0x2c7   : > { %v5587_v22 = vadd.f32 %v5586_v9, %v5546_v37  ;;  %v5627_v44 = vpop.f32.mrf.mxu3  ;;  %v2278_v9 = vrot.slane %v2211_v0, 2  ;;  %v2877_v4 = vrot.slane %v2814_v33, 2  ;;  %v2215_v0 = vld [vmem:[#allocation2 + $0x120] sm:$0x3]  ;;  %v9944_v33 = vpop.f32.mrf.mxu1 }
 0x2c8   : > { %6361 = vmatmul.f32.gmra.mxu1 %v2649_v5  ;;  %v2274_v5 = vrot.slane %v2208_v59, 2  ;;  %v2214_v59 = vld [vmem:[#allocation2 + $0x138] sm:$0x3]  ;;  %12013 = vst [vmem:[#allocation25_spill] sm:$0xff] %v9944_v33 }
 0x2c9   : > { %v9925_v1 = vadd.f32 %v5627_v44, %v5587_v22  ;;  %v12010_v22 = vld [vmem:[#allocation28_spill] sm:$0xff] }
 0x2ca   : > { %v5651_v44 = vadd.f32 %v12010_v22, %v9877_v38  ;;  %v2276_v12 = vsel %vm1050_vm4, %v2274_v5, %v2275_v30  ;;  %v12012_v38 = vld [vmem:[#allocation29_spill] sm:$0xff]  ;;  %v2819_v22 = vld [vmem:[#allocation2 + $0x120] sm:$0x3] }
 0x2cb   : > { %6056 = vmatmul.f32.vlgmr.msrb.gmra.mxu2 %v2270_v7  ;;  %v2880_v7 = vrot.slane %v2815_v53, 2  ;;  %v2818_v30 = vld [vmem:[#allocation2 + $0x138] sm:$0x3]  ;;  %v2816_v53 = vld [vmem:[#allocation2 + $0x80] sm:$0xfc] }
 0x2cc   : > { %6097 = vmatmul.f32.vlgmr.msrb.gmra.mxu3 %v2273_v2  ;;  %v2279_v2 = vsel %vm1050_vm4, %v2277_v14, %v2278_v9  ;;  %v5692_v56 = vadd.f32 %v12012_v38, %v5651_v44  ;;  %v2280_v44 = vrot.slane %v2212_v27, 2  ;;  %v4890_v27 = vld [vmem:[#allocation12 + $0x13f0] sm:$0xff] }
 0x2cd   : > { %v2881_v14 = vsel %vm1050_vm4, %v2879_v50, %v2880_v7  ;;  %v4729_v50 = vld [vmem:[#allocation12 + $0xee8] sm:$0xff]  ;;  %v4874_v7 = vld [vmem:[#allocation12 + $0x1370] sm:$0xff] }
 0x2ce   : > { %6323 = vmatmul.f32.gmra.mxu0 %v2650_v57  ;;  %v5729_v28 = vpop.f32.mrf.mxu2  ;;  %v2878_v57 = vsel %vm1050_vm4, %v2876_v54, %v2877_v4  ;;  %v2284_v54 = vrot.slane %v2215_v0, 2  ;;  %v4875_v4 = vld [vmem:[#allocation12 + $0x1378] sm:$0xff]  ;;  %v2817_v0 = vld [vmem:[#allocation2 + $0x130] sm:$0xfc] }
 0x2cf   : > { %v5730_v39 = vadd.f32 %v5729_v28, %v5689_v35  ;;  %v5770_v37 = vpop.f32.mrf.mxu3  ;;  %v4715_v35 = vld [vmem:[#allocation12 + $0xe78] sm:$0xff]  ;;  %6614 = vmatpush.msrb.mxu0 %v4875_v4  ;;  %v9958_v23 = vpop.f32.mrf.mxu1 }
 0x2d0   : > { %6364 = vmatmul.f32.gmra.mxu1 %v2651_v11  ;;  %v4731_v28 = vld [vmem:[#allocation12 + $0xef8] sm:$0xff]  ;;  %v2281_v11 = vrot.slane %v2214_v59, 2  ;;  %6204 = vmatpush.msra.mxu2 %v4715_v35  ;;  %v2883_v35 = vrot.slane %v2818_v30, 2  ;;  %v4728_v30 = vld [vmem:[#allocation12 + $0xee0] sm:$0xff]  ;;  %12017 = vst [vmem:[#allocation27_spill] sm:$0xff] %v9958_v23 }
 0x2d1   : > { %v9936_v42 = vadd.f32 %v5770_v37, %v5730_v39  ;;  %v2213_v39 = vld [vmem:[#allocation2 + $0x130] sm:$0xfc]  ;;  %6245 = vmatpush.msra.mxu3 %v4731_v28  ;;  %6615 = vmatpush.msrb.mxu0 %v4874_v7  ;;  %v4872_v7 = vld [vmem:[#allocation12 + $0x1360] sm:$0xff] }
 0x2d2   : > { %v4730_v37 = vld [vmem:[#allocation12 + $0xef0] sm:$0xff]  ;;  %6205 = vmatpush.msra.mxu2 %v4714_v19  ;;  %v2283_v33 = vrot.slane %v2213_v39, 2  ;;  %v2282_v28 = vsel %vm1050_vm4, %v2280_v44, %v2281_v11  ;;  %v4712_v19 = vld [vmem:[#allocation12 + $0xe60] sm:$0xff]  ;;  %v2885_v11 = vrot.slane %v2817_v0, 2 }
 0x2d3   : > { %6059 = vmatmul.f32.gmra.mxu2 %v2276_v12  ;;  %v4891_v12 = vld [vmem:[#allocation12 + $0x13f8] sm:$0xff]  ;;  %6246 = vmatpush.msra.mxu3 %v4730_v37  ;;  %v2820_v39 = vld [vmem:[#allocation2 + $0xe0] sm:$0xfc]  ;;  %v2217_v37 = vld [vmem:[#allocation2 + $0xa8] sm:$0xfc] }
 0x2d4   : > { %6100 = vmatmul.f32.gmra.mxu3 %v2279_v2  ;;  %v4713_v2 = vld [vmem:[#allocation12 + $0xe68] sm:$0xff]  ;;  %6655 = vmatpush.msrb.mxu1 %v4891_v12 }
 0x2d5   : > { %6206 = vmatpush.msra.mxu2 %v4713_v2  ;;  %6247 = vmatpush.msra.mxu3 %v4729_v50  ;;  %v12015_v44 = vld [vmem:[#allocation31_spill] sm:$0xff]  ;;  %v4711_v2 = vld [vmem:[#allocation12 + $0xe58] sm:$0xff] }
 0x2d6   : > { %6466 = vmatmul.f32.vlgmr.msra.gmra.mxu0 %v2878_v57  ;;  %v5732_v5 = vpop.f32.mrf.mxu2  ;;  %v12014_v57 = vld [vmem:[#allocation30_spill] sm:$0xff]  ;;  %6656 = vmatpush.msrb.mxu1 %v4890_v27  ;;  %v4889_v12 = vld [vmem:[#allocation12 + $0x13e8] sm:$0xff] }
 0x2d7   : > { %v5733_v9 = vadd.f32 %v5732_v5, %v5692_v56  ;;  %v5773_v51 = vpop.f32.mrf.mxu3  ;;  %v5654_v59 = vadd.f32 %v12014_v57, %v9884_v26  ;;  %v2882_v56 = vrot.slane %v2816_v53, 2  ;;  %v2886_v5 = vrot.slane %v2819_v22, 2  ;;  %6207 = vmatpush.msra.mxu2 %v4712_v19  ;;  %v4873_v22 = vld [vmem:[#allocation12 + $0x1368] sm:$0xff]  ;;  %v2822_v57 = vld [vmem:[#allocation2 + $0xb8] sm:$0x3]  ;;  %6248 = vmatpush.msra.mxu3 %v4728_v30  ;;  %v4888_v19 = vld [vmem:[#allocation12 + $0x13e0] sm:$0xff] }
 0x2d8   : > { %6507 = vmatmul.f32.vlgmr.msra.gmra.mxu1 %v2881_v14  ;;  %v2285_v26 = vsel %vm1050_vm4, %v2283_v33, %v2284_v54  ;;  %v2216_v14 = vld [vmem:[#allocation2 + $0xe0] sm:$0xfc]  ;;  %v9955_v33 = vpop.f32.mrf.mxu0  ;;  %6616 = vmatpush.msrb.mxu0 %v4873_v22  ;;  %v4709_v22 = vld [vmem:[#allocation12 + $0xe48] sm:$0xff] }
 0x2d9   : > { %v9949_v38 = vadd.f32 %v5773_v51, %v5733_v9  ;;  %v2218_v9 = vld [vmem:[#allocation2 + $0xb8] sm:$0x3]  ;;  %v2219_v51 = vld [vmem:[#allocation2 + $0x168] sm:$0x3]  ;;  %v2884_v53 = vsel %vm1050_vm4, %v2882_v56, %v2883_v35  ;;  %v5695_v4 = vadd.f32 %v12015_v44, %v5654_v59  ;;  %12016 = vst [vmem:[#allocation26_spill] sm:$0xff] %v9955_v33  ;;  %v2286_v50 = vrot.slane %v2216_v14, 2  ;;  %6657 = vmatpush.msrb.mxu1 %v4889_v12 }
 0x2da   : > { %v2887_v35 = vsel %vm1050_vm4, %v2885_v11, %v2886_v5  ;;  %v2289_v59 = vrot.slane %v2217_v37, 2  ;;  %v2290_v27 = vrot.slane %v2219_v51, 2  ;;  %v4710_v44 = vld [vmem:[#allocation12 + $0xe50] sm:$0xff]  ;;  %v2823_v33 = vld [vmem:[#allocation2 + $0x168] sm:$0x3]  ;;  %6208 = vmatpush.msra.mxu2 %v4711_v2  ;;  %v2888_v5 = vrot.slane %v2820_v39, 2  ;;  %6617 = vmatpush.msrb.mxu0 %v4872_v7 }
 0x2db   : > { %6062 = vmatmul.f32.gmra.mxu2 %v2282_v28  ;;  %v2287_v28 = vrot.slane %v2218_v9, 2  ;;  %v4726_v14 = vld [vmem:[#allocation12 + $0xed0] sm:$0xff]  ;;  %v2889_v11 = vrot.slane %v2822_v57, 2  ;;  %v4871_v37 = vld [vmem:[#allocation12 + $0x1358] sm:$0xff]  ;;  %6658 = vmatpush.msrb.mxu1 %v4888_v19  ;;  %v2223_v39 = vld [vmem:[#allocation2 + $0x88] sm:$0x3] }
 0x2dc   : > { %6103 = vmatmul.f32.gmra.mxu3 %v2285_v26  ;;  %v4727_v26 = vld [vmem:[#allocation12 + $0xed8] sm:$0xff]  ;;  %v12018_v9 = vld [vmem:[#allocation32_spill] sm:$0xff]  ;;  %6209 = vmatpush.msra.mxu2 %v4710_v44  ;;  %v2291_v2 = vsel %vm1050_vm4, %v2289_v59, %v2290_v27  ;;  %v4724_v44 = vld [vmem:[#allocation12 + $0xec0] sm:$0xff] }
 0x2dd   : > { %v5657_v30 = vadd.f32 %v12018_v9, %v9893_v46  ;;  %6249 = vmatpush.msra.mxu3 %v4727_v26  ;;  %v2288_v51 = vsel %vm1050_vm4, %v2286_v50, %v2287_v28  ;;  %v4725_v46 = vld [vmem:[#allocation12 + $0xec8] sm:$0xff]  ;;  %6618 = vmatpush.msrb.mxu0 %v4871_v37  ;;  %v4870_v57 = vld [vmem:[#allocation12 + $0x1350] sm:$0xff]  ;;  %v2890_v7 = vsel %vm1050_vm4, %v2888_v5, %v2889_v11  ;;  %v2221_v27 = vld [vmem:[#allocation2 + $0xf8] sm:$0xfc]  ;;  %v2296_v5 = vrot.slane %v2223_v39, 2 }
 0x2de   : > { %6469 = vmatmul.f32.gmra.mxu0 %v2884_v53  ;;  %v5735_v54 = vpop.f32.mrf.mxu2  ;;  %v2821_v53 = vld [vmem:[#allocation2 + $0xa8] sm:$0xfc]  ;;  %v4886_v26 = vld [vmem:[#allocation12 + $0x13d0] sm:$0xff]  ;;  %6210 = vmatpush.msra.mxu2 %v4709_v22  ;;  %v4707_v11 = vld [vmem:[#allocation12 + $0xe38] sm:$0xff] }
 0x2df   : > { %v5736_v56 = vadd.f32 %v5735_v54, %v5695_v4  ;;  %v5776_v0 = vpop.f32.mrf.mxu3  ;;  %v4887_v4 = vld [vmem:[#allocation12 + $0x13d8] sm:$0xff]  ;;  %v2891_v12 = vrot.slane %v2821_v53, 2  ;;  %v2892_v54 = vrot.slane %v2823_v33, 2  ;;  %6250 = vmatpush.msra.mxu3 %v4726_v14  ;;  %v4708_v33 = vld [vmem:[#allocation12 + $0xe40] sm:$0xff]  ;;  %v4869_v53 = vld [vmem:[#allocation12 + $0x1348] sm:$0xff]  ;;  %6619 = vmatpush.msrb.mxu0 %v4870_v57  ;;  %v9975_v57 = vpop.f32.mrf.mxu1 }
 0x2e0   : > { %6510 = vmatmul.f32.gmra.mxu1 %v2887_v35  ;;  %v2222_v35 = vld [vmem:[#allocation2 + $0x20] sm:$0x3]  ;;  %v12019_v50 = vld [vmem:[#allocation33_spill] sm:$0xff]  ;;  %v2827_v22 = vld [vmem:[#allocation2 + $0x88] sm:$0x3]  ;;  %6211 = vmatpush.msra.mxu2 %v4708_v33  ;;  %12022 = vst [vmem:[#allocation29_spill] sm:$0xff] %v9975_v57 }
 0x2e1   : > { %v9962_v61 = vadd.f32 %v5776_v0, %v5736_v56  ;;  %v5698_v28 = vadd.f32 %v12019_v50, %v5657_v30  ;;  %v2826_v56 = vld [vmem:[#allocation2 + $0x20] sm:$0x3]  ;;  %v2220_v0 = vld [vmem:[#allocation2 + $0xe8] sm:$0xfc]  ;;  %6659 = vmatpush.msrb.mxu1 %v4887_v4  ;;  %v2293_v59 = vrot.slane %v2222_v35, 2  ;;  %6251 = vmatpush.msra.mxu3 %v4725_v46  ;;  %v2893_v14 = vsel %vm1050_vm4, %v2891_v12, %v2892_v54  ;;  %v9969_v4 = vpop.f32.mrf.mxu0  ;;  %v4868_v39 = vld [vmem:[#allocation12 + $0x1340] sm:$0xff] }
 0x2e2   : > { %v4885_v30 = vld [vmem:[#allocation12 + $0x13c8] sm:$0xff]  ;;  %12020 = vst [vmem:[#allocation28_spill] sm:$0xff] %v9969_v4  ;;  %v4723_v35 = vld [vmem:[#allocation12 + $0xeb8] sm:$0xff]  ;;  %v2895_v12 = vrot.slane %v2826_v56, 2  ;;  %6620 = vmatpush.msrb.mxu0 %v4869_v53  ;;  %6212 = vmatpush.msra.mxu2 %v4707_v11  ;;  %v4706_v33 = vld [vmem:[#allocation12 + $0xe30] sm:$0xff]  ;;  %v2898_v4 = vrot.slane %v2827_v22, 2 }
 0x2e3   : > { %6065 = vmatmul.f32.gmra.mxu2 %v2288_v51  ;;  %v2824_v51 = vld [vmem:[#allocation2 + $0xe8] sm:$0xfc]  ;;  %6660 = vmatpush.msrb.mxu1 %v4886_v26  ;;  %v12021_v46 = vld [vmem:[#allocation34_spill] sm:$0xff]  ;;  %v2226_v56 = vld [vmem:[#allocation2 + $0xf0] sm:$0x3] }
 0x2e4   : > { %6106 = vmatmul.f32.gmra.mxu3 %v2291_v2  ;;  %v2292_v2 = vrot.slane %v2220_v0, 2  ;;  %v2825_v54 = vld [vmem:[#allocation2 + $0xf8] sm:$0xfc]  ;;  %v2894_v26 = vrot.slane %v2824_v51, 2  ;;  %v4884_v0 = vld [vmem:[#allocation12 + $0x13c0] sm:$0xff]  ;;  %6621 = vmatpush.msrb.mxu0 %v4868_v39  ;;  %v4705_v22 = vld [vmem:[#allocation12 + $0xe28] sm:$0xff] }
 0x2e5   : > { %6252 = vmatpush.msra.mxu3 %v4724_v44  ;;  %6661 = vmatpush.msrb.mxu1 %v4885_v30  ;;  %v2227_v44 = vld [vmem:[#allocation2 + $0x140] sm:$0x3]  ;;  %v2897_v51 = vrot.slane %v2825_v54, 2  ;;  %v12023_v30 = vld [vmem:[#allocation35_spill] sm:$0xff] }
 0x2e6   : > { %6472 = vmatmul.f32.gmra.mxu0 %v2890_v7  ;;  %v5738_v19 = vpop.f32.mrf.mxu2  ;;  %v5660_v7 = vadd.f32 %v12021_v46, %v9902_v43  ;;  %v4867_v53 = vld [vmem:[#allocation12 + $0x1338] sm:$0xff]  ;;  %6213 = vmatpush.msra.mxu2 %v4706_v33  ;;  %v2830_v46 = vld [vmem:[#allocation2 + $0xf0] sm:$0x3] }
 0x2e7   : > { %v5739_v9 = vadd.f32 %v5738_v19, %v5698_v28  ;;  %v5779_v37 = vpop.f32.mrf.mxu3  ;;  %v2295_v28 = vrot.slane %v2221_v27, 2  ;;  %v2294_v19 = vsel %vm1050_vm4, %v2292_v2, %v2293_v59  ;;  %6253 = vmatpush.msra.mxu3 %v4723_v35  ;;  %v4722_v27 = vld [vmem:[#allocation12 + $0xeb0] sm:$0xff]  ;;  %v2896_v59 = vsel %vm1050_vm4, %v2894_v26, %v2895_v12  ;;  %v2828_v2 = vld [vmem:[#allocation2 + $0xa0] sm:$0xfc]  ;;  %6662 = vmatpush.msrb.mxu1 %v4884_v0  ;;  %v2831_v33 = vld [vmem:[#allocation2 + $0x140] sm:$0x3] }
 0x2e8   : > { %6513 = vmatmul.f32.gmra.mxu1 %v2893_v14  ;;  %v2224_v14 = vld [vmem:[#allocation2 + $0xa0] sm:$0xfc]  ;;  %v5701_v11 = vadd.f32 %v12023_v30, %v5660_v7  ;;  %v2299_v35 = vrot.slane %v2226_v56, 2  ;;  %v2899_v39 = vsel %vm1050_vm4, %v2897_v51, %v2898_v4  ;;  %v2829_v12 = vld [vmem:[#allocation2 + $0x170] sm:$0xfc]  ;;  %v2302_v26 = vrot.slane %v2227_v44, 2  ;;  %6622 = vmatpush.msrb.mxu0 %v4867_v53 }
 0x2e9   : > { %v9973_v50 = vadd.f32 %v5779_v37, %v5739_v9  ;;  %v2297_v43 = vsel %vm1050_vm4, %v2295_v28, %v2296_v5  ;;  %v2225_v9 = vld [vmem:[#allocation2 + $0x170] sm:$0xfc]  ;;  %v4883_v37 = vld [vmem:[#allocation12 + $0x13b8] sm:$0xff]  ;;  %v2298_v28 = vrot.slane %v2224_v14, 2  ;;  %6254 = vmatpush.msra.mxu3 %v4722_v27  ;;  %v4704_v0 = vld [vmem:[#allocation12 + $0xe20] sm:$0xff]  ;;  %6214 = vmatpush.msra.mxu2 %v4705_v22  ;;  %v5663_v14 = vadd.f32 %v9731_v52, %v9911_v36 }
 0x2ea   : > { %v2301_v54 = vrot.slane %v2225_v9, 2  ;;  %6663 = vmatpush.msrb.mxu1 %v4883_v37  ;;  %v4882_v7 = vld [vmem:[#allocation12 + $0x13b0] sm:$0xff]  ;;  %v2900_v27 = vrot.slane %v2828_v2, 2  ;;  %v2901_v4 = vrot.slane %v2830_v46, 2  ;;  %v4865_v51 = vld [vmem:[#allocation12 + $0x1328] sm:$0xff]  ;;  %v9986_v9 = vpop.f32.mrf.mxu0  ;;  %v2903_v44 = vrot.slane %v2829_v12, 2  ;;  %v9990_v2 = vpop.f32.mrf.mxu1 }
 0x2eb   : > { %6068 = vmatmul.f32.gmra.mxu2 %v2294_v19  ;;  %v4721_v19 = vld [vmem:[#allocation12 + $0xea8] sm:$0xff]  ;;  %v2300_v53 = vsel %vm1050_vm4, %v2298_v28, %v2299_v35  ;;  %v2228_v37 = vld [vmem:[#allocation2 + $0x60] sm:$0xfc]  ;;  %v2904_v22 = vrot.slane %v2831_v33, 2  ;;  %v2230_v36 = vld [vmem:[#allocation2 + $0x28] sm:$0x3] }
 0x2ec   : > { %6109 = vmatmul.f32.gmra.mxu3 %v2297_v43  ;;  %v4866_v43 = vld [vmem:[#allocation12 + $0x1330] sm:$0xff]  ;;  %6664 = vmatpush.msrb.mxu1 %v4882_v7  ;;  %v4881_v30 = vld [vmem:[#allocation12 + $0x13a8] sm:$0xff]  ;;  %v2303_v52 = vsel %vm1050_vm4, %v2301_v54, %v2302_v26  ;;  %12024 = vst [vmem:[#allocation30_spill] sm:$0xff] %v9990_v2  ;;  %v4864_v46 = vld [vmem:[#allocation12 + $0x1320] sm:$0xff]  ;;  %v2902_v35 = vsel %vm1050_vm4, %v2900_v27, %v2901_v4  ;;  %v2304_v7 = vrot.slane %v2228_v37, 2 }
 0x2ed   : > { %6255 = vmatpush.msra.mxu3 %v4721_v19  ;;  %6623 = vmatpush.msrb.mxu0 %v4866_v43  ;;  %v4880_v28 = vld [vmem:[#allocation12 + $0x13a0] sm:$0xff]  ;;  %v12025_v19 = vld [vmem:[#allocation36_spill] sm:$0xff]  ;;  %v5666_v37 = vadd.f32 %v9742_v24, %v9918_v32  ;;  %v2234_v24 = vld [vmem:[#allocation2 + $0x98] sm:$0x3] }
 0x2ee   : > { %6475 = vmatmul.f32.gmra.mxu0 %v2896_v59  ;;  %v5741_v5 = vpop.f32.mrf.mxu2  ;;  %v4720_v59 = vld [vmem:[#allocation12 + $0xea0] sm:$0xff]  ;;  %6215 = vmatpush.msra.mxu2 %v4704_v0  ;;  %v5704_v43 = vadd.f32 %v12025_v19, %v5663_v14  ;;  %v4702_v12 = vld [vmem:[#allocation12 + $0xe10] sm:$0xff]  ;;  %v2305_v0 = vrot.slane %v2230_v36, 2  ;;  %v2833_v2 = vld [vmem:[#allocation2 + $0xc8] sm:$0xfc] }
 0x2ef   : > { %v5742_v57 = vadd.f32 %v5741_v5, %v5701_v11  ;;  %v5782_v23 = vpop.f32.mrf.mxu3  ;;  %v4703_v11 = vld [vmem:[#allocation12 + $0xe18] sm:$0xff]  ;;  %6256 = vmatpush.msra.mxu3 %v4720_v59  ;;  %v2231_v5 = vld [vmem:[#allocation2 + $0x38] sm:$0x3]  ;;  %6624 = vmatpush.msrb.mxu0 %v4865_v51  ;;  %v2834_v26 = vld [vmem:[#allocation2 + $0x28] sm:$0x3]  ;;  %v2905_v51 = vsel %vm1050_vm4, %v2903_v44, %v2904_v22 }
 0x2f0   : > { %6516 = vmatmul.f32.gmra.mxu1 %v2899_v39  ;;  %v2832_v39 = vld [vmem:[#allocation2 + $0x60] sm:$0xfc]  ;;  %6216 = vmatpush.msra.mxu2 %v4703_v11  ;;  %v4718_v33 = vld [vmem:[#allocation12 + $0xe90] sm:$0xff]  ;;  %v4863_v59 = vld [vmem:[#allocation12 + $0x1318] sm:$0xff]  ;;  %v2308_v4 = vrot.slane %v2231_v5, 2  ;;  %v2907_v44 = vrot.slane %v2834_v26, 2  ;;  %v2306_v5 = vsel %vm1050_vm4, %v2304_v7, %v2305_v0 }
 0x2f1   : > { %v9984_v56 = vadd.f32 %v5782_v23, %v5742_v57  ;;  %v2229_v23 = vld [vmem:[#allocation2 + $0xc8] sm:$0xfc]  ;;  %v4719_v57 = vld [vmem:[#allocation12 + $0xe98] sm:$0xff]  ;;  %6665 = vmatpush.msrb.mxu1 %v4881_v30  ;;  %6625 = vmatpush.msrb.mxu0 %v4864_v46  ;;  %v2835_v11 = vld [vmem:[#allocation2 + $0x38] sm:$0x3] }
 0x2f2   : > { %6257 = vmatpush.msra.mxu3 %v4719_v57  ;;  %v2307_v27 = vrot.slane %v2229_v23, 2  ;;  %v4879_v14 = vld [vmem:[#allocation12 + $0x1398] sm:$0xff]  ;;  %v4701_v30 = vld [vmem:[#allocation12 + $0xe08] sm:$0xff]  ;;  %6217 = vmatpush.msra.mxu2 %v4702_v12  ;;  %v2906_v57 = vrot.slane %v2832_v39, 2  ;;  %v4862_v22 = vld [vmem:[#allocation12 + $0x1310] sm:$0xff]  ;;  %v2909_v23 = vrot.slane %v2833_v2, 2 }
 0x2f3   : > { %6071 = vmatmul.f32.gmra.mxu2 %v2300_v53  ;;  %6666 = vmatpush.msrb.mxu1 %v4880_v28  ;;  %v2232_v46 = vld [vmem:[#allocation2 + $0xc0] sm:$0xfc]  ;;  %v4878_v28 = vld [vmem:[#allocation12 + $0x1390] sm:$0xff]  ;;  %v2233_v32 = vld [vmem:[#allocation2 + $0x18] sm:$0xfc] }
 0x2f4   : > { %6112 = vmatmul.f32.gmra.mxu3 %v2303_v52  ;;  %6626 = vmatpush.msrb.mxu0 %v4863_v59  ;;  %v4700_v19 = vld [vmem:[#allocation12 + $0xe00] sm:$0xff]  ;;  %v2309_v12 = vsel %vm1050_vm4, %v2307_v27, %v2308_v4  ;;  %v4861_v2 = vld [vmem:[#allocation12 + $0x1308] sm:$0xff]  ;;  %v2908_v0 = vsel %vm1050_vm4, %v2906_v57, %v2907_v44  ;;  %v2310_v27 = vrot.slane %v2232_v46, 2  ;;  %v2311_v4 = vrot.slane %v2234_v24, 2 }
 0x2f5   : > { %6258 = vmatpush.msra.mxu3 %v4718_v33  ;;  %6667 = vmatpush.msrb.mxu1 %v4879_v14  ;;  %v4716_v39 = vld [vmem:[#allocation12 + $0xe80] sm:$0xff]  ;;  %v4877_v7 = vld [vmem:[#allocation12 + $0x1388] sm:$0xff]  ;;  %v5707_v33 = vadd.f32 %v9745_v29, %v5666_v37  ;;  %v2313_v57 = vrot.slane %v2233_v32, 2  ;;  %v2837_v29 = vld [vmem:[#allocation2 + $0x18] sm:$0xfc] }
 0x2f6   : > { %6478 = vmatmul.f32.gmra.mxu0 %v2902_v35  ;;  %v5744_v54 = vpop.f32.mrf.mxu2  ;;  %v4717_v35 = vld [vmem:[#allocation12 + $0xe88] sm:$0xff]  ;;  %6218 = vmatpush.msra.mxu2 %v4701_v30  ;;  %v2235_v26 = vld [vmem:[#allocation2 + $0x8] sm:$0x3]  ;;  %v2836_v59 = vld [vmem:[#allocation2 + $0xc0] sm:$0xfc] }
 0x2f7   : > { %v5745_v53 = vadd.f32 %v5744_v54, %v5704_v43  ;;  %v5785_v52 = vpop.f32.mrf.mxu3  ;;  %v2910_v43 = vrot.slane %v2835_v11, 2  ;;  %6259 = vmatpush.msra.mxu3 %v4717_v35  ;;  %v10001_v54 = vpop.f32.mrf.mxu0  ;;  %6627 = vmatpush.msrb.mxu0 %v4862_v22  ;;  %v4860_v14 = vld [vmem:[#allocation12 + $0x1300] sm:$0xff]  ;;  %v2314_v44 = vrot.slane %v2235_v26, 2  ;;  %v2912_v46 = vrot.slane %v2836_v59, 2  ;;  %v2494_v32 = vld [vmem:[#allocation2 + $0x90] sm:$0xf] }
 0x2f8   : > { %6519 = vmatmul.f32.gmra.mxu1 %v2905_v51  ;;  %6219 = vmatpush.msra.mxu2 %v4700_v19  ;;  %v10005_v51 = vpop.f32.mrf.mxu1  ;;  %v4876_v30 = vld [vmem:[#allocation12 + $0x1380] sm:$0xff]  ;;  %v2842_v59 = vld [vmem:[#allocation2 + $0x50] sm:$0x3] }
 0x2f9   : > { %v9997_v36 = vadd.f32 %v5785_v52, %v5745_v53  ;;  %6668 = vmatpush.msrb.mxu1 %v4878_v28  ;;  %v2838_v52 = vld [vmem:[#allocation2 + $0x98] sm:$0x3]  ;;  %6260 = vmatpush.msra.mxu3 %v4716_v39  ;;  %v2911_v11 = vsel %vm1050_vm4, %v2909_v23, %v2910_v43  ;;  %v2839_v37 = vld [vmem:[#allocation2 + $0x8] sm:$0x3]  ;;  %v2312_v23 = vsel %vm1050_vm4, %v2310_v27, %v2311_v4  ;;  %v2915_v43 = vrot.slane %v2837_v29, 2 }
 0x2fa   : > { %6628 = vmatpush.msrb.mxu0 %v4861_v2  ;;  %v2913_v19 = vrot.slane %v2838_v52, 2  ;;  %v2315_v24 = vsel %vm1050_vm4, %v2313_v57, %v2314_v44  ;;  %v2495_v39 = vld [vmem:[#allocation2 + $0x118] sm:$0xf]  ;;  %v2493_v2 = vld [vmem:[#allocation2 + $0x110] sm:$0xf0] }
 0x2fb   : > { %6074 = vmatmul.f32.gmra.mxu2 %v2306_v5  ;;  %6669 = vmatpush.msrb.mxu1 %v4877_v7  ;;  %v5669_v5 = vadd.f32 %v9755_v48, %v9925_v1  ;;  %v2492_v1 = vld [vmem:[#allocation2 + $0x108] sm:$0xf0]  ;;  %v12026_v57 = vld [vmem:[#allocation37_spill] sm:$0xff] }
 0x2fc   : > { %6115 = vmatmul.f32.gmra.mxu3 %v2309_v12  ;;  %6629 = vmatpush.msrb.mxu0 %v4860_v14  ;;  %v2916_v12 = vrot.slane %v2839_v37, 2  ;;  %v2914_v26 = vsel %vm1050_vm4, %v2912_v46, %v2913_v19  ;;  %v2560_v14 = vrot.slane %v2495_v39, 4  ;;  %v5812_v44 = vadd.f32 %v12026_v57, %v9936_v42  ;;  %v2499_v39 = vld [vmem:[#allocation2 + $0xd8] sm:$0xf] }
 0x2fd   : > { %6670 = vmatpush.msrb.mxu1 %v4876_v30  ;;  %v5710_v48 = vadd.f32 %v9758_v45, %v5669_v5  ;;  %v2556_v45 = vrot.slane %v2492_v1, 4  ;;  %v2919_v5 = vrot.slane %v2842_v59, 2 }
 0x2fe   : > { %6481 = vmatmul.f32.gmra.mxu0 %v2908_v0  ;;  %v5747_v53 = vpop.f32.mrf.mxu2  ;;  %v2917_v52 = vsel %vm1050_vm4, %v2915_v43, %v2916_v12  ;;  %v2496_v12 = vld [vmem:[#allocation2 + $0x148] sm:$0xf0] }
 0x2ff   : > { %v5748_v35 = vadd.f32 %v5747_v53, %v5707_v33  ;;  %v5788_v22 = vpop.f32.mrf.mxu3  ;;  %v10016_v7 = vpop.f32.mrf.mxu0  ;;  %v2840_v33 = vld [vmem:[#allocation2] sm:$0xfc]  ;;  %v2557_v53 = vrot.slane %v2494_v32, 4 }
 0x300   : > { %6522 = vmatmul.f32.gmra.mxu1 %v2911_v11  ;;  %v10019_v30 = vpop.f32.mrf.mxu1  ;;  %v2841_v11 = vld [vmem:[#allocation2 + $0x78] sm:$0xfc]  ;;  %v2918_v37 = vrot.slane %v2840_v33, 2  ;;  %v2497_v32 = vld [vmem:[#allocation2 + $0x100] sm:$0xf0]  ;;  %v2562_v33 = vrot.slane %v2496_v12, 4 }
 0x301   : > { %v10010_v28 = vadd.f32 %v5788_v22, %v5748_v35  ;;  %v2843_v35 = vld [vmem:[#allocation2 + $0x68] sm:$0x3]  ;;  %v2559_v22 = vrot.slane %v2493_v2, 4  ;;  %v2558_v46 = vsel %vm481_vm0, %v2556_v45, %v2557_v53  ;;  %v2921_v19 = vrot.slane %v2841_v11, 2  ;;  %v3100_v2 = vld [vmem:[#allocation2 + $0x148] sm:$0xf0] }
 0x302   : > { %v3103_v45 = vld [vmem:[#allocation2 + $0xd8] sm:$0xf] }
 0x303   : > { %6077 = vmatmul.f32.gmra.mxu2 %v2312_v23  ;;  %v2922_v23 = vrot.slane %v2843_v35, 2  ;;  %v2561_v43 = vsel %vm481_vm0, %v2559_v22, %v2560_v14  ;;  %v2566_v14 = vrot.slane %v2499_v39, 4  ;;  %v3101_v35 = vld [vmem:[#allocation2 + $0x100] sm:$0xf0]  ;;  %v5815_v22 = vadd.f32 %v9781_v49, %v9949_v38  ;;  %v2502_v12 = vld [vmem:[#allocation2 + $0x138] sm:$0xf] }
 0x304   : > { %6118 = vmatmul.f32.gmra.mxu3 %v2315_v24  ;;  %v2498_v24 = vld [vmem:[#allocation2 + $0x58] sm:$0xf] }
 0x305   : > { %v2563_v59 = vrot.slane %v2498_v24, 4  ;;  %v2923_v53 = vsel %vm1050_vm4, %v2921_v19, %v2922_v23  ;;  %v3167_v19 = vrot.slane %v3101_v35, 4  ;;  %v3168_v23 = vrot.slane %v3103_v45, 4  ;;  %v2500_v24 = vld [vmem:[#allocation2 + $0x80] sm:$0xf0]  ;;  %v4779_v38 = vld [vmem:[#allocation12 + $0x1078] sm:$0xff] }
 0x306   : > { %6484 = vmatmul.f32.gmra.mxu0 %v2914_v26  ;;  %v5750_v0 = vpop.f32.mrf.mxu2  ;;  %v2920_v26 = vsel %vm1050_vm4, %v2918_v37, %v2919_v5  ;;  %v5856_v49 = vadd.f32 %v9786_v21, %v5815_v22  ;;  %6368 = vmatpush.msrb.mxu2 %v4779_v38  ;;  %v2568_v21 = vrot.slane %v2500_v24, 4  ;;  %v4939_v35 = vld [vmem:[#allocation12 + $0x1578] sm:$0xff]  ;;  %v4777_v22 = vld [vmem:[#allocation12 + $0x1068] sm:$0xff]  ;;  %v4954_v38 = vld [vmem:[#allocation12 + $0x15f0] sm:$0xff] }
 0x307   : > { %v5751_v27 = vadd.f32 %v5750_v0, %v5710_v48  ;;  %v5791_v4 = vpop.f32.mrf.mxu3  ;;  %v12027_v48 = vld [vmem:[#allocation38_spill] sm:$0xff]  ;;  %v3102_v0 = vld [vmem:[#allocation2 + $0x58] sm:$0xf]  ;;  %v10030_v11 = vpop.f32.mrf.mxu0  ;;  %6778 = vmatpush.msra.mxu0 %v4939_v35 }
 0x308   : > { %6525 = vmatmul.f32.gmra.mxu1 %v2917_v52  ;;  %v5853_v42 = vadd.f32 %v12027_v48, %v5812_v44  ;;  %v3164_v44 = vrot.slane %v3100_v2, 4  ;;  %v3165_v37 = vrot.slane %v3102_v0, 4  ;;  %v10036_v5 = vpop.f32.mrf.mxu1  ;;  %v4778_v48 = vld [vmem:[#allocation12 + $0x1070] sm:$0xff]  ;;  %v2569_v2 = vrot.slane %v2502_v12, 4  ;;  %v4955_v45 = vld [vmem:[#allocation12 + $0x15f8] sm:$0xff] }
 0x309   : > { %v10023_v29 = vadd.f32 %v5791_v4, %v5751_v27  ;;  %v2565_v4 = vrot.slane %v2497_v32, 4  ;;  %v2503_v32 = vld [vmem:[#allocation2 + $0x120] sm:$0xf]  ;;  %v2501_v0 = vld [vmem:[#allocation2 + $0x130] sm:$0xf0]  ;;  %6369 = vmatpush.msrb.mxu2 %v4778_v48  ;;  %6819 = vmatpush.msra.mxu1 %v4955_v45 }
 0x30a   : > { %v3166_v39 = vsel %vm481_vm0, %v3164_v44, %v3165_v37  ;;  %v12028_v44 = vld [vmem:[#allocation39_spill] sm:$0xff]  ;;  %v2571_v12 = vrot.slane %v2501_v0, 4  ;;  %v2570_v24 = vsel %vm481_vm0, %v2568_v21, %v2569_v2  ;;  %v12030_v21 = vld [vmem:[#allocation40_spill] sm:$0xff]  ;;  %v4775_v45 = vld [vmem:[#allocation12 + $0x1058] sm:$0xff] }
 0x30b   : > { %6220 = vmatmul.f32.vlgmr.msra.gmra.mxu2 %v2558_v46  ;;  %v2564_v46 = vsel %vm481_vm0, %v2562_v33, %v2563_v59  ;;  %v4794_v33 = vld [vmem:[#allocation12 + $0x10f0] sm:$0xff]  ;;  %v3169_v59 = vsel %vm481_vm0, %v3167_v19, %v3168_v23  ;;  %v5818_v37 = vadd.f32 %v12028_v44, %v9962_v61  ;;  %v4793_v19 = vld [vmem:[#allocation12 + $0x10e8] sm:$0xff]  ;;  %v4792_v0 = vld [vmem:[#allocation12 + $0x10e0] sm:$0xff]  ;;  %6820 = vmatpush.msra.mxu1 %v4954_v38 }
 0x30c   : > { %6261 = vmatmul.f32.vlgmr.msra.gmra.mxu3 %v2561_v43  ;;  %v2567_v43 = vsel %vm481_vm0, %v2565_v4, %v2566_v14  ;;  %v3107_v4 = vld [vmem:[#allocation2 + $0x120] sm:$0xf]  ;;  %v2572_v14 = vrot.slane %v2503_v32, 4  ;;  %v4938_v23 = vld [vmem:[#allocation12 + $0x1570] sm:$0xff]  ;;  %6370 = vmatpush.msrb.mxu2 %v4777_v22  ;;  %v3108_v44 = vld [vmem:[#allocation2 + $0xe0] sm:$0xf0] }
 0x30d   : > { %v3174_v48 = vrot.slane %v3107_v4, 4  ;;  %6779 = vmatpush.msra.mxu0 %v4938_v23  ;;  %v5859_v35 = vadd.f32 %v12030_v21, %v5818_v37  ;;  %v4937_v4 = vld [vmem:[#allocation12 + $0x1568] sm:$0xff]  ;;  %v4952_v37 = vld [vmem:[#allocation12 + $0x15e0] sm:$0xff]  ;;  %v4774_v38 = vld [vmem:[#allocation12 + $0x1050] sm:$0xff] }
 0x30e   : > { %6487 = vmatmul.f32.gmra.mxu0 %v2920_v26  ;;  %v5893_v1 = vpop.f32.mrf.mxu2  ;;  %v4795_v26 = vld [vmem:[#allocation12 + $0x10f8] sm:$0xff]  ;;  %v2573_v61 = vsel %vm481_vm0, %v2571_v12, %v2572_v14  ;;  %v4953_v14 = vld [vmem:[#allocation12 + $0x15e8] sm:$0xff]  ;;  %v4790_v21 = vld [vmem:[#allocation12 + $0x10d0] sm:$0xff] }
 0x30f   : > { %v5894_v52 = vadd.f32 %v5893_v1, %v5853_v42  ;;  %v5934_v27 = vpop.f32.mrf.mxu3  ;;  %v3106_v1 = vld [vmem:[#allocation2 + $0x138] sm:$0xf]  ;;  %6409 = vmatpush.msrb.mxu3 %v4795_v26  ;;  %v4776_v26 = vld [vmem:[#allocation12 + $0x1060] sm:$0xff]  ;;  %6780 = vmatpush.msra.mxu0 %v4937_v4 }
 0x310   : > { %6528 = vmatmul.f32.gmra.mxu1 %v2923_v53  ;;  %6371 = vmatpush.msrb.mxu2 %v4776_v26  ;;  %v3109_v26 = vld [vmem:[#allocation2 + $0xa8] sm:$0xf0] }
 0x311   : > { %v10034_v57 = vadd.f32 %v5934_v27, %v5894_v52  ;;  %v3104_v27 = vld [vmem:[#allocation2 + $0x80] sm:$0xf0]  ;;  %6410 = vmatpush.msrb.mxu3 %v4794_v33  ;;  %v10051_v33 = vpop.f32.mrf.mxu1  ;;  %6821 = vmatpush.msra.mxu1 %v4953_v14  ;;  %v3179_v4 = vrot.slane %v3109_v26, 4  ;;  %v4933_v26 = vld [vmem:[#allocation12 + $0x1548] sm:$0xff] }
 0x312   : > { %v3170_v32 = vrot.slane %v3104_v27, 4  ;;  %12029 = vst [vmem:[#allocation31_spill] sm:$0xff] %v10051_v33  ;;  %6372 = vmatpush.msrb.mxu2 %v4775_v45 }
 0x313   : > { %6223 = vmatmul.f32.gmra.mxu2 %v2564_v46  ;;  %6411 = vmatpush.msrb.mxu3 %v4793_v19 }
 0x314   : > { %6264 = vmatmul.f32.gmra.mxu3 %v2567_v43  ;;  %v3171_v43 = vrot.slane %v3106_v1, 4  ;;  %v2506_v1 = vld [vmem:[#allocation2 + $0xb8] sm:$0xf]  ;;  %6822 = vmatpush.msra.mxu1 %v4952_v37 }
 0x315   : > { %v2575_v19 = vrot.slane %v2506_v1, 4  ;;  %6412 = vmatpush.msrb.mxu3 %v4792_v0  ;;  %v3176_v0 = vrot.slane %v3108_v44, 4  ;;  %6373 = vmatpush.msrb.mxu2 %v4774_v38  ;;  %v4950_v44 = vld [vmem:[#allocation12 + $0x15d0] sm:$0xff]  ;;  %v4788_v38 = vld [vmem:[#allocation12 + $0x10c0] sm:$0xff] }
 0x316   : > { %6630 = vmatmul.f32.vlgmr.msrb.gmra.mxu0 %v3166_v39  ;;  %v5896_v42 = vpop.f32.mrf.mxu2  ;;  %v10047_v39 = vpop.f32.mrf.mxu0  ;;  %v3172_v2 = vsel %vm481_vm0, %v3170_v32, %v3171_v43 }
 0x317   : > { %v5897_v53 = vadd.f32 %v5896_v42, %v5856_v49  ;;  %v5937_v52 = vpop.f32.mrf.mxu3  ;;  %v3105_v49 = vld [vmem:[#allocation2 + $0x130] sm:$0xf0]  ;;  %v2504_v42 = vld [vmem:[#allocation2 + $0xe0] sm:$0xf0] }
 0x318   : > { %6671 = vmatmul.f32.vlgmr.msrb.gmra.mxu1 %v3169_v59  ;;  %v3110_v59 = vld [vmem:[#allocation2 + $0xb8] sm:$0xf]  ;;  %v3173_v27 = vrot.slane %v3105_v49, 4  ;;  %v2574_v12 = vrot.slane %v2504_v42, 4  ;;  %v5821_v42 = vadd.f32 %v9810_v18, %v9973_v50  ;;  %v4789_v18 = vld [vmem:[#allocation12 + $0x10c8] sm:$0xff] }
 0x319   : > { %v10045_v46 = vadd.f32 %v5937_v52, %v5897_v53  ;;  %v2505_v53 = vld [vmem:[#allocation2 + $0xa8] sm:$0xf0]  ;;  %v2507_v52 = vld [vmem:[#allocation2 + $0x168] sm:$0xf] }
 0x31a   : > { %v3175_v23 = vsel %vm481_vm0, %v3173_v27, %v3174_v48  ;;  %v2577_v32 = vrot.slane %v2505_v53, 4  ;;  %v2578_v49 = vrot.slane %v2507_v52, 4  ;;  %v3177_v48 = vrot.slane %v3110_v59, 4  ;;  %v4935_v53 = vld [vmem:[#allocation12 + $0x1558] sm:$0xff]  ;;  %v4934_v59 = vld [vmem:[#allocation12 + $0x1550] sm:$0xff] }
 0x31b   : > { %6226 = vmatmul.f32.gmra.mxu2 %v2570_v24  ;;  %v4791_v24 = vld [vmem:[#allocation12 + $0x10d8] sm:$0xff]  ;;  %v2576_v52 = vsel %vm481_vm0, %v2574_v12, %v2575_v19  ;;  %v5862_v19 = vadd.f32 %v9813_v3, %v5821_v42  ;;  %v4949_v42 = vld [vmem:[#allocation12 + $0x15c8] sm:$0xff] }
 0x31c   : > { %6267 = vmatmul.f32.gmra.mxu3 %v2573_v61  ;;  %v4936_v61 = vld [vmem:[#allocation12 + $0x1560] sm:$0xff]  ;;  %v4951_v27 = vld [vmem:[#allocation12 + $0x15d8] sm:$0xff]  ;;  %v2579_v45 = vsel %vm481_vm0, %v2577_v32, %v2578_v49  ;;  %v3178_v12 = vsel %vm481_vm0, %v3176_v0, %v3177_v48  ;;  %v3112_v48 = vld [vmem:[#allocation2 + $0xe8] sm:$0xf0] }
 0x31d   : > { %6413 = vmatpush.msrb.mxu3 %v4791_v24  ;;  %6781 = vmatpush.msra.mxu0 %v4936_v61  ;;  %v2508_v24 = vld [vmem:[#allocation2 + $0xe8] sm:$0xf0]  ;;  %v2509_v61 = vld [vmem:[#allocation2 + $0xf8] sm:$0xf0]  ;;  %v3114_v49 = vld [vmem:[#allocation2 + $0x20] sm:$0xf] }
 0x31e   : > { %6633 = vmatmul.f32.gmra.mxu0 %v3172_v2  ;;  %v5899_v22 = vpop.f32.mrf.mxu2  ;;  %v3111_v2 = vld [vmem:[#allocation2 + $0x168] sm:$0xf]  ;;  %v10062_v50 = vpop.f32.mrf.mxu0  ;;  %6823 = vmatpush.msra.mxu1 %v4951_v27  ;;  %v2580_v27 = vrot.slane %v2508_v24, 4  ;;  %v4770_v24 = vld [vmem:[#allocation12 + $0x1030] sm:$0xff] }
 0x31f   : > { %v5900_v33 = vadd.f32 %v5899_v22, %v5859_v35  ;;  %v5940_v43 = vpop.f32.mrf.mxu3  ;;  %v4773_v35 = vld [vmem:[#allocation12 + $0x1048] sm:$0xff]  ;;  %v3180_v14 = vrot.slane %v3111_v2, 4  ;;  %v2510_v22 = vld [vmem:[#allocation2 + $0x20] sm:$0xf]  ;;  %6414 = vmatpush.msrb.mxu3 %v4790_v21  ;;  %6782 = vmatpush.msra.mxu0 %v4935_v53 }
 0x320   : > { %6674 = vmatmul.f32.gmra.mxu1 %v3175_v23  ;;  %6374 = vmatpush.msrb.mxu2 %v4773_v35  ;;  %v4772_v23 = vld [vmem:[#allocation12 + $0x1040] sm:$0xff]  ;;  %v2581_v37 = vrot.slane %v2510_v22, 4  ;;  %v4771_v53 = vld [vmem:[#allocation12 + $0x1038] sm:$0xff] }
 0x321   : > { %v10058_v1 = vadd.f32 %v5940_v43, %v5900_v33  ;;  %v2511_v33 = vld [vmem:[#allocation2 + $0x88] sm:$0xf]  ;;  %v10066_v43 = vpop.f32.mrf.mxu1  ;;  %6415 = vmatpush.msrb.mxu3 %v4789_v18  ;;  %v3181_v2 = vsel %vm481_vm0, %v3179_v4, %v3180_v14  ;;  %6783 = vmatpush.msra.mxu0 %v4934_v59  ;;  %v4787_v35 = vld [vmem:[#allocation12 + $0x10b8] sm:$0xff]  ;;  %v3183_v18 = vrot.slane %v3114_v49, 4  ;;  %v2583_v14 = vrot.slane %v2509_v61, 4  ;;  %v4786_v49 = vld [vmem:[#allocation12 + $0x10b0] sm:$0xff] }
 0x322   : > { %v2584_v3 = vrot.slane %v2511_v33, 4  ;;  %6824 = vmatpush.msra.mxu1 %v4950_v44  ;;  %6375 = vmatpush.msrb.mxu2 %v4772_v23  ;;  %v3113_v4 = vld [vmem:[#allocation2 + $0xf8] sm:$0xf0]  ;;  %v4932_v33 = vld [vmem:[#allocation12 + $0x1540] sm:$0xff]  ;;  %v3182_v59 = vrot.slane %v3112_v48, 4  ;;  %v2582_v44 = vsel %vm481_vm0, %v2580_v27, %v2581_v37  ;;  %v4769_v48 = vld [vmem:[#allocation12 + $0x1028] sm:$0xff] }
 0x323   : > { %6229 = vmatmul.f32.gmra.mxu2 %v2576_v52  ;;  %v3115_v52 = vld [vmem:[#allocation2 + $0x88] sm:$0xf]  ;;  %6416 = vmatpush.msrb.mxu3 %v4788_v38  ;;  %v2515_v61 = vld [vmem:[#allocation2 + $0x140] sm:$0xf] }
 0x324   : > { %6270 = vmatmul.f32.gmra.mxu3 %v2579_v45  ;;  %v5824_v45 = vadd.f32 %v9823_v6, %v9984_v56  ;;  %6784 = vmatpush.msra.mxu0 %v4933_v26  ;;  %v3186_v23 = vrot.slane %v3115_v52, 4  ;;  %v2585_v6 = vsel %vm481_vm0, %v2583_v14, %v2584_v3  ;;  %v2512_v56 = vld [vmem:[#allocation2 + $0xa0] sm:$0xf0]  ;;  %v4931_v38 = vld [vmem:[#allocation12 + $0x1538] sm:$0xff]  ;;  %v3184_v37 = vsel %vm481_vm0, %v3182_v59, %v3183_v18  ;;  %v4930_v14 = vld [vmem:[#allocation12 + $0x1530] sm:$0xff] }
 0x325   : > { %6825 = vmatpush.msra.mxu1 %v4949_v42  ;;  %6376 = vmatpush.msrb.mxu2 %v4771_v53  ;;  %v4947_v26 = vld [vmem:[#allocation12 + $0x15b8] sm:$0xff]  ;;  %v3116_v53 = vld [vmem:[#allocation2 + $0xa0] sm:$0xf0]  ;;  %v2586_v52 = vrot.slane %v2512_v56, 4  ;;  %v3117_v59 = vld [vmem:[#allocation2 + $0x170] sm:$0xf0]  ;;  %v5827_v56 = vadd.f32 %v9836_v25, %v9997_v36 }
 0x326   : > { %6636 = vmatmul.f32.gmra.mxu0 %v3178_v12  ;;  %v5902_v32 = vpop.f32.mrf.mxu2  ;;  %v2514_v12 = vld [vmem:[#allocation2 + $0xf0] sm:$0xf]  ;;  %6417 = vmatpush.msrb.mxu3 %v4787_v35  ;;  %v10077_v42 = vpop.f32.mrf.mxu0  ;;  %v2518_v25 = vld [vmem:[#allocation2 + $0x28] sm:$0xf]  ;;  %v2517_v36 = vld [vmem:[#allocation2 + $0xc8] sm:$0xf0] }
 0x327   : > { %v5903_v21 = vadd.f32 %v5902_v32, %v5862_v19  ;;  %v5943_v0 = vpop.f32.mrf.mxu3  ;;  %v4948_v19 = vld [vmem:[#allocation12 + $0x15c0] sm:$0xff]  ;;  %v2513_v32 = vld [vmem:[#allocation2 + $0x170] sm:$0xf0]  ;;  %6785 = vmatpush.msra.mxu0 %v4932_v33  ;;  %6377 = vmatpush.msrb.mxu2 %v4770_v24  ;;  %v2587_v27 = vrot.slane %v2514_v12, 4  ;;  %v4785_v35 = vld [vmem:[#allocation12 + $0x10a8] sm:$0xff] }
 0x328   : > { %6677 = vmatmul.f32.gmra.mxu1 %v3181_v2  ;;  %v3185_v2 = vrot.slane %v3113_v4, 4  ;;  %6418 = vmatpush.msrb.mxu3 %v4786_v49  ;;  %v4784_v12 = vld [vmem:[#allocation12 + $0x10a0] sm:$0xff] }
 0x329   : > { %v10071_v22 = vadd.f32 %v5943_v0, %v5903_v21  ;;  %v5865_v21 = vadd.f32 %v9826_v41, %v5824_v45  ;;  %v3118_v0 = vld [vmem:[#allocation2 + $0xf0] sm:$0xf]  ;;  %6826 = vmatpush.msra.mxu1 %v4948_v19  ;;  %v2589_v41 = vrot.slane %v2513_v32, 4  ;;  %v2590_v45 = vrot.slane %v2515_v61, 4  ;;  %6786 = vmatpush.msra.mxu0 %v4931_v38  ;;  %v4768_v19 = vld [vmem:[#allocation12 + $0x1020] sm:$0xff]  ;;  %v10080_v24 = vpop.f32.mrf.mxu1 }
 0x32a   : > { %v3187_v33 = vsel %vm481_vm0, %v3185_v2, %v3186_v23  ;;  %6378 = vmatpush.msrb.mxu2 %v4769_v48  ;;  %v3188_v23 = vrot.slane %v3116_v53, 4  ;;  %6419 = vmatpush.msrb.mxu3 %v4785_v35  ;;  %v4929_v32 = vld [vmem:[#allocation12 + $0x1528] sm:$0xff]  ;;  %v3191_v61 = vrot.slane %v3117_v59, 4  ;;  %v2588_v38 = vsel %vm481_vm0, %v2586_v52, %v2587_v27  ;;  %v4783_v53 = vld [vmem:[#allocation12 + $0x1098] sm:$0xff]  ;;  %v4928_v35 = vld [vmem:[#allocation12 + $0x1520] sm:$0xff] }
 0x32b   : > { %6232 = vmatmul.f32.gmra.mxu2 %v2582_v44  ;;  %6827 = vmatpush.msra.mxu1 %v4947_v26  ;;  %v4946_v44 = vld [vmem:[#allocation12 + $0x15b0] sm:$0xff]  ;;  %v2516_v26 = vld [vmem:[#allocation2 + $0x60] sm:$0xf0]  ;;  %v4945_v2 = vld [vmem:[#allocation12 + $0x15a8] sm:$0xff]  ;;  %v5868_v27 = vadd.f32 %v9839_v13, %v5827_v56 }
 0x32c   : > { %6273 = vmatmul.f32.gmra.mxu3 %v2585_v6  ;;  %v3119_v6 = vld [vmem:[#allocation2 + $0x140] sm:$0xf]  ;;  %6787 = vmatpush.msra.mxu0 %v4930_v14  ;;  %v3122_v59 = vld [vmem:[#allocation2 + $0x28] sm:$0xf] }
 0x32d   : > { %6828 = vmatpush.msra.mxu1 %v4946_v44  ;;  %6379 = vmatpush.msrb.mxu2 %v4768_v19  ;;  %v3192_v48 = vrot.slane %v3119_v6, 4  ;;  %v4944_v14 = vld [vmem:[#allocation12 + $0x15a0] sm:$0xff]  ;;  %v4782_v44 = vld [vmem:[#allocation12 + $0x1090] sm:$0xff]  ;;  %v4927_v19 = vld [vmem:[#allocation12 + $0x1518] sm:$0xff] }
 0x32e   : > { %6639 = vmatmul.f32.gmra.mxu0 %v3184_v37  ;;  %v5905_v3 = vpop.f32.mrf.mxu2  ;;  %v3189_v37 = vrot.slane %v3118_v0, 4  ;;  %6420 = vmatpush.msrb.mxu3 %v4784_v12  ;;  %v2519_v0 = vld [vmem:[#allocation2 + $0x38] sm:$0xf]  ;;  %v4765_v56 = vld [vmem:[#allocation12 + $0x1008] sm:$0xff] }
 0x32f   : > { %v5906_v18 = vadd.f32 %v5905_v3, %v5865_v21  ;;  %v5946_v4 = vpop.f32.mrf.mxu3  ;;  %v4767_v21 = vld [vmem:[#allocation12 + $0x1018] sm:$0xff]  ;;  %v2591_v3 = vsel %vm481_vm0, %v2589_v41, %v2590_v45  ;;  %6788 = vmatpush.msra.mxu0 %v4929_v32  ;;  %6829 = vmatpush.msra.mxu1 %v4945_v2  ;;  %v2592_v41 = vrot.slane %v2516_v26, 4  ;;  %v2593_v45 = vrot.slane %v2518_v25, 4  ;;  %v10091_v2 = vpop.f32.mrf.mxu0  ;;  %v4781_v26 = vld [vmem:[#allocation12 + $0x1088] sm:$0xff] }
 0x330   : > { %6680 = vmatmul.f32.gmra.mxu1 %v3187_v33  ;;  %v3190_v52 = vsel %vm481_vm0, %v3188_v23, %v3189_v37  ;;  %v3120_v33 = vld [vmem:[#allocation2 + $0x60] sm:$0xf0]  ;;  %6380 = vmatpush.msrb.mxu2 %v4767_v21  ;;  %v3193_v6 = vsel %vm481_vm0, %v3191_v61, %v3192_v48  ;;  %v2595_v23 = vrot.slane %v2517_v36, 4  ;;  %v2596_v37 = vrot.slane %v2519_v0, 4  ;;  %v4943_v13 = vld [vmem:[#allocation12 + $0x1598] sm:$0xff]  ;;  %v4926_v36 = vld [vmem:[#allocation12 + $0x1510] sm:$0xff] }
 0x331   : > { %v10084_v49 = vadd.f32 %v5946_v4, %v5906_v18  ;;  %v4766_v18 = vld [vmem:[#allocation12 + $0x1010] sm:$0xff]  ;;  %6421 = vmatpush.msrb.mxu3 %v4783_v53  ;;  %6789 = vmatpush.msra.mxu0 %v4928_v35  ;;  %v3194_v61 = vrot.slane %v3120_v33, 4  ;;  %v3195_v48 = vrot.slane %v3122_v59, 4  ;;  %v10097_v53 = vpop.f32.mrf.mxu1  ;;  %v2594_v35 = vsel %vm481_vm0, %v2592_v41, %v2593_v45  ;;  %v2521_v33 = vld [vmem:[#allocation2 + $0x18] sm:$0xf0] }
 0x332   : > { %6830 = vmatpush.msra.mxu1 %v4944_v14  ;;  %v3123_v21 = vld [vmem:[#allocation2 + $0x38] sm:$0xf]  ;;  %6381 = vmatpush.msrb.mxu2 %v4766_v18  ;;  %v2520_v14 = vld [vmem:[#allocation2 + $0xc0] sm:$0xf0]  ;;  %v2523_v59 = vld [vmem:[#allocation2 + $0x8] sm:$0xf] }
 0x333   : > { %6235 = vmatmul.f32.gmra.mxu2 %v2588_v38  ;;  %v3121_v38 = vld [vmem:[#allocation2 + $0xc8] sm:$0xf0]  ;;  %6422 = vmatpush.msrb.mxu3 %v4782_v44  ;;  %v3198_v18 = vrot.slane %v3123_v21, 4  ;;  %v3196_v41 = vsel %vm481_vm0, %v3194_v61, %v3195_v48  ;;  %v5833_v61 = vadd.f32 %v9863_v34, %v10023_v29  ;;  %v2669_v34 = vld [vmem:[#allocation2 + $0x100] sm:$0xfe] }
 0x334   : > { %6276 = vmatmul.f32.gmra.mxu3 %v2591_v3  ;;  %v5830_v3 = vadd.f32 %v9850_v47, %v10010_v28  ;;  %6790 = vmatpush.msra.mxu0 %v4927_v19  ;;  %v3197_v0 = vrot.slane %v3121_v38, 4  ;;  %v2597_v47 = vsel %vm481_vm0, %v2595_v23, %v2596_v37  ;;  %v2522_v28 = vld [vmem:[#allocation2 + $0x98] sm:$0xf]  ;;  %v4925_v44 = vld [vmem:[#allocation12 + $0x1508] sm:$0xff]  ;;  %v2598_v38 = vrot.slane %v2520_v14, 4  ;;  %v4924_v37 = vld [vmem:[#allocation12 + $0x1500] sm:$0xff] }
 0x335   : > { %6831 = vmatpush.msra.mxu1 %v4943_v13  ;;  %6382 = vmatpush.msrb.mxu2 %v4765_v56  ;;  %v4941_v19 = vld [vmem:[#allocation12 + $0x1588] sm:$0xff]  ;;  %v2599_v23 = vrot.slane %v2522_v28, 4  ;;  %v4940_v13 = vld [vmem:[#allocation12 + $0x1580] sm:$0xff]  ;;  %v2671_v29 = vld [vmem:[#allocation2 + $0xd8] sm:$0x1] }
 0x336   : > { %6642 = vmatmul.f32.gmra.mxu0 %v3190_v52  ;;  %v5908_v4 = vpop.f32.mrf.mxu2  ;;  %v4942_v52 = vld [vmem:[#allocation12 + $0x1590] sm:$0xff]  ;;  %6423 = vmatpush.msrb.mxu3 %v4781_v26  ;;  %v5871_v45 = vadd.f32 %v9854_v40, %v5830_v3  ;;  %v3199_v56 = vsel %vm481_vm0, %v3197_v0, %v3198_v18  ;;  %v3125_v40 = vld [vmem:[#allocation2 + $0x18] sm:$0xf0]  ;;  %v3127_v3 = vld [vmem:[#allocation2 + $0x8] sm:$0xf] }
 0x337   : > { %v5909_v12 = vadd.f32 %v5908_v4, %v5868_v27  ;;  %v5949_v32 = vpop.f32.mrf.mxu3  ;;  %v4764_v27 = vld [vmem:[#allocation12 + $0x1000] sm:$0xff]  ;;  %6791 = vmatpush.msra.mxu0 %v4926_v36  ;;  %6832 = vmatpush.msra.mxu1 %v4942_v52  ;;  %v2601_v36 = vrot.slane %v2521_v33, 4  ;;  %v2600_v0 = vsel %vm481_vm0, %v2598_v38, %v2599_v23  ;;  %v3203_v18 = vrot.slane %v3125_v40, 4 }
 0x338   : > { %6683 = vmatmul.f32.gmra.mxu1 %v3193_v6  ;;  %v4780_v4 = vld [vmem:[#allocation12 + $0x1080] sm:$0xff]  ;;  %6383 = vmatpush.msrb.mxu2 %v4764_v27  ;;  %v10108_v27 = vpop.f32.mrf.mxu0 }
 0x339   : > { %v10095_v25 = vadd.f32 %v5949_v32, %v5909_v12  ;;  %v3124_v6 = vld [vmem:[#allocation2 + $0xc0] sm:$0xf0]  ;;  %v3126_v32 = vld [vmem:[#allocation2 + $0x98] sm:$0xf]  ;;  %6424 = vmatpush.msrb.mxu3 %v4780_v4  ;;  %6792 = vmatpush.msra.mxu0 %v4925_v44  ;;  %v2668_v33 = vld [vmem:[#allocation2 + $0x148] sm:$0xfe] }
 0x33a   : > { %6833 = vmatpush.msra.mxu1 %v4941_v19  ;;  %v3200_v14 = vrot.slane %v3124_v6, 4  ;;  %v3201_v52 = vrot.slane %v3126_v32, 4  ;;  %v2670_v4 = vld [vmem:[#allocation2 + $0x58] sm:$0x1]  ;;  %v5874_v19 = vadd.f32 %v9866_v20, %v5833_v61  ;;  %v3130_v6 = vld [vmem:[#allocation2 + $0x50] sm:$0xf] }
 0x33b   : > { %6238 = vmatmul.f32.gmra.mxu2 %v2594_v35  ;;  %v2602_v35 = vrot.slane %v2523_v59, 4  ;;  %6793 = vmatpush.msra.mxu0 %v4924_v37  ;;  %v10112_v59 = vpop.f32.mrf.mxu1  ;;  %v2733_v32 = vrot.slane %v2670_v4, 1  ;;  %v3207_v40 = vrot.slane %v3130_v6, 4 }
 0x33c   : > { %6279 = vmatmul.f32.gmra.mxu3 %v2597_v47  ;;  %6834 = vmatpush.msra.mxu1 %v4940_v13  ;;  %v3204_v47 = vrot.slane %v3127_v3, 4  ;;  %v3202_v44 = vsel %vm481_vm0, %v3200_v14, %v3201_v52  ;;  %v2735_v13 = vrot.slane %v2669_v34, 1  ;;  %v3278_v34 = vld [vmem:[#allocation2 + $0x138] sm:$0x1] }
 0x33d   : > { %v2603_v28 = vsel %vm481_vm0, %v2601_v36, %v2602_v35  ;;  %v5976_v36 = vadd.f32 %v9873_v63, %v10034_v57  ;;  %v2672_v57 = vld [vmem:[#allocation2 + $0x80] sm:$0xfe] }
 0x33e   : > { %6645 = vmatmul.f32.gmra.mxu0 %v3196_v41  ;;  %v5911_v12 = vpop.f32.mrf.mxu2  ;;  %v3205_v38 = vsel %vm481_vm0, %v3203_v18, %v3204_v47  ;;  %v2675_v47 = vld [vmem:[#allocation2 + $0x120] sm:$0x1] }
 0x33f   : > { %v5912_v21 = vadd.f32 %v5911_v12, %v5871_v45  ;;  %v5952_v26 = vpop.f32.mrf.mxu3  ;;  %v3128_v45 = vld [vmem:[#allocation2] sm:$0xf0]  ;;  %v2732_v12 = vrot.slane %v2668_v33, 1  ;;  %v6017_v63 = vadd.f32 %v9879_v58, %v5976_v36  ;;  %v2742_v6 = vrot.slane %v2675_v47, 1  ;;  %v4843_v47 = vld [vmem:[#allocation12 + $0x1278] sm:$0xff] }
 0x340   : > { %6686 = vmatmul.f32.gmra.mxu1 %v3199_v56  ;;  %v2736_v56 = vrot.slane %v2671_v29, 1  ;;  %v3206_v20 = vrot.slane %v3128_v45, 4  ;;  %v10123_v18 = vpop.f32.mrf.mxu0  ;;  %v5979_v58 = vadd.f32 %v9886_v8, %v10045_v46  ;;  %6532 = vmatpush.msra.mxu2 %v4843_v47 }
 0x341   : > { %v10106_v48 = vadd.f32 %v5952_v26, %v5912_v21  ;;  %v3129_v21 = vld [vmem:[#allocation2 + $0x78] sm:$0xf0]  ;;  %v3131_v26 = vld [vmem:[#allocation2 + $0x68] sm:$0xf]  ;;  %v2734_v3 = vsel %vm905_vm3, %v2732_v12, %v2733_v32  ;;  %v3276_v12 = vld [vmem:[#allocation2 + $0x80] sm:$0xfe] }
 0x342   : > { %v3209_v61 = vrot.slane %v3129_v21, 4  ;;  %v3210_v14 = vrot.slane %v3131_v26, 4  ;;  %v2737_v52 = vsel %vm905_vm3, %v2735_v13, %v2736_v56  ;;  %v3279_v32 = vld [vmem:[#allocation2 + $0x120] sm:$0x1]  ;;  %v3277_v56 = vld [vmem:[#allocation2 + $0x130] sm:$0xfe] }
 0x343   : > { %6241 = vmatmul.f32.gmra.mxu2 %v2600_v0  ;;  %v2674_v0 = vld [vmem:[#allocation2 + $0x138] sm:$0x1]  ;;  %v10127_v33 = vpop.f32.mrf.mxu1  ;;  %v3340_v26 = vrot.slane %v3276_v12, 1  ;;  %v3344_v36 = vrot.slane %v3279_v32, 1  ;;  %v3343_v46 = vrot.slane %v3277_v56, 1  ;;  %v4841_v56 = vld [vmem:[#allocation12 + $0x1268] sm:$0xff] }
 0x344   : > { %6282 = vmatmul.f32.gmra.mxu3 %v2603_v28  ;;  %v3208_v28 = vsel %vm481_vm0, %v3206_v20, %v3207_v40  ;;  %v2739_v29 = vrot.slane %v2674_v0, 1  ;;  %v2676_v40 = vld [vmem:[#allocation2 + $0xe0] sm:$0xfe]  ;;  %v6020_v0 = vadd.f32 %v9888_v60, %v5979_v58  ;;  %v3281_v12 = vld [vmem:[#allocation2 + $0xa8] sm:$0xfe] }
 0x345   : > { %v3283_v32 = vld [vmem:[#allocation2 + $0x168] sm:$0x1] }
 0x346   : > { %6648 = vmatmul.f32.gmra.mxu0 %v3202_v44  ;;  %v5914_v41 = vpop.f32.mrf.mxu2  ;;  %v2673_v44 = vld [vmem:[#allocation2 + $0x130] sm:$0xfe] }
 0x347   : > { %v5915_v23 = vadd.f32 %v5914_v41, %v5874_v19  ;;  %v5955_v37 = vpop.f32.mrf.mxu3  ;;  %v3211_v19 = vsel %vm481_vm0, %v3209_v61, %v3210_v14  ;;  %v2741_v13 = vrot.slane %v2673_v44, 1  ;;  %v3280_v61 = vld [vmem:[#allocation2 + $0xe0] sm:$0xfe]  ;;  %v2677_v14 = vld [vmem:[#allocation2 + $0xa8] sm:$0xfe] }
 0x348   : > { %6689 = vmatmul.f32.gmra.mxu1 %v3205_v38  ;;  %v2738_v38 = vrot.slane %v2672_v57, 1  ;;  %v10138_v57 = vpop.f32.mrf.mxu0 }
 0x349   : > { %v10119_v35 = vadd.f32 %v5955_v37, %v5915_v23  ;;  %v3341_v37 = vrot.slane %v3278_v34, 1  ;;  %v2743_v20 = vsel %vm905_vm3, %v2741_v13, %v2742_v6  ;;  %v3282_v34 = vld [vmem:[#allocation2 + $0xb8] sm:$0x1]  ;;  %v5019_v13 = vld [vmem:[#allocation12 + $0x17f8] sm:$0xff] }
 0x34a   : > { %v2740_v21 = vsel %vm905_vm3, %v2738_v38, %v2739_v29  ;;  %v2744_v29 = vrot.slane %v2676_v40, 1  ;;  %v2747_v38 = vrot.slane %v2677_v14, 1  ;;  %v4857_v40 = vld [vmem:[#allocation12 + $0x12e8] sm:$0xff]  ;;  %6983 = vmatpush.msrb.mxu1 %v5019_v13 }
 0x34b   : > { %6384 = vmatmul.f32.vlgmr.msrb.gmra.mxu2 %v2734_v3  ;;  %v2678_v3 = vld [vmem:[#allocation2 + $0xb8] sm:$0x1]  ;;  %v3342_v8 = vsel %vm905_vm3, %v3340_v26, %v3341_v37  ;;  %v10141_v58 = vpop.f32.mrf.mxu1  ;;  %v5003_v37 = vld [vmem:[#allocation12 + $0x1778] sm:$0xff]  ;;  %v3284_v13 = vld [vmem:[#allocation2 + $0xe8] sm:$0xfe] }
 0x34c   : > { %6425 = vmatmul.f32.vlgmr.msrb.gmra.mxu3 %v2737_v52  ;;  %v2679_v52 = vld [vmem:[#allocation2 + $0x168] sm:$0x1]  ;;  %v2745_v44 = vrot.slane %v2678_v3, 1  ;;  %6942 = vmatpush.msrb.mxu0 %v5003_v37  ;;  %v5002_v3 = vld [vmem:[#allocation12 + $0x1770] sm:$0xff] }
 0x34d   : > { %v2748_v60 = vrot.slane %v2679_v52, 1  ;;  %v5018_v52 = vld [vmem:[#allocation12 + $0x17f0] sm:$0xff] }
 0x34e   : > { %6651 = vmatmul.f32.gmra.mxu0 %v3208_v28  ;;  %v6057_v4 = vpop.f32.mrf.mxu2  ;;  %v4859_v28 = vld [vmem:[#allocation12 + $0x12f8] sm:$0xff]  ;;  %v2746_v14 = vsel %vm905_vm3, %v2744_v29, %v2745_v44  ;;  %6984 = vmatpush.msrb.mxu1 %v5018_v52  ;;  %v5001_v29 = vld [vmem:[#allocation12 + $0x1768] sm:$0xff] }
 0x34f   : > { %v6058_v41 = vadd.f32 %v6057_v4, %v6017_v63  ;;  %v6098_v45 = vpop.f32.mrf.mxu3  ;;  %v4842_v63 = vld [vmem:[#allocation12 + $0x1270] sm:$0xff]  ;;  %6573 = vmatpush.msra.mxu3 %v4859_v28  ;;  %v2749_v47 = vsel %vm905_vm3, %v2747_v38, %v2748_v60  ;;  %v2680_v28 = vld [vmem:[#allocation2 + $0xe8] sm:$0xfe]  ;;  %6943 = vmatpush.msrb.mxu0 %v5002_v3 }
 0x350   : > { %6692 = vmatmul.f32.gmra.mxu1 %v3211_v19  ;;  %v4858_v19 = vld [vmem:[#allocation12 + $0x12f0] sm:$0xff]  ;;  %6533 = vmatpush.msra.mxu2 %v4842_v63  ;;  %v2683_v63 = vld [vmem:[#allocation2 + $0x88] sm:$0x1]  ;;  %v5017_v44 = vld [vmem:[#allocation12 + $0x17e8] sm:$0xff] }
 0x351   : > { %v10132_v23 = vadd.f32 %v6098_v45, %v6058_v41  ;;  %v3345_v41 = vsel %vm905_vm3, %v3343_v46, %v3344_v36  ;;  %v3346_v36 = vrot.slane %v3280_v61, 1  ;;  %6574 = vmatpush.msra.mxu3 %v4858_v19  ;;  %v3349_v46 = vrot.slane %v3281_v12, 1  ;;  %v10149_v61 = vld [vmem:[#allocation2 + $0x20] sm:$0x1]  ;;  %6944 = vmatpush.msrb.mxu0 %v5001_v29  ;;  %v4854_v3 = vld [vmem:[#allocation12 + $0x12d0] sm:$0xff] }
 0x352   : > { %6534 = vmatpush.msra.mxu2 %v4841_v56  ;;  %v4839_v19 = vld [vmem:[#allocation12 + $0x1258] sm:$0xff]  ;;  %v2754_v56 = vrot.slane %v2683_v63, 1  ;;  %6985 = vmatpush.msrb.mxu1 %v5017_v44  ;;  %v2685_v29 = vld [vmem:[#allocation2 + $0x170] sm:$0xfe] }
 0x353   : > { %6387 = vmatmul.f32.gmra.mxu2 %v2740_v21  ;;  %v5982_v21 = vadd.f32 %v9895_v15, %v10058_v1  ;;  %v2682_v15 = vld [vmem:[#allocation2 + $0x20] sm:$0x1]  ;;  %6575 = vmatpush.msra.mxu3 %v4857_v40  ;;  %v4856_v1 = vld [vmem:[#allocation12 + $0x12e0] sm:$0xff]  ;;  %v2750_v40 = vrot.slane %v2680_v28, 1  ;;  %v4853_v44 = vld [vmem:[#allocation12 + $0x12c8] sm:$0xff] }
 0x354   : > { %6428 = vmatmul.f32.gmra.mxu3 %v2743_v20  ;;  %v3347_v20 = vrot.slane %v3282_v34, 1  ;;  %v4855_v12 = vld [vmem:[#allocation12 + $0x12d8] sm:$0xff] }
 0x355   : > { %v6023_v34 = vadd.f32 %v9898_v16, %v5982_v21  ;;  %6576 = vmatpush.msra.mxu3 %v4856_v1  ;;  %v5016_v16 = vld [vmem:[#allocation12 + $0x17e0] sm:$0xff]  ;;  %v4838_v21 = vld [vmem:[#allocation12 + $0x1250] sm:$0xff]  ;;  %v3352_v1 = vrot.slane %v3284_v13, 1  ;;  %v3290_v13 = vld [vmem:[#allocation2 + $0xf0] sm:$0x1] }
 0x356   : > { %6794 = vmatmul.f32.vlgmr.msra.gmra.mxu0 %v3342_v8  ;;  %v6060_v4 = vpop.f32.mrf.mxu2  ;;  %v4840_v8 = vld [vmem:[#allocation12 + $0x1260] sm:$0xff]  ;;  %6986 = vmatpush.msrb.mxu1 %v5016_v16 }
 0x357   : > { %v6061_v45 = vadd.f32 %v6060_v4, %v6020_v0  ;;  %v6101_v6 = vpop.f32.mrf.mxu3  ;;  %v3350_v0 = vrot.slane %v3283_v32, 1  ;;  %v3348_v4 = vsel %vm905_vm3, %v3346_v36, %v3347_v20  ;;  %6535 = vmatpush.msra.mxu2 %v4840_v8  ;;  %v5000_v32 = vld [vmem:[#allocation12 + $0x1760] sm:$0xff]  ;;  %v10154_v36 = vpop.f32.mrf.mxu0  ;;  %v3353_v8 = vrot.slane %v10149_v61, 1  ;;  %6577 = vmatpush.msra.mxu3 %v4855_v12  ;;  %v2686_v61 = vld [vmem:[#allocation2 + $0xf0] sm:$0x1] }
 0x358   : > { %6835 = vmatmul.f32.vlgmr.msra.gmra.mxu1 %v3345_v41  ;;  %v3287_v20 = vld [vmem:[#allocation2 + $0x88] sm:$0x1]  ;;  %6945 = vmatpush.msrb.mxu0 %v5000_v32  ;;  %v2684_v28 = vld [vmem:[#allocation2 + $0xa0] sm:$0xfe]  ;;  %v2757_v16 = vrot.slane %v2686_v61, 1 }
 0x359   : > { %v10145_v26 = vadd.f32 %v6101_v6, %v6061_v45  ;;  %v2751_v45 = vrot.slane %v2682_v15, 1  ;;  %v2681_v6 = vld [vmem:[#allocation2 + $0xf8] sm:$0xfe]  ;;  %v3351_v38 = vsel %vm905_vm3, %v3349_v46, %v3350_v0  ;;  %6536 = vmatpush.msra.mxu2 %v4839_v19  ;;  %v10161_v15 = vpop.f32.mrf.mxu1  ;;  %6578 = vmatpush.msra.mxu3 %v4854_v3  ;;  %v2687_v19 = vld [vmem:[#allocation2 + $0x140] sm:$0x1] }
 0x35a   : > { %v3285_v46 = vld [vmem:[#allocation2 + $0xf8] sm:$0xfe]  ;;  %v2753_v0 = vrot.slane %v2681_v6, 1 }
 0x35b   : > { %6390 = vmatmul.f32.gmra.mxu2 %v2746_v14  ;;  %v5985_v14 = vadd.f32 %v9905_v17, %v10071_v22  ;;  %v2752_v63 = vsel %vm905_vm3, %v2750_v40, %v2751_v45  ;;  %v3356_v17 = vrot.slane %v3287_v20, 1  ;;  %v5014_v6 = vld [vmem:[#allocation12 + $0x17d0] sm:$0xff]  ;;  %v3354_v45 = vsel %vm905_vm3, %v3352_v1, %v3353_v8  ;;  %6579 = vmatpush.msra.mxu3 %v4853_v44  ;;  %v4997_v20 = vld [vmem:[#allocation12 + $0x1748] sm:$0xff]  ;;  %v3291_v1 = vld [vmem:[#allocation2 + $0x140] sm:$0x1] }
 0x35c   : > { %6431 = vmatmul.f32.gmra.mxu3 %v2749_v47  ;;  %v4999_v47 = vld [vmem:[#allocation12 + $0x1758] sm:$0xff]  ;;  %6537 = vmatpush.msra.mxu2 %v4838_v21  ;;  %v2755_v22 = vsel %vm905_vm3, %v2753_v0, %v2754_v56  ;;  %v3355_v12 = vrot.slane %v3285_v46, 1  ;;  %v2756_v56 = vrot.slane %v2684_v28, 1  ;;  %v4852_v21 = vld [vmem:[#allocation12 + $0x12c0] sm:$0xff]  ;;  %v3289_v8 = vld [vmem:[#allocation2 + $0x170] sm:$0xfe]  ;;  %v5988_v28 = vadd.f32 %v9914_v10, %v10084_v49 }
 0x35d   : > { %6946 = vmatpush.msrb.mxu0 %v4999_v47  ;;  %v6026_v32 = vadd.f32 %v9907_v31, %v5985_v14  ;;  %v2759_v46 = vrot.slane %v2685_v29, 1  ;;  %v2760_v47 = vrot.slane %v2687_v19, 1  ;;  %v5013_v31 = vld [vmem:[#allocation12 + $0x17c8] sm:$0xff]  ;;  %v4835_v14 = vld [vmem:[#allocation12 + $0x1238] sm:$0xff]  ;;  %6580 = vmatpush.msra.mxu3 %v4852_v21  ;;  %v3361_v29 = vrot.slane %v3289_v8, 1 }
 0x35e   : > { %6797 = vmatmul.f32.gmra.mxu0 %v3348_v4  ;;  %v6063_v41 = vpop.f32.mrf.mxu2  ;;  %v5015_v4 = vld [vmem:[#allocation12 + $0x17d8] sm:$0xff]  ;;  %v3357_v40 = vsel %vm905_vm3, %v3355_v12, %v3356_v17  ;;  %v3359_v17 = vrot.slane %v3290_v13, 1  ;;  %v2758_v44 = vsel %vm905_vm3, %v2756_v56, %v2757_v16  ;;  %v2690_v49 = vld [vmem:[#allocation2 + $0x28] sm:$0x1]  ;;  %v2689_v12 = vld [vmem:[#allocation2 + $0xc8] sm:$0xfe]  ;;  %v6029_v16 = vadd.f32 %v9920_v55, %v5988_v28 }
 0x35f   : > { %v6064_v60 = vadd.f32 %v6063_v41, %v6023_v34  ;;  %v6104_v37 = vpop.f32.mrf.mxu3  ;;  %v4837_v34 = vld [vmem:[#allocation12 + $0x1248] sm:$0xff]  ;;  %v4998_v41 = vld [vmem:[#allocation12 + $0x1750] sm:$0xff]  ;;  %6987 = vmatpush.msrb.mxu1 %v5015_v4  ;;  %v10172_v61 = vpop.f32.mrf.mxu0  ;;  %v2688_v19 = vld [vmem:[#allocation2 + $0x60] sm:$0xfe]  ;;  %v2761_v10 = vsel %vm905_vm3, %v2759_v46, %v2760_v47  ;;  %v2763_v8 = vrot.slane %v2690_v49, 1 }
 0x360   : > { %6838 = vmatmul.f32.gmra.mxu1 %v3351_v38  ;;  %v3288_v38 = vld [vmem:[#allocation2 + $0xa0] sm:$0xfe]  ;;  %6538 = vmatpush.msra.mxu2 %v4837_v34  ;;  %v4849_v46 = vld [vmem:[#allocation12 + $0x12a8] sm:$0xff]  ;;  %v4994_v47 = vld [vmem:[#allocation12 + $0x1730] sm:$0xff] }
 0x361   : > { %v10158_v52 = vadd.f32 %v6104_v37, %v6064_v60  ;;  %v4836_v60 = vld [vmem:[#allocation12 + $0x1240] sm:$0xff]  ;;  %6947 = vmatpush.msrb.mxu0 %v4998_v41  ;;  %6988 = vmatpush.msrb.mxu1 %v5014_v6  ;;  %v3358_v34 = vrot.slane %v3288_v38, 1  ;;  %v4834_v6 = vld [vmem:[#allocation12 + $0x1230] sm:$0xff]  ;;  %v10176_v38 = vpop.f32.mrf.mxu1  ;;  %v5011_v13 = vld [vmem:[#allocation12 + $0x17b8] sm:$0xff] }
 0x362   : > { %6539 = vmatpush.msra.mxu2 %v4836_v60  ;;  %v5012_v41 = vld [vmem:[#allocation12 + $0x17c0] sm:$0xff]  ;;  %v2691_v60 = vld [vmem:[#allocation2 + $0x38] sm:$0x1] }
 0x363   : > { %6393 = vmatmul.f32.gmra.mxu2 %v2752_v63  ;;  %v4851_v63 = vld [vmem:[#allocation12 + $0x12b8] sm:$0xff]  ;;  %6948 = vmatpush.msrb.mxu0 %v4997_v20  ;;  %v3360_v56 = vsel %vm905_vm3, %v3358_v34, %v3359_v17  ;;  %v4833_v20 = vld [vmem:[#allocation12 + $0x1228] sm:$0xff]  ;;  %v2765_v34 = vrot.slane %v2689_v12, 1  ;;  %v2766_v17 = vrot.slane %v2691_v60, 1  ;;  %v5010_v55 = vld [vmem:[#allocation12 + $0x17b0] sm:$0xff] }
 0x364   : > { %6434 = vmatmul.f32.gmra.mxu3 %v2755_v22  ;;  %v4996_v22 = vld [vmem:[#allocation12 + $0x1740] sm:$0xff]  ;;  %6989 = vmatpush.msrb.mxu1 %v5013_v31  ;;  %v4831_v60 = vld [vmem:[#allocation12 + $0x1218] sm:$0xff] }
 0x365   : > { %6540 = vmatpush.msra.mxu2 %v4835_v14  ;;  %6581 = vmatpush.msra.mxu3 %v4851_v63  ;;  %v3292_v21 = vld [vmem:[#allocation2 + $0x60] sm:$0xfe]  ;;  %v3293_v63 = vld [vmem:[#allocation2 + $0xc8] sm:$0xfe] }
 0x366   : > { %6800 = vmatmul.f32.gmra.mxu0 %v3354_v45  ;;  %v6066_v37 = vpop.f32.mrf.mxu2  ;;  %v3362_v45 = vrot.slane %v3291_v1, 1  ;;  %6990 = vmatpush.msrb.mxu1 %v5012_v41  ;;  %v4832_v28 = vld [vmem:[#allocation12 + $0x1220] sm:$0xff] }
 0x367   : > { %v6067_v3 = vadd.f32 %v6066_v37, %v6026_v32  ;;  %v6107_v0 = vpop.f32.mrf.mxu3  ;;  %v4850_v32 = vld [vmem:[#allocation12 + $0x12b0] sm:$0xff]  ;;  %6949 = vmatpush.msrb.mxu0 %v4996_v22  ;;  %v4995_v37 = vld [vmem:[#allocation12 + $0x1738] sm:$0xff]  ;;  %6541 = vmatpush.msra.mxu2 %v4834_v6  ;;  %v3364_v6 = vrot.slane %v3292_v21, 1  ;;  %v2695_v21 = vld [vmem:[#allocation2 + $0x8] sm:$0x1] }
 0x368   : > { %6841 = vmatmul.f32.gmra.mxu1 %v3357_v40  ;;  %6582 = vmatpush.msra.mxu3 %v4850_v32  ;;  %v3363_v31 = vsel %vm905_vm3, %v3361_v29, %v3362_v45  ;;  %v3295_v22 = vld [vmem:[#allocation2 + $0x38] sm:$0x1]  ;;  %v4993_v45 = vld [vmem:[#allocation12 + $0x1728] sm:$0xff]  ;;  %v2692_v12 = vld [vmem:[#allocation2 + $0xc0] sm:$0xfe] }
 0x369   : > { %v10170_v4 = vadd.f32 %v6107_v0, %v6067_v3  ;;  %v3294_v3 = vld [vmem:[#allocation2 + $0x28] sm:$0x1]  ;;  %v2762_v0 = vrot.slane %v2688_v19, 1  ;;  %6950 = vmatpush.msrb.mxu0 %v4995_v37  ;;  %6991 = vmatpush.msrb.mxu1 %v5011_v13  ;;  %v5991_v19 = vadd.f32 %v9927_v62, %v10095_v25  ;;  %v5009_v32 = vld [vmem:[#allocation12 + $0x17a8] sm:$0xff]  ;;  %v3368_v37 = vrot.slane %v3295_v22, 1 }
 0x36a   : > { %6542 = vmatpush.msra.mxu2 %v4833_v20  ;;  %v3365_v29 = vrot.slane %v3294_v3, 1  ;;  %6583 = vmatpush.msra.mxu3 %v4849_v46  ;;  %v2767_v13 = vsel %vm905_vm3, %v2765_v34, %v2766_v17  ;;  %v2694_v62 = vld [vmem:[#allocation2 + $0x98] sm:$0x1]  ;;  %v2693_v25 = vld [vmem:[#allocation2 + $0x18] sm:$0xfe]  ;;  %v4992_v20 = vld [vmem:[#allocation12 + $0x1720] sm:$0xff] }
 0x36b   : > { %6396 = vmatmul.f32.gmra.mxu2 %v2758_v44  ;;  %v4848_v44 = vld [vmem:[#allocation12 + $0x12a0] sm:$0xff]  ;;  %6951 = vmatpush.msrb.mxu0 %v4994_v47  ;;  %v2764_v49 = vsel %vm905_vm3, %v2762_v0, %v2763_v8  ;;  %v4830_v47 = vld [vmem:[#allocation12 + $0x1210] sm:$0xff]  ;;  %v2769_v34 = vrot.slane %v2694_v62, 1 }
 0x36c   : > { %6437 = vmatmul.f32.gmra.mxu3 %v2761_v10  ;;  %v3367_v10 = vrot.slane %v3293_v63, 1  ;;  %6992 = vmatpush.msrb.mxu1 %v5010_v55  ;;  %v3366_v3 = vsel %vm905_vm3, %v3364_v6, %v3365_v29  ;;  %v12031_v0 = vld [vmem:[#allocation23_spill] sm:$0xff]  ;;  %v2768_v63 = vrot.slane %v2692_v12, 1  ;;  %v4846_v17 = vld [vmem:[#allocation12 + $0x1290] sm:$0xff]  ;;  %v4991_v55 = vld [vmem:[#allocation12 + $0x1718] sm:$0xff]  ;;  %v2772_v29 = vrot.slane %v2695_v21, 1 }
 0x36d   : > { %6543 = vmatpush.msra.mxu2 %v4832_v28  ;;  %6584 = vmatpush.msra.mxu3 %v4848_v44  ;;  %v6032_v8 = vadd.f32 %v12031_v0, %v5991_v19  ;;  %v3296_v46 = vld [vmem:[#allocation2 + $0xc0] sm:$0xfe]  ;;  %v3297_v6 = vld [vmem:[#allocation2 + $0x18] sm:$0xfe]  ;;  %v2771_v19 = vrot.slane %v2693_v25, 1  ;;  %v12032_v12 = vld [vmem:[#allocation24_spill] sm:$0xff] }
 0x36e   : > { %6803 = vmatmul.f32.gmra.mxu0 %v3360_v56  ;;  %v6069_v40 = vpop.f32.mrf.mxu2  ;;  %v4847_v56 = vld [vmem:[#allocation12 + $0x1298] sm:$0xff]  ;;  %6993 = vmatpush.msrb.mxu1 %v5009_v32  ;;  %v3369_v28 = vsel %vm905_vm3, %v3367_v10, %v3368_v37  ;;  %v3299_v32 = vld [vmem:[#allocation2 + $0x8] sm:$0x1]  ;;  %v4990_v37 = vld [vmem:[#allocation12 + $0x1710] sm:$0xff]  ;;  %v3373_v25 = vrot.slane %v3297_v6, 1  ;;  %v2770_v21 = vsel %vm905_vm3, %v2768_v63, %v2769_v34 }
 0x36f   : > { %v6070_v14 = vadd.f32 %v6069_v40, %v6029_v16  ;;  %v6110_v1 = vpop.f32.mrf.mxu3  ;;  %v10187_v16 = vpop.f32.mrf.mxu0  ;;  %6952 = vmatpush.msrb.mxu0 %v4993_v45  ;;  %v5008_v40 = vld [vmem:[#allocation12 + $0x17a0] sm:$0xff]  ;;  %6544 = vmatpush.msra.mxu2 %v4831_v60  ;;  %v5007_v45 = vld [vmem:[#allocation12 + $0x1798] sm:$0xff]  ;;  %v4845_v60 = vld [vmem:[#allocation12 + $0x1288] sm:$0xff]  ;;  %v3374_v0 = vrot.slane %v3299_v32, 1 }
 0x370   : > { %6844 = vmatmul.f32.gmra.mxu1 %v3363_v31  ;;  %v10191_v31 = vpop.f32.mrf.mxu1  ;;  %6585 = vmatpush.msra.mxu3 %v4847_v56  ;;  %v3370_v56 = vrot.slane %v3296_v46, 1  ;;  %v4844_v46 = vld [vmem:[#allocation12 + $0x1280] sm:$0xff]  ;;  %v12033_v34 = vld [vmem:[#allocation25_spill] sm:$0xff]  ;;  %v3302_v6 = vld [vmem:[#allocation2 + $0x50] sm:$0x1] }
 0x371   : > { %v10183_v41 = vadd.f32 %v6110_v1, %v6070_v14  ;;  %v3298_v1 = vld [vmem:[#allocation2 + $0x98] sm:$0x1]  ;;  %6953 = vmatpush.msrb.mxu0 %v4992_v20  ;;  %6994 = vmatpush.msrb.mxu1 %v5008_v40  ;;  %v2696_v20 = vld [vmem:[#allocation2] sm:$0xfe]  ;;  %v3375_v32 = vsel %vm905_vm3, %v3373_v25, %v3374_v0 }
 0x372   : > { %6545 = vmatpush.msra.mxu2 %v4830_v47  ;;  %v3371_v10 = vrot.slane %v3298_v1, 1  ;;  %6586 = vmatpush.msra.mxu3 %v4846_v17  ;;  %v5006_v40 = vld [vmem:[#allocation12 + $0x1790] sm:$0xff]  ;;  %v4989_v1 = vld [vmem:[#allocation12 + $0x1708] sm:$0xff] }
 0x373   : > { %6399 = vmatmul.f32.gmra.mxu2 %v2764_v49  ;;  %v4829_v49 = vld [vmem:[#allocation12 + $0x1208] sm:$0xff]  ;;  %6954 = vmatpush.msrb.mxu0 %v4991_v55  ;;  %v2697_v47 = vld [vmem:[#allocation2 + $0x78] sm:$0xfe] }
 0x374   : > { %6440 = vmatmul.f32.gmra.mxu3 %v2767_v13  ;;  %v5994_v13 = vadd.f32 %v12032_v12, %v10106_v48  ;;  %6995 = vmatpush.msrb.mxu1 %v5007_v45  ;;  %v2698_v48 = vld [vmem:[#allocation2 + $0x50] sm:$0x1]  ;;  %v3372_v63 = vsel %vm905_vm3, %v3370_v56, %v3371_v10  ;;  %v4988_v45 = vld [vmem:[#allocation12 + $0x1700] sm:$0xff]  ;;  %v2777_v56 = vrot.slane %v2697_v47, 1 }
 0x375   : > { %6546 = vmatpush.msra.mxu2 %v4829_v49  ;;  %6587 = vmatpush.msra.mxu3 %v4845_v60  ;;  %v5005_v17 = vld [vmem:[#allocation12 + $0x1788] sm:$0xff]  ;;  %v5004_v49 = vld [vmem:[#allocation12 + $0x1780] sm:$0xff] }
 0x376   : > { %6806 = vmatmul.f32.gmra.mxu0 %v3366_v3  ;;  %v6072_v14 = vpop.f32.mrf.mxu2  ;;  %v4828_v3 = vld [vmem:[#allocation12 + $0x1200] sm:$0xff]  ;;  %v6035_v55 = vadd.f32 %v12033_v34, %v5994_v13  ;;  %6996 = vmatpush.msrb.mxu1 %v5006_v40 }
 0x377   : > { %v6073_v22 = vadd.f32 %v6072_v14, %v6032_v8  ;;  %v6113_v44 = vpop.f32.mrf.mxu3  ;;  %v2773_v8 = vsel %vm905_vm3, %v2771_v19, %v2772_v29  ;;  %v2699_v14 = vld [vmem:[#allocation2 + $0x68] sm:$0x1]  ;;  %6955 = vmatpush.msrb.mxu0 %v4990_v37  ;;  %6547 = vmatpush.msra.mxu2 %v4828_v3  ;;  %v2774_v19 = vrot.slane %v2696_v20, 1  ;;  %v2775_v29 = vrot.slane %v2698_v48, 1  ;;  %v3301_v37 = vld [vmem:[#allocation2 + $0x78] sm:$0xfe] }
 0x378   : > { %6847 = vmatmul.f32.gmra.mxu1 %v3369_v28  ;;  %v3300_v28 = vld [vmem:[#allocation2] sm:$0xfe]  ;;  %6588 = vmatpush.msra.mxu3 %v4844_v46  ;;  %v2778_v10 = vrot.slane %v2699_v14, 1  ;;  %v10205_v13 = vpop.f32.mrf.mxu1  ;;  %v3377_v48 = vrot.slane %v3302_v6, 1  ;;  %v3379_v0 = vrot.slane %v3301_v37, 1 }
 0x379   : > { %v10196_v62 = vadd.f32 %v6113_v44, %v6073_v22  ;;  %v10202_v22 = vpop.f32.mrf.mxu0  ;;  %6956 = vmatpush.msrb.mxu0 %v4989_v1  ;;  %6997 = vmatpush.msrb.mxu1 %v5005_v17  ;;  %v12034_v40 = vld [vmem:[#allocation26_spill] sm:$0xff]  ;;  %v2776_v25 = vsel %vm905_vm3, %v2774_v19, %v2775_v29  ;;  %v2956_v14 = vld [vmem:[#allocation2 + $0x148] sm:$0xf8]  ;;  %v2958_v1 = vld [vmem:[#allocation2 + $0x58] sm:$0x7] }
 0x37a   : > { %v5997_v20 = vadd.f32 %v12034_v40, %v10119_v35  ;;  %v2779_v46 = vsel %vm905_vm3, %v2777_v56, %v2778_v10  ;;  %v2957_v17 = vld [vmem:[#allocation2 + $0x100] sm:$0xf8]  ;;  %v3306_v6 = vld [vmem:[#allocation2 + $0x158] sm:$0x1]  ;;  %v3021_v19 = vrot.slane %v2958_v1, 3 }
 0x37b   : > { %6402 = vmatmul.f32.gmra.mxu2 %v2770_v21  ;;  %v3303_v21 = vld [vmem:[#allocation2 + $0x68] sm:$0x1]  ;;  %6957 = vmatpush.msrb.mxu0 %v4988_v45  ;;  %v3020_v45 = vrot.slane %v2956_v14, 3  ;;  %v3305_v10 = vld [vmem:[#allocation2 + $0x30] sm:$0xfe] }
 0x37c   : > { %6443 = vmatmul.f32.gmra.mxu3 %v2773_v8  ;;  %v3376_v8 = vrot.slane %v3300_v28, 1  ;;  %6998 = vmatpush.msrb.mxu1 %v5004_v49  ;;  %v3380_v47 = vrot.slane %v3303_v21, 1  ;;  %v12035_v34 = vld [vmem:[#allocation27_spill] sm:$0xff]  ;;  %v3307_v37 = vld [vmem:[#allocation2 + $0x150] sm:$0x1] }
 0x37d   : > { %v12036_v21 = vld [vmem:[#allocation28_spill] sm:$0xff]  ;;  %v2962_v1 = vld [vmem:[#allocation2 + $0x138] sm:$0x7] }
 0x37e   : > { %6809 = vmatmul.f32.gmra.mxu0 %v3372_v63  ;;  %v6075_v44 = vpop.f32.mrf.mxu2  ;;  %v2959_v63 = vld [vmem:[#allocation2 + $0xd8] sm:$0x7]  ;;  %v3378_v35 = vsel %vm905_vm3, %v3376_v8, %v3377_v48  ;;  %v3381_v29 = vsel %vm905_vm3, %v3379_v0, %v3380_v47  ;;  %v6140_v40 = vadd.f32 %v12036_v21, %v10132_v23  ;;  %v3383_v48 = vrot.slane %v3306_v6, 1  ;;  %v2961_v6 = vld [vmem:[#allocation2 + $0x130] sm:$0xf8] }
 0x37f   : > { %v6076_v60 = vadd.f32 %v6075_v44, %v6035_v55  ;;  %v6116_v12 = vpop.f32.mrf.mxu3  ;;  %v6038_v55 = vadd.f32 %v12035_v34, %v5997_v20  ;;  %v3304_v44 = vld [vmem:[#allocation2 + $0x70] sm:$0xfe]  ;;  %v3022_v0 = vsel %vm1195_vm2, %v3020_v45, %v3021_v19  ;;  %v3385_v47 = vrot.slane %v3305_v10, 1  ;;  %v2960_v34 = vld [vmem:[#allocation2 + $0x80] sm:$0xf8] }
 0x380   : > { %6850 = vmatmul.f32.gmra.mxu1 %v3375_v32  ;;  %v3382_v8 = vrot.slane %v3304_v44, 1  ;;  %v3027_v44 = vrot.slane %v2962_v1, 3  ;;  %v6143_v10 = vadd.f32 %v9986_v9, %v10145_v26  ;;  %v2964_v1 = vld [vmem:[#allocation2 + $0xe0] sm:$0xf8]  ;;  %v2965_v26 = vld [vmem:[#allocation2 + $0xa8] sm:$0xf8] }
 0x381   : > { %v10209_v3 = vadd.f32 %v6116_v12, %v6076_v60  ;;  %v3023_v60 = vrot.slane %v2957_v17, 3  ;;  %v3024_v12 = vrot.slane %v2959_v63, 3  ;;  %v10216_v56 = vpop.f32.mrf.mxu0  ;;  %v2963_v17 = vld [vmem:[#allocation2 + $0x120] sm:$0x7]  ;;  %v3568_v9 = vld [vmem:[#allocation2 + $0xe0] sm:$0xf8] }
 0x382   : > { %v3384_v63 = vsel %vm905_vm3, %v3382_v8, %v3383_v48  ;;  %v3565_v48 = vld [vmem:[#allocation2 + $0x130] sm:$0xf8] }
 0x383   : > { %6405 = vmatmul.f32.gmra.mxu2 %v2776_v25  ;;  %v10222_v25 = vpop.f32.mrf.mxu1  ;;  %v3025_v14 = vsel %vm1195_vm2, %v3023_v60, %v3024_v12  ;;  %v3567_v60 = vld [vmem:[#allocation2 + $0x120] sm:$0x7]  ;;  %v3026_v12 = vrot.slane %v2960_v34, 3  ;;  %v3631_v34 = vrot.slane %v3565_v48, 3  ;;  %v4905_v48 = vld [vmem:[#allocation12 + $0x1468] sm:$0xff] }
 0x384   : > { %6446 = vmatmul.f32.gmra.mxu3 %v2779_v46  ;;  %v3386_v46 = vrot.slane %v3307_v37, 1 }
 0x386   : > { %6812 = vmatmul.f32.gmra.mxu0 %v3378_v35  ;;  %v6078_v28 = vpop.f32.mrf.mxu2  ;;  %v12037_v35 = vld [vmem:[#allocation29_spill] sm:$0xff]  ;;  %v3387_v45 = vsel %vm905_vm3, %v3385_v47, %v3386_v46  ;;  %v3632_v46 = vrot.slane %v3567_v60, 3 }
 0x387   : > { %v6079_v49 = vadd.f32 %v6078_v28, %v6038_v55  ;;  %v6119_v32 = vpop.f32.mrf.mxu3  ;;  %v6181_v23 = vadd.f32 %v12037_v35, %v6140_v40  ;;  %v3566_v28 = vld [vmem:[#allocation2 + $0x138] sm:$0x7]  ;;  %v3029_v40 = vrot.slane %v2961_v6, 3  ;;  %v2967_v35 = vld [vmem:[#allocation2 + $0x168] sm:$0x7] }
 0x388   : > { %6853 = vmatmul.f32.gmra.mxu1 %v3381_v29  ;;  %v3629_v21 = vrot.slane %v3566_v28, 3  ;;  %v4907_v6 = vld [vmem:[#allocation12 + $0x1478] sm:$0xff]  ;;  %v4922_v60 = vld [vmem:[#allocation12 + $0x14f0] sm:$0xff] }
 0x389   : > { %v10220_v20 = vadd.f32 %v6119_v32, %v6079_v49  ;;  %v3030_v49 = vrot.slane %v2963_v17, 3  ;;  %v3564_v32 = vld [vmem:[#allocation2 + $0x80] sm:$0xf8]  ;;  %v10233_v8 = vpop.f32.mrf.mxu0  ;;  %v2966_v17 = vld [vmem:[#allocation2 + $0xb8] sm:$0x7]  ;;  %6696 = vmatpush.msrb.mxu2 %v4907_v6 }
 0x38a   : > { %v3628_v47 = vrot.slane %v3564_v32, 3  ;;  %v3033_v32 = vrot.slane %v2966_v17, 3  ;;  %v3634_v17 = vrot.slane %v3568_v9, 3 }
 0x38b   : > { %6548 = vmatmul.f32.vlgmr.msra.gmra.mxu2 %v3022_v0  ;;  %v3028_v0 = vsel %vm1195_vm2, %v3026_v12, %v3027_v44  ;;  %v4923_v44 = vld [vmem:[#allocation12 + $0x14f8] sm:$0xff]  ;;  %v3633_v12 = vsel %vm1195_vm2, %v3631_v34, %v3632_v46  ;;  %v4904_v46 = vld [vmem:[#allocation12 + $0x1460] sm:$0xff] }
 0x38c   : > { %6589 = vmatmul.f32.vlgmr.msra.gmra.mxu3 %v3025_v14  ;;  %v3031_v14 = vsel %vm1195_vm2, %v3029_v40, %v3030_v49  ;;  %v3032_v49 = vrot.slane %v2964_v1, 3 }
 0x38d   : > { %6737 = vmatpush.msrb.mxu3 %v4923_v44  ;;  %v2970_v44 = vld [vmem:[#allocation2 + $0x20] sm:$0x7] }
 0x38e   : > { %6815 = vmatmul.f32.gmra.mxu0 %v3384_v63  ;;  %v6221_v55 = vpop.f32.mrf.mxu2  ;;  %v10237_v63 = vpop.f32.mrf.mxu1  ;;  %v3034_v34 = vsel %vm1195_vm2, %v3032_v49, %v3033_v32  ;;  %v4919_v49 = vld [vmem:[#allocation12 + $0x14d8] sm:$0xff]  ;;  %v4902_v32 = vld [vmem:[#allocation12 + $0x1450] sm:$0xff] }
 0x38f   : > { %v6222_v19 = vadd.f32 %v6221_v55, %v6181_v23  ;;  %v6262_v29 = vpop.f32.mrf.mxu3  ;;  %12038 = vst [vmem:[#allocation32_spill] sm:$0xff] %v10237_v63  ;;  %v3630_v23 = vsel %vm1195_vm2, %v3628_v47, %v3629_v21  ;;  %v12039_v55 = vld [vmem:[#allocation30_spill] sm:$0xff]  ;;  %v3035_v63 = vrot.slane %v2965_v26, 3  ;;  %v3036_v21 = vrot.slane %v2967_v35, 3  ;;  %v4921_v47 = vld [vmem:[#allocation12 + $0x14e8] sm:$0xff]  ;;  %6738 = vmatpush.msrb.mxu3 %v4922_v60 }
 0x390   : > { %6856 = vmatmul.f32.gmra.mxu1 %v3387_v45  ;;  %v6184_v28 = vadd.f32 %v12039_v55, %v6143_v10  ;;  %v4906_v45 = vld [vmem:[#allocation12 + $0x1470] sm:$0xff]  ;;  %v3571_v10 = vld [vmem:[#allocation2 + $0x168] sm:$0x7] }
 0x391   : > { %v10231_v37 = vadd.f32 %v6262_v29, %v6222_v19  ;;  %v3570_v29 = vld [vmem:[#allocation2 + $0xb8] sm:$0x7]  ;;  %6697 = vmatpush.msrb.mxu2 %v4906_v45  ;;  %v4920_v26 = vld [vmem:[#allocation12 + $0x14e0] sm:$0xff]  ;;  %v3037_v6 = vsel %vm1195_vm2, %v3035_v63, %v3036_v21  ;;  %6739 = vmatpush.msrb.mxu3 %v4921_v47  ;;  %v10248_v45 = vpop.f32.mrf.mxu0  ;;  %v3572_v47 = vld [vmem:[#allocation2 + $0xe8] sm:$0xf8] }
 0x392   : > { %v3635_v55 = vrot.slane %v3570_v29, 3  ;;  %v4903_v29 = vld [vmem:[#allocation12 + $0x1458] sm:$0xff] }
 0x393   : > { %6551 = vmatmul.f32.gmra.mxu2 %v3028_v0  ;;  %6740 = vmatpush.msrb.mxu3 %v4920_v26 }
 0x394   : > { %6592 = vmatmul.f32.gmra.mxu3 %v3031_v14  ;;  %v3569_v14 = vld [vmem:[#allocation2 + $0xa8] sm:$0xf8]  ;;  %6698 = vmatpush.msrb.mxu2 %v4905_v48  ;;  %v3636_v9 = vsel %vm1195_vm2, %v3634_v17, %v3635_v55 }
 0x395   : > { %v3637_v35 = vrot.slane %v3569_v14, 3  ;;  %v4918_v14 = vld [vmem:[#allocation12 + $0x14d0] sm:$0xff]  ;;  %6741 = vmatpush.msrb.mxu3 %v4919_v49  ;;  %v4901_v55 = vld [vmem:[#allocation12 + $0x1448] sm:$0xff]  ;;  %v2972_v49 = vld [vmem:[#allocation2 + $0xa0] sm:$0xf8] }
 0x396   : > { %6958 = vmatmul.f32.vlgmr.msrb.gmra.mxu0 %v3630_v23  ;;  %v6224_v19 = vpop.f32.mrf.mxu2  ;;  %v6146_v23 = vadd.f32 %v10001_v54, %v10158_v52  ;;  %v2968_v54 = vld [vmem:[#allocation2 + $0xe8] sm:$0xf8]  ;;  %v2971_v52 = vld [vmem:[#allocation2 + $0x88] sm:$0x7]  ;;  %6699 = vmatpush.msrb.mxu2 %v4904_v46  ;;  %v10252_v60 = vpop.f32.mrf.mxu1 }
 0x397   : > { %v6225_v40 = vadd.f32 %v6224_v19, %v6184_v28  ;;  %v6265_v0 = vpop.f32.mrf.mxu3  ;;  %v3638_v28 = vrot.slane %v3571_v10, 3  ;;  %v3042_v17 = vrot.slane %v2971_v52, 3  ;;  %v4917_v46 = vld [vmem:[#allocation12 + $0x14c8] sm:$0xff]  ;;  %6742 = vmatpush.msrb.mxu3 %v4918_v14  ;;  %v4916_v52 = vld [vmem:[#allocation12 + $0x14c0] sm:$0xff]  ;;  %v4899_v14 = vld [vmem:[#allocation12 + $0x1438] sm:$0xff] }
 0x398   : > { %6999 = vmatmul.f32.vlgmr.msrb.gmra.mxu1 %v3633_v12  ;;  %v6187_v19 = vadd.f32 %v10005_v51, %v6146_v23  ;;  %v3574_v12 = vld [vmem:[#allocation2 + $0x20] sm:$0x7]  ;;  %6700 = vmatpush.msrb.mxu2 %v4903_v29  ;;  %v3575_v51 = vld [vmem:[#allocation2 + $0x88] sm:$0x7]  ;;  %v3038_v23 = vrot.slane %v2968_v54, 3 }
 0x399   : > { %v10244_v1 = vadd.f32 %v6265_v0, %v6225_v40  ;;  %v3039_v40 = vrot.slane %v2970_v44, 3  ;;  %v2969_v0 = vld [vmem:[#allocation2 + $0xf8] sm:$0xf8]  ;;  %v3639_v21 = vsel %vm1195_vm2, %v3637_v35, %v3638_v28  ;;  %v4900_v35 = vld [vmem:[#allocation12 + $0x1440] sm:$0xff]  ;;  %v3644_v29 = vrot.slane %v3575_v51, 3  ;;  %6743 = vmatpush.msrb.mxu3 %v4917_v46 }
 0x39a   : > { %6701 = vmatpush.msrb.mxu2 %v4902_v32  ;;  %v3041_v44 = vrot.slane %v2969_v0, 3  ;;  %v3573_v28 = vld [vmem:[#allocation2 + $0xf8] sm:$0xf8]  ;;  %v2974_v32 = vld [vmem:[#allocation2 + $0xf0] sm:$0x7]  ;;  %v3044_v51 = vrot.slane %v2972_v49, 3 }
 0x39b   : > { %6554 = vmatmul.f32.gmra.mxu2 %v3034_v34  ;;  %v6149_v34 = vadd.f32 %v10016_v7, %v10170_v4  ;;  %v3578_v7 = vld [vmem:[#allocation2 + $0xf0] sm:$0x7]  ;;  %v2973_v4 = vld [vmem:[#allocation2 + $0x170] sm:$0xf8]  ;;  %v3643_v0 = vrot.slane %v3573_v28, 3  ;;  %6744 = vmatpush.msrb.mxu3 %v4916_v52 }
 0x39c   : > { %6595 = vmatmul.f32.gmra.mxu3 %v3037_v6  ;;  %v3641_v6 = vrot.slane %v3574_v12, 3  ;;  %6702 = vmatpush.msrb.mxu2 %v4901_v55  ;;  %v3043_v54 = vsel %vm1195_vm2, %v3041_v44, %v3042_v17  ;;  %v3576_v17 = vld [vmem:[#allocation2 + $0xa0] sm:$0xf8]  ;;  %v4914_v55 = vld [vmem:[#allocation12 + $0x14b0] sm:$0xff]  ;;  %v3047_v28 = vrot.slane %v2973_v4, 3  ;;  %v4897_v52 = vld [vmem:[#allocation12 + $0x1428] sm:$0xff] }
 0x39d   : > { %v3645_v46 = vsel %vm1195_vm2, %v3643_v0, %v3644_v29  ;;  %v3647_v29 = vrot.slane %v3578_v7, 3 }
 0x39e   : > { %6961 = vmatmul.f32.gmra.mxu0 %v3636_v9  ;;  %v6227_v63 = vpop.f32.mrf.mxu2  ;;  %v3040_v9 = vsel %vm1195_vm2, %v3038_v23, %v3039_v40  ;;  %6703 = vmatpush.msrb.mxu2 %v4900_v35  ;;  %v6190_v40 = vadd.f32 %v10019_v30, %v6149_v34  ;;  %v3045_v23 = vrot.slane %v2974_v32, 3  ;;  %v3577_v35 = vld [vmem:[#allocation2 + $0x170] sm:$0xf8]  ;;  %v10266_v34 = vpop.f32.mrf.mxu1  ;;  %v3646_v32 = vrot.slane %v3576_v17, 3 }
 0x39f   : > { %v6228_v10 = vadd.f32 %v6227_v63, %v6187_v19  ;;  %v6268_v48 = vpop.f32.mrf.mxu3  ;;  %v3640_v19 = vrot.slane %v3572_v47, 3  ;;  %v2975_v63 = vld [vmem:[#allocation2 + $0x140] sm:$0x7]  ;;  %v3649_v0 = vrot.slane %v3577_v35, 3 }
 0x3a0   : > { %7002 = vmatmul.f32.gmra.mxu1 %v3639_v21  ;;  %v4915_v21 = vld [vmem:[#allocation12 + $0x14b8] sm:$0xff]  ;;  %6704 = vmatpush.msrb.mxu2 %v4899_v14  ;;  %v3048_v30 = vrot.slane %v2975_v63, 3  ;;  %v3046_v4 = vsel %vm1195_vm2, %v3044_v51, %v3045_v23  ;;  %v4912_v63 = vld [vmem:[#allocation12 + $0x14a0] sm:$0xff]  ;;  %v3648_v7 = vsel %vm1195_vm2, %v3646_v32, %v3647_v29  ;;  %v4893_v29 = vld [vmem:[#allocation12 + $0x1408] sm:$0xff] }
 0x3a1   : > { %v10257_v26 = vadd.f32 %v6268_v48, %v6228_v10  ;;  %v3642_v12 = vsel %vm1195_vm2, %v3640_v19, %v3641_v6  ;;  %v4898_v10 = vld [vmem:[#allocation12 + $0x1430] sm:$0xff]  ;;  %v10263_v48 = vpop.f32.mrf.mxu0  ;;  %6745 = vmatpush.msrb.mxu3 %v4915_v21  ;;  %v4913_v19 = vld [vmem:[#allocation12 + $0x14a8] sm:$0xff]  ;;  %v2976_v21 = vld [vmem:[#allocation2 + $0x60] sm:$0xf8] }
 0x3a2   : > { %6705 = vmatpush.msrb.mxu2 %v4898_v10  ;;  %v3049_v14 = vsel %vm1195_vm2, %v3047_v28, %v3048_v30  ;;  %v2978_v10 = vld [vmem:[#allocation2 + $0x28] sm:$0x7]  ;;  %v4895_v51 = vld [vmem:[#allocation12 + $0x1418] sm:$0xff]  ;;  %v4910_v28 = vld [vmem:[#allocation12 + $0x1490] sm:$0xff] }
 0x3a3   : > { %6557 = vmatmul.f32.gmra.mxu2 %v3040_v9  ;;  %v3579_v9 = vld [vmem:[#allocation2 + $0x140] sm:$0x7]  ;;  %6746 = vmatpush.msrb.mxu3 %v4914_v55  ;;  %v4894_v55 = vld [vmem:[#allocation12 + $0x1410] sm:$0xff]  ;;  %v3051_v35 = vrot.slane %v2978_v10, 3 }
 0x3a4   : > { %6598 = vmatmul.f32.gmra.mxu3 %v3043_v54  ;;  %v6152_v54 = vadd.f32 %v10030_v11, %v10183_v41  ;;  %6706 = vmatpush.msrb.mxu2 %v4897_v52  ;;  %v3580_v11 = vld [vmem:[#allocation2 + $0x60] sm:$0xf8]  ;;  %v2977_v41 = vld [vmem:[#allocation2 + $0xc8] sm:$0xf8]  ;;  %v4911_v23 = vld [vmem:[#allocation12 + $0x1498] sm:$0xff] }
 0x3a5   : > { %6747 = vmatpush.msrb.mxu3 %v4913_v19  ;;  %v3581_v19 = vld [vmem:[#allocation2 + $0xc8] sm:$0xf8] }
 0x3a6   : > { %6964 = vmatmul.f32.gmra.mxu0 %v3642_v12  ;;  %v6230_v47 = vpop.f32.mrf.mxu2  ;;  %v4896_v12 = vld [vmem:[#allocation12 + $0x1420] sm:$0xff]  ;;  %v6193_v17 = vadd.f32 %v10036_v5, %v6152_v54  ;;  %v3583_v54 = vld [vmem:[#allocation2 + $0x38] sm:$0x7]  ;;  %v10283_v10 = vpop.f32.mrf.mxu1 }
 0x3a7   : > { %v6231_v44 = vadd.f32 %v6230_v47, %v6190_v40  ;;  %v6271_v6 = vpop.f32.mrf.mxu3  ;;  %v3650_v40 = vrot.slane %v3579_v9, 3  ;;  %v2979_v47 = vld [vmem:[#allocation2 + $0x38] sm:$0x7]  ;;  %6707 = vmatpush.msrb.mxu2 %v4896_v12  ;;  %6748 = vmatpush.msrb.mxu3 %v4912_v63  ;;  %v3053_v12 = vrot.slane %v2977_v41, 3  ;;  %v6155_v63 = vadd.f32 %v10047_v39, %v10196_v62  ;;  %v2981_v39 = vld [vmem:[#allocation2 + $0x18] sm:$0xf8] }
 0x3a8   : > { %7005 = vmatmul.f32.gmra.mxu1 %v3645_v46  ;;  %v3054_v32 = vrot.slane %v2979_v47, 3  ;;  %v4908_v47 = vld [vmem:[#allocation12 + $0x1480] sm:$0xff] }
 0x3a9   : > { %v10270_v49 = vadd.f32 %v6271_v6, %v6231_v44  ;;  %v3582_v44 = vld [vmem:[#allocation2 + $0x28] sm:$0x7]  ;;  %v3050_v6 = vrot.slane %v2976_v21, 3  ;;  %6708 = vmatpush.msrb.mxu2 %v4895_v51  ;;  %v3651_v30 = vsel %vm1195_vm2, %v3649_v0, %v3650_v40  ;;  %6749 = vmatpush.msrb.mxu3 %v4911_v23  ;;  %v10277_v5 = vpop.f32.mrf.mxu0  ;;  %v3652_v21 = vrot.slane %v3580_v11, 3  ;;  %v2980_v23 = vld [vmem:[#allocation2 + $0xc0] sm:$0xf8] }
 0x3aa   : > { %v3653_v0 = vrot.slane %v3582_v44, 3  ;;  %v4892_v40 = vld [vmem:[#allocation12 + $0x1400] sm:$0xff]  ;;  %v3055_v51 = vsel %vm1195_vm2, %v3053_v12, %v3054_v32  ;;  %v3059_v32 = vrot.slane %v2981_v39, 3 }
 0x3ab   : > { %6560 = vmatmul.f32.gmra.mxu2 %v3046_v4  ;;  %v4909_v4 = vld [vmem:[#allocation12 + $0x1488] sm:$0xff]  ;;  %6750 = vmatpush.msrb.mxu3 %v4910_v28  ;;  %v3052_v41 = vsel %vm1195_vm2, %v3050_v6, %v3051_v35  ;;  %v3584_v35 = vld [vmem:[#allocation2 + $0xc0] sm:$0xf8]  ;;  %v3586_v28 = vld [vmem:[#allocation2 + $0x98] sm:$0x7] }
 0x3ac   : > { %6601 = vmatmul.f32.gmra.mxu3 %v3049_v14  ;;  %6709 = vmatpush.msrb.mxu2 %v4894_v55  ;;  %v2982_v55 = vld [vmem:[#allocation2 + $0x98] sm:$0x7]  ;;  %v2983_v62 = vld [vmem:[#allocation2 + $0x8] sm:$0x7]  ;;  %v3654_v11 = vsel %vm1195_vm2, %v3652_v21, %v3653_v0  ;;  %v6158_v21 = vadd.f32 %v10062_v50, %v10209_v3  ;;  %v3658_v0 = vrot.slane %v3584_v35, 3 }
 0x3ad   : > { %6751 = vmatpush.msrb.mxu3 %v4909_v4  ;;  %v3587_v4 = vld [vmem:[#allocation2 + $0x8] sm:$0x7] }
 0x3ae   : > { %6967 = vmatmul.f32.gmra.mxu0 %v3648_v7  ;;  %v6233_v46 = vpop.f32.mrf.mxu2  ;;  %6710 = vmatpush.msrb.mxu2 %v4893_v29  ;;  %v3655_v7 = vrot.slane %v3581_v19, 3  ;;  %v3585_v29 = vld [vmem:[#allocation2 + $0x18] sm:$0xf8]  ;;  %v10298_v39 = vpop.f32.mrf.mxu1  ;;  %v2987_v50 = vld [vmem:[#allocation2 + $0x68] sm:$0x7] }
 0x3af   : > { %v6234_v9 = vadd.f32 %v6233_v46, %v6193_v17  ;;  %v6274_v52 = vpop.f32.mrf.mxu3  ;;  %v3656_v17 = vrot.slane %v3583_v54, 3  ;;  %v12040_v46 = vld [vmem:[#allocation31_spill] sm:$0xff]  ;;  %6752 = vmatpush.msrb.mxu3 %v4908_v47  ;;  %v3060_v54 = vrot.slane %v2983_v62, 3  ;;  %v2985_v62 = vld [vmem:[#allocation2 + $0x78] sm:$0xf8] }
 0x3b0   : > { %7008 = vmatmul.f32.gmra.mxu1 %v3651_v30  ;;  %6711 = vmatpush.msrb.mxu2 %v4892_v40  ;;  %v6196_v44 = vadd.f32 %v12040_v46, %v6155_v63  ;;  %v3056_v30 = vrot.slane %v2980_v23, 3  ;;  %v3659_v40 = vrot.slane %v3586_v28, 3  ;;  %v2984_v23 = vld [vmem:[#allocation2] sm:$0xf8] }
 0x3b1   : > { %v10281_v14 = vadd.f32 %v6274_v52, %v6234_v9  ;;  %v3057_v9 = vrot.slane %v2982_v55, 3  ;;  %v3657_v52 = vsel %vm1195_vm2, %v3655_v7, %v3656_v17  ;;  %v3662_v7 = vrot.slane %v3587_v4, 3  ;;  %v2986_v55 = vld [vmem:[#allocation2 + $0x50] sm:$0x7] }
 0x3b2   : > { %v3061_v17 = vsel %vm1195_vm2, %v3059_v32, %v3060_v54  ;;  %v3660_v3 = vsel %vm1195_vm2, %v3658_v0, %v3659_v40  ;;  %v3062_v35 = vrot.slane %v2984_v23, 3  ;;  %v3063_v28 = vrot.slane %v2986_v55, 3  ;;  %v3589_v32 = vld [vmem:[#allocation2 + $0x78] sm:$0xf8]  ;;  %v3591_v54 = vld [vmem:[#allocation2 + $0x68] sm:$0x7] }
 0x3b3   : > { %6563 = vmatmul.f32.gmra.mxu2 %v3052_v41  ;;  %v10294_v41 = vpop.f32.mrf.mxu0  ;;  %v3058_v47 = vsel %vm1195_vm2, %v3056_v30, %v3057_v9  ;;  %v3667_v40 = vrot.slane %v3589_v32, 3 }
 0x3b4   : > { %6604 = vmatmul.f32.gmra.mxu3 %v3055_v51  ;;  %v3661_v51 = vrot.slane %v3585_v29, 3  ;;  %v6161_v29 = vadd.f32 %v10077_v42, %v10220_v20  ;;  %v3064_v0 = vsel %vm1195_vm2, %v3062_v35, %v3063_v28  ;;  %v3592_v20 = vld [vmem:[#allocation2 + $0x70] sm:$0xf8] }
 0x3b5   : > { %v3670_v28 = vrot.slane %v3592_v20, 3 }
 0x3b6   : > { %6970 = vmatmul.f32.gmra.mxu0 %v3654_v11  ;;  %v6236_v6 = vpop.f32.mrf.mxu2  ;;  %v6199_v11 = vadd.f32 %v10066_v43, %v6158_v21  ;;  %v3663_v30 = vsel %vm1195_vm2, %v3661_v51, %v3662_v7  ;;  %v6202_v23 = vadd.f32 %v10080_v24, %v6161_v29  ;;  %v10313_v55 = vpop.f32.mrf.mxu1 }
 0x3b7   : > { %v6237_v19 = vadd.f32 %v6236_v6, %v6196_v44  ;;  %v6277_v12 = vpop.f32.mrf.mxu3  ;;  %v3588_v44 = vld [vmem:[#allocation2] sm:$0xf8]  ;;  %v3590_v6 = vld [vmem:[#allocation2 + $0x50] sm:$0x7] }
 0x3b8   : > { %7011 = vmatmul.f32.gmra.mxu1 %v3657_v52  ;;  %v3664_v43 = vrot.slane %v3588_v44, 3  ;;  %v3665_v21 = vrot.slane %v3590_v6, 3  ;;  %v3595_v44 = vld [vmem:[#allocation2 + $0x150] sm:$0x7]  ;;  %v6304_v6 = vadd.f32 %v10091_v2, %v10231_v37 }
 0x3b9   : > { %v10292_v63 = vadd.f32 %v6277_v12, %v6237_v19  ;;  %v3065_v19 = vrot.slane %v2985_v62, 3  ;;  %v3066_v12 = vrot.slane %v2987_v50, 3  ;;  %v3594_v62 = vld [vmem:[#allocation2 + $0x158] sm:$0x7] }
 0x3ba   : > { %v3671_v24 = vrot.slane %v3594_v62, 3  ;;  %v6345_v32 = vadd.f32 %v10097_v53, %v6304_v6  ;;  %v4986_v62 = vld [vmem:[#allocation12 + $0x16f0] sm:$0xff]  ;;  %v4984_v6 = vld [vmem:[#allocation12 + $0x16e0] sm:$0xff] }
 0x3bb   : > { %6566 = vmatmul.f32.gmra.mxu2 %v3058_v47  ;;  %v3668_v47 = vrot.slane %v3591_v54, 3  ;;  %v3067_v51 = vsel %vm1195_vm2, %v3065_v19, %v3066_v12  ;;  %v10309_v7 = vpop.f32.mrf.mxu0  ;;  %v3245_v19 = vld [vmem:[#allocation2 + $0x130] sm:$0xff] }
 0x3bc   : > { %6607 = vmatmul.f32.gmra.mxu3 %v3061_v17  ;;  %v3666_v17 = vsel %vm1195_vm2, %v3664_v43, %v3665_v21  ;;  %v3672_v12 = vsel %vm1195_vm2, %v3670_v28, %v3671_v24  ;;  %v3249_v28 = vld [vmem:[#allocation2 + $0xf8] sm:$0xff] }
 0x3bd   : > { %v3669_v50 = vsel %vm1195_vm2, %v3667_v40, %v3668_v47  ;;  %v3246_v47 = vld [vmem:[#allocation2 + $0xe0] sm:$0xff] }
 0x3be   : > { %6973 = vmatmul.f32.gmra.mxu0 %v3660_v3  ;;  %v6239_v46 = vpop.f32.mrf.mxu2  ;;  %v10325_v21 = vpop.f32.mrf.mxu1 }
 0x3bf   : > { %v6240_v9 = vadd.f32 %v6239_v46, %v6199_v11  ;;  %v6280_v52 = vpop.f32.mrf.mxu3  ;;  %v3593_v46 = vld [vmem:[#allocation2 + $0x30] sm:$0xf8] }
 0x3c0   : > { %7014 = vmatmul.f32.gmra.mxu1 %v3663_v30  ;;  %v3244_v30 = vld [vmem:[#allocation2 + $0x80] sm:$0xff] }
 0x3c1   : > { %v10305_v4 = vadd.f32 %v6280_v52, %v6240_v9  ;;  %v3673_v9 = vrot.slane %v3593_v46, 3  ;;  %v3674_v52 = vrot.slane %v3595_v44, 3  ;;  %v4985_v46 = vld [vmem:[#allocation12 + $0x16e8] sm:$0xff]  ;;  %v4968_v44 = vld [vmem:[#allocation12 + $0x1660] sm:$0xff] }
 0x3c3   : > { %6569 = vmatmul.f32.gmra.mxu2 %v3064_v0  ;;  %v10322_v54 = vpop.f32.mrf.mxu0  ;;  %v3675_v2 = vsel %vm1195_vm2, %v3673_v9, %v3674_v52  ;;  %v6307_v0 = vadd.f32 %v10108_v27, %v10244_v1  ;;  %v6310_v27 = vadd.f32 %v10123_v18, %v10257_v26  ;;  %v4983_v9 = vld [vmem:[#allocation12 + $0x16d8] sm:$0xff]  ;;  %v4966_v52 = vld [vmem:[#allocation12 + $0x1650] sm:$0xff] }
 0x3c4   : > { %6610 = vmatmul.f32.gmra.mxu3 %v3067_v51  ;;  %v3247_v51 = vld [vmem:[#allocation2 + $0xa8] sm:$0xff]  ;;  %v4982_v18 = vld [vmem:[#allocation12 + $0x16d0] sm:$0xff] }
 0x3c5   : > { %v6348_v53 = vadd.f32 %v10112_v59, %v6307_v0  ;;  %v3248_v59 = vld [vmem:[#allocation2 + $0xe8] sm:$0xff]  ;;  %v6351_v24 = vadd.f32 %v10127_v33, %v6310_v27 }
 0x3c6   : > { %6976 = vmatmul.f32.gmra.mxu0 %v3666_v17  ;;  %v6242_v42 = vpop.f32.mrf.mxu2  ;;  %v4971_v17 = vld [vmem:[#allocation12 + $0x1678] sm:$0xff]  ;;  %v4964_v33 = vld [vmem:[#allocation12 + $0x1640] sm:$0xff] }
 0x3c7   : > { %v6243_v3 = vadd.f32 %v6242_v42, %v6202_v23  ;;  %v6283_v11 = vpop.f32.mrf.mxu3  ;;  %v4987_v23 = vld [vmem:[#allocation12 + $0x16f8] sm:$0xff]  ;;  %v4970_v42 = vld [vmem:[#allocation12 + $0x1670] sm:$0xff]  ;;  %6860 = vmatpush.msra.mxu2 %v4971_v17  ;;  %v4980_v0 = vld [vmem:[#allocation12 + $0x16c0] sm:$0xff] }
 0x3c8   : > { %7017 = vmatmul.f32.gmra.mxu1 %v3669_v50  ;;  %6901 = vmatpush.msra.mxu3 %v4987_v23  ;;  %v4979_v17 = vld [vmem:[#allocation12 + $0x16b8] sm:$0xff]  ;;  %v4962_v23 = vld [vmem:[#allocation12 + $0x1630] sm:$0xff]  ;;  %v4976_v27 = vld [vmem:[#allocation12 + $0x16a0] sm:$0xff] }
 0x3c9   : > { %v10318_v35 = vadd.f32 %v6283_v11, %v6243_v3  ;;  %v4969_v11 = vld [vmem:[#allocation12 + $0x1668] sm:$0xff]  ;;  %6861 = vmatpush.msra.mxu2 %v4970_v42 }
 0x3ca   : > { %6902 = vmatpush.msra.mxu3 %v4986_v62  ;;  %v4961_v62 = vld [vmem:[#allocation12 + $0x1628] sm:$0xff] }
 0x3cb   : > { %6712 = vmatmul.f32.vlgmr.msrb.gmra.mxu2 %v3244_v30  ;;  %v4967_v30 = vld [vmem:[#allocation12 + $0x1658] sm:$0xff] }
 0x3cc   : > { %6753 = vmatmul.f32.vlgmr.msrb.gmra.mxu3 %v3245_v19  ;;  %6862 = vmatpush.msra.mxu2 %v4969_v11 }
 0x3cd   : > { %6903 = vmatpush.msra.mxu3 %v4985_v46  ;;  %v3252_v46 = vld [vmem:[#allocation2 + $0x60] sm:$0xff] }
 0x3ce   : > { %6979 = vmatmul.f32.gmra.mxu0 %v3672_v12  ;;  %v6385_v29 = vpop.f32.mrf.mxu2  ;;  %6863 = vmatpush.msra.mxu2 %v4968_v44  ;;  %v3253_v44 = vld [vmem:[#allocation2 + $0xc8] sm:$0xff] }
 0x3cf   : > { %v6386_v37 = vadd.f32 %v6385_v29, %v6345_v32  ;;  %v6426_v43 = vpop.f32.mrf.mxu3  ;;  %6904 = vmatpush.msra.mxu3 %v4984_v6  ;;  %v4965_v32 = vld [vmem:[#allocation12 + $0x1648] sm:$0xff]  ;;  %v4959_v6 = vld [vmem:[#allocation12 + $0x1618] sm:$0xff] }
 0x3d0   : > { %7020 = vmatmul.f32.gmra.mxu1 %v3675_v2  ;;  %6864 = vmatpush.msra.mxu2 %v4967_v30  ;;  %v4981_v29 = vld [vmem:[#allocation12 + $0x16c8] sm:$0xff]  ;;  %v6313_v2 = vadd.f32 %v10138_v57, %v10270_v49  ;;  %v4978_v57 = vld [vmem:[#allocation12 + $0x16b0] sm:$0xff] }
 0x3d1   : > { %v10329_v40 = vadd.f32 %v6426_v43, %v6386_v37  ;;  %6905 = vmatpush.msra.mxu3 %v4983_v9  ;;  %v3250_v43 = vld [vmem:[#allocation2 + $0xa0] sm:$0xff] }
 0x3d2   : > { %6865 = vmatpush.msra.mxu2 %v4966_v52  ;;  %v4957_v52 = vld [vmem:[#allocation12 + $0x1608] sm:$0xff] }
 0x3d3   : > { %6715 = vmatmul.f32.gmra.mxu2 %v3246_v47  ;;  %6906 = vmatpush.msra.mxu3 %v4982_v18  ;;  %v3251_v47 = vld [vmem:[#allocation2 + $0x170] sm:$0xff]  ;;  %v6319_v18 = vadd.f32 %v10172_v61, %v10292_v63  ;;  %v6322_v61 = vadd.f32 %v10187_v16, %v10305_v4  ;;  %v3422_v16 = vld [vmem:[#allocation2 + $0x138] sm:$0x3]  ;;  %v3423_v4 = vld [vmem:[#allocation2 + $0x120] sm:$0x3] }
 0x3d4   : > { %6756 = vmatmul.f32.gmra.mxu3 %v3247_v51  ;;  %6866 = vmatpush.msra.mxu2 %v4965_v32  ;;  %v6354_v51 = vadd.f32 %v10141_v58, %v6313_v2  ;;  %v4960_v58 = vld [vmem:[#allocation12 + $0x1620] sm:$0xff] }
 0x3d5   : > { %6907 = vmatpush.msra.mxu3 %v4981_v29  ;;  %v4972_v32 = vld [vmem:[#allocation12 + $0x1680] sm:$0xff]  ;;  %v3255_v29 = vld [vmem:[#allocation2 + $0x18] sm:$0xff]  ;;  %v6360_v2 = vadd.f32 %v10176_v38, %v6319_v18  ;;  %v6325_v38 = vadd.f32 %v10202_v22, %v10318_v35  ;;  %v6468_v22 = vadd.f32 %v10216_v56, %v10329_v40 }
 0x3d6   : > { %v6388_v20 = vpop.f32.mrf.mxu2  ;;  %6867 = vmatpush.msra.mxu2 %v4964_v33 }
 0x3d7   : > { %v6389_v50 = vadd.f32 %v6388_v20, %v6348_v53  ;;  %v6429_v3 = vpop.f32.mrf.mxu3  ;;  %6908 = vmatpush.msra.mxu3 %v4980_v0  ;;  %v4963_v53 = vld [vmem:[#allocation12 + $0x1638] sm:$0xff] }
 0x3d8   : > { %6868 = vmatpush.msra.mxu2 %v4963_v53  ;;  %v6363_v53 = vadd.f32 %v10191_v31, %v6322_v61  ;;  %v3421_v31 = vld [vmem:[#allocation2 + $0x130] sm:$0xfc] }
 0x3d9   : > { %v10334_v1 = vadd.f32 %v6429_v3, %v6389_v50  ;;  %6909 = vmatpush.msra.mxu3 %v4979_v17  ;;  %v4977_v50 = vld [vmem:[#allocation12 + $0x16a8] sm:$0xff]  ;;  %v6316_v3 = vadd.f32 %v10154_v36, %v10281_v14  ;;  %v4974_v36 = vld [vmem:[#allocation12 + $0x1690] sm:$0xff] }
 0x3da   : > { %6869 = vmatpush.msra.mxu2 %v4962_v23  ;;  %v12041_v61 = vld [vmem:[#allocation32_spill] sm:$0xff] }
 0x3db   : > { %6718 = vmatmul.f32.gmra.mxu2 %v3248_v59  ;;  %6910 = vmatpush.msra.mxu3 %v4978_v57  ;;  %v6357_v59 = vadd.f32 %v10161_v15, %v6316_v3  ;;  %v4956_v15 = vld [vmem:[#allocation12 + $0x1600] sm:$0xff] }
 0x3dc   : > { %6759 = vmatmul.f32.gmra.mxu3 %v3249_v28  ;;  %6870 = vmatpush.msra.mxu2 %v4961_v62  ;;  %v4975_v28 = vld [vmem:[#allocation12 + $0x1698] sm:$0xff]  ;;  %v6366_v62 = vadd.f32 %v10205_v13, %v6325_v38  ;;  %v3424_v13 = vld [vmem:[#allocation2 + $0xe0] sm:$0xfc] }
 0x3dd   : > { %6911 = vmatpush.msra.mxu3 %v4977_v50  ;;  %v3420_v50 = vld [vmem:[#allocation2 + $0x80] sm:$0xfc]  ;;  %v3429_v38 = vld [vmem:[#allocation2 + $0xf8] sm:$0xfc] }
 0x3de   : > { %v6391_v19 = vpop.f32.mrf.mxu2  ;;  %6871 = vmatpush.msra.mxu2 %v4960_v58  ;;  %v3485_v58 = vrot.slane %v3422_v16, 2  ;;  %v5033_v16 = vld [vmem:[#allocation12 + $0x1868] sm:$0xff] }
 0x3df   : > { %v6392_v26 = vadd.f32 %v6391_v19, %v6351_v24  ;;  %v6432_v12 = vpop.f32.mrf.mxu3  ;;  %6912 = vmatpush.msra.mxu3 %v4976_v27  ;;  %v4958_v24 = vld [vmem:[#allocation12 + $0x1610] sm:$0xff]  ;;  %v4973_v19 = vld [vmem:[#allocation12 + $0x1688] sm:$0xff] }
 0x3e0   : > { %6872 = vmatpush.msra.mxu2 %v4959_v6  ;;  %v3487_v6 = vrot.slane %v3421_v31, 2  ;;  %v5032_v31 = vld [vmem:[#allocation12 + $0x1860] sm:$0xff] }
 0x3e1   : > { %v10339_v37 = vadd.f32 %v6432_v12, %v6392_v26  ;;  %6913 = vmatpush.msra.mxu3 %v4975_v28  ;;  %v3254_v12 = vld [vmem:[#allocation2 + $0xc0] sm:$0xff] }
 0x3e2   : > { %6873 = vmatpush.msra.mxu2 %v4958_v24 }
 0x3e3   : > { %6721 = vmatmul.f32.gmra.mxu2 %v3250_v43  ;;  %6914 = vmatpush.msra.mxu3 %v4974_v36  ;;  %v3425_v36 = vld [vmem:[#allocation2 + $0xa8] sm:$0xfc] }
 0x3e4   : > { %6762 = vmatmul.f32.gmra.mxu3 %v3251_v47  ;;  %6874 = vmatpush.msra.mxu2 %v4957_v52  ;;  %v3256_v47 = vld [vmem:[#allocation2] sm:$0xff]  ;;  %v3493_v40 = vrot.slane %v3425_v36, 2  ;;  %v10385_v36 = vpop.f32.mrf.mxu1 }
 0x3e5   : > { %6915 = vmatpush.msra.mxu3 %v4973_v19  ;;  %v3490_v19 = vrot.slane %v3424_v13, 2  ;;  %v5047_v13 = vld [vmem:[#allocation12 + $0x18d8] sm:$0xff] }
 0x3e6   : > { %v6394_v42 = vpop.f32.mrf.mxu2  ;;  %6875 = vmatpush.msra.mxu2 %v4956_v15 }
 0x3e7   : > { %v6395_v49 = vadd.f32 %v6394_v42, %v6354_v51  ;;  %v6435_v20 = vpop.f32.mrf.mxu3  ;;  %6916 = vmatpush.msra.mxu3 %v4972_v32  ;;  %v3257_v51 = vld [vmem:[#allocation2 + $0x78] sm:$0xff]  ;;  %v6471_v32 = vadd.f32 %v10233_v8, %v10334_v1 }
 0x3e8   : > { %v5050_v8 = vld [vmem:[#allocation12 + $0x18f0] sm:$0xff] }
 0x3e9   : > { %v10344_v11 = vadd.f32 %v6435_v20, %v6395_v49  ;;  %v3258_v49 = vld [vmem:[#allocation2 + $0x70] sm:$0xff] }
 0x3ea   : > { %v3259_v20 = vld [vmem:[#allocation2 + $0x30] sm:$0xff] }
 0x3eb   : > { %6724 = vmatmul.f32.gmra.mxu2 %v3252_v46 }
 0x3ec   : > { %6765 = vmatmul.f32.gmra.mxu3 %v3253_v44  ;;  %v3488_v44 = vrot.slane %v3423_v4, 2  ;;  %v5049_v4 = vld [vmem:[#allocation12 + $0x18e8] sm:$0xff] }
 0x3ee   : > { %v6397_v30 = vpop.f32.mrf.mxu2  ;;  %v3489_v24 = vsel %vm1050_vm4, %v3487_v6, %v3488_v44  ;;  %v5048_v44 = vld [vmem:[#allocation12 + $0x18e0] sm:$0xff]  ;;  %v3434_v6 = vld [vmem:[#allocation2 + $0xf0] sm:$0x3] }
 0x3ef   : > { %v6398_v14 = vadd.f32 %v6397_v30, %v6357_v59  ;;  %v6438_v9 = vpop.f32.mrf.mxu3  ;;  %v3484_v59 = vrot.slane %v3420_v50, 2  ;;  %v3426_v30 = vld [vmem:[#allocation2 + $0xb8] sm:$0x3]  ;;  %v6474_v50 = vadd.f32 %v10248_v45, %v10339_v37  ;;  %v5031_v37 = vld [vmem:[#allocation12 + $0x1858] sm:$0xff] }
 0x3f0   : > { %v3491_v18 = vrot.slane %v3426_v30, 2  ;;  %v5030_v30 = vld [vmem:[#allocation12 + $0x1850] sm:$0xff] }
 0x3f1   : > { %v10349_v26 = vadd.f32 %v6438_v9, %v6398_v14  ;;  %v3486_v28 = vsel %vm1050_vm4, %v3484_v59, %v3485_v58  ;;  %v3427_v14 = vld [vmem:[#allocation2 + $0x168] sm:$0x3]  ;;  %v6509_v9 = vadd.f32 %v10222_v25, %v6468_v22  ;;  %v3428_v25 = vld [vmem:[#allocation2 + $0xe8] sm:$0xfc]  ;;  %v3499_v58 = vrot.slane %v3429_v38, 2 }
 0x3f2   : > { %v3432_v22 = vld [vmem:[#allocation2 + $0xa0] sm:$0xfc]  ;;  %v6515_v45 = vadd.f32 %v10252_v60, %v6474_v50  ;;  %v6477_v60 = vadd.f32 %v10263_v48, %v10344_v11  ;;  %v5027_v11 = vld [vmem:[#allocation12 + $0x1838] sm:$0xff]  ;;  %v5025_v50 = vld [vmem:[#allocation12 + $0x1828] sm:$0xff] }
 0x3f3   : > { %6727 = vmatmul.f32.gmra.mxu2 %v3254_v12  ;;  %v3494_v12 = vrot.slane %v3427_v14, 2 }
 0x3f4   : > { %6768 = vmatmul.f32.gmra.mxu3 %v3255_v29  ;;  %v6518_v48 = vadd.f32 %v10266_v34, %v6477_v60  ;;  %v6480_v34 = vadd.f32 %v10277_v5, %v10349_v26  ;;  %v5023_v26 = vld [vmem:[#allocation12 + $0x1818] sm:$0xff]  ;;  %v5037_v60 = vld [vmem:[#allocation12 + $0x1888] sm:$0xff] }
 0x3f6   : > { %v6400_v33 = vpop.f32.mrf.mxu2  ;;  %v6521_v5 = vadd.f32 %v10283_v10, %v6480_v34 }
 0x3f7   : > { %v6401_v43 = vadd.f32 %v6400_v33, %v6360_v2  ;;  %v6441_v0 = vpop.f32.mrf.mxu3  ;;  %v3492_v2 = vsel %vm1050_vm4, %v3490_v19, %v3491_v18  ;;  %v3495_v33 = vsel %vm1050_vm4, %v3493_v40, %v3494_v12  ;;  %v5046_v19 = vld [vmem:[#allocation12 + $0x18d0] sm:$0xff]  ;;  %v5029_v12 = vld [vmem:[#allocation12 + $0x1848] sm:$0xff] }
 0x3f9   : > { %v10354_v63 = vadd.f32 %v6441_v0, %v6401_v43  ;;  %v3430_v43 = vld [vmem:[#allocation2 + $0x20] sm:$0x3]  ;;  %v3431_v0 = vld [vmem:[#allocation2 + $0x88] sm:$0x3] }
 0x3fb   : > { %6730 = vmatmul.f32.gmra.mxu2 %v3256_v47  ;;  %v6512_v47 = vadd.f32 %v12041_v61, %v6471_v32  ;;  %v5045_v32 = vld [vmem:[#allocation12 + $0x18c8] sm:$0xff]  ;;  %v3436_v61 = vld [vmem:[#allocation2 + $0x60] sm:$0xfc]  ;;  %v6483_v10 = vadd.f32 %v10294_v41, %v10354_v63 }
 0x3fc   : > { %6771 = vmatmul.f32.gmra.mxu3 %v3257_v51  ;;  %v5035_v51 = vld [vmem:[#allocation12 + $0x1878] sm:$0xff] }
 0x3fd   : > { %7024 = vmatpush.msrb.mxu2 %v5035_v51  ;;  %v6524_v41 = vadd.f32 %v10298_v39, %v6483_v10 }
 0x3fe   : > { %v6403_v17 = vpop.f32.mrf.mxu2 }
 0x3ff   : > { %v6404_v23 = vadd.f32 %v6403_v17, %v6363_v53  ;;  %v6444_v42 = vpop.f32.mrf.mxu3  ;;  %v5051_v53 = vld [vmem:[#allocation12 + $0x18f8] sm:$0xff]  ;;  %v5034_v17 = vld [vmem:[#allocation12 + $0x1870] sm:$0xff] }
 0x400   : > { %7065 = vmatpush.msrb.mxu3 %v5051_v53  ;;  %7025 = vmatpush.msrb.mxu2 %v5034_v17  ;;  %v3437_v53 = vld [vmem:[#allocation2 + $0xc8] sm:$0xfc]  ;;  %v3439_v17 = vld [vmem:[#allocation2 + $0x38] sm:$0x3] }
 0x401   : > { %v10359_v57 = vadd.f32 %v6444_v42, %v6404_v23  ;;  %v3497_v42 = vrot.slane %v3430_v43, 2 }
 0x402   : > { %7066 = vmatpush.msrb.mxu3 %v5050_v8  ;;  %7026 = vmatpush.msrb.mxu2 %v5033_v16  ;;  %v3508_v8 = vrot.slane %v3436_v61, 2  ;;  %v5036_v61 = vld [vmem:[#allocation12 + $0x1880] sm:$0xff] }
 0x403   : > { %6733 = vmatmul.f32.gmra.mxu2 %v3258_v49 }
 0x404   : > { %6774 = vmatmul.f32.gmra.mxu3 %v3259_v20  ;;  %v3500_v20 = vrot.slane %v3431_v0, 2  ;;  %7027 = vmatpush.msrb.mxu2 %v5032_v31  ;;  %v5041_v31 = vld [vmem:[#allocation12 + $0x18a8] sm:$0xff] }
 0x405   : > { %7067 = vmatpush.msrb.mxu3 %v5049_v4  ;;  %v3511_v4 = vrot.slane %v3437_v53, 2  ;;  %v3444_v53 = vld [vmem:[#allocation2] sm:$0xfc] }
 0x406   : > { %v6406_v3 = vpop.f32.mrf.mxu2  ;;  %v3501_v59 = vsel %vm1050_vm4, %v3499_v58, %v3500_v20  ;;  %7028 = vmatpush.msrb.mxu2 %v5031_v37  ;;  %v10396_v58 = vpop.f32.mrf.mxu1  ;;  %v3443_v37 = vld [vmem:[#allocation2 + $0x8] sm:$0x3] }
 0x407   : > { %v6407_v46 = vadd.f32 %v6406_v3, %v6366_v62  ;;  %v6447_v27 = vpop.f32.mrf.mxu3  ;;  %v3496_v62 = vrot.slane %v3428_v25, 2  ;;  %7068 = vmatpush.msrb.mxu3 %v5048_v44  ;;  %v5044_v25 = vld [vmem:[#allocation12 + $0x18c0] sm:$0xff] }
 0x408   : > { %7029 = vmatpush.msrb.mxu2 %v5030_v30  ;;  %v5024_v44 = vld [vmem:[#allocation12 + $0x1820] sm:$0xff]  ;;  %v5022_v30 = vld [vmem:[#allocation12 + $0x1810] sm:$0xff] }
 0x409   : > { %v10364_v35 = vadd.f32 %v6447_v27, %v6407_v46  ;;  %v10380_v46 = vpop.f32.mrf.mxu0  ;;  %v3498_v27 = vsel %vm1050_vm4, %v3496_v62, %v3497_v42  ;;  %7069 = vmatpush.msrb.mxu3 %v5047_v13  ;;  %v5026_v42 = vld [vmem:[#allocation12 + $0x1830] sm:$0xff]  ;;  %v3512_v62 = vrot.slane %v3439_v17, 2  ;;  %v5039_v13 = vld [vmem:[#allocation12 + $0x1898] sm:$0xff]  ;;  %v3446_v17 = vld [vmem:[#allocation2 + $0x50] sm:$0x3] }
 0x40a   : > { %7030 = vmatpush.msrb.mxu2 %v5029_v12  ;;  %v3518_v12 = vrot.slane %v3443_v37, 2 }
 0x40b   : > { %6876 = vmatmul.f32.vlgmr.msra.gmra.mxu2 %v3486_v28  ;;  %v3433_v28 = vld [vmem:[#allocation2 + $0x170] sm:$0xfc]  ;;  %7070 = vmatpush.msrb.mxu3 %v5046_v19 }
 0x40c   : > { %6917 = vmatmul.f32.vlgmr.msra.gmra.mxu3 %v3489_v24  ;;  %v3435_v24 = vld [vmem:[#allocation2 + $0x140] sm:$0x3] }
 0x40d   : > { %v3506_v40 = vrot.slane %v3435_v24, 2  ;;  %7071 = vmatpush.msrb.mxu3 %v5045_v32  ;;  %v3442_v24 = vld [vmem:[#allocation2 + $0x98] sm:$0x3]  ;;  %v5021_v32 = vld [vmem:[#allocation12 + $0x1808] sm:$0xff] }
 0x40e   : > { %v6549_v52 = vpop.f32.mrf.mxu2  ;;  %v3515_v19 = vrot.slane %v3442_v24, 2 }
 0x40f   : > { %v6550_v15 = vadd.f32 %v6549_v52, %v6509_v9  ;;  %v6590_v56 = vpop.f32.mrf.mxu3  ;;  %v3502_v9 = vrot.slane %v3432_v22, 2  ;;  %v3503_v52 = vrot.slane %v3434_v6, 2  ;;  %7072 = vmatpush.msrb.mxu3 %v5044_v25  ;;  %v5040_v22 = vld [vmem:[#allocation12 + $0x18a0] sm:$0xff]  ;;  %v3513_v6 = vsel %vm1050_vm4, %v3511_v4, %v3512_v62  ;;  %v10411_v25 = vpop.f32.mrf.mxu1 }
 0x411   : > { %v10371_v29 = vadd.f32 %v6590_v56, %v6550_v15  ;;  %v3505_v56 = vrot.slane %v3433_v28, 2  ;;  %v3504_v43 = vsel %vm1050_vm4, %v3502_v9, %v3503_v52  ;;  %v10393_v51 = vpop.f32.mrf.mxu0  ;;  %v3440_v28 = vld [vmem:[#allocation2 + $0xc0] sm:$0xfc] }
 0x412   : > { %v3514_v52 = vrot.slane %v3440_v28, 2 }
 0x413   : > { %6879 = vmatmul.f32.gmra.mxu2 %v3492_v2  ;;  %v3507_v0 = vsel %vm1050_vm4, %v3505_v56, %v3506_v40 }
 0x414   : > { %6920 = vmatmul.f32.gmra.mxu3 %v3495_v33  ;;  %v5028_v33 = vld [vmem:[#allocation12 + $0x1840] sm:$0xff] }
 0x415   : > { %7031 = vmatpush.msrb.mxu2 %v5028_v33 }
 0x416   : > { %v6552_v23 = vpop.f32.mrf.mxu2 }
 0x417   : > { %v6553_v1 = vadd.f32 %v6552_v23, %v6512_v47  ;;  %v6593_v49 = vpop.f32.mrf.mxu3  ;;  %v3438_v47 = vld [vmem:[#allocation2 + $0x28] sm:$0x3]  ;;  %v5043_v23 = vld [vmem:[#allocation12 + $0x18b8] sm:$0xff]  ;;  %7032 = vmatpush.msrb.mxu2 %v5027_v11  ;;  %v10424_v34 = vpop.f32.mrf.mxu1 }
 0x418   : > { %7073 = vmatpush.msrb.mxu3 %v5043_v23  ;;  %v3447_v11 = vld [vmem:[#allocation2 + $0x68] sm:$0x3]  ;;  %v3520_v23 = vrot.slane %v3444_v53, 2 }
 0x419   : > { %v10378_v3 = vadd.f32 %v6593_v49, %v6553_v1  ;;  %v3509_v1 = vrot.slane %v3438_v47, 2  ;;  %v5042_v49 = vld [vmem:[#allocation12 + $0x18b0] sm:$0xff]  ;;  %7033 = vmatpush.msrb.mxu2 %v5026_v42  ;;  %v3521_v42 = vrot.slane %v3446_v17, 2  ;;  %v3713_v17 = vld [vmem:[#allocation2 + $0xa8] sm:$0xf0] }
 0x41a   : > { %7074 = vmatpush.msrb.mxu3 %v5042_v49  ;;  %v3524_v49 = vrot.slane %v3447_v11, 2 }
 0x41b   : > { %6882 = vmatmul.f32.gmra.mxu2 %v3498_v27  ;;  %v3522_v62 = vsel %vm1050_vm4, %v3520_v23, %v3521_v42  ;;  %v3781_v42 = vrot.slane %v3713_v17, 4 }
 0x41c   : > { %6923 = vmatmul.f32.gmra.mxu3 %v3501_v59  ;;  %v3510_v59 = vsel %vm1050_vm4, %v3508_v8, %v3509_v1  ;;  %7034 = vmatpush.msrb.mxu2 %v5025_v50  ;;  %v3448_v50 = vld [vmem:[#allocation2 + $0x70] sm:$0xfc] }
 0x41d   : > { %7075 = vmatpush.msrb.mxu3 %v5041_v31  ;;  %v3450_v31 = vld [vmem:[#allocation2 + $0x158] sm:$0x3]  ;;  %v3526_v28 = vrot.slane %v3448_v50, 2 }
 0x41e   : > { %v6555_v14 = vpop.f32.mrf.mxu2  ;;  %7035 = vmatpush.msrb.mxu2 %v5024_v44  ;;  %v3449_v44 = vld [vmem:[#allocation2 + $0x30] sm:$0xfc]  ;;  %v3527_v24 = vrot.slane %v3450_v31, 2 }
 0x41f   : > { %v6556_v18 = vadd.f32 %v6555_v14, %v6515_v45  ;;  %v6596_v15 = vpop.f32.mrf.mxu3  ;;  %v3441_v45 = vld [vmem:[#allocation2 + $0x18] sm:$0xfc]  ;;  %7076 = vmatpush.msrb.mxu3 %v5040_v22  ;;  %v10405_v14 = vpop.f32.mrf.mxu0 }
 0x420   : > { %7036 = vmatpush.msrb.mxu2 %v5023_v26  ;;  %v3517_v40 = vrot.slane %v3441_v45, 2  ;;  %v3529_v45 = vrot.slane %v3449_v44, 2 }
 0x421   : > { %v10389_v2 = vadd.f32 %v6596_v15, %v6556_v18  ;;  %v5038_v18 = vld [vmem:[#allocation12 + $0x1890] sm:$0xff]  ;;  %7077 = vmatpush.msrb.mxu3 %v5039_v13 }
 0x422   : > { %7037 = vmatpush.msrb.mxu2 %v5022_v30  ;;  %v3519_v47 = vsel %vm1050_vm4, %v3517_v40, %v3518_v12  ;;  %v3528_v30 = vsel %vm1050_vm4, %v3526_v28, %v3527_v24 }
 0x423   : > { %6885 = vmatmul.f32.gmra.mxu2 %v3504_v43  ;;  %7078 = vmatpush.msrb.mxu3 %v5038_v18  ;;  %v5020_v43 = vld [vmem:[#allocation12 + $0x1800] sm:$0xff] }
 0x424   : > { %6926 = vmatmul.f32.gmra.mxu3 %v3507_v0  ;;  %v3516_v0 = vsel %vm1050_vm4, %v3514_v52, %v3515_v19  ;;  %7038 = vmatpush.msrb.mxu2 %v5021_v32  ;;  %v3711_v52 = vld [vmem:[#allocation2 + $0x120] sm:$0xf]  ;;  %v3708_v18 = vld [vmem:[#allocation2 + $0x80] sm:$0xf0] }
 0x425   : > { %7079 = vmatpush.msrb.mxu3 %v5037_v60  ;;  %v3776_v32 = vrot.slane %v3711_v52, 4  ;;  %v3772_v60 = vrot.slane %v3708_v18, 4 }
 0x426   : > { %v6558_v38 = vpop.f32.mrf.mxu2  ;;  %7039 = vmatpush.msrb.mxu2 %v5020_v43 }
 0x427   : > { %v6559_v20 = vadd.f32 %v6558_v38, %v6518_v48  ;;  %v6599_v16 = vpop.f32.mrf.mxu3  ;;  %v3445_v48 = vld [vmem:[#allocation2 + $0x78] sm:$0xfc]  ;;  %7080 = vmatpush.msrb.mxu3 %v5036_v61 }
 0x428   : > { %v3523_v1 = vrot.slane %v3445_v48, 2  ;;  %v3715_v48 = vld [vmem:[#allocation2 + $0x168] sm:$0xf] }
 0x429   : > { %v10400_v27 = vadd.f32 %v6599_v16, %v6559_v20  ;;  %v10416_v20 = vpop.f32.mrf.mxu0  ;;  %v6486_v16 = vadd.f32 %v10309_v7, %v10359_v57 }
 0x42a   : > { %v3525_v39 = vsel %vm1050_vm4, %v3523_v1, %v3524_v49 }
 0x42b   : > { %6888 = vmatmul.f32.gmra.mxu2 %v3510_v59  ;;  %v3451_v59 = vld [vmem:[#allocation2 + $0x150] sm:$0x3]  ;;  %v6527_v22 = vadd.f32 %v10313_v55, %v6486_v16  ;;  %v3710_v55 = vld [vmem:[#allocation2 + $0x138] sm:$0xf]  ;;  %v3718_v16 = vld [vmem:[#allocation2 + $0x20] sm:$0xf] }
 0x42c   : > { %6929 = vmatmul.f32.gmra.mxu3 %v3513_v6  ;;  %v3530_v37 = vrot.slane %v3451_v59, 2  ;;  %v3773_v40 = vrot.slane %v3710_v55, 4  ;;  %v3785_v44 = vrot.slane %v3718_v16, 4  ;;  %v3717_v59 = vld [vmem:[#allocation2 + $0xf8] sm:$0xf0] }
 0x42d   : > { %v3787_v24 = vrot.slane %v3717_v59, 4  ;;  %v3730_v16 = vld [vmem:[#allocation2 + $0x98] sm:$0xf] }
 0x42e   : > { %v6561_v9 = vpop.f32.mrf.mxu2 }
 0x42f   : > { %v6562_v15 = vadd.f32 %v6561_v9, %v6521_v5  ;;  %v6602_v56 = vpop.f32.mrf.mxu3  ;;  %v6489_v5 = vadd.f32 %v10322_v54, %v10364_v35  ;;  %v3531_v9 = vsel %vm1050_vm4, %v3529_v45, %v3530_v37  ;;  %v3709_v54 = vld [vmem:[#allocation2 + $0x130] sm:$0xf0]  ;;  %v3720_v37 = vld [vmem:[#allocation2 + $0xa0] sm:$0xf0] }
 0x430   : > { %v3775_v43 = vrot.slane %v3709_v54, 4  ;;  %v3790_v52 = vrot.slane %v3720_v37, 4 }
 0x431   : > { %v10409_v33 = vadd.f32 %v6602_v56, %v6562_v15  ;;  %v10431_v13 = vpop.f32.mrf.mxu0  ;;  %v6530_v19 = vadd.f32 %v10325_v21, %v6489_v5  ;;  %v10436_v15 = vpop.f32.mrf.mxu1  ;;  %v3714_v21 = vld [vmem:[#allocation2 + $0xb8] sm:$0xf]  ;;  %v3722_v5 = vld [vmem:[#allocation2 + $0xf0] sm:$0xf] }
 0x432   : > { %v3777_v61 = vsel %vm481_vm0, %v3775_v43, %v3776_v32  ;;  %v3724_v32 = vld [vmem:[#allocation2 + $0x60] sm:$0xf0] }
 0x433   : > { %6891 = vmatmul.f32.gmra.mxu2 %v3516_v0  ;;  %v3774_v0 = vsel %vm481_vm0, %v3772_v60, %v3773_v40  ;;  %v3726_v60 = vld [vmem:[#allocation2 + $0x28] sm:$0xf] }
 0x434   : > { %6932 = vmatmul.f32.gmra.mxu3 %v3519_v47  ;;  %v3712_v47 = vld [vmem:[#allocation2 + $0xe0] sm:$0xf0]  ;;  %v3797_v17 = vrot.slane %v3726_v60, 4 }
 0x436   : > { %v6564_v63 = vpop.f32.mrf.mxu2 }
 0x437   : > { %v6565_v38 = vadd.f32 %v6564_v63, %v6524_v41  ;;  %v6605_v8 = vpop.f32.mrf.mxu3  ;;  %v3778_v41 = vrot.slane %v3712_v47, 4  ;;  %v3779_v63 = vrot.slane %v3714_v21, 4  ;;  %v3796_v21 = vrot.slane %v3724_v32, 4 }
 0x439   : > { %v10420_v4 = vadd.f32 %v6605_v8, %v6565_v38  ;;  %v10442_v53 = vpop.f32.mrf.mxu0  ;;  %v3782_v38 = vrot.slane %v3715_v48, 4  ;;  %v10448_v8 = vpop.f32.mrf.mxu1  ;;  %v3780_v1 = vsel %vm481_vm0, %v3778_v41, %v3779_v63 }
 0x43b   : > { %6894 = vmatmul.f32.gmra.mxu2 %v3522_v62  ;;  %v3783_v49 = vsel %vm481_vm0, %v3781_v42, %v3782_v38  ;;  %v3719_v62 = vld [vmem:[#allocation2 + $0x88] sm:$0xf]  ;;  %v3798_v38 = vsel %vm481_vm0, %v3796_v21, %v3797_v17 }
 0x43c   : > { %6935 = vmatmul.f32.gmra.mxu3 %v3525_v39  ;;  %v3716_v39 = vld [vmem:[#allocation2 + $0xe8] sm:$0xf0] }
 0x43d   : > { %v3784_v28 = vrot.slane %v3716_v39, 4  ;;  %v3731_v39 = vld [vmem:[#allocation2 + $0x8] sm:$0xf] }
 0x43e   : > { %v6567_v6 = vpop.f32.mrf.mxu2 }
 0x43f   : > { %v6568_v7 = vadd.f32 %v6567_v6, %v6527_v22  ;;  %v6608_v57 = vpop.f32.mrf.mxu3  ;;  %v3788_v6 = vrot.slane %v3719_v62, 4  ;;  %v3729_v62 = vld [vmem:[#allocation2 + $0x18] sm:$0xf0] }
 0x441   : > { %v10429_v26 = vadd.f32 %v6608_v57, %v6568_v7  ;;  %v10452_v50 = vpop.f32.mrf.mxu0  ;;  %v10458_v7 = vpop.f32.mrf.mxu1  ;;  %v3786_v57 = vsel %vm481_vm0, %v3784_v28, %v3785_v44  ;;  %v3789_v45 = vsel %vm481_vm0, %v3787_v24, %v3788_v6  ;;  %v3803_v28 = vrot.slane %v3730_v16, 4 }
 0x443   : > { %6897 = vmatmul.f32.gmra.mxu2 %v3528_v30  ;;  %v3721_v30 = vld [vmem:[#allocation2 + $0x170] sm:$0xf0] }
 0x444   : > { %6938 = vmatmul.f32.gmra.mxu3 %v3531_v9  ;;  %v3723_v9 = vld [vmem:[#allocation2 + $0x140] sm:$0xf] }
 0x445   : > { %v3794_v40 = vrot.slane %v3723_v9, 4  ;;  %v3734_v9 = vld [vmem:[#allocation2 + $0x50] sm:$0xf] }
 0x446   : > { %v6570_v56 = vpop.f32.mrf.mxu2 }
 0x447   : > { %v6571_v35 = vadd.f32 %v6570_v56, %v6530_v19  ;;  %v6611_v12 = vpop.f32.mrf.mxu3  ;;  %v3791_v19 = vrot.slane %v3722_v5, 4  ;;  %v3793_v56 = vrot.slane %v3721_v30, 4  ;;  %v3732_v30 = vld [vmem:[#allocation2] sm:$0xf0] }
 0x449   : > { %v10438_v10 = vadd.f32 %v6611_v12, %v6571_v35  ;;  %v10466_v54 = vpop.f32.mrf.mxu0  ;;  %v3792_v35 = vsel %vm481_vm0, %v3790_v52, %v3791_v19  ;;  %v3795_v12 = vsel %vm481_vm0, %v3793_v56, %v3794_v40  ;;  %v10470_v43 = vpop.f32.mrf.mxu1  ;;  %v3733_v19 = vld [vmem:[#allocation2 + $0x78] sm:$0xf0]  ;;  %v3735_v56 = vld [vmem:[#allocation2 + $0x68] sm:$0xf] }
 0x44a   : > { %12043 = vst [vmem:[#allocation34_spill] sm:$0xff] %v10466_v54  ;;  %v3811_v60 = vrot.slane %v3733_v19, 4  ;;  %v7564_v54 = vld [vmem:[%s11965_s5 + $0x2a8] sm:$0xff] }
 0x44b   : > { %12042 = vst [vmem:[#allocation33_spill] sm:$0xff] %v10438_v10  ;;  %7040 = vmatmul.f32.vlgmr.msrb.gmra.mxu2 %v3774_v0  ;;  %v3725_v0 = vld [vmem:[#allocation2 + $0xc8] sm:$0xf0]  ;;  %v7619_v10 = vld [vmem:[%s11965_s5 + $0x460] sm:$0xff] }
 0x44c   : > { %7081 = vmatmul.f32.vlgmr.msrb.gmra.mxu3 %v3777_v61  ;;  %12044 = vst [vmem:[#allocation35_spill] sm:$0xff] %v10470_v43  ;;  %v3727_v61 = vld [vmem:[#allocation2 + $0x38] sm:$0xf]  ;;  %v3799_v41 = vrot.slane %v3725_v0, 4  ;;  %v3812_v0 = vrot.slane %v3735_v56, 4  ;;  %v7547_v43 = vld [vmem:[%s11965_s5 + $0x220] sm:$0xff] }
 0x44d   : > { %v3800_v63 = vrot.slane %v3727_v61, 4  ;;  %v7558_v56 = vld [vmem:[%s11965_s5 + $0x278] sm:$0xff] }
 0x44e   : > { %v10444_v11 = vpop.f32.mrf.mxu2  ;;  %v3813_v17 = vsel %vm481_vm0, %v3811_v60, %v3812_v0  ;;  %7975 = vmatpush.msra.mxu2 %v7558_v56  ;;  %v7557_v0 = vld [vmem:[%s11965_s5 + $0x270] sm:$0xff]  ;;  %v7490_v56 = vld [vmem:[%s11965_s5 + $0x58] sm:$0xff] }
 0x44f   : > { %v10446_v23 = vpop.f32.mrf.mxu3 }
 0x450   : > { %7976 = vmatpush.msra.mxu2 %v7557_v0  ;;  %v7574_v0 = vld [vmem:[%s11965_s5 + $0x2f8] sm:$0xff] }
 0x451   : > { %v10476_v42 = vpop.f32.mrf.mxu0  ;;  %v10480_v44 = vpop.f32.mrf.mxu1  ;;  %7998 = vmatpush.msra.mxu3 %v7574_v0  ;;  %v7503_v0 = vld [vmem:[%s11965_s5 + $0xc0] sm:$0xff] }
 0x453   : > { %7043 = vmatmul.f32.gmra.mxu2 %v3780_v1  ;;  %v3801_v1 = vsel %vm481_vm0, %v3799_v41, %v3800_v63  ;;  %v3736_v41 = vld [vmem:[#allocation2 + $0x70] sm:$0xf0]  ;;  %v3738_v63 = vld [vmem:[#allocation2 + $0x158] sm:$0xf] }
 0x454   : > { %7084 = vmatmul.f32.gmra.mxu3 %v3783_v49  ;;  %v3728_v49 = vld [vmem:[#allocation2 + $0xc0] sm:$0xf0] }
 0x455   : > { %v3802_v6 = vrot.slane %v3728_v49, 4 }
 0x456   : > { %v10454_v31 = vpop.f32.mrf.mxu2 }
 0x457   : > { %v10456_v22 = vpop.f32.mrf.mxu3  ;;  %v3804_v37 = vsel %vm481_vm0, %v3802_v6, %v3803_v28 }
 0x459   : > { %v10488_v52 = vpop.f32.mrf.mxu0  ;;  %v10494_v61 = vpop.f32.mrf.mxu1 }
 0x45b   : > { %7046 = vmatmul.f32.gmra.mxu2 %v3786_v57  ;;  %v3805_v57 = vrot.slane %v3729_v62, 4  ;;  %v3814_v62 = vrot.slane %v3736_v41, 4  ;;  %v7556_v41 = vld [vmem:[%s11965_s5 + $0x268] sm:$0xff] }
 0x45c   : > { %7087 = vmatmul.f32.gmra.mxu3 %v3789_v45  ;;  %v3806_v45 = vrot.slane %v3731_v39, 4  ;;  %v3815_v39 = vrot.slane %v3738_v63, 4  ;;  %v7492_v63 = vld [vmem:[%s11965_s5 + $0x68] sm:$0xff]  ;;  %7977 = vmatpush.msra.mxu2 %v7556_v41 }
 0x45e   : > { %v10462_v55 = vpop.f32.mrf.mxu2  ;;  %v3807_v5 = vsel %vm481_vm0, %v3805_v57, %v3806_v45 }
 0x45f   : > { %v10464_v18 = vpop.f32.mrf.mxu3 }
 0x461   : > { %v10498_v49 = vpop.f32.mrf.mxu0  ;;  %v10504_v45 = vpop.f32.mrf.mxu1 }
 0x463   : > { %7049 = vmatmul.f32.gmra.mxu2 %v3792_v35  ;;  %v3808_v35 = vrot.slane %v3732_v30, 4 }
 0x464   : > { %7090 = vmatmul.f32.gmra.mxu3 %v3795_v12  ;;  %v3809_v12 = vrot.slane %v3734_v9, 4 }
 0x466   : > { %v10472_v47 = vpop.f32.mrf.mxu2  ;;  %v3810_v21 = vsel %vm481_vm0, %v3808_v35, %v3809_v12  ;;  %v7494_v35 = vld [vmem:[%s11965_s5 + $0x78] sm:$0xff] }
 0x467   : > { %v10474_v48 = vpop.f32.mrf.mxu3  ;;  %v7510_v12 = vld [vmem:[%s11965_s5 + $0xf8] sm:$0xff]  ;;  %7883 = vmatpush.msra.mxu0 %v7494_v35 }
 0x468   : > { %7906 = vmatpush.msra.mxu1 %v7510_v12  ;;  %v7506_v35 = vld [vmem:[%s11965_s5 + $0xd8] sm:$0xff]  ;;  %v7553_v12 = vld [vmem:[%s11965_s5 + $0x250] sm:$0xff] }
 0x469   : > { %v10512_v19 = vpop.f32.mrf.mxu0  ;;  %v10523_v60 = vpop.f32.mrf.mxu1 }
 0x46b   : > { %7052 = vmatmul.f32.gmra.mxu2 %v3798_v38  ;;  %v3737_v38 = vld [vmem:[#allocation2 + $0x30] sm:$0xf0] }
 0x46c   : > { %7093 = vmatmul.f32.gmra.mxu3 %v3801_v1  ;;  %v3739_v1 = vld [vmem:[#allocation2 + $0x150] sm:$0xf]  ;;  %v3817_v28 = vrot.slane %v3737_v38, 4 }
 0x46d   : > { %v3818_v57 = vrot.slane %v3739_v1, 4  ;;  %v7508_v1 = vld [vmem:[%s11965_s5 + $0xe8] sm:$0xff] }
 0x46e   : > { %v10482_v59 = vpop.f32.mrf.mxu2 }
 0x46f   : > { %v10484_v24 = vpop.f32.mrf.mxu3 }
 0x471   : > { %v10579_v41 = vpop.f32.mrf.mxu1 }
 0x473   : > { %7055 = vmatmul.f32.gmra.mxu2 %v3804_v37  ;;  %v3816_v37 = vsel %vm481_vm0, %v3814_v62, %v3815_v39  ;;  %v7555_v39 = vld [vmem:[%s11965_s5 + $0x260] sm:$0xff] }
 0x474   : > { %7096 = vmatmul.f32.gmra.mxu3 %v3807_v5  ;;  %v3819_v5 = vsel %vm481_vm0, %v3817_v28, %v3818_v57  ;;  %v10550_v28 = vpop.f32.mrf.mxu0  ;;  %7978 = vmatpush.msra.mxu2 %v7555_v39  ;;  %v7491_v57 = vld [vmem:[%s11965_s5 + $0x60] sm:$0xff]  ;;  %v7573_v39 = vld [vmem:[%s11965_s5 + $0x2f0] sm:$0xff] }
 0x475   : > { %7999 = vmatpush.msra.mxu3 %v7573_v39  ;;  %v7486_v39 = vld [vmem:[%s11965_s5 + $0x38] sm:$0xff] }
 0x476   : > { %v10490_v40 = vpop.f32.mrf.mxu2 }
 0x477   : > { %v10492_v32 = vpop.f32.mrf.mxu3 }
 0x47b   : > { %7058 = vmatmul.f32.gmra.mxu2 %v3810_v21  ;;  %v7493_v21 = vld [vmem:[%s11965_s5 + $0x70] sm:$0xff] }
 0x47c   : > { %7099 = vmatmul.f32.gmra.mxu3 %v3813_v17  ;;  %v7509_v17 = vld [vmem:[%s11965_s5 + $0xf0] sm:$0xff]  ;;  %7884 = vmatpush.msra.mxu0 %v7493_v21 }
 0x47d   : > { %7907 = vmatpush.msra.mxu1 %v7509_v17  ;;  %v7489_v21 = vld [vmem:[%s11965_s5 + $0x50] sm:$0xff] }
 0x47e   : > { %v10500_v16 = vpop.f32.mrf.mxu2  ;;  %7885 = vmatpush.msra.mxu0 %v7492_v63  ;;  %v7505_v17 = vld [vmem:[%s11965_s5 + $0xd0] sm:$0xff] }
 0x47f   : > { %12045 = vst [vmem:[#allocation36_spill] sm:$0xff] %v10500_v16  ;;  %v10502_v6 = vpop.f32.mrf.mxu3  ;;  %7908 = vmatpush.msra.mxu1 %v7508_v1  ;;  %v7552_v1 = vld [vmem:[%s11965_s5 + $0x248] sm:$0xff] }
 0x480   : > { %12046 = vst [vmem:[#allocation37_spill] sm:$0xff] %v10502_v6  ;;  %7886 = vmatpush.msra.mxu0 %v7491_v57 }
 0x482   : > { %7887 = vmatpush.msra.mxu0 %v7490_v56  ;;  %v7551_v56 = vld [vmem:[%s11965_s5 + $0x240] sm:$0xff] }
 0x483   : > { %7061 = vmatmul.f32.gmra.mxu2 %v3816_v37  ;;  %v7507_v37 = vld [vmem:[%s11965_s5 + $0xe0] sm:$0xff] }
 0x484   : > { %7102 = vmatmul.f32.gmra.mxu3 %v3819_v5  ;;  %v7554_v5 = vld [vmem:[%s11965_s5 + $0x258] sm:$0xff]  ;;  %7909 = vmatpush.msra.mxu1 %v7507_v37  ;;  %v7488_v37 = vld [vmem:[%s11965_s5 + $0x48] sm:$0xff] }
 0x485   : > { %7979 = vmatpush.msra.mxu2 %v7554_v5  ;;  %v7504_v5 = vld [vmem:[%s11965_s5 + $0xc8] sm:$0xff]  ;;  %7888 = vmatpush.msra.mxu0 %v7489_v21  ;;  %v7550_v21 = vld [vmem:[%s11965_s5 + $0x238] sm:$0xff] }
 0x486   : > { %v10508_v30 = vpop.f32.mrf.mxu2  ;;  %7910 = vmatpush.msra.mxu1 %v7506_v35  ;;  %v7572_v35 = vld [vmem:[%s11965_s5 + $0x2e8] sm:$0xff] }
 0x487   : > { %12047 = vst [vmem:[#allocation38_spill] sm:$0xff] %v10508_v30  ;;  %v10510_v9 = vpop.f32.mrf.mxu3  ;;  %7980 = vmatpush.msra.mxu2 %v7553_v12  ;;  %7889 = vmatpush.msra.mxu0 %v7488_v37  ;;  %v7487_v12 = vld [vmem:[%s11965_s5 + $0x40] sm:$0xff]  ;;  %v7502_v37 = vld [vmem:[%s11965_s5 + $0xb8] sm:$0xff]  ;;  %v10651_v30 = vpop.f32.mrf.mxu1 }
 0x488   : > { %12048 = vst [vmem:[#allocation39_spill] sm:$0xff] %v10510_v9  ;;  %7911 = vmatpush.msra.mxu1 %v7505_v17  ;;  %8000 = vmatpush.msra.mxu3 %v7572_v35  ;;  %v10612_v17 = vpop.f32.mrf.mxu0  ;;  %v7485_v35 = vld [vmem:[%s11965_s5 + $0x30] sm:$0xff] }
 0x489   : > { %7981 = vmatpush.msra.mxu2 %v7552_v1  ;;  %12049 = vst [vmem:[#allocation40_spill] sm:$0xff] %v10612_v17  ;;  %7890 = vmatpush.msra.mxu0 %v7487_v12  ;;  %v7571_v1 = vld [vmem:[%s11965_s5 + $0x2e0] sm:$0xff] }
 0x48a   : > { %7912 = vmatpush.msra.mxu1 %v7504_v5  ;;  %8001 = vmatpush.msra.mxu3 %v7571_v1  ;;  %v7549_v5 = vld [vmem:[%s11965_s5 + $0x230] sm:$0xff]  ;;  %12050 = vst [vmem:[#allocation23_spill] sm:$0xff] %v10651_v30 }
 0x48b   : > { %7982 = vmatpush.msra.mxu2 %v7551_v56  ;;  %v7570_v56 = vld [vmem:[%s11965_s5 + $0x2d8] sm:$0xff]  ;;  %7891 = vmatpush.msra.mxu0 %v7486_v39  ;;  %v7569_v1 = vld [vmem:[%s11965_s5 + $0x2d0] sm:$0xff]  ;;  %v7484_v39 = vld [vmem:[%s11965_s5 + $0x28] sm:$0xff] }
 0x48c   : > { %7913 = vmatpush.msra.mxu1 %v7503_v0  ;;  %v7501_v0 = vld [vmem:[%s11965_s5 + $0xb0] sm:$0xff]  ;;  %8002 = vmatpush.msra.mxu3 %v7570_v56  ;;  %v7483_v56 = vld [vmem:[%s11965_s5 + $0x20] sm:$0xff] }
 0x48d   : > { %7983 = vmatpush.msra.mxu2 %v7550_v21  ;;  %v7548_v21 = vld [vmem:[%s11965_s5 + $0x228] sm:$0xff]  ;;  %7892 = vmatpush.msra.mxu0 %v7485_v35  ;;  %v7499_v35 = vld [vmem:[%s11965_s5 + $0xa0] sm:$0xff]  ;;  %v7565_v30 = vld [vmem:[%s11965_s5 + $0x2b0] sm:$0xff] }
 0x48e   : > { %v10540_v38 = vpop.f32.mrf.mxu2  ;;  %7914 = vmatpush.msra.mxu1 %v7502_v37  ;;  %v7500_v37 = vld [vmem:[%s11965_s5 + $0xa8] sm:$0xff]  ;;  %8003 = vmatpush.msra.mxu3 %v7569_v1  ;;  %v7498_v1 = vld [vmem:[%s11965_s5 + $0x98] sm:$0xff] }
 0x48f   : > { %v10545_v62 = vpop.f32.mrf.mxu3  ;;  %7984 = vmatpush.msra.mxu2 %v7549_v5  ;;  %v7568_v5 = vld [vmem:[%s11965_s5 + $0x2c8] sm:$0xff]  ;;  %7893 = vmatpush.msra.mxu0 %v7484_v39  ;;  %v7545_v39 = vld [vmem:[%s11965_s5 + $0x210] sm:$0xff] }
 0x490   : > { %7915 = vmatpush.msra.mxu1 %v7501_v0  ;;  %8004 = vmatpush.msra.mxu3 %v7568_v5  ;;  %v7546_v0 = vld [vmem:[%s11965_s5 + $0x218] sm:$0xff]  ;;  %v7481_v5 = vld [vmem:[%s11965_s5 + $0x10] sm:$0xff] }
 0x491   : > { %7985 = vmatpush.msra.mxu2 %v7548_v21  ;;  %7894 = vmatpush.msra.mxu0 %v7483_v56  ;;  %v7567_v21 = vld [vmem:[%s11965_s5 + $0x2c0] sm:$0xff]  ;;  %v10686_v56 = vpop.f32.mrf.mxu0 }
 0x492   : > { %7916 = vmatpush.msra.mxu1 %v7500_v37  ;;  %8005 = vmatpush.msra.mxu3 %v7567_v21  ;;  %v7566_v37 = vld [vmem:[%s11965_s5 + $0x2b8] sm:$0xff]  ;;  %12051 = vst [vmem:[#allocation24_spill] sm:$0xff] %v10686_v56  ;;  %v7544_v21 = vld [vmem:[%s11965_s5 + $0x208] sm:$0xff]  ;;  %v7543_v56 = vld [vmem:[%s11965_s5 + $0x200] sm:$0xff] }
 0x493   : > { %7986 = vmatpush.msra.mxu2 %v7547_v43  ;;  %v7482_v43 = vld [vmem:[%s11965_s5 + $0x18] sm:$0xff] }
 0x494   : > { %7917 = vmatpush.msra.mxu1 %v7499_v35  ;;  %7895 = vmatpush.msra.mxu0 %v7482_v43  ;;  %v7480_v43 = vld [vmem:[%s11965_s5 + $0x8] sm:$0xff] }
 0x495   : > { %7987 = vmatpush.msra.mxu2 %v7546_v0  ;;  %v7497_v0 = vld [vmem:[%s11965_s5 + $0x90] sm:$0xff]  ;;  %8006 = vmatpush.msra.mxu3 %v7566_v37  ;;  %v7622_v37 = vld [vmem:[%s11965_s5 + $0x478] sm:$0xff] }
 0x496   : > { %v10581_v63 = vpop.f32.mrf.mxu2  ;;  %7918 = vmatpush.msra.mxu1 %v7498_v1  ;;  %v7496_v1 = vld [vmem:[%s11965_s5 + $0x88] sm:$0xff]  ;;  %7896 = vmatpush.msra.mxu0 %v7481_v5  ;;  %v7479_v5 = vld [vmem:[%s11965_s5] sm:$0xff] }
 0x497   : > { %v10589_v57 = vpop.f32.mrf.mxu3  ;;  %7988 = vmatpush.msra.mxu2 %v7545_v39  ;;  %8007 = vmatpush.msra.mxu3 %v7565_v30  ;;  %v10713_v39 = vpop.f32.mrf.mxu1  ;;  %v7563_v30 = vld [vmem:[%s11965_s5 + $0x2a0] sm:$0xff] }
 0x498   : > { %7919 = vmatpush.msra.mxu1 %v7497_v0  ;;  %12052 = vst [vmem:[#allocation25_spill] sm:$0xff] %v10713_v39  ;;  %7897 = vmatpush.msra.mxu0 %v7480_v43  ;;  %v7495_v0 = vld [vmem:[%s11965_s5 + $0x80] sm:$0xff]  ;;  %v7621_v43 = vld [vmem:[%s11965_s5 + $0x470] sm:$0xff] }
 0x499   : > { %7989 = vmatpush.msra.mxu2 %v7544_v21  ;;  %8008 = vmatpush.msra.mxu3 %v7564_v54  ;;  %v7526_v54 = vld [vmem:[%s11965_s5 + $0x178] sm:$0xff]  ;;  %v6632_v21 = vadd.f32 %v10380_v46, %v10371_v29  ;;  %v7541_v29 = vld [vmem:[%s11965_s5 + $0x1f0] sm:$0xff]  ;;  %v7620_v46 = vld [vmem:[%s11965_s5 + $0x468] sm:$0xff]  ;;  %v10763_v39 = vpop.f32.mrf.mxu0 }
 0x49a   : > { %7920 = vmatpush.msra.mxu1 %v7496_v1  ;;  %7898 = vmatpush.msra.mxu0 %v7479_v5  ;;  %v7562_v1 = vld [vmem:[%s11965_s5 + $0x298] sm:$0xff]  ;;  %12054 = vst [vmem:[#allocation27_spill] sm:$0xff] %v10763_v39 }
 0x49b   : > { %7990 = vmatpush.msra.mxu2 %v7543_v56  ;;  %v7542_v56 = vld [vmem:[%s11965_s5 + $0x1f8] sm:$0xff]  ;;  %8009 = vmatpush.msra.mxu3 %v7563_v30 }
 0x49c   : > { %7921 = vmatpush.msra.mxu1 %v7495_v0  ;;  %7929 = vmatpush.msrb.mxu0 %v7526_v54  ;;  %v7561_v0 = vld [vmem:[%s11965_s5 + $0x290] sm:$0xff]  ;;  %v7524_v54 = vld [vmem:[%s11965_s5 + $0x168] sm:$0xff] }
 0x49d   : > { %8067 = vmatpush.msrb.mxu2 %v7622_v37  ;;  %v7525_v37 = vld [vmem:[%s11965_s5 + $0x170] sm:$0xff]  ;;  %8010 = vmatpush.msra.mxu3 %v7562_v1  ;;  %v6673_v1 = vadd.f32 %v10385_v36, %v6632_v21 }
 0x49e   : > { %v10632_v12 = vpop.f32.mrf.mxu2  ;;  %7952 = vmatpush.msrb.mxu1 %v7542_v56  ;;  %v7540_v56 = vld [vmem:[%s11965_s5 + $0x1e8] sm:$0xff]  ;;  %7930 = vmatpush.msrb.mxu0 %v7525_v37 }
 0x49f   : > { %v10643_v9 = vpop.f32.mrf.mxu3  ;;  %8068 = vmatpush.msrb.mxu2 %v7621_v43  ;;  %v7560_v43 = vld [vmem:[%s11965_s5 + $0x288] sm:$0xff]  ;;  %8011 = vmatpush.msra.mxu3 %v7561_v0  ;;  %v10773_v37 = vpop.f32.mrf.mxu1  ;;  %v7538_v0 = vld [vmem:[%s11965_s5 + $0x1d8] sm:$0xff] }
 0x4a0   : > { %7953 = vmatpush.msrb.mxu1 %v7541_v29  ;;  %7931 = vmatpush.msrb.mxu0 %v7524_v54  ;;  %v6635_v29 = vadd.f32 %v10393_v51, %v10378_v3  ;;  %v7618_v3 = vld [vmem:[%s11965_s5 + $0x458] sm:$0xff]  ;;  %v7637_v54 = vld [vmem:[%s11965_s5 + $0x4f0] sm:$0xff] }
 0x4a1   : > { %8069 = vmatpush.msrb.mxu2 %v7620_v46  ;;  %8012 = vmatpush.msra.mxu3 %v7560_v43  ;;  %v10783_v21 = vpop.f32.mrf.mxu0  ;;  %v7522_v46 = vld [vmem:[%s11965_s5 + $0x158] sm:$0xff] }
 0x4a2   : > { %7954 = vmatpush.msrb.mxu1 %v7540_v56  ;;  %v6676_v36 = vadd.f32 %v10396_v58, %v6635_v29  ;;  %v7559_v58 = vld [vmem:[%s11965_s5 + $0x280] sm:$0xff]  ;;  %v7536_v29 = vld [vmem:[%s11965_s5 + $0x1c8] sm:$0xff] }
 0x4a3   : > { %8070 = vmatpush.msrb.mxu2 %v7619_v10  ;;  %v7523_v10 = vld [vmem:[%s11965_s5 + $0x160] sm:$0xff]  ;;  %8013 = vmatpush.msra.mxu3 %v7559_v58  ;;  %v7636_v58 = vld [vmem:[%s11965_s5 + $0x4e8] sm:$0xff] }
 0x4a4   : > { %7932 = vmatpush.msrb.mxu0 %v7523_v10 }
 0x4a5   : > { %8071 = vmatpush.msrb.mxu2 %v7618_v3  ;;  %v7615_v3 = vld [vmem:[%s11965_s5 + $0x440] sm:$0xff] }
 0x4a6   : > { %v10688_v35 = vpop.f32.mrf.mxu2  ;;  %7933 = vmatpush.msrb.mxu0 %v7522_v46 }
 0x4a7   : > { %v10699_v6 = vpop.f32.mrf.mxu3  ;;  %v10825_v56 = vpop.f32.mrf.mxu1 }
 0x4ae   : > { %v10744_v5 = vpop.f32.mrf.mxu2 }
 0x4af   : > { %v10755_v30 = vpop.f32.mrf.mxu3 }
 0x4b0   : > { %12053 = vst [vmem:[#allocation26_spill] sm:$0xff] %v10755_v30  ;;  %v6714_v30 = vadd.f32 %v10444_v11, %v6673_v1  ;;  %v7539_v11 = vld [vmem:[%s11965_s5 + $0x1e0] sm:$0xff]  ;;  %v7520_v1 = vld [vmem:[%s11965_s5 + $0x148] sm:$0xff] }
 0x4b1   : > { %7955 = vmatpush.msrb.mxu1 %v7539_v11 }
 0x4b2   : > { %v6755_v17 = vadd.f32 %v10446_v23, %v6714_v30  ;;  %v6717_v23 = vadd.f32 %v10454_v31, %v6676_v36  ;;  %v6638_v30 = vadd.f32 %v10405_v14, %v10389_v2  ;;  %v7617_v31 = vld [vmem:[%s11965_s5 + $0x450] sm:$0xff]  ;;  %v7616_v14 = vld [vmem:[%s11965_s5 + $0x448] sm:$0xff] }
 0x4b3   : > { %7956 = vmatpush.msrb.mxu1 %v7538_v0  ;;  %v7537_v2 = vld [vmem:[%s11965_s5 + $0x1d0] sm:$0xff]  ;;  %8072 = vmatpush.msrb.mxu2 %v7617_v31 }
 0x4b4   : > { %v6796_v51 = vadd.f32 %v10476_v42, %v6755_v17  ;;  %v7638_v42 = vld [vmem:[%s11965_s5 + $0x4f8] sm:$0xff]  ;;  %v7521_v17 = vld [vmem:[%s11965_s5 + $0x150] sm:$0xff]  ;;  %v6758_v36 = vadd.f32 %v10456_v22, %v6717_v23  ;;  %v6679_v46 = vadd.f32 %v10411_v25, %v6638_v30  ;;  %v7519_v22 = vld [vmem:[%s11965_s5 + $0x140] sm:$0xff] }
 0x4b5   : > { %8090 = vmatpush.msrb.mxu3 %v7638_v42  ;;  %7934 = vmatpush.msrb.mxu0 %v7521_v17  ;;  %v7614_v23 = vld [vmem:[%s11965_s5 + $0x438] sm:$0xff]  ;;  %v7635_v25 = vld [vmem:[%s11965_s5 + $0x4e0] sm:$0xff]  ;;  %v7613_v42 = vld [vmem:[%s11965_s5 + $0x430] sm:$0xff]  ;;  %v10873_v17 = vpop.f32.mrf.mxu0 }
 0x4b6   : > { %v10777_v39 = vpop.f32.mrf.mxu2  ;;  %v6837_v10 = vadd.f32 %v10480_v44, %v6796_v51  ;;  %7957 = vmatpush.msrb.mxu1 %v7537_v2  ;;  %8073 = vmatpush.msrb.mxu2 %v7616_v14  ;;  %v7535_v44 = vld [vmem:[%s11965_s5 + $0x1c0] sm:$0xff]  ;;  %v6720_v0 = vadd.f32 %v10462_v55, %v6679_v46  ;;  %v7518_v30 = vld [vmem:[%s11965_s5 + $0x138] sm:$0xff]  ;;  %v6799_v31 = vadd.f32 %v10488_v52, %v6758_v36  ;;  %v7517_v2 = vld [vmem:[%s11965_s5 + $0x130] sm:$0xff]  ;;  %v10908_v46 = vpop.f32.mrf.mxu1 }
 0x4b7   : > { %v10780_v16 = vpop.f32.mrf.mxu3  ;;  %8091 = vmatpush.msrb.mxu3 %v7637_v54  ;;  %7935 = vmatpush.msrb.mxu0 %v7520_v1  ;;  %v7634_v55 = vld [vmem:[%s11965_s5 + $0x4d8] sm:$0xff]  ;;  %v7533_v52 = vld [vmem:[%s11965_s5 + $0x1b0] sm:$0xff]  ;;  %v6641_v14 = vadd.f32 %v10416_v20, %v10400_v27  ;;  %v7612_v1 = vld [vmem:[%s11965_s5 + $0x428] sm:$0xff] }
 0x4b8   : > { %v6878_v51 = vadd.f32 %v10540_v38, %v6837_v10  ;;  %7958 = vmatpush.msrb.mxu1 %v7536_v29  ;;  %8074 = vmatpush.msrb.mxu2 %v7615_v3  ;;  %v7534_v38 = vld [vmem:[%s11965_s5 + $0x1b8] sm:$0xff]  ;;  %v7633_v29 = vld [vmem:[%s11965_s5 + $0x4d0] sm:$0xff]  ;;  %v6761_v36 = vadd.f32 %v10464_v18, %v6720_v0  ;;  %v7516_v27 = vld [vmem:[%s11965_s5 + $0x128] sm:$0xff] }
 0x4b9   : > { %8092 = vmatpush.msrb.mxu3 %v7636_v58  ;;  %7936 = vmatpush.msrb.mxu0 %v7519_v22  ;;  %v7532_v20 = vld [vmem:[%s11965_s5 + $0x1a8] sm:$0xff]  ;;  %v7611_v18 = vld [vmem:[%s11965_s5 + $0x420] sm:$0xff] }
 0x4ba   : > { %7959 = vmatpush.msrb.mxu1 %v7535_v44  ;;  %8075 = vmatpush.msrb.mxu2 %v7614_v23  ;;  %v6919_v54 = vadd.f32 %v10545_v62, %v6878_v51  ;;  %v6840_v62 = vadd.f32 %v10494_v61, %v6799_v31  ;;  %v7632_v58 = vld [vmem:[%s11965_s5 + $0x4c8] sm:$0xff]  ;;  %v7515_v61 = vld [vmem:[%s11965_s5 + $0x120] sm:$0xff]  ;;  %v6682_v44 = vadd.f32 %v10424_v34, %v6641_v14  ;;  %v7514_v34 = vld [vmem:[%s11965_s5 + $0x118] sm:$0xff] }
 0x4bb   : > { %8093 = vmatpush.msrb.mxu3 %v7635_v25  ;;  %7937 = vmatpush.msrb.mxu0 %v7518_v30  ;;  %v7531_v22 = vld [vmem:[%s11965_s5 + $0x1a0] sm:$0xff]  ;;  %v7610_v25 = vld [vmem:[%s11965_s5 + $0x418] sm:$0xff]  ;;  %v6802_v30 = vadd.f32 %v10498_v49, %v6761_v36  ;;  %v7513_v31 = vld [vmem:[%s11965_s5 + $0x110] sm:$0xff] }
 0x4bc   : > { %7960 = vmatpush.msrb.mxu1 %v7534_v38  ;;  %8076 = vmatpush.msrb.mxu2 %v7613_v42  ;;  %v6960_v51 = vadd.f32 %v10783_v21, %v6919_v54  ;;  %v6881_v23 = vadd.f32 %v10581_v63, %v6840_v62  ;;  %v7631_v0 = vld [vmem:[%s11965_s5 + $0x4c0] sm:$0xff]  ;;  %v7530_v63 = vld [vmem:[%s11965_s5 + $0x198] sm:$0xff]  ;;  %v6723_v21 = vadd.f32 %v10472_v47, %v6682_v44  ;;  %v7609_v38 = vld [vmem:[%s11965_s5 + $0x410] sm:$0xff] }
 0x4bd   : > { %8094 = vmatpush.msrb.mxu3 %v7634_v55  ;;  %7938 = vmatpush.msrb.mxu0 %v7517_v2  ;;  %v7630_v49 = vld [vmem:[%s11965_s5 + $0x4b8] sm:$0xff]  ;;  %v7529_v47 = vld [vmem:[%s11965_s5 + $0x190] sm:$0xff]  ;;  %v6644_v42 = vadd.f32 %v10431_v13, %v10409_v33  ;;  %v6965_v54 = vpop.f32.mrf.mxu0  ;;  %v7512_v33 = vld [vmem:[%s11965_s5 + $0x108] sm:$0xff] }
 0x4be   : > { %v10827_v43 = vpop.f32.mrf.mxu2  ;;  %7961 = vmatpush.msrb.mxu1 %v7533_v52  ;;  %8077 = vmatpush.msrb.mxu2 %v7612_v1  ;;  %v6922_v55 = vadd.f32 %v10589_v57, %v6881_v23  ;;  %v7001_v2 = vadd.f32 %v10825_v56, %v6960_v51  ;;  %v7608_v52 = vld [vmem:[%s11965_s5 + $0x408] sm:$0xff]  ;;  %v7629_v14 = vld [vmem:[%s11965_s5 + $0x4b0] sm:$0xff]  ;;  %v6843_v1 = vadd.f32 %v10504_v45, %v6802_v30  ;;  %v7607_v45 = vld [vmem:[%s11965_s5 + $0x400] sm:$0xff] }
 0x4bf   : > { %v10837_v11 = vpop.f32.mrf.mxu3  ;;  %8095 = vmatpush.msrb.mxu3 %v7633_v29  ;;  %7939 = vmatpush.msrb.mxu0 %v7516_v27  ;;  %v7528_v13 = vld [vmem:[%s11965_s5 + $0x188] sm:$0xff]  ;;  %v6764_v57 = vadd.f32 %v10474_v48, %v6723_v21  ;;  %v7511_v48 = vld [vmem:[%s11965_s5 + $0x100] sm:$0xff] }
 0x4c0   : > { %7962 = vmatpush.msrb.mxu1 %v7532_v20  ;;  %8078 = vmatpush.msrb.mxu2 %v7611_v18  ;;  %v7628_v27 = vld [vmem:[%s11965_s5 + $0x4a8] sm:$0xff]  ;;  %v6884_v20 = vadd.f32 %v10632_v12, %v6843_v1  ;;  %v7527_v62 = vld [vmem:[%s11965_s5 + $0x180] sm:$0xff]  ;;  %v6685_v18 = vadd.f32 %v10436_v15, %v6644_v42  ;;  %v7626_v15 = vld [vmem:[%s11965_s5 + $0x498] sm:$0xff] }
 0x4c1   : > { %8096 = vmatpush.msrb.mxu3 %v7632_v58  ;;  %7940 = vmatpush.msrb.mxu0 %v7515_v61  ;;  %v6963_v58 = vadd.f32 %v10873_v17, %v6922_v55  ;;  %v7627_v12 = vld [vmem:[%s11965_s5 + $0x4a0] sm:$0xff]  ;;  %v6805_v44 = vadd.f32 %v10512_v19, %v6764_v57  ;;  %v6647_v17 = vadd.f32 %v10442_v53, %v10420_v4 }
 0x4c2   : > { %7963 = vmatpush.msrb.mxu1 %v7531_v22  ;;  %8079 = vmatpush.msrb.mxu2 %v7610_v25  ;;  %v7006_v22 = vpop.f32.mrf.mxu1  ;;  %v6726_v51 = vadd.f32 %v10482_v59, %v6685_v18  ;;  %v6925_v25 = vadd.f32 %v10643_v9, %v6884_v20  ;;  %v7625_v59 = vld [vmem:[%s11965_s5 + $0x490] sm:$0xff]  ;;  %v12058_v18 = vld [vmem:[#allocation34_spill] sm:$0xff] }
 0x4c3   : > { %8097 = vmatpush.msrb.mxu3 %v7631_v0  ;;  %7941 = vmatpush.msrb.mxu0 %v7514_v34  ;;  %v7004_v19 = vadd.f32 %v10908_v46, %v6963_v58  ;;  %v6846_v4 = vadd.f32 %v10523_v60, %v6805_v44  ;;  %v6688_v46 = vadd.f32 %v10448_v8, %v6647_v17  ;;  %v7590_v44 = vld [vmem:[%s11965_s5 + $0x378] sm:$0xff] }
 0x4c4   : > { %7964 = vmatpush.msrb.mxu1 %v7530_v63  ;;  %8080 = vmatpush.msrb.mxu2 %v7609_v38  ;;  %v6767_v38 = vadd.f32 %v10484_v24, %v6726_v51  ;;  %v7623_v24 = vld [vmem:[%s11965_s5 + $0x480] sm:$0xff]  ;;  %v6650_v8 = vadd.f32 %v10452_v50, %v10429_v26 }
 0x4c5   : > { %8098 = vmatpush.msrb.mxu3 %v7630_v49  ;;  %7942 = vmatpush.msrb.mxu0 %v7513_v31  ;;  %v7624_v49 = vld [vmem:[%s11965_s5 + $0x488] sm:$0xff]  ;;  %v6968_v31 = vpop.f32.mrf.mxu0  ;;  %v6887_v42 = vadd.f32 %v10688_v35, %v6846_v4 }
 0x4c6   : > { %v10891_v10 = vpop.f32.mrf.mxu2  ;;  %7965 = vmatpush.msrb.mxu1 %v7529_v47  ;;  %8081 = vmatpush.msrb.mxu2 %v7608_v52  ;;  %v6966_v47 = vadd.f32 %v6965_v54, %v6925_v25  ;;  %v6808_v60 = vadd.f32 %v10550_v28, %v6767_v38  ;;  %v6691_v26 = vadd.f32 %v10458_v7, %v6650_v8  ;;  %v7686_v7 = vld [vmem:[%s11965_s5 + $0x678] sm:$0xff]  ;;  %v7589_v38 = vld [vmem:[%s11965_s5 + $0x370] sm:$0xff] }
 0x4c7   : > { %v10900_v3 = vpop.f32.mrf.mxu3  ;;  %8099 = vmatpush.msrb.mxu3 %v7629_v14  ;;  %7943 = vmatpush.msrb.mxu0 %v7512_v33  ;;  %v6928_v35 = vadd.f32 %v10699_v6, %v6887_v42 }
 0x4c8   : > { %7966 = vmatpush.msrb.mxu1 %v7528_v13  ;;  %8082 = vmatpush.msrb.mxu2 %v7607_v45  ;;  %v7007_v54 = vadd.f32 %v7006_v22, %v6966_v47  ;;  %v6849_v33 = vadd.f32 %v10579_v41, %v6808_v60  ;;  %v12057_v41 = vld [vmem:[#allocation33_spill] sm:$0xff]  ;;  %v7683_v60 = vld [vmem:[%s11965_s5 + $0x660] sm:$0xff] }
 0x4c9   : > { %8100 = vmatpush.msrb.mxu3 %v7628_v27  ;;  %7944 = vmatpush.msrb.mxu0 %v7511_v48  ;;  %v6969_v50 = vadd.f32 %v6968_v31, %v6928_v35  ;;  %v12055_v27 = vld [vmem:[#allocation36_spill] sm:$0xff]  ;;  %v6653_v58 = vadd.f32 %v12058_v18, %v12057_v41  ;;  %v7702_v41 = vld [vmem:[%s11965_s5 + $0x6f8] sm:$0xff] }
 0x4ca   : > { %7967 = vmatpush.msrb.mxu1 %v7527_v62  ;;  %v7009_v14 = vpop.f32.mrf.mxu1  ;;  %v6890_v6 = vadd.f32 %v10744_v5, %v6849_v33  ;;  %v6732_v20 = vadd.f32 %v12055_v27, %v6691_v26  ;;  %v12056_v48 = vld [vmem:[#allocation40_spill] sm:$0xff]  ;;  %v12059_v5 = vld [vmem:[#allocation26_spill] sm:$0xff] }
 0x4cb   : > { %8101 = vmatpush.msrb.mxu3 %v7627_v12  ;;  %v7010_v22 = vadd.f32 %v7009_v14, %v6969_v50  ;;  %v7684_v31 = vld [vmem:[%s11965_s5 + $0x668] sm:$0xff]  ;;  %v12064_v14 = vld [vmem:[#allocation38_spill] sm:$0xff] }
 0x4cc   : > { %v7603_v33 = vld [vmem:[%s11965_s5 + $0x3e0] sm:$0xff]  ;;  %v7586_v50 = vld [vmem:[%s11965_s5 + $0x358] sm:$0xff] }
 0x4cd   : > { %8102 = vmatpush.msrb.mxu3 %v7626_v15  ;;  %v6971_v45 = vpop.f32.mrf.mxu0  ;;  %v12060_v15 = vld [vmem:[#allocation37_spill] sm:$0xff] }
 0x4ce   : > { %v7041_v29 = vpop.f32.mrf.mxu2  ;;  %v6773_v17 = vadd.f32 %v12060_v15, %v6732_v20 }
 0x4cf   : > { %v7042_v56 = vadd.f32 %v7041_v29, %v7001_v2  ;;  %v7082_v36 = vpop.f32.mrf.mxu3  ;;  %8103 = vmatpush.msrb.mxu3 %v7625_v59  ;;  %v6729_v2 = vadd.f32 %v10490_v40, %v6688_v46 }
 0x4d1   : > { %v7083_v61 = vadd.f32 %v7082_v36, %v7042_v56  ;;  %8104 = vmatpush.msrb.mxu3 %v7624_v49  ;;  %v6770_v40 = vadd.f32 %v10492_v32, %v6729_v2 }
 0x4d3   : > { %v7106_v23 = vmax.f32 %v7083_v61, 0.0  ;;  %8105 = vmatpush.msrb.mxu3 %v7623_v24  ;;  %v6811_v32 = vadd.f32 %v12056_v48, %v6770_v40  ;;  %v6931_v61 = vadd.f32 %v12059_v5, %v6890_v6  ;;  %v7588_v24 = vld [vmem:[%s11965_s5 + $0x368] sm:$0xff] }
 0x4d4   : > { %v12065_v6 = vld [vmem:[#allocation39_spill] sm:$0xff] }
 0x4d5   : > { %7130 = vst [vmem:[#allocation5 + $0xb0] sm:$0xf] %v7106_v23  ;;  %v7132_v0 = vrot.slane %v7106_v23, 1  ;;  %v7135_v30 = vrot.slane %v7106_v23, 2  ;;  %v7138_v34 = vrot.slane %v7106_v23, 3  ;;  %v7141_v63 = vrot.slane %v7106_v23, 4  ;;  %v7012_v23 = vpop.f32.mrf.mxu1 }
 0x4d6   : > { %v7044_v21 = vpop.f32.mrf.mxu2  ;;  %v6972_v46 = vadd.f32 %v6971_v45, %v6931_v61 }
 0x4d7   : > { %7134 = vst [vmem:[#allocation5 + $0xc0] sm:$0xf] %v7132_v0  ;;  %v7045_v53 = vadd.f32 %v7044_v21, %v7004_v19  ;;  %v7085_v9 = vpop.f32.mrf.mxu3  ;;  %v7606_v21 = vld [vmem:[%s11965_s5 + $0x3f8] sm:$0xff] }
 0x4d8   : > { %7137 = vst [vmem:[#allocation5 + $0x88] sm:$0xf] %v7135_v30  ;;  %v7685_v30 = vld [vmem:[%s11965_s5 + $0x670] sm:$0xff] }
 0x4d9   : > { %7140 = vst [vmem:[#allocation5 + $0x108] sm:$0xf] %v7138_v34  ;;  %v7086_v55 = vadd.f32 %v7085_v9, %v7045_v53  ;;  %v12061_v34 = vld [vmem:[#allocation23_spill] sm:$0xff] }
 0x4da   : > { %7143 = vst [vmem:[#allocation5 + $0x28] sm:$0xf] %v7141_v63  ;;  %v6852_v19 = vadd.f32 %v12061_v34, %v6811_v32  ;;  %v12062_v53 = vld [vmem:[#allocation35_spill] sm:$0xff]  ;;  %v7602_v32 = vld [vmem:[%s11965_s5 + $0x3d8] sm:$0xff] }
 0x4db   : > { %v11005_v52 = vmax.f32 %v7086_v55, 0.0  ;;  %v6694_v9 = vadd.f32 %v12062_v53, %v6653_v58  ;;  %v7605_v55 = vld [vmem:[%s11965_s5 + $0x3f0] sm:$0xff]  ;;  %v7678_v34 = vld [vmem:[%s11965_s5 + $0x638] sm:$0xff] }
 0x4dc   : > { %v6893_v47 = vadd.f32 %v10777_v39, %v6852_v19  ;;  %v12063_v39 = vld [vmem:[#allocation24_spill] sm:$0xff] }
 0x4dd   : > { %7145 = vst [vmem:[#allocation5 + $0x90] sm:$0xf] %v11005_v52  ;;  %v7156_v1 = vrot.slane %v11005_v52, 4  ;;  %v7209_v29 = vrot.slane %v11005_v52, 5  ;;  %v7153_v36 = vrot.slane %v11005_v52, 3  ;;  %v6814_v2 = vadd.f32 %v12063_v39, %v6773_v17  ;;  %v7015_v18 = vpop.f32.mrf.mxu1  ;;  %v7585_v58 = vld [vmem:[%s11965_s5 + $0x350] sm:$0xff] }
 0x4de   : > { %7218 = vst [vmem:[#allocation5 + $0x28] sm:$0xf0] %v11005_v52  ;;  %v7047_v28 = vpop.f32.mrf.mxu2  ;;  %v6735_v8 = vadd.f32 %v12064_v14, %v6694_v9  ;;  %v6934_v40 = vadd.f32 %v10780_v16, %v6893_v47  ;;  %v7681_v16 = vld [vmem:[%s11965_s5 + $0x650] sm:$0xff]  ;;  %v7598_v47 = vld [vmem:[%s11965_s5 + $0x3b8] sm:$0xff] }
 0x4df   : > { %v7048_v13 = vadd.f32 %v7047_v28, %v7007_v54  ;;  %v7088_v57 = vpop.f32.mrf.mxu3  ;;  %7208 = vst [vmem:[#allocation5 + $0xb0] sm:$0xf0] %v7156_v1  ;;  %v7604_v54 = vld [vmem:[%s11965_s5 + $0x3e8] sm:$0xff]  ;;  %v7682_v28 = vld [vmem:[%s11965_s5 + $0x658] sm:$0xff] }
 0x4e0   : > { %7158 = vst [vmem:[#allocation5 + $0x180] sm:$0xf] %v7156_v1  ;;  %v7587_v1 = vld [vmem:[%s11965_s5 + $0x360] sm:$0xff] }
 0x4e1   : > { %v7089_v56 = vadd.f32 %v7088_v57, %v7048_v13  ;;  %7211 = vst [vmem:[#allocation5 + $0xc0] sm:$0xf0] %v7209_v29  ;;  %v6974_v29 = vpop.f32.mrf.mxu0  ;;  %v7013_v13 = vadd.f32 %v7012_v23, %v6972_v46  ;;  %v12067_v23 = vld [vmem:[#allocation27_spill] sm:$0xff]  ;;  %v7582_v46 = vld [vmem:[%s11965_s5 + $0x338] sm:$0xff] }
 0x4e2   : > { %7155 = vst [vmem:[#allocation5 + $0xc8] sm:$0xf] %v7153_v36  ;;  %v12066_v36 = vld [vmem:[#allocation25_spill] sm:$0xff]  ;;  %v6975_v5 = vadd.f32 %v6974_v29, %v6934_v40  ;;  %v7580_v40 = vld [vmem:[%s11965_s5 + $0x328] sm:$0xff] }
 0x4e3   : > { %v11021_v62 = vmax.f32 %v7089_v56, 0.0  ;;  %v6776_v56 = vadd.f32 %v12065_v6, %v6735_v8  ;;  %v6855_v45 = vadd.f32 %v12066_v36, %v6814_v2  ;;  %v7581_v8 = vld [vmem:[%s11965_s5 + $0x330] sm:$0xff]  ;;  %v7595_v6 = vld [vmem:[%s11965_s5 + $0x3a0] sm:$0xff] }
 0x4e4   : > { %v7697_v29 = vld [vmem:[%s11965_s5 + $0x6d0] sm:$0xff] }
 0x4e5   : > { %7160 = vst [vmem:[#allocation5 + $0xb8] sm:$0xf] %v11021_v62  ;;  %v7433_v12 = vld [vmem:[#allocation5 + $0x28] sm:$0xff]  ;;  %v7171_v51 = vrot.slane %v11021_v62, 4  ;;  %v7162_v4 = vrot.slane %v11021_v62, 1  ;;  %v6896_v61 = vadd.f32 %v10827_v43, %v6855_v45  ;;  %v7679_v43 = vld [vmem:[%s11965_s5 + $0x640] sm:$0xff]  ;;  %v6817_v15 = vadd.f32 %v12067_v23, %v6776_v56 }
 0x4e6   : > { %7233 = vst [vmem:[#allocation5 + $0x180] sm:$0xf0] %v11021_v62  ;;  %7991 = vmatmul.f32.vlgmr.msra.gmra.mxu2 %v7433_v12  ;;  %v7050_v25 = vpop.f32.mrf.mxu2  ;;  %v7429_v0 = vld [vmem:[#allocation5 + $0xb0] sm:$0xff] }
 0x4e7   : > { %7280 = vst [vmem:[#allocation5 + $0xe0] sm:$0xf] %v11021_v62  ;;  %8159 = vmatpush.msra.mxu2 %v7686_v7  ;;  %v7051_v59 = vadd.f32 %v7050_v25, %v7010_v22  ;;  %v7091_v63 = vpop.f32.mrf.mxu3  ;;  %7899 = vmatmul.f32.vlgmr.msra.gmra.mxu0 %v7429_v0  ;;  %v7680_v7 = vld [vmem:[%s11965_s5 + $0x648] sm:$0xff]  ;;  %v7601_v22 = vld [vmem:[%s11965_s5 + $0x3d0] sm:$0xff]  ;;  %v6937_v19 = vadd.f32 %v10837_v11, %v6896_v61  ;;  %v7699_v11 = vld [vmem:[%s11965_s5 + $0x6e0] sm:$0xff] }
 0x4e8   : > { %v7430_v49 = vld [vmem:[#allocation5 + $0xc0] sm:$0xff]  ;;  %8021 = vmatpush.msra.mxu0 %v7590_v44  ;;  %7223 = vst [vmem:[#allocation5 + $0x90] sm:$0xf0] %v7171_v51  ;;  %v7701_v44 = vld [vmem:[%s11965_s5 + $0x6f0] sm:$0xff]  ;;  %v7600_v25 = vld [vmem:[%s11965_s5 + $0x3c8] sm:$0xff]  ;;  %v6858_v53 = vadd.f32 %v10773_v37, %v6817_v15 }
 0x4e9   : > { %v7092_v42 = vadd.f32 %v7091_v63, %v7051_v59  ;;  %7922 = vmatmul.f32.vlgmr.msra.gmra.mxu1 %v7430_v49  ;;  %8160 = vmatpush.msra.mxu2 %v7685_v30  ;;  %7173 = vst [vmem:[#allocation5 + $0xd8] sm:$0xf] %v7171_v51  ;;  %v7700_v0 = vld [vmem:[%s11965_s5 + $0x6e8] sm:$0xff]  ;;  %v7583_v30 = vld [vmem:[%s11965_s5 + $0x340] sm:$0xff]  ;;  %v7016_v63 = vadd.f32 %v7015_v18, %v6975_v5  ;;  %v7673_v61 = vld [vmem:[%s11965_s5 + $0x610] sm:$0xff] }
 0x4ea   : > { %8044 = vmatpush.msra.mxu1 %v7606_v21  ;;  %8022 = vmatpush.msra.mxu0 %v7589_v38  ;;  %7293 = vst [vmem:[#allocation5 + $0x100] sm:$0xf] %v7171_v51  ;;  %v7584_v51 = vld [vmem:[%s11965_s5 + $0x348] sm:$0xff]  ;;  %v7599_v59 = vld [vmem:[%s11965_s5 + $0x3c0] sm:$0xff]  ;;  %v6977_v38 = vpop.f32.mrf.mxu0  ;;  %v6899_v2 = vadd.f32 %v10891_v10, %v6858_v53 }
 0x4eb   : > { %v11064_v35 = vmax.f32 %v7092_v42, 0.0  ;;  %8161 = vmatpush.msra.mxu2 %v7684_v31  ;;  %7284 = vst [vmem:[#allocation5 + $0x10] sm:$0xf] %v7162_v4  ;;  %v7230_v42 = vrot.slane %v11021_v62, 7  ;;  %v6978_v39 = vadd.f32 %v6977_v38, %v6937_v19  ;;  %v7676_v10 = vld [vmem:[%s11965_s5 + $0x628] sm:$0xff]  ;;  %v7575_v53 = vld [vmem:[%s11965_s5 + $0x300] sm:$0xff] }
 0x4ec   : > { %8045 = vmatpush.msra.mxu1 %v7605_v55  ;;  %8023 = vmatpush.msra.mxu0 %v7588_v24  ;;  %7164 = vst [vmem:[#allocation5] sm:$0xf] %v7162_v4  ;;  %v7677_v55 = vld [vmem:[%s11965_s5 + $0x630] sm:$0xff]  ;;  %v7698_v24 = vld [vmem:[%s11965_s5 + $0x6d8] sm:$0xff]  ;;  %v7672_v15 = vld [vmem:[%s11965_s5 + $0x608] sm:$0xff] }
 0x4ed   : > { %7175 = vst [vmem:[#allocation5 + $0x70] sm:$0xf] %v11064_v35  ;;  %8162 = vmatpush.msra.mxu2 %v7683_v60  ;;  %v7186_v57 = vrot.slane %v11064_v35, 4  ;;  %v7239_v21 = vrot.slane %v11064_v35, 5  ;;  %v7212_v60 = vrot.slane %v11005_v52, 6 }
 0x4ee   : > { %7248 = vst [vmem:[#allocation5 + $0xd8] sm:$0xf0] %v11064_v35  ;;  %8046 = vmatpush.msra.mxu1 %v7604_v54  ;;  %8024 = vmatpush.msra.mxu0 %v7587_v1  ;;  %v7053_v26 = vpop.f32.mrf.mxu2  ;;  %v7597_v54 = vld [vmem:[%s11965_s5 + $0x3b0] sm:$0xff]  ;;  %v7018_v1 = vpop.f32.mrf.mxu1 }
 0x4ef   : > { %7295 = vst [vmem:[#allocation5 + $0x60] sm:$0xf] %v11064_v35  ;;  %8163 = vmatpush.msra.mxu2 %v7682_v28  ;;  %v7054_v27 = vadd.f32 %v7053_v26, %v7013_v13  ;;  %v7094_v20 = vpop.f32.mrf.mxu3  ;;  %v7434_v48 = vld [vmem:[#allocation5 + $0x90] sm:$0xff]  ;;  %v7675_v13 = vld [vmem:[%s11965_s5 + $0x620] sm:$0xff]  ;;  %v7215_v26 = vrot.slane %v11005_v52, 7  ;;  %v7019_v56 = vadd.f32 %v7018_v1, %v6978_v39  ;;  %v7670_v39 = vld [vmem:[%s11965_s5 + $0x5f8] sm:$0xff] }
 0x4f0   : > { %7368 = vst [vmem:[#allocation5 + $0x100] sm:$0xf0] %v11064_v35  ;;  %8047 = vmatpush.msra.mxu1 %v7603_v33  ;;  %8014 = vmatmul.f32.vlgmr.msra.gmra.mxu3 %v7434_v48  ;;  %v7596_v33 = vld [vmem:[%s11965_s5 + $0x3a8] sm:$0xff]  ;;  %v7669_v1 = vld [vmem:[%s11965_s5 + $0x5f0] sm:$0xff] }
 0x4f1   : > { %v7095_v12 = vadd.f32 %v7094_v20, %v7054_v27  ;;  %8025 = vmatpush.msra.mxu0 %v7586_v50  ;;  %8164 = vmatpush.msra.mxu2 %v7681_v16  ;;  %7358 = vst [vmem:[#allocation5 + $0xe0] sm:$0xf0] %v7186_v57  ;;  %v6940_v50 = vadd.f32 %v10900_v3, %v6899_v2  ;;  %v7579_v16 = vld [vmem:[%s11965_s5 + $0x320] sm:$0xff]  ;;  %v7674_v3 = vld [vmem:[%s11965_s5 + $0x618] sm:$0xff]  ;;  %v7749_v2 = vld [vmem:[%s11965_s5 + $0x870] sm:$0xff] }
 0x4f2   : > { %8048 = vmatpush.msra.mxu1 %v7602_v32  ;;  %8182 = vmatpush.msra.mxu3 %v7702_v41  ;;  %7188 = vst [vmem:[#allocation5 + $0x20] sm:$0xf] %v7186_v57  ;;  %v7695_v27 = vld [vmem:[%s11965_s5 + $0x6c0] sm:$0xff]  ;;  %v7578_v32 = vld [vmem:[%s11965_s5 + $0x318] sm:$0xff]  ;;  %v6980_v41 = vpop.f32.mrf.mxu0 }
 0x4f3   : > { %v11118_v17 = vmax.f32 %v7095_v12, 0.0  ;;  %8026 = vmatpush.msra.mxu0 %v7585_v58  ;;  %8165 = vmatpush.msra.mxu2 %v7680_v7  ;;  %7238 = vst [vmem:[#allocation5 + $0xb8] sm:$0xf0] %v7186_v57  ;;  %v7594_v58 = vld [vmem:[%s11965_s5 + $0x398] sm:$0xff]  ;;  %v6981_v7 = vadd.f32 %v6980_v41, %v6940_v50 }
 0x4f4   : > { %8049 = vmatpush.msra.mxu1 %v7601_v22  ;;  %8183 = vmatpush.msra.mxu3 %v7701_v44  ;;  %7308 = vst [vmem:[#allocation5 + $0x80] sm:$0xf] %v7186_v57  ;;  %v7696_v57 = vld [vmem:[%s11965_s5 + $0x6c8] sm:$0xff]  ;;  %v7694_v12 = vld [vmem:[%s11965_s5 + $0x6b8] sm:$0xff]  ;;  %v7577_v44 = vld [vmem:[%s11965_s5 + $0x310] sm:$0xff] }
 0x4f5   : > { %7190 = vst [vmem:[#allocation5 + $0xa8] sm:$0xf] %v11118_v17  ;;  %8027 = vmatpush.msra.mxu0 %v7584_v51  ;;  %8166 = vmatpush.msra.mxu2 %v7679_v43  ;;  %v7201_v36 = vrot.slane %v11118_v17, 4  ;;  %v7593_v51 = vld [vmem:[%s11965_s5 + $0x390] sm:$0xff]  ;;  %v7260_v19 = vrot.slane %v11118_v17, 7 }
 0x4f6   : > { %7263 = vst [vmem:[#allocation5 + $0x20] sm:$0xf0] %v11118_v17  ;;  %8050 = vmatpush.msra.mxu1 %v7600_v25  ;;  %8184 = vmatpush.msra.mxu3 %v7700_v0  ;;  %v7056_v4 = vpop.f32.mrf.mxu2  ;;  %v7183_v25 = vrot.slane %v11064_v35, 3  ;;  %v7021_v0 = vpop.f32.mrf.mxu1 }
 0x4f7   : > { %7310 = vst [vmem:[#allocation5 + $0xa0] sm:$0xf] %v11118_v17  ;;  %v7458_v9 = vld [vmem:[#allocation5 + $0x100] sm:$0xff]  ;;  %8028 = vmatpush.msra.mxu0 %v7583_v30  ;;  %8167 = vmatpush.msra.mxu2 %v7678_v34  ;;  %v7057_v49 = vadd.f32 %v7056_v4, %v7016_v63  ;;  %v7097_v31 = vpop.f32.mrf.mxu3  ;;  %v7693_v30 = vld [vmem:[%s11965_s5 + $0x6b0] sm:$0xff]  ;;  %v7576_v34 = vld [vmem:[%s11965_s5 + $0x308] sm:$0xff] }
 0x4f8   : > { %7383 = vst [vmem:[#allocation5 + $0x80] sm:$0xf0] %v11118_v17  ;;  %7994 = vmatmul.f32.gmra.mxu2 %v7458_v9  ;;  %8051 = vmatpush.msra.mxu1 %v7599_v59  ;;  %v7454_v37 = vld [vmem:[#allocation5 + $0xe0] sm:$0xff]  ;;  %v7592_v59 = vld [vmem:[%s11965_s5 + $0x388] sm:$0xff]  ;;  %v7750_v4 = vld [vmem:[%s11965_s5 + $0x878] sm:$0xff] }
 0x4f9   : > { %8185 = vmatpush.msra.mxu3 %v7699_v11  ;;  %v7098_v14 = vadd.f32 %v7097_v31, %v7057_v49  ;;  %7902 = vmatmul.f32.gmra.mxu0 %v7454_v37  ;;  %7361 = vst [vmem:[#allocation5 + $0x10] sm:$0xf0] %v7239_v21  ;;  %v7671_v63 = vld [vmem:[%s11965_s5 + $0x600] sm:$0xff]  ;;  %v7692_v11 = vld [vmem:[%s11965_s5 + $0x6a8] sm:$0xff]  ;;  %v7165_v49 = vrot.slane %v11021_v62, 2  ;;  %v7242_v37 = vrot.slane %v11064_v35, 6 }
 0x4fa   : > { %7241 = vst [vmem:[#allocation5] sm:$0xf0] %v7239_v21  ;;  %8029 = vmatpush.msra.mxu0 %v7582_v46  ;;  %8052 = vmatpush.msra.mxu1 %v7598_v47  ;;  %v7022_v21 = vadd.f32 %v7021_v0, %v6981_v7  ;;  %v7591_v47 = vld [vmem:[%s11965_s5 + $0x380] sm:$0xff]  ;;  %v7745_v7 = vld [vmem:[%s11965_s5 + $0x850] sm:$0xff]  ;;  %v7648_v0 = vld [vmem:[%s11965_s5 + $0x548] sm:$0xff] }
 0x4fb   : > { %v11172_v28 = vmax.f32 %v7098_v14, 0.0  ;;  %8168 = vmatpush.msra.mxu2 %v7677_v55  ;;  %8186 = vmatpush.msra.mxu3 %v7698_v24  ;;  %7232 = vst [vmem:[#allocation5 + $0xc8] sm:$0xf0] %v7230_v42  ;;  %v7691_v55 = vld [vmem:[%s11965_s5 + $0x6a0] sm:$0xff] }
 0x4fc   : > { %8030 = vmatpush.msra.mxu0 %v7581_v8  ;;  %8053 = vmatpush.msra.mxu1 %v7597_v54  ;;  %7214 = vst [vmem:[#allocation5 + $0x88] sm:$0xf0] %v7212_v60  ;;  %v7654_v60 = vld [vmem:[%s11965_s5 + $0x578] sm:$0xff]  ;;  %v7653_v54 = vld [vmem:[%s11965_s5 + $0x570] sm:$0xff] }
 0x4fd   : > { %7278 = vst [vmem:[#allocation5 + $0xf0] sm:$0xf0] %v11172_v28  ;;  %8169 = vmatpush.msra.mxu2 %v7676_v10  ;;  %8187 = vmatpush.msra.mxu3 %v7697_v29  ;;  %v7690_v8 = vld [vmem:[%s11965_s5 + $0x698] sm:$0xff]  ;;  %v7748_v10 = vld [vmem:[%s11965_s5 + $0x868] sm:$0xff] }
 0x4fe   : > { %7325 = vst [vmem:[#allocation5 + $0xf8] sm:$0xf] %v11172_v28  ;;  %8031 = vmatpush.msra.mxu0 %v7580_v40  ;;  %8054 = vmatpush.msra.mxu1 %v7596_v33  ;;  %v7059_v45 = vpop.f32.mrf.mxu2 }
 0x4ff   : > { %7398 = vst [vmem:[#allocation5 + $0x160] sm:$0xf0] %v11172_v28  ;;  %8170 = vmatpush.msra.mxu2 %v7675_v13  ;;  %8188 = vmatpush.msra.mxu3 %v7696_v57  ;;  %v7060_v20 = vadd.f32 %v7059_v45, %v7019_v56  ;;  %v7100_v48 = vpop.f32.mrf.mxu3  ;;  %v7689_v13 = vld [vmem:[%s11965_s5 + $0x690] sm:$0xff]  ;;  %v7168_v56 = vrot.slane %v11021_v62, 3  ;;  %v7651_v45 = vld [vmem:[%s11965_s5 + $0x560] sm:$0xff] }
 0x500   : > { %v7455_v18 = vld [vmem:[#allocation5 + $0x10] sm:$0xff]  ;;  %8032 = vmatpush.msra.mxu0 %v7579_v16  ;;  %8055 = vmatpush.msra.mxu1 %v7595_v6  ;;  %7217 = vst [vmem:[#allocation5 + $0x108] sm:$0xf0] %v7215_v26  ;;  %v7652_v26 = vld [vmem:[%s11965_s5 + $0x568] sm:$0xff]  ;;  %v7747_v6 = vld [vmem:[%s11965_s5 + $0x860] sm:$0xff] }
 0x501   : > { %7925 = vmatmul.f32.gmra.mxu1 %v7455_v18  ;;  %8171 = vmatpush.msra.mxu2 %v7674_v3  ;;  %v7101_v5 = vadd.f32 %v7100_v48, %v7060_v20  ;;  %7373 = vst [vmem:[#allocation5 + $0x60] sm:$0xf0] %v7201_v36  ;;  %v7668_v16 = vld [vmem:[%s11965_s5 + $0x5e8] sm:$0xff]  ;;  %v7667_v20 = vld [vmem:[%s11965_s5 + $0x5e0] sm:$0xff]  ;;  %v7746_v48 = vld [vmem:[%s11965_s5 + $0x858] sm:$0xff] }
 0x502   : > { %v7437_v22 = vld [vmem:[#allocation5 + $0xc8] sm:$0xff]  ;;  %8189 = vmatpush.msra.mxu3 %v7695_v27  ;;  %7203 = vst [vmem:[#allocation5 + $0xf0] sm:$0xf] %v7201_v36  ;;  %8033 = vmatpush.msra.mxu0 %v7578_v32  ;;  %v7245_v27 = vrot.slane %v11064_v35, 7  ;;  %v7687_v32 = vld [vmem:[%s11965_s5 + $0x680] sm:$0xff]  ;;  %v7650_v18 = vld [vmem:[%s11965_s5 + $0x558] sm:$0xff] }
 0x503   : > { %8083 = vmatmul.f32.vlgmr.msrb.gmra.mxu2 %v7437_v22  ;;  %v11222_v43 = vmax.f32 %v7101_v5, 0.0  ;;  %v7431_v23 = vld [vmem:[#allocation5 + $0x88] sm:$0xff]  ;;  %7253 = vst [vmem:[#allocation5 + $0x70] sm:$0xf0] %v7201_v36  ;;  %8056 = vmatpush.msra.mxu1 %v7594_v58  ;;  %v7666_v58 = vld [vmem:[%s11965_s5 + $0x5d8] sm:$0xff]  ;;  %v7649_v22 = vld [vmem:[%s11965_s5 + $0x550] sm:$0xff] }
 0x504   : > { %7945 = vmatmul.f32.vlgmr.msrb.gmra.mxu0 %v7431_v23  ;;  %7323 = vst [vmem:[#allocation5 + $0x160] sm:$0xf] %v7201_v36  ;;  %8172 = vmatpush.msra.mxu2 %v7673_v61  ;;  %v7438_v36 = vld [vmem:[#allocation5 + $0x180] sm:$0xff]  ;;  %v7688_v3 = vld [vmem:[%s11965_s5 + $0x688] sm:$0xff]  ;;  %v7766_v5 = vld [vmem:[%s11965_s5 + $0x8f8] sm:$0xff]  ;;  %v7147_v61 = vrot.slane %v11005_v52, 1 }
 0x505   : > { %7340 = vst [vmem:[#allocation5 + $0x30] sm:$0xf] %v11222_v43  ;;  %8190 = vmatpush.msra.mxu3 %v7694_v12  ;;  %8034 = vmatpush.msra.mxu0 %v7577_v44  ;;  %v7224_v12 = vrot.slane %v11021_v62, 5  ;;  %v7665_v44 = vld [vmem:[%s11965_s5 + $0x5d0] sm:$0xff]  ;;  %v7744_v23 = vld [vmem:[%s11965_s5 + $0x848] sm:$0xff] }
 0x506   : > { %7413 = vst [vmem:[#allocation5 + $0x98] sm:$0xf0] %v11222_v43  ;;  %8057 = vmatpush.msra.mxu1 %v7593_v51  ;;  %8173 = vmatpush.msra.mxu2 %v7672_v15  ;;  %v7062_v38 = vpop.f32.mrf.mxu2  ;;  %v7150_v51 = vrot.slane %v11005_v52, 2  ;;  %v7227_v15 = vrot.slane %v11021_v62, 6  ;;  %v7664_v52 = vld [vmem:[%s11965_s5 + $0x5c8] sm:$0xff]  ;;  %v7743_v62 = vld [vmem:[%s11965_s5 + $0x840] sm:$0xff] }
 0x507   : > { %8191 = vmatpush.msra.mxu3 %v7693_v30  ;;  %8035 = vmatpush.msra.mxu0 %v7576_v34  ;;  %7305 = vst [vmem:[#allocation5 + $0x110] sm:$0xf] %v7183_v25  ;;  %v7063_v9 = vadd.f32 %v7062_v38, %v7022_v21  ;;  %v7432_v31 = vld [vmem:[#allocation5 + $0x108] sm:$0xff]  ;;  %v7103_v42 = vpop.f32.mrf.mxu3  ;;  %v7463_v30 = vld [vmem:[#allocation5 + $0x80] sm:$0xff]  ;;  %v7195_v34 = vrot.slane %v11118_v17, 2 }
 0x508   : > { %v7459_v46 = vld [vmem:[#allocation5 + $0x60] sm:$0xff]  ;;  %8058 = vmatpush.msra.mxu1 %v7592_v59  ;;  %8174 = vmatpush.msra.mxu2 %v7671_v63  ;;  %7382 = vst [vmem:[#allocation5 + $0x110] sm:$0xf0] %v7260_v19  ;;  %v7272_v59 = vrot.slane %v11172_v28, 6 }
 0x509   : > { %7968 = vmatmul.f32.vlgmr.msrb.gmra.mxu1 %v7432_v31  ;;  %8017 = vmatmul.f32.gmra.mxu3 %v7459_v46  ;;  %7185 = vst [vmem:[#allocation5 + $0x140] sm:$0xf] %v7183_v25  ;;  %v7104_v24 = vadd.f32 %v7103_v42, %v7063_v9  ;;  %v7765_v25 = vld [vmem:[%s11965_s5 + $0x8f0] sm:$0xff]  ;;  %v7647_v21 = vld [vmem:[%s11965_s5 + $0x540] sm:$0xff]  ;;  %v7646_v9 = vld [vmem:[%s11965_s5 + $0x538] sm:$0xff] }
 0x50a   : > { %8192 = vmatpush.msra.mxu3 %v7692_v11  ;;  %8251 = vmatpush.msrb.mxu2 %v7750_v4  ;;  %7262 = vst [vmem:[#allocation5 + $0x140] sm:$0xf0] %v7260_v19  ;;  %v7764_v19 = vld [vmem:[%s11965_s5 + $0x8e8] sm:$0xff]  ;;  %v7663_v38 = vld [vmem:[%s11965_s5 + $0x5c0] sm:$0xff]  ;;  %v7742_v11 = vld [vmem:[%s11965_s5 + $0x838] sm:$0xff] }
 0x50b   : > { %8036 = vmatpush.msra.mxu0 %v7575_v53  ;;  %8059 = vmatpush.msra.mxu1 %v7591_v47  ;;  %v7113_v14 = vmax.f32 %v7104_v24, 0.0  ;;  %7287 = vst [vmem:[#allocation5 + $0xd0] sm:$0xf] %v7165_v49  ;;  %v7763_v53 = vld [vmem:[%s11965_s5 + $0x8e0] sm:$0xff]  ;;  %v7662_v31 = vld [vmem:[%s11965_s5 + $0x5b8] sm:$0xff]  ;;  %v7741_v46 = vld [vmem:[%s11965_s5 + $0x830] sm:$0xff] }
 0x50c   : > { %8193 = vmatpush.msra.mxu3 %v7691_v55  ;;  %7364 = vst [vmem:[#allocation5 + $0xd0] sm:$0xf0] %v7242_v37  ;;  %8252 = vmatpush.msrb.mxu2 %v7749_v2  ;;  %v7254_v47 = vrot.slane %v11118_v17, 5  ;;  %v7762_v42 = vld [vmem:[%s11965_s5 + $0x8d8] sm:$0xff]  ;;  %v7180_v24 = vrot.slane %v11064_v35, 2  ;;  %v7257_v2 = vrot.slane %v11118_v17, 6 }
 0x50d   : > { %8113 = vmatpush.msrb.mxu0 %v7654_v60  ;;  %v7416_v29 = vrot.slane %v7113_v14, 4  ;;  %v7419_v40 = vrot.slane %v7113_v14, 5  ;;  %v7422_v33 = vrot.slane %v7113_v14, 6  ;;  %7428 = vst [vmem:[#allocation5 + $0x148] sm:$0xf0] %v7113_v14  ;;  %8136 = vmatpush.msrb.mxu1 %v7670_v39  ;;  %v7425_v57 = vrot.slane %v7113_v14, 7 }
 0x50e   : > { %7167 = vst [vmem:[#allocation5 + $0x188] sm:$0xf] %v7165_v49  ;;  %8194 = vmatpush.msra.mxu3 %v7690_v8  ;;  %8253 = vmatpush.msrb.mxu2 %v7748_v10  ;;  %v7177_v49 = vrot.slane %v11064_v35, 1  ;;  %v7661_v60 = vld [vmem:[%s11965_s5 + $0x5b0] sm:$0xff]  ;;  %v7740_v39 = vld [vmem:[%s11965_s5 + $0x828] sm:$0xff] }
 0x50f   : > { %8114 = vmatpush.msrb.mxu0 %v7653_v54  ;;  %v7462_v50 = vld [vmem:[#allocation5 + $0x110] sm:$0xff]  ;;  %7418 = vst [vmem:[#allocation5 + $0x30] sm:$0xf0] %v7416_v29  ;;  %8137 = vmatpush.msrb.mxu1 %v7669_v1  ;;  %v7644_v35 = vld [vmem:[%s11965_s5 + $0x528] sm:$0xff]  ;;  %v7739_v1 = vld [vmem:[%s11965_s5 + $0x820] sm:$0xff] }
 0x510   : > { %8086 = vmatmul.f32.gmra.mxu2 %v7462_v50  ;;  %7421 = vst [vmem:[#allocation5 + $0x158] sm:$0xf0] %v7419_v40  ;;  %8195 = vmatpush.msra.mxu3 %v7689_v13  ;;  %v7761_v8 = vld [vmem:[%s11965_s5 + $0x8d0] sm:$0xff]  ;;  %v7660_v54 = vld [vmem:[%s11965_s5 + $0x5a8] sm:$0xff]  ;;  %v7198_v13 = vrot.slane %v11118_v17, 3  ;;  %v7275_v50 = vrot.slane %v11172_v28, 7 }
 0x511   : > { %7424 = vst [vmem:[#allocation5 + $0x128] sm:$0xf0] %v7422_v33  ;;  %8106 = vmatmul.f32.vlgmr.msrb.gmra.mxu3 %v7438_v36  ;;  %8115 = vmatpush.msrb.mxu0 %v7652_v26  ;;  %v7760_v10 = vld [vmem:[%s11965_s5 + $0x8c8] sm:$0xff]  ;;  %v7643_v33 = vld [vmem:[%s11965_s5 + $0x520] sm:$0xff]  ;;  %v7738_v26 = vld [vmem:[%s11965_s5 + $0x818] sm:$0xff] }
 0x512   : > { %7427 = vst [vmem:[#allocation5 + $0x68] sm:$0xf0] %v7425_v57  ;;  %8138 = vmatpush.msrb.mxu1 %v7668_v16  ;;  %8254 = vmatpush.msrb.mxu2 %v7747_v6  ;;  %v7659_v57 = vld [vmem:[%s11965_s5 + $0x5a0] sm:$0xff]  ;;  %v7642_v6 = vld [vmem:[%s11965_s5 + $0x518] sm:$0xff] }
 0x513   : > { %v7456_v41 = vld [vmem:[#allocation5 + $0xd0] sm:$0xff]  ;;  %7244 = vst [vmem:[#allocation5 + $0x188] sm:$0xf0] %v7242_v37  ;;  %8196 = vmatpush.msra.mxu3 %v7688_v3  ;;  %8116 = vmatpush.msrb.mxu0 %v7651_v45  ;;  %v7759_v16 = vld [vmem:[%s11965_s5 + $0x8c0] sm:$0xff]  ;;  %v7758_v45 = vld [vmem:[%s11965_s5 + $0x8b8] sm:$0xff] }
 0x514   : > { %7948 = vmatmul.f32.gmra.mxu0 %v7456_v41  ;;  %7290 = vst [vmem:[#allocation5 + $0x40] sm:$0xf] %v7168_v56  ;;  %8139 = vmatpush.msrb.mxu1 %v7667_v20  ;;  %v7645_v37 = vld [vmem:[%s11965_s5 + $0x530] sm:$0xff]  ;;  %v7736_v41 = vld [vmem:[%s11965_s5 + $0x808] sm:$0xff] }
 0x515   : > { %7367 = vst [vmem:[#allocation5 + $0x40] sm:$0xf0] %v7245_v27  ;;  %8255 = vmatpush.msrb.mxu2 %v7746_v48  ;;  %8197 = vmatpush.msra.mxu3 %v7687_v32  ;;  %v7737_v3 = vld [vmem:[%s11965_s5 + $0x810] sm:$0xff]  ;;  %v7404_v32 = vrot.slane %v11222_v43, 5 }
 0x516   : > { %7170 = vst [vmem:[#allocation5 + $0x18] sm:$0xf] %v7168_v56  ;;  %8117 = vmatpush.msrb.mxu0 %v7650_v18  ;;  %8140 = vmatpush.msrb.mxu1 %v7666_v58  ;;  %v7658_v56 = vld [vmem:[%s11965_s5 + $0x598] sm:$0xff]  ;;  %v7641_v20 = vld [vmem:[%s11965_s5 + $0x510] sm:$0xff]  ;;  %v7266_v18 = vrot.slane %v11172_v28, 4 }
 0x517   : > { %7247 = vst [vmem:[#allocation5 + $0x18] sm:$0xf0] %v7245_v27  ;;  %8256 = vmatpush.msrb.mxu2 %v7745_v7  ;;  %8274 = vmatpush.msrb.mxu3 %v7766_v5  ;;  %v7327_v27 = vrot.slane %v11172_v28, 1  ;;  %v7657_v48 = vld [vmem:[%s11965_s5 + $0x590] sm:$0xff]  ;;  %v7640_v7 = vld [vmem:[%s11965_s5 + $0x508] sm:$0xff] }
 0x518   : > { %7149 = vst [vmem:[#allocation5 + $0x118] sm:$0xf] %v7147_v61  ;;  %8118 = vmatpush.msrb.mxu0 %v7649_v22  ;;  %8141 = vmatpush.msrb.mxu1 %v7665_v44  ;;  %v7757_v58 = vld [vmem:[%s11965_s5 + $0x8b0] sm:$0xff]  ;;  %v7656_v61 = vld [vmem:[%s11965_s5 + $0x588] sm:$0xff]  ;;  %v7192_v44 = vrot.slane %v11118_v17, 1  ;;  %v7655_v17 = vld [vmem:[%s11965_s5 + $0x580] sm:$0xff] }
 0x519   : > { %7226 = vst [vmem:[#allocation5 + $0x118] sm:$0xf0] %v7224_v12  ;;  %8109 = vmatmul.f32.gmra.mxu3 %v7463_v30  ;;  %8257 = vmatpush.msrb.mxu2 %v7744_v23  ;;  %v7735_v12 = vld [vmem:[%s11965_s5 + $0x800] sm:$0xff]  ;;  %v7756_v22 = vld [vmem:[%s11965_s5 + $0x8a8] sm:$0xff]  ;;  %v7269_v23 = vrot.slane %v11172_v28, 5 }
 0x51a   : > { %v7441_v63 = vld [vmem:[#allocation5 + $0x188] sm:$0xff]  ;;  %7152 = vst [vmem:[#allocation5 + $0x150] sm:$0xf] %v7150_v51  ;;  %8275 = vmatpush.msrb.mxu3 %v7765_v25  ;;  %8119 = vmatpush.msrb.mxu0 %v7648_v0  ;;  %v7814_v51 = vld [vmem:[%s11965_s5 + $0xa78] sm:$0xff]  ;;  %v7639_v25 = vld [vmem:[%s11965_s5 + $0x500] sm:$0xff] }
 0x51b   : > { %8175 = vmatmul.f32.vlgmr.msra.gmra.mxu2 %v7441_v63  ;;  %7229 = vst [vmem:[#allocation5 + $0x150] sm:$0xf0] %v7227_v15  ;;  %8142 = vmatpush.msrb.mxu1 %v7664_v52  ;;  %v7755_v30 = vld [vmem:[%s11965_s5 + $0x8a0] sm:$0xff]  ;;  %v7718_v52 = vld [vmem:[%s11965_s5 + $0x778] sm:$0xff]  ;;  %v7407_v63 = vrot.slane %v11222_v43, 6 }
 0x51c   : > { %v7457_v4 = vld [vmem:[#allocation5 + $0x40] sm:$0xff]  ;;  %8258 = vmatpush.msrb.mxu2 %v7743_v62  ;;  %8276 = vmatpush.msrb.mxu3 %v7764_v19  ;;  %7317 = vst [vmem:[#allocation5 + $0x178] sm:$0xf] %v7195_v34  ;;  %v7330_v62 = vrot.slane %v11172_v28, 2  ;;  %v7439_v19 = vld [vmem:[#allocation5 + $0xb8] sm:$0xff] }
 0x51d   : > { %7971 = vmatmul.f32.gmra.mxu1 %v7457_v4  ;;  %8120 = vmatpush.msrb.mxu0 %v7647_v21  ;;  %7394 = vst [vmem:[#allocation5 + $0x178] sm:$0xf0] %v7272_v59  ;;  %v7754_v21 = vld [vmem:[%s11965_s5 + $0x898] sm:$0xff]  ;;  %v7733_v4 = vld [vmem:[%s11965_s5 + $0x7f0] sm:$0xff] }
 0x51e   : > { %8143 = vmatpush.msrb.mxu1 %v7663_v38  ;;  %8259 = vmatpush.msrb.mxu2 %v7742_v11  ;;  %7197 = vst [vmem:[#allocation5 + $0x38] sm:$0xf] %v7195_v34  ;;  %v7442_v14 = vld [vmem:[#allocation5 + $0x18] sm:$0xff]  ;;  %v7717_v38 = vld [vmem:[%s11965_s5 + $0x770] sm:$0xff]  ;;  %v7440_v11 = vld [vmem:[#allocation5] sm:$0xff] }
 0x51f   : > { %8277 = vmatpush.msrb.mxu3 %v7763_v53  ;;  %7274 = vst [vmem:[#allocation5 + $0x38] sm:$0xf0] %v7272_v59  ;;  %8121 = vmatpush.msrb.mxu0 %v7646_v9  ;;  %v7734_v34 = vld [vmem:[%s11965_s5 + $0x7f8] sm:$0xff]  ;;  %v7813_v59 = vld [vmem:[%s11965_s5 + $0xa70] sm:$0xff]  ;;  %v7812_v53 = vld [vmem:[%s11965_s5 + $0xa68] sm:$0xff] }
 0x520   : > { %v7435_v55 = vld [vmem:[#allocation5 + $0x118] sm:$0xff]  ;;  %8144 = vmatpush.msrb.mxu1 %v7662_v31  ;;  %8260 = vmatpush.msrb.mxu2 %v7741_v46  ;;  %7299 = vst [vmem:[#allocation5 + $0x168] sm:$0xf] %v7177_v49  ;;  %v7753_v9 = vld [vmem:[%s11965_s5 + $0x890] sm:$0xff]  ;;  %v7732_v31 = vld [vmem:[%s11965_s5 + $0x7e8] sm:$0xff] }
 0x521   : > { %8037 = vmatmul.f32.vlgmr.msra.gmra.mxu0 %v7435_v55  ;;  %8278 = vmatpush.msrb.mxu3 %v7762_v42  ;;  %7376 = vst [vmem:[#allocation5 + $0x168] sm:$0xf0] %v7254_v47  ;;  %v7811_v46 = vld [vmem:[%s11965_s5 + $0xa60] sm:$0xff]  ;;  %v7810_v55 = vld [vmem:[%s11965_s5 + $0xa58] sm:$0xff] }
 0x522   : > { %7179 = vst [vmem:[#allocation5 + $0x130] sm:$0xf] %v7177_v49  ;;  %8198 = vmatmul.f32.vlgmr.msra.gmra.mxu3 %v7442_v14  ;;  %8122 = vmatpush.msrb.mxu0 %v7645_v37  ;;  %v7436_v29 = vld [vmem:[#allocation5 + $0x150] sm:$0xff]  ;;  %v7716_v49 = vld [vmem:[%s11965_s5 + $0x768] sm:$0xff]  ;;  %v7715_v42 = vld [vmem:[%s11965_s5 + $0x760] sm:$0xff] }
 0x523   : > { %7256 = vst [vmem:[#allocation5 + $0x130] sm:$0xf0] %v7254_v47  ;;  %8145 = vmatpush.msrb.mxu1 %v7661_v60  ;;  %8261 = vmatpush.msrb.mxu2 %v7740_v39  ;;  %v7752_v47 = vld [vmem:[%s11965_s5 + $0x888] sm:$0xff]  ;;  %v7731_v37 = vld [vmem:[%s11965_s5 + $0x7e0] sm:$0xff]  ;;  %v7714_v39 = vld [vmem:[%s11965_s5 + $0x758] sm:$0xff] }
 0x524   : > { %v7466_v40 = vld [vmem:[#allocation5 + $0x178] sm:$0xff]  ;;  %7302 = vst [vmem:[#allocation5 + $0x170] sm:$0xf] %v7180_v24  ;;  %8279 = vmatpush.msrb.mxu3 %v7761_v8  ;;  %8123 = vmatpush.msrb.mxu0 %v7644_v35  ;;  %v7809_v35 = vld [vmem:[%s11965_s5 + $0xa50] sm:$0xff] }
 0x525   : > { %8060 = vmatmul.f32.vlgmr.msra.gmra.mxu1 %v7436_v29  ;;  %8178 = vmatmul.f32.gmra.mxu2 %v7466_v40  ;;  %7379 = vst [vmem:[#allocation5 + $0x170] sm:$0xf0] %v7257_v2  ;;  %v7729_v29 = vld [vmem:[%s11965_s5 + $0x7d0] sm:$0xff]  ;;  %v7808_v40 = vld [vmem:[%s11965_s5 + $0xa48] sm:$0xff] }
 0x526   : > { %7182 = vst [vmem:[#allocation5 + $0x138] sm:$0xf] %v7180_v24  ;;  %8146 = vmatpush.msrb.mxu1 %v7660_v54  ;;  %8262 = vmatpush.msrb.mxu2 %v7739_v1  ;;  %v7751_v24 = vld [vmem:[%s11965_s5 + $0x880] sm:$0xff]  ;;  %v7830_v54 = vld [vmem:[%s11965_s5 + $0xaf8] sm:$0xff]  ;;  %v7713_v1 = vld [vmem:[%s11965_s5 + $0x750] sm:$0xff] }
 0x527   : > { %7259 = vst [vmem:[#allocation5 + $0x138] sm:$0xf0] %v7257_v2  ;;  %8280 = vmatpush.msrb.mxu3 %v7760_v10  ;;  %8124 = vmatpush.msrb.mxu0 %v7643_v33  ;;  %v7730_v2 = vld [vmem:[%s11965_s5 + $0x7d8] sm:$0xff]  ;;  %v7829_v33 = vld [vmem:[%s11965_s5 + $0xaf0] sm:$0xff] }
 0x528   : > { %v7460_v36 = vld [vmem:[#allocation5 + $0x168] sm:$0xff]  ;;  %8147 = vmatpush.msrb.mxu1 %v7659_v57  ;;  %8263 = vmatpush.msrb.mxu2 %v7738_v26  ;;  %7320 = vst [vmem:[#allocation5 + $0x120] sm:$0xf] %v7198_v13  ;;  %v7807_v26 = vld [vmem:[%s11965_s5 + $0xa40] sm:$0xff] }
 0x529   : > { %8040 = vmatmul.f32.gmra.mxu0 %v7460_v36  ;;  %8281 = vmatpush.msrb.mxu3 %v7759_v16  ;;  %7397 = vst [vmem:[#allocation5 + $0x120] sm:$0xf0] %v7275_v50  ;;  %v7728_v57 = vld [vmem:[%s11965_s5 + $0x7c8] sm:$0xff]  ;;  %v7711_v16 = vld [vmem:[%s11965_s5 + $0x740] sm:$0xff]  ;;  %v7806_v36 = vld [vmem:[%s11965_s5 + $0xa38] sm:$0xff] }
 0x52a   : > { %8125 = vmatpush.msrb.mxu0 %v7642_v6  ;;  %8148 = vmatpush.msrb.mxu1 %v7658_v56  ;;  %7200 = vst [vmem:[#allocation5 + $0x48] sm:$0xf] %v7198_v13  ;;  %v7445_v15 = vld [vmem:[#allocation5 + $0x130] sm:$0xff]  ;;  %v7712_v13 = vld [vmem:[%s11965_s5 + $0x748] sm:$0xff]  ;;  %v7351_v6 = vrot.slane %v11222_v43, 4  ;;  %v7727_v56 = vld [vmem:[%s11965_s5 + $0x7c0] sm:$0xff] }
 0x52b   : > { %8264 = vmatpush.msrb.mxu2 %v7737_v3  ;;  %8282 = vmatpush.msrb.mxu3 %v7758_v45  ;;  %7277 = vst [vmem:[#allocation5 + $0x48] sm:$0xf0] %v7275_v50  ;;  %v7828_v50 = vld [vmem:[%s11965_s5 + $0xae8] sm:$0xff]  ;;  %v7827_v3 = vld [vmem:[%s11965_s5 + $0xae0] sm:$0xff]  ;;  %v7710_v45 = vld [vmem:[%s11965_s5 + $0x738] sm:$0xff] }
 0x52c   : > { %v7461_v5 = vld [vmem:[#allocation5 + $0x170] sm:$0xff]  ;;  %8126 = vmatpush.msrb.mxu0 %v7641_v20  ;;  %8149 = vmatpush.msrb.mxu1 %v7657_v48  ;;  %7329 = vst [vmem:[#allocation5 + $0xe8] sm:$0xf] %v7327_v27  ;;  %v7726_v27 = vld [vmem:[%s11965_s5 + $0x7b8] sm:$0xff] }
 0x52d   : > { %8063 = vmatmul.f32.gmra.mxu1 %v7461_v5  ;;  %8265 = vmatpush.msrb.mxu2 %v7736_v41  ;;  %7406 = vst [vmem:[#allocation5 + $0xe8] sm:$0xf0] %v7404_v32  ;;  %v7805_v20 = vld [vmem:[%s11965_s5 + $0xa30] sm:$0xff]  ;;  %v7826_v48 = vld [vmem:[%s11965_s5 + $0xad8] sm:$0xff]  ;;  %v7708_v5 = vld [vmem:[%s11965_s5 + $0x728] sm:$0xff] }
 0x52e   : > { %8283 = vmatpush.msrb.mxu3 %v7757_v58  ;;  %8127 = vmatpush.msrb.mxu0 %v7640_v7  ;;  %7388 = vst [vmem:[#allocation5 + $0xa0] sm:$0xf0] %v7266_v18  ;;  %v7446_v10 = vld [vmem:[#allocation5 + $0x138] sm:$0xff]  ;;  %v7709_v41 = vld [vmem:[%s11965_s5 + $0x730] sm:$0xff]  ;;  %v7804_v58 = vld [vmem:[%s11965_s5 + $0xa28] sm:$0xff] }
 0x52f   : > { %8150 = vmatpush.msrb.mxu1 %v7656_v61  ;;  %8266 = vmatpush.msrb.mxu2 %v7735_v12  ;;  %7268 = vst [vmem:[#allocation5 + $0xa8] sm:$0xf0] %v7266_v18  ;;  %v7825_v7 = vld [vmem:[%s11965_s5 + $0xad0] sm:$0xff]  ;;  %v7724_v61 = vld [vmem:[%s11965_s5 + $0x7a8] sm:$0xff]  ;;  %v7803_v12 = vld [vmem:[%s11965_s5 + $0xa20] sm:$0xff] }
 0x530   : > { %v7467_v0 = vld [vmem:[#allocation5 + $0x120] sm:$0xff]  ;;  %8284 = vmatpush.msrb.mxu3 %v7756_v22  ;;  %8267 = vmatmul.f32.vlgmr.msrb.gmra.mxu2 %v7445_v15  ;;  %7338 = vst [vmem:[#allocation5 + $0x98] sm:$0xf] %v7266_v18  ;;  %v7725_v18 = vld [vmem:[%s11965_s5 + $0x7b0] sm:$0xff]  ;;  %v7824_v22 = vld [vmem:[%s11965_s5 + $0xac8] sm:$0xff] }
 0x531   : > { %8201 = vmatmul.f32.gmra.mxu3 %v7467_v0  ;;  %8343 = vmatpush.msra.mxu2 %v7814_v51  ;;  %7314 = vst [vmem:[#allocation5 + $0x8] sm:$0xf] %v7192_v44  ;;  %v7723_v51 = vld [vmem:[%s11965_s5 + $0x7a0] sm:$0xff]  ;;  %v7722_v0 = vld [vmem:[%s11965_s5 + $0x798] sm:$0xff] }
 0x532   : > { %8128 = vmatpush.msrb.mxu0 %v7639_v25  ;;  %8151 = vmatpush.msrb.mxu1 %v7655_v17  ;;  %7391 = vst [vmem:[#allocation5 + $0x8] sm:$0xf0] %v7269_v23  ;;  %v7823_v15 = vld [vmem:[%s11965_s5 + $0xac0] sm:$0xff]  ;;  %v7342_v25 = vrot.slane %v11222_v43, 1  ;;  %v7706_v17 = vld [vmem:[%s11965_s5 + $0x718] sm:$0xff] }
 0x533   : > { %8285 = vmatpush.msrb.mxu3 %v7755_v30  ;;  %8129 = vmatmul.f32.vlgmr.msrb.gmra.mxu0 %v7439_v19  ;;  %7194 = vst [vmem:[#allocation5 + $0x58] sm:$0xf] %v7192_v44  ;;  %v7707_v44 = vld [vmem:[%s11965_s5 + $0x720] sm:$0xff]  ;;  %v7801_v30 = vld [vmem:[%s11965_s5 + $0xa10] sm:$0xff]  ;;  %v7800_v19 = vld [vmem:[%s11965_s5 + $0xa08] sm:$0xff] }
 0x534   : > { %8205 = vmatpush.msra.mxu0 %v7718_v52  ;;  %8228 = vmatpush.msra.mxu1 %v7734_v34  ;;  %7271 = vst [vmem:[#allocation5 + $0x58] sm:$0xf0] %v7269_v23  ;;  %v7470_v60 = vld [vmem:[#allocation5 + $0xe8] sm:$0xff]  ;;  %v7802_v23 = vld [vmem:[%s11965_s5 + $0xa18] sm:$0xff]  ;;  %v7705_v34 = vld [vmem:[%s11965_s5 + $0x710] sm:$0xff] }
 0x535   : > { %8152 = vmatmul.f32.vlgmr.msrb.gmra.mxu1 %v7440_v11  ;;  %8344 = vmatpush.msra.mxu2 %v7813_v59  ;;  %7332 = vst [vmem:[#allocation5 + $0x78] sm:$0xf] %v7330_v62  ;;  %v7464_v14 = vld [vmem:[#allocation5 + $0xa0] sm:$0xff]  ;;  %v7822_v52 = vld [vmem:[%s11965_s5 + $0xab8] sm:$0xff]  ;;  %v7721_v62 = vld [vmem:[%s11965_s5 + $0x790] sm:$0xff] }
 0x536   : > { %8286 = vmatpush.msrb.mxu3 %v7754_v21  ;;  %8206 = vmatpush.msra.mxu0 %v7717_v38  ;;  %7409 = vst [vmem:[#allocation5 + $0x78] sm:$0xf0] %v7407_v63  ;;  %v7821_v59 = vld [vmem:[%s11965_s5 + $0xab0] sm:$0xff]  ;;  %v7704_v63 = vld [vmem:[%s11965_s5 + $0x708] sm:$0xff]  ;;  %v7799_v38 = vld [vmem:[%s11965_s5 + $0xa00] sm:$0xff] }
 0x537   : > { %8229 = vmatpush.msra.mxu1 %v7733_v4  ;;  %8345 = vmatpush.msra.mxu2 %v7812_v53  ;;  %7403 = vst [vmem:[#allocation5 + $0xf8] sm:$0xf0] %v7351_v6  ;;  %v7720_v21 = vld [vmem:[%s11965_s5 + $0x788] sm:$0xff]  ;;  %v7703_v4 = vld [vmem:[%s11965_s5 + $0x700] sm:$0xff]  ;;  %v11661_v53 = vld [vmem:[%s11965_s5 + $0xc78] sm:$0xff] }
 0x538   : > { %8287 = vmatpush.msrb.mxu3 %v7753_v9  ;;  %8207 = vmatpush.msra.mxu0 %v7716_v49  ;;  %7353 = vst [vmem:[#allocation5 + $0x148] sm:$0xf] %v7351_v6  ;;  %v7820_v11 = vld [vmem:[%s11965_s5 + $0xaa8] sm:$0xff]  ;;  %v7719_v9 = vld [vmem:[%s11965_s5 + $0x780] sm:$0xff]  ;;  %v7873_v6 = vld [vmem:[%s11965_s5 + $0xc50] sm:$0xff] }
 0x539   : > { %8230 = vmatpush.msra.mxu1 %v7732_v31  ;;  %8346 = vmatpush.msra.mxu2 %v7811_v46  ;;  %v7465_v8 = vld [vmem:[#allocation5 + $0x8] sm:$0xff]  ;;  %7344 = vst [vmem:[#allocation5 + $0x158] sm:$0xf] %v7342_v25  ;;  %v7819_v31 = vld [vmem:[%s11965_s5 + $0xaa0] sm:$0xff]  ;;  %v7782_v46 = vld [vmem:[%s11965_s5 + $0x978] sm:$0xff] }
 0x53a   : > { %8288 = vmatpush.msrb.mxu3 %v7752_v47  ;;  %8208 = vmatpush.msra.mxu0 %v7715_v42  ;;  %v7449_v49 = vld [vmem:[#allocation5 + $0xa8] sm:$0xff]  ;;  %v7443_v47 = vld [vmem:[#allocation5 + $0xd8] sm:$0xff]  ;;  %v7867_v25 = vld [vmem:[%s11965_s5 + $0xc20] sm:$0xff] }
 0x53b   : > { %8231 = vmatpush.msra.mxu1 %v7731_v37  ;;  %8270 = vmatmul.f32.gmra.mxu2 %v7470_v60  ;;  %v7798_v42 = vld [vmem:[%s11965_s5 + $0x9f8] sm:$0xff]  ;;  %v7877_v37 = vld [vmem:[%s11965_s5 + $0xc70] sm:$0xff] }
 0x53c   : > { %8347 = vmatpush.msra.mxu2 %v7810_v55  ;;  %8289 = vmatpush.msrb.mxu3 %v7751_v24  ;;  %v7444_v55 = vld [vmem:[#allocation5 + $0x70] sm:$0xff]  ;;  %v7818_v24 = vld [vmem:[%s11965_s5 + $0xa98] sm:$0xff] }
 0x53d   : > { %8132 = vmatmul.f32.gmra.mxu0 %v7464_v14  ;;  %8155 = vmatmul.f32.gmra.mxu1 %v7465_v8  ;;  %v7471_v32 = vld [vmem:[#allocation5 + $0x78] sm:$0xff]  ;;  %v7781_v60 = vld [vmem:[%s11965_s5 + $0x970] sm:$0xff]  ;;  %v7780_v8 = vld [vmem:[%s11965_s5 + $0x968] sm:$0xff] }
 0x53e   : > { %8209 = vmatpush.msra.mxu0 %v7714_v39  ;;  %8232 = vmatpush.msra.mxu1 %v7730_v2  ;;  %v7797_v39 = vld [vmem:[%s11965_s5 + $0x9f0] sm:$0xff]  ;;  %v7876_v2 = vld [vmem:[%s11965_s5 + $0xc68] sm:$0xff] }
 0x53f   : > { %8290 = vmatmul.f32.vlgmr.msrb.gmra.mxu3 %v7446_v10  ;;  %8348 = vmatpush.msra.mxu2 %v7809_v35  ;;  %v7817_v14 = vld [vmem:[%s11965_s5 + $0xa90] sm:$0xff]  ;;  %v7796_v35 = vld [vmem:[%s11965_s5 + $0x9e8] sm:$0xff]  ;;  %v7779_v10 = vld [vmem:[%s11965_s5 + $0x960] sm:$0xff] }
 0x540   : > { %8366 = vmatpush.msra.mxu3 %v7830_v54  ;;  %8210 = vmatpush.msra.mxu0 %v7713_v1  ;;  %v7875_v54 = vld [vmem:[%s11965_s5 + $0xc60] sm:$0xff]  ;;  %v7816_v1 = vld [vmem:[%s11965_s5 + $0xa88] sm:$0xff] }
 0x541   : > { %8233 = vmatpush.msra.mxu1 %v7729_v29  ;;  %8349 = vmatpush.msra.mxu2 %v7808_v40  ;;  %v7795_v29 = vld [vmem:[%s11965_s5 + $0x9e0] sm:$0xff]  ;;  %v7874_v40 = vld [vmem:[%s11965_s5 + $0xc58] sm:$0xff] }
 0x542   : > { %8367 = vmatpush.msra.mxu3 %v7829_v33  ;;  %8211 = vmatpush.msra.mxu0 %v7712_v13  ;;  %v7815_v33 = vld [vmem:[%s11965_s5 + $0xa80] sm:$0xff]  ;;  %v7474_v13 = vld [vmem:[#allocation5 + $0x30] sm:$0xff] }
 0x543   : > { %8234 = vmatpush.msra.mxu1 %v7728_v57  ;;  %8350 = vmatpush.msra.mxu2 %v7807_v26  ;;  %v7778_v57 = vld [vmem:[%s11965_s5 + $0x958] sm:$0xff] }
 0x544   : > { %8368 = vmatpush.msra.mxu3 %v7828_v50  ;;  %8212 = vmatpush.msra.mxu0 %v7711_v16  ;;  %v7794_v26 = vld [vmem:[%s11965_s5 + $0x9d8] sm:$0xff]  ;;  %v7468_v50 = vld [vmem:[#allocation5 + $0x160] sm:$0xff] }
 0x545   : > { %8235 = vmatpush.msra.mxu1 %v7727_v56  ;;  %8351 = vmatpush.msra.mxu2 %v7806_v36  ;;  %v7469_v16 = vld [vmem:[#allocation5 + $0xf8] sm:$0xff]  ;;  %v7777_v56 = vld [vmem:[%s11965_s5 + $0x950] sm:$0xff] }
 0x546   : > { %8369 = vmatpush.msra.mxu3 %v7827_v3  ;;  %8213 = vmatpush.msra.mxu0 %v7710_v45  ;;  %v7450_v36 = vld [vmem:[#allocation5 + $0x58] sm:$0xff]  ;;  %v7793_v3 = vld [vmem:[%s11965_s5 + $0x9d0] sm:$0xff]  ;;  %v7872_v45 = vld [vmem:[%s11965_s5 + $0xc48] sm:$0xff] }
 0x547   : > { %8236 = vmatpush.msra.mxu1 %v7726_v27  ;;  %8293 = vmatmul.f32.gmra.mxu3 %v7471_v32  ;;  %v7776_v27 = vld [vmem:[%s11965_s5 + $0x948] sm:$0xff] }
 0x548   : > { %8352 = vmatpush.msra.mxu2 %v7805_v20  ;;  %8370 = vmatpush.msra.mxu3 %v7826_v48  ;;  %v7333_v20 = vrot.slane %v11172_v28, 3  ;;  %v7410_v48 = vrot.slane %v11222_v43, 7  ;;  %v7792_v32 = vld [vmem:[%s11965_s5 + $0x9c8] sm:$0xff]  ;;  %v7791_v28 = vld [vmem:[%s11965_s5 + $0x9c0] sm:$0xff] }
 0x549   : > { %8214 = vmatpush.msra.mxu0 %v7709_v41  ;;  %8237 = vmatpush.msra.mxu1 %v7725_v18  ;;  %v7871_v41 = vld [vmem:[%s11965_s5 + $0xc40] sm:$0xff] }
 0x54a   : > { %8353 = vmatpush.msra.mxu2 %v7804_v58  ;;  %8371 = vmatpush.msra.mxu3 %v7825_v7  ;;  %v7775_v18 = vld [vmem:[%s11965_s5 + $0x940] sm:$0xff]  ;;  %7335 = vst [vmem:[#allocation5 + $0x50] sm:$0xf] %v7333_v20  ;;  %v7870_v58 = vld [vmem:[%s11965_s5 + $0xc38] sm:$0xff] }
 0x54b   : > { %8215 = vmatpush.msra.mxu0 %v7708_v5  ;;  %8238 = vmatpush.msra.mxu1 %v7724_v61  ;;  %7412 = vst [vmem:[#allocation5 + $0x50] sm:$0xf0] %v7410_v48  ;;  %v7774_v7 = vld [vmem:[%s11965_s5 + $0x938] sm:$0xff]  ;;  %v7869_v61 = vld [vmem:[%s11965_s5 + $0xc30] sm:$0xff] }
 0x54c   : > { %8354 = vmatpush.msra.mxu2 %v7803_v12  ;;  %8372 = vmatpush.msra.mxu3 %v7824_v22  ;;  %v7790_v5 = vld [vmem:[%s11965_s5 + $0x9b8] sm:$0xff]  ;;  %v7773_v22 = vld [vmem:[%s11965_s5 + $0x930] sm:$0xff] }
 0x54d   : > { %8216 = vmatpush.msra.mxu0 %v7707_v44  ;;  %8239 = vmatpush.msra.mxu1 %v7723_v51  ;;  %v7475_v12 = vld [vmem:[#allocation5 + $0x158] sm:$0xff]  ;;  %v7789_v44 = vld [vmem:[%s11965_s5 + $0x9b0] sm:$0xff]  ;;  %v7868_v51 = vld [vmem:[%s11965_s5 + $0xc28] sm:$0xff] }
 0x54e   : > { %8355 = vmatpush.msra.mxu2 %v7802_v23  ;;  %8373 = vmatpush.msra.mxu3 %v7823_v15  ;;  %v7772_v23 = vld [vmem:[%s11965_s5 + $0x928] sm:$0xff]  ;;  %v7850_v20 = vld [vmem:[%s11965_s5 + $0xb98] sm:$0xff]  ;;  %v7833_v48 = vld [vmem:[%s11965_s5 + $0xb10] sm:$0xff] }
 0x54f   : > { %8217 = vmatpush.msra.mxu0 %v7706_v17  ;;  %8240 = vmatpush.msra.mxu1 %v7722_v0  ;;  %v7788_v15 = vld [vmem:[%s11965_s5 + $0x9a8] sm:$0xff]  ;;  %v7771_v17 = vld [vmem:[%s11965_s5 + $0x920] sm:$0xff] }
 0x550   : > { %8356 = vmatpush.msra.mxu2 %v7801_v30  ;;  %8374 = vmatpush.msra.mxu3 %v7822_v52  ;;  %v7787_v0 = vld [vmem:[%s11965_s5 + $0x9a0] sm:$0xff]  ;;  %v7866_v30 = vld [vmem:[%s11965_s5 + $0xc18] sm:$0xff] }
 0x551   : > { %8218 = vmatpush.msra.mxu0 %v7705_v34  ;;  %8241 = vmatpush.msra.mxu1 %v7721_v62  ;;  %v7770_v52 = vld [vmem:[%s11965_s5 + $0x918] sm:$0xff]  ;;  %v7865_v62 = vld [vmem:[%s11965_s5 + $0xc10] sm:$0xff] }
 0x552   : > { %8357 = vmatpush.msra.mxu2 %v7800_v19  ;;  %8375 = vmatpush.msra.mxu3 %v7821_v59  ;;  %v7786_v34 = vld [vmem:[%s11965_s5 + $0x998] sm:$0xff]  ;;  %v7769_v19 = vld [vmem:[%s11965_s5 + $0x910] sm:$0xff] }
 0x553   : > { %8219 = vmatpush.msra.mxu0 %v7704_v63  ;;  %8242 = vmatpush.msra.mxu1 %v7720_v21  ;;  %v7785_v59 = vld [vmem:[%s11965_s5 + $0x990] sm:$0xff]  ;;  %v7864_v63 = vld [vmem:[%s11965_s5 + $0xc08] sm:$0xff] }
 0x554   : > { %8358 = vmatpush.msra.mxu2 %v7799_v38  ;;  %8376 = vmatpush.msra.mxu3 %v7820_v11  ;;  %v7768_v21 = vld [vmem:[%s11965_s5 + $0x908] sm:$0xff]  ;;  %v7863_v11 = vld [vmem:[%s11965_s5 + $0xc00] sm:$0xff] }
 0x555   : > { %8359 = vmatmul.f32.vlgmr.msra.gmra.mxu2 %v7449_v49  ;;  %8220 = vmatpush.msra.mxu0 %v7703_v4  ;;  %v7784_v38 = vld [vmem:[%s11965_s5 + $0x988] sm:$0xff]  ;;  %v7767_v4 = vld [vmem:[%s11965_s5 + $0x900] sm:$0xff]  ;;  %v7846_v49 = vld [vmem:[%s11965_s5 + $0xb78] sm:$0xff] }
 0x556   : > { %8435 = vmatpush.msrb.mxu2 %v11661_v53  ;;  %8243 = vmatpush.msra.mxu1 %v7719_v9  ;;  %v7453_v9 = vld [vmem:[#allocation5 + $0xf0] sm:$0xff] }
 0x557   : > { %8377 = vmatpush.msra.mxu3 %v7819_v31  ;;  %8221 = vmatmul.f32.vlgmr.msra.gmra.mxu0 %v7443_v47  ;;  %v7862_v31 = vld [vmem:[%s11965_s5 + $0xbf8] sm:$0xff]  ;;  %v7448_v47 = vld [vmem:[#allocation5 + $0x20] sm:$0xff] }
 0x558   : > { %8244 = vmatmul.f32.vlgmr.msra.gmra.mxu1 %v7444_v55  ;;  %8297 = vmatpush.msrb.mxu0 %v7782_v46  ;;  %v7447_v46 = vld [vmem:[#allocation5 + $0x140] sm:$0xff]  ;;  %v7844_v55 = vld [vmem:[%s11965_s5 + $0xb68] sm:$0xff] }
 0x559   : > { %8320 = vmatpush.msrb.mxu1 %v7798_v42  ;;  %8436 = vmatpush.msrb.mxu2 %v7877_v37  ;;  %v7845_v42 = vld [vmem:[%s11965_s5 + $0xb70] sm:$0xff] }
 0x55a   : > { %8378 = vmatpush.msra.mxu3 %v7818_v24  ;;  %8298 = vmatpush.msrb.mxu0 %v7781_v60  ;;  %v7860_v24 = vld [vmem:[%s11965_s5 + $0xbe8] sm:$0xff]  ;;  %v7345_v60 = vrot.slane %v11222_v43, 2 }
 0x55b   : > { %8321 = vmatpush.msrb.mxu1 %v7797_v39  ;;  %8437 = vmatpush.msrb.mxu2 %v7876_v2  ;;  %v7843_v39 = vld [vmem:[%s11965_s5 + $0xb60] sm:$0xff] }
 0x55c   : > { %8379 = vmatpush.msra.mxu3 %v7817_v14  ;;  %8299 = vmatpush.msrb.mxu0 %v7780_v8  ;;  %7347 = vst [vmem:[#allocation5 + $0x128] sm:$0xf] %v7345_v60  ;;  %v7842_v14 = vld [vmem:[%s11965_s5 + $0xb58] sm:$0xff]  ;;  %v7472_v8 = vld [vmem:[#allocation5 + $0x50] sm:$0xff] }
 0x55d   : > { %8322 = vmatpush.msrb.mxu1 %v7796_v35  ;;  %8438 = vmatpush.msrb.mxu2 %v7875_v54  ;;  %v7858_v35 = vld [vmem:[%s11965_s5 + $0xbd8] sm:$0xff] }
 0x55e   : > { %8380 = vmatpush.msra.mxu3 %v7816_v1  ;;  %8300 = vmatpush.msrb.mxu0 %v7779_v10  ;;  %v7841_v1 = vld [vmem:[%s11965_s5 + $0xb50] sm:$0xff]  ;;  %v7348_v10 = vrot.slane %v11222_v43, 3  ;;  %v7839_v43 = vld [vmem:[%s11965_s5 + $0xb40] sm:$0xff] }
 0x55f   : > { %8323 = vmatpush.msrb.mxu1 %v7795_v29  ;;  %8362 = vmatmul.f32.gmra.mxu2 %v7474_v13  ;;  %v7478_v29 = vld [vmem:[#allocation5 + $0x148] sm:$0xff] }
 0x560   : > { %8439 = vmatpush.msrb.mxu2 %v7874_v40  ;;  %8381 = vmatpush.msra.mxu3 %v7815_v33  ;;  %v7840_v33 = vld [vmem:[%s11965_s5 + $0xb48] sm:$0xff]  ;;  %7350 = vst [vmem:[#allocation5 + $0x68] sm:$0xf] %v7348_v10 }
 0x561   : > { %8224 = vmatmul.f32.gmra.mxu0 %v7468_v50  ;;  %8247 = vmatmul.f32.gmra.mxu1 %v7469_v16  ;;  %v7856_v13 = vld [vmem:[%s11965_s5 + $0xbc8] sm:$0xff]  ;;  %v7854_v50 = vld [vmem:[%s11965_s5 + $0xbb8] sm:$0xff]  ;;  %v7837_v16 = vld [vmem:[%s11965_s5 + $0xb30] sm:$0xff] }
 0x562   : > { %8301 = vmatpush.msrb.mxu0 %v7778_v57  ;;  %8324 = vmatpush.msrb.mxu1 %v7794_v26  ;;  %v7855_v57 = vld [vmem:[%s11965_s5 + $0xbc0] sm:$0xff]  ;;  %v7838_v26 = vld [vmem:[%s11965_s5 + $0xb38] sm:$0xff] }
 0x563   : > { %8382 = vmatmul.f32.vlgmr.msra.gmra.mxu3 %v7450_v36  ;;  %8440 = vmatpush.msrb.mxu2 %v7873_v6  ;;  %v7852_v36 = vld [vmem:[%s11965_s5 + $0xba8] sm:$0xff] }
 0x564   : > { %8658 = vmatpush.msrb.mxu3 %v11661_v53  ;;  %8302 = vmatpush.msrb.mxu0 %v7777_v56  ;;  %v7783_v53 = vld [vmem:[%s11965_s5 + $0x980] sm:$0xff]  ;;  %v7836_v56 = vld [vmem:[%s11965_s5 + $0xb28] sm:$0xff] }
 0x565   : > { %8325 = vmatpush.msrb.mxu1 %v7793_v3  ;;  %8441 = vmatpush.msrb.mxu2 %v7872_v45  ;;  %v7835_v3 = vld [vmem:[%s11965_s5 + $0xb20] sm:$0xff] }
 0x566   : > { %8659 = vmatpush.msrb.mxu3 %v7877_v37  ;;  %8303 = vmatpush.msrb.mxu0 %v7776_v27  ;;  %v7861_v37 = vld [vmem:[%s11965_s5 + $0xbf0] sm:$0xff]  ;;  %v7834_v27 = vld [vmem:[%s11965_s5 + $0xb18] sm:$0xff] }
 0x567   : > { %8326 = vmatpush.msrb.mxu1 %v7792_v32  ;;  %8442 = vmatpush.msrb.mxu2 %v7871_v41  ;;  %v7849_v32 = vld [vmem:[%s11965_s5 + $0xb90] sm:$0xff] }
 0x568   : > { %8660 = vmatpush.msrb.mxu3 %v7876_v2  ;;  %8304 = vmatpush.msrb.mxu0 %v7775_v18  ;;  %v7859_v2 = vld [vmem:[%s11965_s5 + $0xbe0] sm:$0xff]  ;;  %v7848_v18 = vld [vmem:[%s11965_s5 + $0xb88] sm:$0xff] }
 0x569   : > { %8327 = vmatpush.msrb.mxu1 %v7791_v28  ;;  %8443 = vmatpush.msrb.mxu2 %v7870_v58  ;;  %v7831_v28 = vld [vmem:[%s11965_s5 + $0xb00] sm:$0xff] }
 0x56a   : > { %8661 = vmatpush.msrb.mxu3 %v7875_v54  ;;  %8305 = vmatpush.msrb.mxu0 %v7774_v7  ;;  %v7473_v54 = vld [vmem:[#allocation5 + $0x98] sm:$0xff] }
 0x56b   : > { %8328 = vmatpush.msrb.mxu1 %v7790_v5  ;;  %8385 = vmatmul.f32.gmra.mxu3 %v7475_v12  ;;  %v7451_v7 = vld [vmem:[#allocation5 + $0x38] sm:$0xff]  ;;  %v7452_v5 = vld [vmem:[#allocation5 + $0x48] sm:$0xff] }
 0x56c   : > { %8662 = vmatpush.msrb.mxu3 %v7874_v40  ;;  %8444 = vmatpush.msrb.mxu2 %v7869_v61  ;;  %v7857_v40 = vld [vmem:[%s11965_s5 + $0xbd0] sm:$0xff]  ;;  %v7477_v12 = vld [vmem:[#allocation5 + $0x68] sm:$0xff] }
 0x56d   : > { %8306 = vmatpush.msrb.mxu0 %v7773_v22  ;;  %8329 = vmatpush.msrb.mxu1 %v7789_v44  ;;  %v7900_v22 = vpop.f32.mrf.mxu0  ;;  %v7923_v44 = vpop.f32.mrf.mxu1 }
 0x56e   : > { %8663 = vmatpush.msrb.mxu3 %v7873_v6  ;;  %8445 = vmatpush.msrb.mxu2 %v7868_v51  ;;  %v7853_v6 = vld [vmem:[%s11965_s5 + $0xbb0] sm:$0xff] }
 0x56f   : > { %8307 = vmatpush.msrb.mxu0 %v7772_v23  ;;  %8330 = vmatpush.msrb.mxu1 %v7788_v15 }
 0x570   : > { %8664 = vmatpush.msrb.mxu3 %v7872_v45  ;;  %8446 = vmatpush.msrb.mxu2 %v7867_v25  ;;  %v7851_v45 = vld [vmem:[%s11965_s5 + $0xba0] sm:$0xff] }
 0x571   : > { %8308 = vmatpush.msrb.mxu0 %v7771_v17  ;;  %8331 = vmatpush.msrb.mxu1 %v7787_v0  ;;  %v7992_v17 = vpop.f32.mrf.mxu2 }
 0x572   : > { %8665 = vmatpush.msrb.mxu3 %v7871_v41  ;;  %8447 = vmatpush.msrb.mxu2 %v7866_v30  ;;  %v7832_v41 = vld [vmem:[%s11965_s5 + $0xb08] sm:$0xff] }
 0x573   : > { %8309 = vmatpush.msrb.mxu0 %v7770_v52  ;;  %8332 = vmatpush.msrb.mxu1 %v7786_v34  ;;  %v8015_v52 = vpop.f32.mrf.mxu3 }
 0x574   : > { %8666 = vmatpush.msrb.mxu3 %v7870_v58  ;;  %8448 = vmatpush.msrb.mxu2 %v7865_v62  ;;  %v7847_v58 = vld [vmem:[%s11965_s5 + $0xb80] sm:$0xff] }
 0x575   : > { %8310 = vmatpush.msrb.mxu0 %v7769_v19  ;;  %8333 = vmatpush.msrb.mxu1 %v7785_v59 }
 0x576   : > { %8667 = vmatpush.msrb.mxu3 %v7869_v61  ;;  %8449 = vmatpush.msrb.mxu2 %v7864_v63  ;;  %v7476_v61 = vld [vmem:[#allocation5 + $0x128] sm:$0xff] }
 0x577   : > { %8311 = vmatpush.msrb.mxu0 %v7768_v21  ;;  %8334 = vmatpush.msrb.mxu1 %v7784_v38 }
 0x578   : > { %8668 = vmatpush.msrb.mxu3 %v7868_v51  ;;  %8450 = vmatpush.msrb.mxu2 %v7863_v11  ;;  %v7903_v51 = vpop.f32.mrf.mxu0 }
 0x579   : > { %8451 = vmatmul.f32.vlgmr.msrb.gmra.mxu2 %v7453_v9  ;;  %8312 = vmatpush.msrb.mxu0 %v7767_v4 }
 0x57a   : > { %8335 = vmatpush.msrb.mxu1 %v7783_v53  ;;  %8669 = vmatpush.msrb.mxu3 %v7867_v25 }
 0x57b   : > { %8313 = vmatmul.f32.vlgmr.msrb.gmra.mxu0 %v7447_v46  ;;  %8336 = vmatmul.f32.vlgmr.msrb.gmra.mxu1 %v7448_v47  ;;  %v7995_v34 = vpop.f32.mrf.mxu2 }
 0x57c   : > { %8389 = vmatpush.msra.mxu0 %v7846_v49  ;;  %8412 = vmatpush.msra.mxu1 %v7862_v31 }
 0x57d   : > { %8670 = vmatpush.msrb.mxu3 %v7866_v30 }
 0x57e   : > { %8390 = vmatpush.msra.mxu0 %v7845_v42  ;;  %8413 = vmatpush.msra.mxu1 %v7861_v37  ;;  %v7926_v23 = vpop.f32.mrf.mxu1 }
 0x57f   : > { %8671 = vmatpush.msrb.mxu3 %v7865_v62  ;;  %v8781_v62 = vld [vmem:[#allocation15] ss:$0 sm:$0xff] }
 0x580   : > { %8391 = vmatpush.msra.mxu0 %v7844_v55  ;;  %8414 = vmatpush.msra.mxu1 %v7860_v24  ;;  %v7901_v19 = vadd.f32 %v8781_v62, %v7900_v22  ;;  %v7904_v53 = vadd.f32 %v8781_v62, %v7903_v51 }
 0x581   : > { %8672 = vmatpush.msrb.mxu3 %v7864_v63  ;;  %v7946_v15 = vpop.f32.mrf.mxu0 }
 0x582   : > { %8392 = vmatpush.msra.mxu0 %v7843_v39  ;;  %8415 = vmatpush.msra.mxu1 %v7859_v2  ;;  %v7924_v21 = vadd.f32 %v7923_v44, %v7901_v19  ;;  %v7927_v49 = vadd.f32 %v7926_v23, %v7904_v53 }
 0x583   : > { %8673 = vmatpush.msrb.mxu3 %v7863_v11  ;;  %8316 = vmatmul.f32.gmra.mxu0 %v7472_v8 }
 0x584   : > { %8339 = vmatmul.f32.gmra.mxu1 %v7473_v54  ;;  %8393 = vmatpush.msra.mxu0 %v7842_v14  ;;  %v7947_v4 = vadd.f32 %v7946_v15, %v7924_v21 }
 0x585   : > { %8416 = vmatpush.msra.mxu1 %v7858_v35  ;;  %8454 = vmatmul.f32.vlgmr.msrb.gmra.mxu3 %v7478_v29 }
 0x586   : > { %8394 = vmatpush.msra.mxu0 %v7841_v1  ;;  %v7969_v25 = vpop.f32.mrf.mxu1  ;;  %v8084_v11 = vpop.f32.mrf.mxu2 }
 0x587   : > { %8417 = vmatpush.msra.mxu1 %v7857_v40  ;;  %v7970_v9 = vadd.f32 %v7969_v25, %v7947_v4 }
 0x588   : > { %8395 = vmatpush.msra.mxu0 %v7840_v33 }
 0x589   : > { %8418 = vmatpush.msra.mxu1 %v7856_v13  ;;  %v7993_v47 = vadd.f32 %v7992_v17, %v7970_v9 }
 0x58a   : > { %8396 = vmatpush.msra.mxu0 %v7839_v43 }
 0x58b   : > { %8419 = vmatpush.msra.mxu1 %v7855_v57  ;;  %v8016_v60 = vadd.f32 %v8015_v52, %v7993_v47 }
 0x58c   : > { %8397 = vmatpush.msra.mxu0 %v7838_v26  ;;  %v8018_v59 = vpop.f32.mrf.mxu3 }
 0x58d   : > { %8420 = vmatpush.msra.mxu1 %v7854_v50 }
 0x58e   : > { %8398 = vmatpush.msra.mxu0 %v7837_v16 }
 0x58f   : > { %8421 = vmatpush.msra.mxu1 %v7853_v6 }
 0x590   : > { %8399 = vmatpush.msra.mxu0 %v7836_v56 }
 0x591   : > { %8422 = vmatpush.msra.mxu1 %v7852_v36  ;;  %v7949_v0 = vpop.f32.mrf.mxu0 }
 0x592   : > { %8400 = vmatpush.msra.mxu0 %v7835_v3  ;;  %v7950_v42 = vadd.f32 %v7949_v0, %v7927_v49 }
 0x593   : > { %8423 = vmatpush.msra.mxu1 %v7851_v45  ;;  %v8087_v55 = vpop.f32.mrf.mxu2 }
 0x594   : > { %8401 = vmatpush.msra.mxu0 %v7834_v27  ;;  %v8107_v31 = vpop.f32.mrf.mxu3 }
 0x595   : > { %8424 = vmatpush.msra.mxu1 %v7850_v20 }
 0x596   : > { %8402 = vmatpush.msra.mxu0 %v7833_v48 }
 0x597   : > { %8425 = vmatpush.msra.mxu1 %v7849_v32 }
 0x598   : > { %8403 = vmatpush.msra.mxu0 %v7832_v41 }
 0x599   : > { %8426 = vmatpush.msra.mxu1 %v7848_v18 }
 0x59a   : > { %8404 = vmatpush.msra.mxu0 %v7831_v28  ;;  %v7972_v30 = vpop.f32.mrf.mxu1 }
 0x59b   : > { %8427 = vmatpush.msra.mxu1 %v7847_v58  ;;  %8405 = vmatmul.f32.vlgmr.msra.gmra.mxu0 %v7451_v7  ;;  %v7973_v24 = vadd.f32 %v7972_v30, %v7950_v42 }
 0x59c   : > { %8428 = vmatmul.f32.vlgmr.msra.gmra.mxu1 %v7452_v5  ;;  %v8110_v35 = vpop.f32.mrf.mxu3 }
 0x59d   : > { %v7996_v14 = vadd.f32 %v7995_v34, %v7973_v24 }
 0x59e   : > { %v8038_v63 = vpop.f32.mrf.mxu0  ;;  %v8176_v1 = vpop.f32.mrf.mxu2 }
 0x59f   : > { %v8039_v39 = vadd.f32 %v8038_v63, %v8016_v60  ;;  %v8019_v10 = vadd.f32 %v8018_v59, %v7996_v14 }
 0x5a2   : > { %v8061_v38 = vpop.f32.mrf.mxu1 }
 0x5a3   : > { %8408 = vmatmul.f32.gmra.mxu0 %v7476_v61  ;;  %v8062_v54 = vadd.f32 %v8061_v38, %v8039_v39 }
 0x5a4   : > { %8431 = vmatmul.f32.gmra.mxu1 %v7477_v12 }
 0x5a5   : > { %v8085_v29 = vadd.f32 %v8084_v11, %v8062_v54  ;;  %v8199_v26 = vpop.f32.mrf.mxu3 }
 0x5a6   : > { %v8041_v46 = vpop.f32.mrf.mxu0 }
 0x5a7   : > { %v8042_v40 = vadd.f32 %v8041_v46, %v8019_v10  ;;  %v8108_v43 = vadd.f32 %v8107_v31, %v8085_v29 }
 0x5a8   : > { %v8179_v16 = vpop.f32.mrf.mxu2 }
 0x5aa   : > { %v8064_v37 = vpop.f32.mrf.mxu1 }
 0x5ab   : > { %v8065_v13 = vadd.f32 %v8064_v37, %v8042_v40 }
 0x5ad   : > { %v8088_v6 = vadd.f32 %v8087_v55, %v8065_v13 }
 0x5af   : > { %v8111_v3 = vadd.f32 %v8110_v35, %v8088_v6 }
 0x5b0   : > { %v8130_v2 = vpop.f32.mrf.mxu0 }
 0x5b1   : > { %v8131_v50 = vadd.f32 %v8130_v2, %v8108_v43 }
 0x5b2   : > { %v8153_v8 = vpop.f32.mrf.mxu1 }
 0x5b3   : > { %v8154_v56 = vadd.f32 %v8153_v8, %v8131_v50  ;;  %v8268_v32 = vpop.f32.mrf.mxu2 }
 0x5b4   : > { %v8202_v48 = vpop.f32.mrf.mxu3 }
 0x5b5   : > { %v8177_v27 = vadd.f32 %v8176_v1, %v8154_v56 }
 0x5b7   : > { %v8200_v18 = vadd.f32 %v8199_v26, %v8177_v27 }
 0x5ba   : > { %v8133_v33 = vpop.f32.mrf.mxu0  ;;  %v8156_v57 = vpop.f32.mrf.mxu1 }
 0x5bb   : > { %v8134_v20 = vadd.f32 %v8133_v33, %v8111_v3 }
 0x5bd   : > { %v8157_v41 = vadd.f32 %v8156_v57, %v8134_v20 }
 0x5be   : > { %v8271_v22 = vpop.f32.mrf.mxu2 }
 0x5bf   : > { %v8180_v7 = vadd.f32 %v8179_v16, %v8157_v41 }
 0x5c1   : > { %v8203_v44 = vadd.f32 %v8202_v48, %v8180_v7 }
 0x5c2   : > { %v8291_v61 = vpop.f32.mrf.mxu3 }
 0x5ca   : > { %v8294_v30 = vpop.f32.mrf.mxu3 }
 0x5d4   : > { %v8222_v36 = vpop.f32.mrf.mxu0 }
 0x5d5   : > { %v8245_v45 = vpop.f32.mrf.mxu1  ;;  %v8223_v28 = vadd.f32 %v8222_v36, %v8200_v18 }
 0x5d7   : > { %v8246_v12 = vadd.f32 %v8245_v45, %v8223_v28 }
 0x5d8   : > { %v8360_v52 = vpop.f32.mrf.mxu2 }
 0x5d9   : > { %v8269_v51 = vadd.f32 %v8268_v32, %v8246_v12 }
 0x5db   : > { %v8292_v0 = vadd.f32 %v8291_v61, %v8269_v51 }
 0x5de   : > { %v8225_v58 = vpop.f32.mrf.mxu0  ;;  %v8248_v5 = vpop.f32.mrf.mxu1 }
 0x5df   : > { %v8226_v23 = vadd.f32 %v8225_v58, %v8203_v44 }
 0x5e1   : > { %v8249_v17 = vadd.f32 %v8248_v5, %v8226_v23 }
 0x5e2   : > { %v8363_v53 = vpop.f32.mrf.mxu2 }
 0x5e3   : > { %v8272_v62 = vadd.f32 %v8271_v22, %v8249_v17 }
 0x5e5   : > { %v8295_v63 = vadd.f32 %v8294_v30, %v8272_v62 }
 0x5e6   : > { %v8383_v38 = vpop.f32.mrf.mxu3 }
 0x5ee   : > { %v8386_v55 = vpop.f32.mrf.mxu3 }
 0x5f8   : > { %v8314_v15 = vpop.f32.mrf.mxu0  ;;  %v8337_v25 = vpop.f32.mrf.mxu1 }
 0x5f9   : > { %v8315_v34 = vadd.f32 %v8314_v15, %v8292_v0 }
 0x5fb   : > { %v8338_v19 = vadd.f32 %v8337_v25, %v8315_v34 }
 0x5fc   : > { %v8452_v24 = vpop.f32.mrf.mxu2 }
 0x5fd   : > { %v8361_v11 = vadd.f32 %v8360_v52, %v8338_v19 }
 0x5ff   : > { %v8384_v49 = vadd.f32 %v8383_v38, %v8361_v11 }
 0x600   : > { %v8317_v59 = vpop.f32.mrf.mxu0 }
 0x601   : > { %v8340_v21 = vpop.f32.mrf.mxu1  ;;  %v8318_v4 = vadd.f32 %v8317_v59, %v8295_v63 }
 0x603   : > { %v8341_v9 = vadd.f32 %v8340_v21, %v8318_v4 }
 0x605   : > { %v8364_v42 = vadd.f32 %v8363_v53, %v8341_v9 }
 0x607   : > { %v8387_v39 = vadd.f32 %v8386_v55, %v8364_v42 }
 0x608   : > { %v8455_v54 = vpop.f32.mrf.mxu3 }
 0x618   : > { %v8406_v31 = vpop.f32.mrf.mxu0 }
 0x619   : > { %v8407_v46 = vadd.f32 %v8406_v31, %v8384_v49  ;;  %v8429_v47 = vpop.f32.mrf.mxu1 }
 0x61b   : > { %v8430_v37 = vadd.f32 %v8429_v47, %v8407_v46 }
 0x61d   : > { %v8453_v60 = vadd.f32 %v8452_v24, %v8430_v37 }
 0x61f   : > { %8459 = vst.msk [vmem:[%s375_s22] sm:$0xff] %vm8458_vm5, %v8453_v60 }
 0x620   : > { %v8409_v2 = vpop.f32.mrf.mxu0 }
 0x621   : > { %v8410_v14 = vadd.f32 %v8409_v2, %v8387_v39  ;;  %v8432_v8 = vpop.f32.mrf.mxu1 }
 0x623   : > { %v8433_v35 = vadd.f32 %v8432_v8, %v8410_v14 }
 0x625   : > { %v8456_v1 = vadd.f32 %v8455_v54, %v8433_v35 }
 0x627   : > { %8460 = vst.msk [vmem:[%s375_s22 + $0x8] sm:$0xff] %vm8458_vm5, %v8456_v1 }
 0x628   : > { %8989 = shalt.err (!%p8986_p9)
}
 0x629   : > { %s9051_s2 = smov 128   ;;  %s9052_s4 = smov 8  }
 0x62a   : > { %8699 = dma.vmem_to_hbm [thread:$0]  (%p9182_p0), %s8475_s29, 256, %s8477_s10, %s8462_s8, %s9051_s2, %s9051_s2, %s9052_s4  }
 0x62b PF: > { %s8491_s9 = sand.u32 1, %s9028_s24   ;;  %p12068_p10 = scmp.ge.s32.totalorder %s9040_s27, 2 }
 0x62c   : > { %s8492_s20 = scalar_lea.sflag [#allocation8], %s8491_s9 }
 0x62d   : > { %p8722_p11 = pnand %p12068_p10, %p9188_p6 }
 0x62f   : > { %p8723_p12 = pneg %p8722_p11 }
 0x631   : > { %9023 = dma.done.wait (%p8723_p12), %s8492_s20, 256  }
 0x632   : > { %9025 = vsyncadd (%p8723_p12), %s8492_s20, 4294967040  ;;  %p23_p2 = scmp.ge.s32.totalorder %s9162_s28, 4   ;;  %s12069_s24 = smov %s9032_s25 }
 0x633   : > { %s12070_s25 = smov %s9036_s26  ;;  %s12071_s26 = smov %s9174_s30 }
 0x634   : > { %s12072_s27 = smov %s9162_s28  ;;  %25 = sbr.rel (!%p23_p2) target bundleno = 13 (0xd), region = 131 }
 0x639   :  { %8498 = vsyncpa [#allocation7], 1 }
 0x63a   :  { %8500 = vsyncpa [#allocation7 + $0x1], 1 }
 0x63b   :  { %8501 = vsyncpa [#allocation10], 1 }
 0x63c   :  { %8502 = vsyncpa [#allocation13], 1 }
 0x63d   :  { %8503 = vsyncpa [#allocation16], 1 }
 0x63e   :  { %8504 = vsyncpa [#allocation8], 1 }
 0x63f   :  { %8506 = vsyncpa [#allocation8 + $0x1], 1 }

</bundles_post_ra>
